<compile_context>
chip_gen: v7x
topology: tpu7x:2x2x1
jax: 0.10.0
libtpu: 0.0.40
codegen_flags: <defaults>
</compile_context>

<pallas_src>
import functools

import jax
import jax.numpy as jnp
from jax.experimental import pallas as pl
from jax.experimental.pallas import tpu as pltpu

# ----------------------------- static dims ---------------------------------
H_IN = 28          # input spatial size implied by the 4*4*50 flatten
K = 5              # conv kernel
C1_OUT = 20
H1 = H_IN - K + 1  # 24
P1 = H1 // 2       # 12
C2_OUT = 50
H2 = P1 - K + 1    # 8
P2 = H2 // 2       # 4
FC1_OUT = 500
N_CLASSES = 10


# ----------------------------- fused kernel --------------------------------
def _net_kernel(patches1_ref, w1_ref, b1_ref, w2_ref, b2_ref,
                wfc1_ref, bfc1_ref, wfc2_ref, bfc2_ref,
                out_ref,
                c1_ref, s1_ref, p1_ref, c2_ref, s2_ref, p2_ref, *, bt):
    # ---- conv1 + bias + relu: one MXU matmul over the im2col patch matrix
    o1 = jnp.dot(patches1_ref[...], w1_ref[...],
                 preferred_element_type=jnp.float32)          # [bt*576, 20]
    o1 = jnp.maximum(o1 + b1_ref[...], 0.0)
    c1_ref[...] = o1.reshape(bt, H1, H1, C1_OUT)              # NHWC, layout-trivial

    # ---- maxpool 2x2 #1 (stage A over rows, stage B over cols), ref-indexed
    for i in range(P1):
        s1_ref[:, i] = jnp.maximum(c1_ref[:, 2 * i], c1_ref[:, 2 * i + 1])
    for j in range(P1):
        p1_ref[:, :, j, :] = jnp.maximum(s1_ref[:, :, 2 * j, :],
                                         s1_ref[:, :, 2 * j + 1, :])

    # ---- conv2: in-kernel im2col as 25 shifted slices, accumulated on MXU
    acc2 = jnp.zeros((bt * H2 * H2, C2_OUT), jnp.float32)
    for kh in range(K):
        for kw in range(K):
            xs = p1_ref[:, kh:kh + H2, kw:kw + H2, :]          # [bt, 8, 8, 20]
            xs = xs.reshape(bt * H2 * H2, C1_OUT).astype(jnp.bfloat16)
            acc2 = acc2 + jnp.dot(xs, w2_ref[kh * K + kw],
                                  preferred_element_type=jnp.float32)
    o2 = jnp.maximum(acc2 + b2_ref[...], 0.0)                  # [bt*64, 50]
    c2_ref[...] = o2.reshape(bt, H2, H2, C2_OUT)

    # ---- maxpool 2x2 #2
    for i in range(P2):
        s2_ref[:, i] = jnp.maximum(c2_ref[:, 2 * i], c2_ref[:, 2 * i + 1])
    for j in range(P2):
        p2_ref[:, :, j, :] = jnp.maximum(s2_ref[:, :, 2 * j, :],
                                         s2_ref[:, :, 2 * j + 1, :])

    # ---- fc1 as a sum over the 16 spatial positions (weights pre-permuted
    #      to torch's NCHW flatten order -> no activation transpose needed)
    acc_fc1 = jnp.zeros((bt, FC1_OUT), jnp.float32)
    for p in range(P2 * P2):
        xp = p2_ref[:, p // P2, p % P2, :].astype(jnp.bfloat16)    # [bt, 50]
        acc_fc1 = acc_fc1 + jnp.dot(xp, wfc1_ref[p],
                                    preferred_element_type=jnp.float32)
    a1 = jnp.maximum(acc_fc1 + bfc1_ref[...], 0.0)             # [bt, 500]

    # ---- fc2 + log_softmax epilogue (f32)
    logits = jnp.dot(a1.astype(jnp.bfloat16), wfc2_ref[...],
                     preferred_element_type=jnp.float32) + bfc2_ref[...]
    m = jnp.max(logits, axis=-1, keepdims=True)
    s = logits - m
    lse = jnp.log(jnp.sum(jnp.exp(s), axis=-1, keepdims=True))
    out_ref[...] = s - lse


# ------------------------------- wrapper ------------------------------------
def _im2col_conv1(x):
    """x: [B, 1, 28, 28] -> bf16 patches [B*24*24, 25], column order (kh, kw)."""
    x2 = x[:, 0, :, :]
    cols = [x2[:, kh:kh + H1, kw:kw + H1] for kh in range(K) for kw in range(K)]
    p = jnp.stack(cols, axis=-1)                               # [B, 24, 24, 25]
    return p.reshape(x.shape[0] * H1 * H1, K * K).astype(jnp.bfloat16)


def net_forward(x, params):
    """x: [B, 1, 28, 28] f32 (torch NCHW), params: packed (see pack_params)."""
    B = x.shape[0]
    bt = min(B, 8)
    assert B % bt == 0, "batch must be <= 8 or a multiple of 8"
    patches1 = _im2col_conv1(x)
    m1 = bt * H1 * H1

    def rep0(rank):
        return lambda i: (0,) * rank

    kernel = functools.partial(_net_kernel, bt=bt)
    return pl.pallas_call(
        kernel,
        out_shape=jax.ShapeDtypeStruct((B, N_CLASSES), jnp.float32),
        grid_spec=pltpu.PrefetchScalarGridSpec(
            num_scalar_prefetch=0,
            grid=(B // bt,),
            in_specs=[
                pl.BlockSpec((m1, K * K), lambda i: (i, 0)),            # patches1
                pl.BlockSpec((K * K, C1_OUT), rep0(2)),                 # w1
                pl.BlockSpec((1, C1_OUT), rep0(2)),                     # b1
                pl.BlockSpec((K * K, C1_OUT, C2_OUT), rep0(3)),         # w2
                pl.BlockSpec((1, C2_OUT), rep0(2)),                     # b2
                pl.BlockSpec((P2 * P2, C2_OUT, FC1_OUT), rep0(3)),      # w_fc1
                pl.BlockSpec((1, FC1_OUT), rep0(2)),                    # b_fc1
                pl.BlockSpec((FC1_OUT, N_CLASSES), rep0(2)),            # w_fc2
                pl.BlockSpec((1, N_CLASSES), rep0(2)),                  # b_fc2
            ],
            out_specs=pl.BlockSpec((bt, N_CLASSES), lambda i: (i, 0)),
            scratch_shapes=[
                pltpu.VMEM((bt, H1, H1, C1_OUT), jnp.float32),   # conv1 out
                pltpu.VMEM((bt, P1, H1, C1_OUT), jnp.float32),   # pool1 stage A
                pltpu.VMEM((bt, P1, P1, C1_OUT), jnp.float32),   # pooled1
                pltpu.VMEM((bt, H2, H2, C2_OUT), jnp.float32),   # conv2 out
                pltpu.VMEM((bt, P2, H2, C2_OUT), jnp.float32),   # pool2 stage A
                pltpu.VMEM((bt, P2, P2, C2_OUT), jnp.float32),   # pooled2
            ],
        ),
        compiler_params=pltpu.CompilerParams(
            dimension_semantics=("parallel",)),
    )(patches1, params["w1c"], params["b1"], params["w2r"], params["b2"],
      params["wfc1r"], params["bfc1"], params["wfc2t"], params["bfc2"])


# ------------------------- params (torch layout) ----------------------------
def init_params(key):
    ks = jax.random.split(key, 8)
    scale = 0.05
    return {
        "w1": scale * jax.random.normal(ks[0], (20, 1, 5, 5), jnp.float32),
        "b1": scale * jax.random.normal(ks[1], (20,), jnp.float32),
        "w2": scale * jax.random.normal(ks[2], (50, 20, 5, 5), jnp.float32),
        "b2": scale * jax.random.normal(ks[3], (50,), jnp.float32),
        "w_fc1": scale * jax.random.normal(ks[4], (500, 800), jnp.float32),
        "b_fc1": scale * jax.random.normal(ks[5], (500,), jnp.float32),
        "w_fc2": scale * jax.random.normal(ks[6], (10, 500), jnp.float32),
        "b_fc2": scale * jax.random.normal(ks[7], (10,), jnp.float32),
    }


def pack_params(p):
    """One-time rearrangement of torch-layout params into kernel layout."""
    w1c = jnp.transpose(p["w1"].reshape(C1_OUT, K * K), (1, 0)).astype(jnp.bfloat16)
    w2r = jnp.transpose(p["w2"], (2, 3, 1, 0)).reshape(
        K * K, C1_OUT, C2_OUT).astype(jnp.bfloat16)
    # torch fc1 input index = c*16 + ph*4 + pw  ->  [p=ph*4+pw, c, out]
    wfc1 = jnp.transpose(p["w_fc1"], (1, 0)).reshape(C2_OUT, P2 * P2, FC1_OUT)
    wfc1r = jnp.transpose(wfc1, (1, 0, 2)).astype(jnp.bfloat16)      # [16, 50, 500]
    wfc2t = jnp.transpose(p["w_fc2"], (1, 0)).astype(jnp.bfloat16)   # [500, 10]
    return {
        "w1c": w1c, "b1": p["b1"].reshape(1, C1_OUT),
        "w2r": w2r, "b2": p["b2"].reshape(1, C2_OUT),
        "wfc1r": wfc1r, "bfc1": p["b_fc1"].reshape(1, FC1_OUT),
        "wfc2t": wfc2t, "bfc2": p["b_fc2"].reshape(1, N_CLASSES),
    }


# --------------------------- pure-JAX reference -----------------------------
def reference_forward(x, p):
    dn = ("NCHW", "OIHW", "NCHW")
    out = jax.lax.conv_general_dilated(x, p["w1"], (1, 1), "VALID",
                                       dimension_numbers=dn)
    out = jax.nn.relu(out + p["b1"].reshape(1, -1, 1, 1))
    out = jax.lax.reduce_window(out, -jnp.inf, jax.lax.max,
                                (1, 1, 2, 2), (1, 1, 2, 2), "VALID")
    out = jax.lax.conv_general_dilated(out, p["w2"], (1, 1), "VALID",
                                       dimension_numbers=dn)
    out = jax.nn.relu(out + p["b2"].reshape(1, -1, 1, 1))
    out = jax.lax.reduce_window(out, -jnp.inf, jax.lax.max,
                                (1, 1, 2, 2), (1, 1, 2, 2), "VALID")
    out = out.reshape(out.shape[0], -1)
    out = jax.nn.relu(out @ p["w_fc1"].T + p["b_fc1"])
    out = out @ p["w_fc2"].T + p["b_fc2"]
    return jax.nn.log_softmax(out, axis=-1)


if __name__ == "__main__":
    key = jax.random.PRNGKey(0)
    k_x, k_p = jax.random.split(key)
    x = jax.random.normal(k_x, (2, 1, 28, 28), jnp.float32)
    torch_params = init_params(k_p)
    params = pack_params(torch_params)

    fwd = jax.jit(net_forward)
    out = jax.block_until_ready(fwd(x, params))

    assert out.shape == (2, 10)
    assert bool(jnp.all(jnp.isfinite(out)))
    # log_softmax rows exponentiate-sum to 1
    assert jnp.allclose(jnp.sum(jnp.exp(out), axis=1), 1.0, atol=1e-4)
    # compare against f32 XLA reference (bf16 matmul inputs => loose tol)
    ref = jax.block_until_ready(reference_forward(x, torch_params))
    assert jnp.max(jnp.abs(out - ref)) < 0.1
    print("KERNEL_OK")
</pallas_src>

<mosaic_0001>
module attributes {stable_mosaic.version = 11 : i64} {
  func.func @_net_kernel(%arg0: i32, %arg1: memref<1152x25xbf16, #tpu.memory_space<vmem>>, %arg2: memref<25x20xbf16, #tpu.memory_space<vmem>>, %arg3: memref<1x20xf32, #tpu.memory_space<vmem>>, %arg4: memref<25x20x50xbf16, #tpu.memory_space<vmem>>, %arg5: memref<1x50xf32, #tpu.memory_space<vmem>>, %arg6: memref<16x50x500xbf16, #tpu.memory_space<vmem>>, %arg7: memref<1x500xf32, #tpu.memory_space<vmem>>, %arg8: memref<500x10xbf16, #tpu.memory_space<vmem>>, %arg9: memref<1x10xf32, #tpu.memory_space<vmem>>, %arg10: memref<2x10xf32, #tpu.memory_space<vmem>>, %arg11: memref<2x24x24x20xf32, #tpu.memory_space<vmem>>, %arg12: memref<2x12x24x20xf32, #tpu.memory_space<vmem>>, %arg13: memref<2x12x12x20xf32, #tpu.memory_space<vmem>>, %arg14: memref<2x8x8x50xf32, #tpu.memory_space<vmem>>, %arg15: memref<2x4x8x50xf32, #tpu.memory_space<vmem>>, %arg16: memref<2x4x4x50xf32, #tpu.memory_space<vmem>>) attributes {dimension_semantics = [#tpu.dimension_semantics<parallel>], iteration_bounds = array<i64: 1>, scalar_prefetch = 0 : i64, scratch_operands = 6 : i64, tpu.core_type = #tpu.core_type<tc>, window_params = [{transform_indices = @transform_0, window_bounds = array<i64: 1152, 25>}, {pipeline_mode = #tpu.pipeline_mode<synchronous>, transform_indices = @transform_1, window_bounds = array<i64: 25, 20>}, {pipeline_mode = #tpu.pipeline_mode<synchronous>, transform_indices = @transform_2, window_bounds = array<i64: 1, 20>}, {pipeline_mode = #tpu.pipeline_mode<synchronous>, transform_indices = @transform_3, window_bounds = array<i64: 25, 20, 50>}, {pipeline_mode = #tpu.pipeline_mode<synchronous>, transform_indices = @transform_4, window_bounds = array<i64: 1, 50>}, {pipeline_mode = #tpu.pipeline_mode<synchronous>, transform_indices = @transform_5, window_bounds = array<i64: 16, 50, 500>}, {pipeline_mode = #tpu.pipeline_mode<synchronous>, transform_indices = @transform_6, window_bounds = array<i64: 1, 500>}, {pipeline_mode = #tpu.pipeline_mode<synchronous>, transform_indices = @transform_7, window_bounds = array<i64: 500, 10>}, {pipeline_mode = #tpu.pipeline_mode<synchronous>, transform_indices = @transform_8, window_bounds = array<i64: 1, 10>}, {transform_indices = @transform_9, window_bounds = array<i64: 2, 10>}]} {
    %c0 = arith.constant 0 : index
    %c0_0 = arith.constant 0 : index
    %0 = vector.load %arg1[%c0, %c0_0] : memref<1152x25xbf16, #tpu.memory_space<vmem>>, vector<1152x25xbf16>
    %c0_1 = arith.constant 0 : index
    %c0_2 = arith.constant 0 : index
    %1 = vector.load %arg2[%c0_1, %c0_2] : memref<25x20xbf16, #tpu.memory_space<vmem>>, vector<25x20xbf16>
    %cst = arith.constant dense<0.000000e+00> : vector<1152x20xf32>
    %2 = tpu.matmul %0, %1, %cst {dimension_numbers = #tpu.dot_dimension_numbers<[1], [0], [0], [1], [0, 0, 1, 1], [], []>} : vector<1152x25xbf16>, vector<25x20xbf16>, vector<1152x20xf32> -> vector<1152x20xf32>
    %c0_3 = arith.constant 0 : index
    %c0_4 = arith.constant 0 : index
    %3 = vector.load %arg3[%c0_3, %c0_4] : memref<1x20xf32, #tpu.memory_space<vmem>>, vector<1x20xf32>
    %4 = vector.broadcast %3 : vector<1x20xf32> to vector<1152x20xf32>
    %5 = arith.addf %2, %4 : vector<1152x20xf32>
    %cst_5 = arith.constant 0.000000e+00 : f32
    %6 = vector.broadcast %cst_5 : f32 to vector<1152x20xf32>
    %7 = arith.maximumf %5, %6 : vector<1152x20xf32>
    %8 = vector.shape_cast %7 : vector<1152x20xf32> to vector<2x24x24x20xf32>
    %c0_6 = arith.constant 0 : index
    %c0_7 = arith.constant 0 : index
    %c0_8 = arith.constant 0 : index
    %c0_9 = arith.constant 0 : index
    %9 = vector.load %arg11[%c0_6, %c0_7, %c0_8, %c0_9] : memref<2x24x24x20xf32, #tpu.memory_space<vmem>>, vector<2x24x24x20xf32>
    tpu.vector_store %arg11[%c0_6, %c0_7, %c0_8, %c0_9], %8 {strides = array<i32>} : memref<2x24x24x20xf32, #tpu.memory_space<vmem>>, vector<2x24x24x20xf32>,
    %c0_10 = arith.constant 0 : index
    %c0_11 = arith.constant 0 : index
    %c0_12 = arith.constant 0 : index
    %c0_13 = arith.constant 0 : index
    %10 = vector.load %arg11[%c0_10, %c0_11, %c0_12, %c0_13] : memref<2x24x24x20xf32, #tpu.memory_space<vmem>>, vector<2x1x24x20xf32>
    %11 = vector.shape_cast %10 : vector<2x1x24x20xf32> to vector<2x24x20xf32>
    %c0_14 = arith.constant 0 : index
    %c1 = arith.constant 1 : index
    %c0_15 = arith.constant 0 : index
    %c0_16 = arith.constant 0 : index
    %12 = vector.load %arg11[%c0_14, %c1, %c0_15, %c0_16] : memref<2x24x24x20xf32, #tpu.memory_space<vmem>>, vector<2x1x24x20xf32>
    %13 = vector.shape_cast %12 : vector<2x1x24x20xf32> to vector<2x24x20xf32>
    %14 = arith.maximumf %11, %13 : vector<2x24x20xf32>
    %c0_17 = arith.constant 0 : index
    %c0_18 = arith.constant 0 : index
    %c0_19 = arith.constant 0 : index
    %c0_20 = arith.constant 0 : index
    %15 = vector.load %arg12[%c0_17, %c0_18, %c0_19, %c0_20] : memref<2x12x24x20xf32, #tpu.memory_space<vmem>>, vector<2x1x24x20xf32>
    %16 = vector.shape_cast %15 : vector<2x1x24x20xf32> to vector<2x24x20xf32>
    %17 = vector.shape_cast %14 : vector<2x24x20xf32> to vector<2x1x24x20xf32>
    tpu.vector_store %arg12[%c0_17, %c0_18, %c0_19, %c0_20], %17 {strides = array<i32>} : memref<2x12x24x20xf32, #tpu.memory_space<vmem>>, vector<2x1x24x20xf32>,
    %c0_21 = arith.constant 0 : index
    %c2 = arith.constant 2 : index
    %c0_22 = arith.constant 0 : index
    %c0_23 = arith.constant 0 : index
    %18 = vector.load %arg11[%c0_21, %c2, %c0_22, %c0_23] : memref<2x24x24x20xf32, #tpu.memory_space<vmem>>, vector<2x1x24x20xf32>
    %19 = vector.shape_cast %18 : vector<2x1x24x20xf32> to vector<2x24x20xf32>
    %c0_24 = arith.constant 0 : index
    %c3 = arith.constant 3 : index
    %c0_25 = arith.constant 0 : index
    %c0_26 = arith.constant 0 : index
    %20 = vector.load %arg11[%c0_24, %c3, %c0_25, %c0_26] : memref<2x24x24x20xf32, #tpu.memory_space<vmem>>, vector<2x1x24x20xf32>
    %21 = vector.shape_cast %20 : vector<2x1x24x20xf32> to vector<2x24x20xf32>
    %22 = arith.maximumf %19, %21 : vector<2x24x20xf32>
    %c0_27 = arith.constant 0 : index
    %c1_28 = arith.constant 1 : index
    %c0_29 = arith.constant 0 : index
    %c0_30 = arith.constant 0 : index
    %23 = vector.load %arg12[%c0_27, %c1_28, %c0_29, %c0_30] : memref<2x12x24x20xf32, #tpu.memory_space<vmem>>, vector<2x1x24x20xf32>
    %24 = vector.shape_cast %23 : vector<2x1x24x20xf32> to vector<2x24x20xf32>
    %25 = vector.shape_cast %22 : vector<2x24x20xf32> to vector<2x1x24x20xf32>
    tpu.vector_store %arg12[%c0_27, %c1_28, %c0_29, %c0_30], %25 {strides = array<i32>} : memref<2x12x24x20xf32, #tpu.memory_space<vmem>>, vector<2x1x24x20xf32>,
    %c0_31 = arith.constant 0 : index
    %c4 = arith.constant 4 : index
    %c0_32 = arith.constant 0 : index
    %c0_33 = arith.constant 0 : index
    %26 = vector.load %arg11[%c0_31, %c4, %c0_32, %c0_33] : memref<2x24x24x20xf32, #tpu.memory_space<vmem>>, vector<2x1x24x20xf32>
    %27 = vector.shape_cast %26 : vector<2x1x24x20xf32> to vector<2x24x20xf32>
    %c0_34 = arith.constant 0 : index
    %c5 = arith.constant 5 : index
    %c0_35 = arith.constant 0 : index
    %c0_36 = arith.constant 0 : index
    %28 = vector.load %arg11[%c0_34, %c5, %c0_35, %c0_36] : memref<2x24x24x20xf32, #tpu.memory_space<vmem>>, vector<2x1x24x20xf32>
    %29 = vector.shape_cast %28 : vector<2x1x24x20xf32> to vector<2x24x20xf32>
    %30 = arith.maximumf %27, %29 : vector<2x24x20xf32>
    %c0_37 = arith.constant 0 : index
    %c2_38 = arith.constant 2 : index
    %c0_39 = arith.constant 0 : index
    %c0_40 = arith.constant 0 : index
    %31 = vector.load %arg12[%c0_37, %c2_38, %c0_39, %c0_40] : memref<2x12x24x20xf32, #tpu.memory_space<vmem>>, vector<2x1x24x20xf32>
    %32 = vector.shape_cast %31 : vector<2x1x24x20xf32> to vector<2x24x20xf32>
    %33 = vector.shape_cast %30 : vector<2x24x20xf32> to vector<2x1x24x20xf32>
    tpu.vector_store %arg12[%c0_37, %c2_38, %c0_39, %c0_40], %33 {strides = array<i32>} : memref<2x12x24x20xf32, #tpu.memory_space<vmem>>, vector<2x1x24x20xf32>,
    %c0_41 = arith.constant 0 : index
    %c6 = arith.constant 6 : index
    %c0_42 = arith.constant 0 : index
    %c0_43 = arith.constant 0 : index
    %34 = vector.load %arg11[%c0_41, %c6, %c0_42, %c0_43] : memref<2x24x24x20xf32, #tpu.memory_space<vmem>>, vector<2x1x24x20xf32>
    %35 = vector.shape_cast %34 : vector<2x1x24x20xf32> to vector<2x24x20xf32>
    %c0_44 = arith.constant 0 : index
    %c7 = arith.constant 7 : index
    %c0_45 = arith.constant 0 : index
    %c0_46 = arith.constant 0 : index
    %36 = vector.load %arg11[%c0_44, %c7, %c0_45, %c0_46] : memref<2x24x24x20xf32, #tpu.memory_space<vmem>>, vector<2x1x24x20xf32>
    %37 = vector.shape_cast %36 : vector<2x1x24x20xf32> to vector<2x24x20xf32>
    %38 = arith.maximumf %35, %37 : vector<2x24x20xf32>
    %c0_47 = arith.constant 0 : index
    %c3_48 = arith.constant 3 : index
    %c0_49 = arith.constant 0 : index
    %c0_50 = arith.constant 0 : index
    %39 = vector.load %arg12[%c0_47, %c3_48, %c0_49, %c0_50] : memref<2x12x24x20xf32, #tpu.memory_space<vmem>>, vector<2x1x24x20xf32>
    %40 = vector.shape_cast %39 : vector<2x1x24x20xf32> to vector<2x24x20xf32>
    %41 = vector.shape_cast %38 : vector<2x24x20xf32> to vector<2x1x24x20xf32>
    tpu.vector_store %arg12[%c0_47, %c3_48, %c0_49, %c0_50], %41 {strides = array<i32>} : memref<2x12x24x20xf32, #tpu.memory_space<vmem>>, vector<2x1x24x20xf32>,
    %c0_51 = arith.constant 0 : index
    %c8 = arith.constant 8 : index
    %c0_52 = arith.constant 0 : index
    %c0_53 = arith.constant 0 : index
    %42 = vector.load %arg11[%c0_51, %c8, %c0_52, %c0_53] : memref<2x24x24x20xf32, #tpu.memory_space<vmem>>, vector<2x1x24x20xf32>
    %43 = vector.shape_cast %42 : vector<2x1x24x20xf32> to vector<2x24x20xf32>
    %c0_54 = arith.constant 0 : index
    %c9 = arith.constant 9 : index
    %c0_55 = arith.constant 0 : index
    %c0_56 = arith.constant 0 : index
    %44 = vector.load %arg11[%c0_54, %c9, %c0_55, %c0_56] : memref<2x24x24x20xf32, #tpu.memory_space<vmem>>, vector<2x1x24x20xf32>
    %45 = vector.shape_cast %44 : vector<2x1x24x20xf32> to vector<2x24x20xf32>
    %46 = arith.maximumf %43, %45 : vector<2x24x20xf32>
    %c0_57 = arith.constant 0 : index
    %c4_58 = arith.constant 4 : index
    %c0_59 = arith.constant 0 : index
    %c0_60 = arith.constant 0 : index
    %47 = vector.load %arg12[%c0_57, %c4_58, %c0_59, %c0_60] : memref<2x12x24x20xf32, #tpu.memory_space<vmem>>, vector<2x1x24x20xf32>
    %48 = vector.shape_cast %47 : vector<2x1x24x20xf32> to vector<2x24x20xf32>
    %49 = vector.shape_cast %46 : vector<2x24x20xf32> to vector<2x1x24x20xf32>
    tpu.vector_store %arg12[%c0_57, %c4_58, %c0_59, %c0_60], %49 {strides = array<i32>} : memref<2x12x24x20xf32, #tpu.memory_space<vmem>>, vector<2x1x24x20xf32>,
    %c0_61 = arith.constant 0 : index
    %c10 = arith.constant 10 : index
    %c0_62 = arith.constant 0 : index
    %c0_63 = arith.constant 0 : index
    %50 = vector.load %arg11[%c0_61, %c10, %c0_62, %c0_63] : memref<2x24x24x20xf32, #tpu.memory_space<vmem>>, vector<2x1x24x20xf32>
    %51 = vector.shape_cast %50 : vector<2x1x24x20xf32> to vector<2x24x20xf32>
    %c0_64 = arith.constant 0 : index
    %c11 = arith.constant 11 : index
    %c0_65 = arith.constant 0 : index
    %c0_66 = arith.constant 0 : index
    %52 = vector.load %arg11[%c0_64, %c11, %c0_65, %c0_66] : memref<2x24x24x20xf32, #tpu.memory_space<vmem>>, vector<2x1x24x20xf32>
    %53 = vector.shape_cast %52 : vector<2x1x24x20xf32> to vector<2x24x20xf32>
    %54 = arith.maximumf %51, %53 : vector<2x24x20xf32>
    %c0_67 = arith.constant 0 : index
    %c5_68 = arith.constant 5 : index
    %c0_69 = arith.constant 0 : index
    %c0_70 = arith.constant 0 : index
    %55 = vector.load %arg12[%c0_67, %c5_68, %c0_69, %c0_70] : memref<2x12x24x20xf32, #tpu.memory_space<vmem>>, vector<2x1x24x20xf32>
    %56 = vector.shape_cast %55 : vector<2x1x24x20xf32> to vector<2x24x20xf32>
    %57 = vector.shape_cast %54 : vector<2x24x20xf32> to vector<2x1x24x20xf32>
    tpu.vector_store %arg12[%c0_67, %c5_68, %c0_69, %c0_70], %57 {strides = array<i32>} : memref<2x12x24x20xf32, #tpu.memory_space<vmem>>, vector<2x1x24x20xf32>,
    %c0_71 = arith.constant 0 : index
    %c12 = arith.constant 12 : index
    %c0_72 = arith.constant 0 : index
    %c0_73 = arith.constant 0 : index
    %58 = vector.load %arg11[%c0_71, %c12, %c0_72, %c0_73] : memref<2x24x24x20xf32, #tpu.memory_space<vmem>>, vector<2x1x24x20xf32>
    %59 = vector.shape_cast %58 : vector<2x1x24x20xf32> to vector<2x24x20xf32>
    %c0_74 = arith.constant 0 : index
    %c13 = arith.constant 13 : index
    %c0_75 = arith.constant 0 : index
    %c0_76 = arith.constant 0 : index
    %60 = vector.load %arg11[%c0_74, %c13, %c0_75, %c0_76] : memref<2x24x24x20xf32, #tpu.memory_space<vmem>>, vector<2x1x24x20xf32>
    %61 = vector.shape_cast %60 : vector<2x1x24x20xf32> to vector<2x24x20xf32>
    %62 = arith.maximumf %59, %61 : vector<2x24x20xf32>
    %c0_77 = arith.constant 0 : index
    %c6_78 = arith.constant 6 : index
    %c0_79 = arith.constant 0 : index
    %c0_80 = arith.constant 0 : index
    %63 = vector.load %arg12[%c0_77, %c6_78, %c0_79, %c0_80] : memref<2x12x24x20xf32, #tpu.memory_space<vmem>>, vector<2x1x24x20xf32>
    %64 = vector.shape_cast %63 : vector<2x1x24x20xf32> to vector<2x24x20xf32>
    %65 = vector.shape_cast %62 : vector<2x24x20xf32> to vector<2x1x24x20xf32>
    tpu.vector_store %arg12[%c0_77, %c6_78, %c0_79, %c0_80], %65 {strides = array<i32>} : memref<2x12x24x20xf32, #tpu.memory_space<vmem>>, vector<2x1x24x20xf32>,
    %c0_81 = arith.constant 0 : index
    %c14 = arith.constant 14 : index
    %c0_82 = arith.constant 0 : index
    %c0_83 = arith.constant 0 : index
    %66 = vector.load %arg11[%c0_81, %c14, %c0_82, %c0_83] : memref<2x24x24x20xf32, #tpu.memory_space<vmem>>, vector<2x1x24x20xf32>
    %67 = vector.shape_cast %66 : vector<2x1x24x20xf32> to vector<2x24x20xf32>
    %c0_84 = arith.constant 0 : index
    %c15 = arith.constant 15 : index
    %c0_85 = arith.constant 0 : index
    %c0_86 = arith.constant 0 : index
    %68 = vector.load %arg11[%c0_84, %c15, %c0_85, %c0_86] : memref<2x24x24x20xf32, #tpu.memory_space<vmem>>, vector<2x1x24x20xf32>
    %69 = vector.shape_cast %68 : vector<2x1x24x20xf32> to vector<2x24x20xf32>
    %70 = arith.maximumf %67, %69 : vector<2x24x20xf32>
    %c0_87 = arith.constant 0 : index
    %c7_88 = arith.constant 7 : index
    %c0_89 = arith.constant 0 : index
    %c0_90 = arith.constant 0 : index
    %71 = vector.load %arg12[%c0_87, %c7_88, %c0_89, %c0_90] : memref<2x12x24x20xf32, #tpu.memory_space<vmem>>, vector<2x1x24x20xf32>
    %72 = vector.shape_cast %71 : vector<2x1x24x20xf32> to vector<2x24x20xf32>
    %73 = vector.shape_cast %70 : vector<2x24x20xf32> to vector<2x1x24x20xf32>
    tpu.vector_store %arg12[%c0_87, %c7_88, %c0_89, %c0_90], %73 {strides = array<i32>} : memref<2x12x24x20xf32, #tpu.memory_space<vmem>>, vector<2x1x24x20xf32>,
    %c0_91 = arith.constant 0 : index
    %c16 = arith.constant 16 : index
    %c0_92 = arith.constant 0 : index
    %c0_93 = arith.constant 0 : index
    %74 = vector.load %arg11[%c0_91, %c16, %c0_92, %c0_93] : memref<2x24x24x20xf32, #tpu.memory_space<vmem>>, vector<2x1x24x20xf32>
    %75 = vector.shape_cast %74 : vector<2x1x24x20xf32> to vector<2x24x20xf32>
    %c0_94 = arith.constant 0 : index
    %c17 = arith.constant 17 : index
    %c0_95 = arith.constant 0 : index
    %c0_96 = arith.constant 0 : index
    %76 = vector.load %arg11[%c0_94, %c17, %c0_95, %c0_96] : memref<2x24x24x20xf32, #tpu.memory_space<vmem>>, vector<2x1x24x20xf32>
    %77 = vector.shape_cast %76 : vector<2x1x24x20xf32> to vector<2x24x20xf32>
    %78 = arith.maximumf %75, %77 : vector<2x24x20xf32>
    %c0_97 = arith.constant 0 : index
    %c8_98 = arith.constant 8 : index
    %c0_99 = arith.constant 0 : index
    %c0_100 = arith.constant 0 : index
    %79 = vector.load %arg12[%c0_97, %c8_98, %c0_99, %c0_100] : memref<2x12x24x20xf32, #tpu.memory_space<vmem>>, vector<2x1x24x20xf32>
    %80 = vector.shape_cast %79 : vector<2x1x24x20xf32> to vector<2x24x20xf32>
    %81 = vector.shape_cast %78 : vector<2x24x20xf32> to vector<2x1x24x20xf32>
    tpu.vector_store %arg12[%c0_97, %c8_98, %c0_99, %c0_100], %81 {strides = array<i32>} : memref<2x12x24x20xf32, #tpu.memory_space<vmem>>, vector<2x1x24x20xf32>,
    %c0_101 = arith.constant 0 : index
    %c18 = arith.constant 18 : index
    %c0_102 = arith.constant 0 : index
    %c0_103 = arith.constant 0 : index
    %82 = vector.load %arg11[%c0_101, %c18, %c0_102, %c0_103] : memref<2x24x24x20xf32, #tpu.memory_space<vmem>>, vector<2x1x24x20xf32>
    %83 = vector.shape_cast %82 : vector<2x1x24x20xf32> to vector<2x24x20xf32>
    %c0_104 = arith.constant 0 : index
    %c19 = arith.constant 19 : index
    %c0_105 = arith.constant 0 : index
    %c0_106 = arith.constant 0 : index
    %84 = vector.load %arg11[%c0_104, %c19, %c0_105, %c0_106] : memref<2x24x24x20xf32, #tpu.memory_space<vmem>>, vector<2x1x24x20xf32>
    %85 = vector.shape_cast %84 : vector<2x1x24x20xf32> to vector<2x24x20xf32>
    %86 = arith.maximumf %83, %85 : vector<2x24x20xf32>
    %c0_107 = arith.constant 0 : index
    %c9_108 = arith.constant 9 : index
    %c0_109 = arith.constant 0 : index
    %c0_110 = arith.constant 0 : index
    %87 = vector.load %arg12[%c0_107, %c9_108, %c0_109, %c0_110] : memref<2x12x24x20xf32, #tpu.memory_space<vmem>>, vector<2x1x24x20xf32>
    %88 = vector.shape_cast %87 : vector<2x1x24x20xf32> to vector<2x24x20xf32>
    %89 = vector.shape_cast %86 : vector<2x24x20xf32> to vector<2x1x24x20xf32>
    tpu.vector_store %arg12[%c0_107, %c9_108, %c0_109, %c0_110], %89 {strides = array<i32>} : memref<2x12x24x20xf32, #tpu.memory_space<vmem>>, vector<2x1x24x20xf32>,
    %c0_111 = arith.constant 0 : index
    %c20 = arith.constant 20 : index
    %c0_112 = arith.constant 0 : index
    %c0_113 = arith.constant 0 : index
    %90 = vector.load %arg11[%c0_111, %c20, %c0_112, %c0_113] : memref<2x24x24x20xf32, #tpu.memory_space<vmem>>, vector<2x1x24x20xf32>
    %91 = vector.shape_cast %90 : vector<2x1x24x20xf32> to vector<2x24x20xf32>
    %c0_114 = arith.constant 0 : index
    %c21 = arith.constant 21 : index
    %c0_115 = arith.constant 0 : index
    %c0_116 = arith.constant 0 : index
    %92 = vector.load %arg11[%c0_114, %c21, %c0_115, %c0_116] : memref<2x24x24x20xf32, #tpu.memory_space<vmem>>, vector<2x1x24x20xf32>
    %93 = vector.shape_cast %92 : vector<2x1x24x20xf32> to vector<2x24x20xf32>
    %94 = arith.maximumf %91, %93 : vector<2x24x20xf32>
    %c0_117 = arith.constant 0 : index
    %c10_118 = arith.constant 10 : index
    %c0_119 = arith.constant 0 : index
    %c0_120 = arith.constant 0 : index
    %95 = vector.load %arg12[%c0_117, %c10_118, %c0_119, %c0_120] : memref<2x12x24x20xf32, #tpu.memory_space<vmem>>, vector<2x1x24x20xf32>
    %96 = vector.shape_cast %95 : vector<2x1x24x20xf32> to vector<2x24x20xf32>
    %97 = vector.shape_cast %94 : vector<2x24x20xf32> to vector<2x1x24x20xf32>
    tpu.vector_store %arg12[%c0_117, %c10_118, %c0_119, %c0_120], %97 {strides = array<i32>} : memref<2x12x24x20xf32, #tpu.memory_space<vmem>>, vector<2x1x24x20xf32>,
    %c0_121 = arith.constant 0 : index
    %c22 = arith.constant 22 : index
    %c0_122 = arith.constant 0 : index
    %c0_123 = arith.constant 0 : index
    %98 = vector.load %arg11[%c0_121, %c22, %c0_122, %c0_123] : memref<2x24x24x20xf32, #tpu.memory_space<vmem>>, vector<2x1x24x20xf32>
    %99 = vector.shape_cast %98 : vector<2x1x24x20xf32> to vector<2x24x20xf32>
    %c0_124 = arith.constant 0 : index
    %c23 = arith.constant 23 : index
    %c0_125 = arith.constant 0 : index
    %c0_126 = arith.constant 0 : index
    %100 = vector.load %arg11[%c0_124, %c23, %c0_125, %c0_126] : memref<2x24x24x20xf32, #tpu.memory_space<vmem>>, vector<2x1x24x20xf32>
    %101 = vector.shape_cast %100 : vector<2x1x24x20xf32> to vector<2x24x20xf32>
    %102 = arith.maximumf %99, %101 : vector<2x24x20xf32>
    %c0_127 = arith.constant 0 : index
    %c11_128 = arith.constant 11 : index
    %c0_129 = arith.constant 0 : index
    %c0_130 = arith.constant 0 : index
    %103 = vector.load %arg12[%c0_127, %c11_128, %c0_129, %c0_130] : memref<2x12x24x20xf32, #tpu.memory_space<vmem>>, vector<2x1x24x20xf32>
    %104 = vector.shape_cast %103 : vector<2x1x24x20xf32> to vector<2x24x20xf32>
    %105 = vector.shape_cast %102 : vector<2x24x20xf32> to vector<2x1x24x20xf32>
    tpu.vector_store %arg12[%c0_127, %c11_128, %c0_129, %c0_130], %105 {strides = array<i32>} : memref<2x12x24x20xf32, #tpu.memory_space<vmem>>, vector<2x1x24x20xf32>,
    %c0_131 = arith.constant 0 : index
    %c0_132 = arith.constant 0 : index
    %c0_133 = arith.constant 0 : index
    %c0_134 = arith.constant 0 : index
    %106 = vector.load %arg12[%c0_131, %c0_132, %c0_133, %c0_134] : memref<2x12x24x20xf32, #tpu.memory_space<vmem>>, vector<2x12x1x20xf32>
    %107 = vector.shape_cast %106 : vector<2x12x1x20xf32> to vector<2x12x20xf32>
    %c0_135 = arith.constant 0 : index
    %c0_136 = arith.constant 0 : index
    %c1_137 = arith.constant 1 : index
    %c0_138 = arith.constant 0 : index
    %108 = vector.load %arg12[%c0_135, %c0_136, %c1_137, %c0_138] : memref<2x12x24x20xf32, #tpu.memory_space<vmem>>, vector<2x12x1x20xf32>
    %109 = vector.shape_cast %108 : vector<2x12x1x20xf32> to vector<2x12x20xf32>
    %110 = arith.maximumf %107, %109 : vector<2x12x20xf32>
    %c0_139 = arith.constant 0 : index
    %c0_140 = arith.constant 0 : index
    %c0_141 = arith.constant 0 : index
    %c0_142 = arith.constant 0 : index
    %111 = vector.load %arg13[%c0_139, %c0_140, %c0_141, %c0_142] : memref<2x12x12x20xf32, #tpu.memory_space<vmem>>, vector<2x12x1x20xf32>
    %112 = vector.shape_cast %111 : vector<2x12x1x20xf32> to vector<2x12x20xf32>
    %113 = vector.shape_cast %110 : vector<2x12x20xf32> to vector<2x12x1x20xf32>
    tpu.vector_store %arg13[%c0_139, %c0_140, %c0_141, %c0_142], %113 {strides = array<i32>} : memref<2x12x12x20xf32, #tpu.memory_space<vmem>>, vector<2x12x1x20xf32>,
    %c0_143 = arith.constant 0 : index
    %c0_144 = arith.constant 0 : index
    %c2_145 = arith.constant 2 : index
    %c0_146 = arith.constant 0 : index
    %114 = vector.load %arg12[%c0_143, %c0_144, %c2_145, %c0_146] : memref<2x12x24x20xf32, #tpu.memory_space<vmem>>, vector<2x12x1x20xf32>
    %115 = vector.shape_cast %114 : vector<2x12x1x20xf32> to vector<2x12x20xf32>
    %c0_147 = arith.constant 0 : index
    %c0_148 = arith.constant 0 : index
    %c3_149 = arith.constant 3 : index
    %c0_150 = arith.constant 0 : index
    %116 = vector.load %arg12[%c0_147, %c0_148, %c3_149, %c0_150] : memref<2x12x24x20xf32, #tpu.memory_space<vmem>>, vector<2x12x1x20xf32>
    %117 = vector.shape_cast %116 : vector<2x12x1x20xf32> to vector<2x12x20xf32>
    %118 = arith.maximumf %115, %117 : vector<2x12x20xf32>
    %c0_151 = arith.constant 0 : index
    %c0_152 = arith.constant 0 : index
    %c1_153 = arith.constant 1 : index
    %c0_154 = arith.constant 0 : index
    %119 = vector.load %arg13[%c0_151, %c0_152, %c1_153, %c0_154] : memref<2x12x12x20xf32, #tpu.memory_space<vmem>>, vector<2x12x1x20xf32>
    %120 = vector.shape_cast %119 : vector<2x12x1x20xf32> to vector<2x12x20xf32>
    %121 = vector.shape_cast %118 : vector<2x12x20xf32> to vector<2x12x1x20xf32>
    tpu.vector_store %arg13[%c0_151, %c0_152, %c1_153, %c0_154], %121 {strides = array<i32>} : memref<2x12x12x20xf32, #tpu.memory_space<vmem>>, vector<2x12x1x20xf32>,
    %c0_155 = arith.constant 0 : index
    %c0_156 = arith.constant 0 : index
    %c4_157 = arith.constant 4 : index
    %c0_158 = arith.constant 0 : index
    %122 = vector.load %arg12[%c0_155, %c0_156, %c4_157, %c0_158] : memref<2x12x24x20xf32, #tpu.memory_space<vmem>>, vector<2x12x1x20xf32>
    %123 = vector.shape_cast %122 : vector<2x12x1x20xf32> to vector<2x12x20xf32>
    %c0_159 = arith.constant 0 : index
    %c0_160 = arith.constant 0 : index
    %c5_161 = arith.constant 5 : index
    %c0_162 = arith.constant 0 : index
    %124 = vector.load %arg12[%c0_159, %c0_160, %c5_161, %c0_162] : memref<2x12x24x20xf32, #tpu.memory_space<vmem>>, vector<2x12x1x20xf32>
    %125 = vector.shape_cast %124 : vector<2x12x1x20xf32> to vector<2x12x20xf32>
    %126 = arith.maximumf %123, %125 : vector<2x12x20xf32>
    %c0_163 = arith.constant 0 : index
    %c0_164 = arith.constant 0 : index
    %c2_165 = arith.constant 2 : index
    %c0_166 = arith.constant 0 : index
    %127 = vector.load %arg13[%c0_163, %c0_164, %c2_165, %c0_166] : memref<2x12x12x20xf32, #tpu.memory_space<vmem>>, vector<2x12x1x20xf32>
    %128 = vector.shape_cast %127 : vector<2x12x1x20xf32> to vector<2x12x20xf32>
    %129 = vector.shape_cast %126 : vector<2x12x20xf32> to vector<2x12x1x20xf32>
    tpu.vector_store %arg13[%c0_163, %c0_164, %c2_165, %c0_166], %129 {strides = array<i32>} : memref<2x12x12x20xf32, #tpu.memory_space<vmem>>, vector<2x12x1x20xf32>,
    %c0_167 = arith.constant 0 : index
    %c0_168 = arith.constant 0 : index
    %c6_169 = arith.constant 6 : index
    %c0_170 = arith.constant 0 : index
    %130 = vector.load %arg12[%c0_167, %c0_168, %c6_169, %c0_170] : memref<2x12x24x20xf32, #tpu.memory_space<vmem>>, vector<2x12x1x20xf32>
    %131 = vector.shape_cast %130 : vector<2x12x1x20xf32> to vector<2x12x20xf32>
    %c0_171 = arith.constant 0 : index
    %c0_172 = arith.constant 0 : index
    %c7_173 = arith.constant 7 : index
    %c0_174 = arith.constant 0 : index
    %132 = vector.load %arg12[%c0_171, %c0_172, %c7_173, %c0_174] : memref<2x12x24x20xf32, #tpu.memory_space<vmem>>, vector<2x12x1x20xf32>
    %133 = vector.shape_cast %132 : vector<2x12x1x20xf32> to vector<2x12x20xf32>
    %134 = arith.maximumf %131, %133 : vector<2x12x20xf32>
    %c0_175 = arith.constant 0 : index
    %c0_176 = arith.constant 0 : index
    %c3_177 = arith.constant 3 : index
    %c0_178 = arith.constant 0 : index
    %135 = vector.load %arg13[%c0_175, %c0_176, %c3_177, %c0_178] : memref<2x12x12x20xf32, #tpu.memory_space<vmem>>, vector<2x12x1x20xf32>
    %136 = vector.shape_cast %135 : vector<2x12x1x20xf32> to vector<2x12x20xf32>
    %137 = vector.shape_cast %134 : vector<2x12x20xf32> to vector<2x12x1x20xf32>
    tpu.vector_store %arg13[%c0_175, %c0_176, %c3_177, %c0_178], %137 {strides = array<i32>} : memref<2x12x12x20xf32, #tpu.memory_space<vmem>>, vector<2x12x1x20xf32>,
    %c0_179 = arith.constant 0 : index
    %c0_180 = arith.constant 0 : index
    %c8_181 = arith.constant 8 : index
    %c0_182 = arith.constant 0 : index
    %138 = vector.load %arg12[%c0_179, %c0_180, %c8_181, %c0_182] : memref<2x12x24x20xf32, #tpu.memory_space<vmem>>, vector<2x12x1x20xf32>
    %139 = vector.shape_cast %138 : vector<2x12x1x20xf32> to vector<2x12x20xf32>
    %c0_183 = arith.constant 0 : index
    %c0_184 = arith.constant 0 : index
    %c9_185 = arith.constant 9 : index
    %c0_186 = arith.constant 0 : index
    %140 = vector.load %arg12[%c0_183, %c0_184, %c9_185, %c0_186] : memref<2x12x24x20xf32, #tpu.memory_space<vmem>>, vector<2x12x1x20xf32>
    %141 = vector.shape_cast %140 : vector<2x12x1x20xf32> to vector<2x12x20xf32>
    %142 = arith.maximumf %139, %141 : vector<2x12x20xf32>
    %c0_187 = arith.constant 0 : index
    %c0_188 = arith.constant 0 : index
    %c4_189 = arith.constant 4 : index
    %c0_190 = arith.constant 0 : index
    %143 = vector.load %arg13[%c0_187, %c0_188, %c4_189, %c0_190] : memref<2x12x12x20xf32, #tpu.memory_space<vmem>>, vector<2x12x1x20xf32>
    %144 = vector.shape_cast %143 : vector<2x12x1x20xf32> to vector<2x12x20xf32>
    %145 = vector.shape_cast %142 : vector<2x12x20xf32> to vector<2x12x1x20xf32>
    tpu.vector_store %arg13[%c0_187, %c0_188, %c4_189, %c0_190], %145 {strides = array<i32>} : memref<2x12x12x20xf32, #tpu.memory_space<vmem>>, vector<2x12x1x20xf32>,
    %c0_191 = arith.constant 0 : index
    %c0_192 = arith.constant 0 : index
    %c10_193 = arith.constant 10 : index
    %c0_194 = arith.constant 0 : index
    %146 = vector.load %arg12[%c0_191, %c0_192, %c10_193, %c0_194] : memref<2x12x24x20xf32, #tpu.memory_space<vmem>>, vector<2x12x1x20xf32>
    %147 = vector.shape_cast %146 : vector<2x12x1x20xf32> to vector<2x12x20xf32>
    %c0_195 = arith.constant 0 : index
    %c0_196 = arith.constant 0 : index
    %c11_197 = arith.constant 11 : index
    %c0_198 = arith.constant 0 : index
    %148 = vector.load %arg12[%c0_195, %c0_196, %c11_197, %c0_198] : memref<2x12x24x20xf32, #tpu.memory_space<vmem>>, vector<2x12x1x20xf32>
    %149 = vector.shape_cast %148 : vector<2x12x1x20xf32> to vector<2x12x20xf32>
    %150 = arith.maximumf %147, %149 : vector<2x12x20xf32>
    %c0_199 = arith.constant 0 : index
    %c0_200 = arith.constant 0 : index
    %c5_201 = arith.constant 5 : index
    %c0_202 = arith.constant 0 : index
    %151 = vector.load %arg13[%c0_199, %c0_200, %c5_201, %c0_202] : memref<2x12x12x20xf32, #tpu.memory_space<vmem>>, vector<2x12x1x20xf32>
    %152 = vector.shape_cast %151 : vector<2x12x1x20xf32> to vector<2x12x20xf32>
    %153 = vector.shape_cast %150 : vector<2x12x20xf32> to vector<2x12x1x20xf32>
    tpu.vector_store %arg13[%c0_199, %c0_200, %c5_201, %c0_202], %153 {strides = array<i32>} : memref<2x12x12x20xf32, #tpu.memory_space<vmem>>, vector<2x12x1x20xf32>,
    %c0_203 = arith.constant 0 : index
    %c0_204 = arith.constant 0 : index
    %c12_205 = arith.constant 12 : index
    %c0_206 = arith.constant 0 : index
    %154 = vector.load %arg12[%c0_203, %c0_204, %c12_205, %c0_206] : memref<2x12x24x20xf32, #tpu.memory_space<vmem>>, vector<2x12x1x20xf32>
    %155 = vector.shape_cast %154 : vector<2x12x1x20xf32> to vector<2x12x20xf32>
    %c0_207 = arith.constant 0 : index
    %c0_208 = arith.constant 0 : index
    %c13_209 = arith.constant 13 : index
    %c0_210 = arith.constant 0 : index
    %156 = vector.load %arg12[%c0_207, %c0_208, %c13_209, %c0_210] : memref<2x12x24x20xf32, #tpu.memory_space<vmem>>, vector<2x12x1x20xf32>
    %157 = vector.shape_cast %156 : vector<2x12x1x20xf32> to vector<2x12x20xf32>
    %158 = arith.maximumf %155, %157 : vector<2x12x20xf32>
    %c0_211 = arith.constant 0 : index
    %c0_212 = arith.constant 0 : index
    %c6_213 = arith.constant 6 : index
    %c0_214 = arith.constant 0 : index
    %159 = vector.load %arg13[%c0_211, %c0_212, %c6_213, %c0_214] : memref<2x12x12x20xf32, #tpu.memory_space<vmem>>, vector<2x12x1x20xf32>
    %160 = vector.shape_cast %159 : vector<2x12x1x20xf32> to vector<2x12x20xf32>
    %161 = vector.shape_cast %158 : vector<2x12x20xf32> to vector<2x12x1x20xf32>
    tpu.vector_store %arg13[%c0_211, %c0_212, %c6_213, %c0_214], %161 {strides = array<i32>} : memref<2x12x12x20xf32, #tpu.memory_space<vmem>>, vector<2x12x1x20xf32>,
    %c0_215 = arith.constant 0 : index
    %c0_216 = arith.constant 0 : index
    %c14_217 = arith.constant 14 : index
    %c0_218 = arith.constant 0 : index
    %162 = vector.load %arg12[%c0_215, %c0_216, %c14_217, %c0_218] : memref<2x12x24x20xf32, #tpu.memory_space<vmem>>, vector<2x12x1x20xf32>
    %163 = vector.shape_cast %162 : vector<2x12x1x20xf32> to vector<2x12x20xf32>
    %c0_219 = arith.constant 0 : index
    %c0_220 = arith.constant 0 : index
    %c15_221 = arith.constant 15 : index
    %c0_222 = arith.constant 0 : index
    %164 = vector.load %arg12[%c0_219, %c0_220, %c15_221, %c0_222] : memref<2x12x24x20xf32, #tpu.memory_space<vmem>>, vector<2x12x1x20xf32>
    %165 = vector.shape_cast %164 : vector<2x12x1x20xf32> to vector<2x12x20xf32>
    %166 = arith.maximumf %163, %165 : vector<2x12x20xf32>
    %c0_223 = arith.constant 0 : index
    %c0_224 = arith.constant 0 : index
    %c7_225 = arith.constant 7 : index
    %c0_226 = arith.constant 0 : index
    %167 = vector.load %arg13[%c0_223, %c0_224, %c7_225, %c0_226] : memref<2x12x12x20xf32, #tpu.memory_space<vmem>>, vector<2x12x1x20xf32>
    %168 = vector.shape_cast %167 : vector<2x12x1x20xf32> to vector<2x12x20xf32>
    %169 = vector.shape_cast %166 : vector<2x12x20xf32> to vector<2x12x1x20xf32>
    tpu.vector_store %arg13[%c0_223, %c0_224, %c7_225, %c0_226], %169 {strides = array<i32>} : memref<2x12x12x20xf32, #tpu.memory_space<vmem>>, vector<2x12x1x20xf32>,
    %c0_227 = arith.constant 0 : index
    %c0_228 = arith.constant 0 : index
    %c16_229 = arith.constant 16 : index
    %c0_230 = arith.constant 0 : index
    %170 = vector.load %arg12[%c0_227, %c0_228, %c16_229, %c0_230] : memref<2x12x24x20xf32, #tpu.memory_space<vmem>>, vector<2x12x1x20xf32>
    %171 = vector.shape_cast %170 : vector<2x12x1x20xf32> to vector<2x12x20xf32>
    %c0_231 = arith.constant 0 : index
    %c0_232 = arith.constant 0 : index
    %c17_233 = arith.constant 17 : index
    %c0_234 = arith.constant 0 : index
    %172 = vector.load %arg12[%c0_231, %c0_232, %c17_233, %c0_234] : memref<2x12x24x20xf32, #tpu.memory_space<vmem>>, vector<2x12x1x20xf32>
    %173 = vector.shape_cast %172 : vector<2x12x1x20xf32> to vector<2x12x20xf32>
    %174 = arith.maximumf %171, %173 : vector<2x12x20xf32>
    %c0_235 = arith.constant 0 : index
    %c0_236 = arith.constant 0 : index
    %c8_237 = arith.constant 8 : index
    %c0_238 = arith.constant 0 : index
    %175 = vector.load %arg13[%c0_235, %c0_236, %c8_237, %c0_238] : memref<2x12x12x20xf32, #tpu.memory_space<vmem>>, vector<2x12x1x20xf32>
    %176 = vector.shape_cast %175 : vector<2x12x1x20xf32> to vector<2x12x20xf32>
    %177 = vector.shape_cast %174 : vector<2x12x20xf32> to vector<2x12x1x20xf32>
    tpu.vector_store %arg13[%c0_235, %c0_236, %c8_237, %c0_238], %177 {strides = array<i32>} : memref<2x12x12x20xf32, #tpu.memory_space<vmem>>, vector<2x12x1x20xf32>,
    %c0_239 = arith.constant 0 : index
    %c0_240 = arith.constant 0 : index
    %c18_241 = arith.constant 18 : index
    %c0_242 = arith.constant 0 : index
    %178 = vector.load %arg12[%c0_239, %c0_240, %c18_241, %c0_242] : memref<2x12x24x20xf32, #tpu.memory_space<vmem>>, vector<2x12x1x20xf32>
    %179 = vector.shape_cast %178 : vector<2x12x1x20xf32> to vector<2x12x20xf32>
    %c0_243 = arith.constant 0 : index
    %c0_244 = arith.constant 0 : index
    %c19_245 = arith.constant 19 : index
    %c0_246 = arith.constant 0 : index
    %180 = vector.load %arg12[%c0_243, %c0_244, %c19_245, %c0_246] : memref<2x12x24x20xf32, #tpu.memory_space<vmem>>, vector<2x12x1x20xf32>
    %181 = vector.shape_cast %180 : vector<2x12x1x20xf32> to vector<2x12x20xf32>
    %182 = arith.maximumf %179, %181 : vector<2x12x20xf32>
    %c0_247 = arith.constant 0 : index
    %c0_248 = arith.constant 0 : index
    %c9_249 = arith.constant 9 : index
    %c0_250 = arith.constant 0 : index
    %183 = vector.load %arg13[%c0_247, %c0_248, %c9_249, %c0_250] : memref<2x12x12x20xf32, #tpu.memory_space<vmem>>, vector<2x12x1x20xf32>
    %184 = vector.shape_cast %183 : vector<2x12x1x20xf32> to vector<2x12x20xf32>
    %185 = vector.shape_cast %182 : vector<2x12x20xf32> to vector<2x12x1x20xf32>
    tpu.vector_store %arg13[%c0_247, %c0_248, %c9_249, %c0_250], %185 {strides = array<i32>} : memref<2x12x12x20xf32, #tpu.memory_space<vmem>>, vector<2x12x1x20xf32>,
    %c0_251 = arith.constant 0 : index
    %c0_252 = arith.constant 0 : index
    %c20_253 = arith.constant 20 : index
    %c0_254 = arith.constant 0 : index
    %186 = vector.load %arg12[%c0_251, %c0_252, %c20_253, %c0_254] : memref<2x12x24x20xf32, #tpu.memory_space<vmem>>, vector<2x12x1x20xf32>
    %187 = vector.shape_cast %186 : vector<2x12x1x20xf32> to vector<2x12x20xf32>
    %c0_255 = arith.constant 0 : index
    %c0_256 = arith.constant 0 : index
    %c21_257 = arith.constant 21 : index
    %c0_258 = arith.constant 0 : index
    %188 = vector.load %arg12[%c0_255, %c0_256, %c21_257, %c0_258] : memref<2x12x24x20xf32, #tpu.memory_space<vmem>>, vector<2x12x1x20xf32>
    %189 = vector.shape_cast %188 : vector<2x12x1x20xf32> to vector<2x12x20xf32>
    %190 = arith.maximumf %187, %189 : vector<2x12x20xf32>
    %c0_259 = arith.constant 0 : index
    %c0_260 = arith.constant 0 : index
    %c10_261 = arith.constant 10 : index
    %c0_262 = arith.constant 0 : index
    %191 = vector.load %arg13[%c0_259, %c0_260, %c10_261, %c0_262] : memref<2x12x12x20xf32, #tpu.memory_space<vmem>>, vector<2x12x1x20xf32>
    %192 = vector.shape_cast %191 : vector<2x12x1x20xf32> to vector<2x12x20xf32>
    %193 = vector.shape_cast %190 : vector<2x12x20xf32> to vector<2x12x1x20xf32>
    tpu.vector_store %arg13[%c0_259, %c0_260, %c10_261, %c0_262], %193 {strides = array<i32>} : memref<2x12x12x20xf32, #tpu.memory_space<vmem>>, vector<2x12x1x20xf32>,
    %c0_263 = arith.constant 0 : index
    %c0_264 = arith.constant 0 : index
    %c22_265 = arith.constant 22 : index
    %c0_266 = arith.constant 0 : index
    %194 = vector.load %arg12[%c0_263, %c0_264, %c22_265, %c0_266] : memref<2x12x24x20xf32, #tpu.memory_space<vmem>>, vector<2x12x1x20xf32>
    %195 = vector.shape_cast %194 : vector<2x12x1x20xf32> to vector<2x12x20xf32>
    %c0_267 = arith.constant 0 : index
    %c0_268 = arith.constant 0 : index
    %c23_269 = arith.constant 23 : index
    %c0_270 = arith.constant 0 : index
    %196 = vector.load %arg12[%c0_267, %c0_268, %c23_269, %c0_270] : memref<2x12x24x20xf32, #tpu.memory_space<vmem>>, vector<2x12x1x20xf32>
    %197 = vector.shape_cast %196 : vector<2x12x1x20xf32> to vector<2x12x20xf32>
    %198 = arith.maximumf %195, %197 : vector<2x12x20xf32>
    %c0_271 = arith.constant 0 : index
    %c0_272 = arith.constant 0 : index
    %c11_273 = arith.constant 11 : index
    %c0_274 = arith.constant 0 : index
    %199 = vector.load %arg13[%c0_271, %c0_272, %c11_273, %c0_274] : memref<2x12x12x20xf32, #tpu.memory_space<vmem>>, vector<2x12x1x20xf32>
    %200 = vector.shape_cast %199 : vector<2x12x1x20xf32> to vector<2x12x20xf32>
    %201 = vector.shape_cast %198 : vector<2x12x20xf32> to vector<2x12x1x20xf32>
    tpu.vector_store %arg13[%c0_271, %c0_272, %c11_273, %c0_274], %201 {strides = array<i32>} : memref<2x12x12x20xf32, #tpu.memory_space<vmem>>, vector<2x12x1x20xf32>,
    %cst_275 = arith.constant 0.000000e+00 : f32
    %202 = vector.broadcast %cst_275 : f32 to vector<128x50xf32>
    %c0_276 = arith.constant 0 : index
    %c0_277 = arith.constant 0 : index
    %c0_278 = arith.constant 0 : index
    %c0_279 = arith.constant 0 : index
    %203 = vector.load %arg13[%c0_276, %c0_277, %c0_278, %c0_279] : memref<2x12x12x20xf32, #tpu.memory_space<vmem>>, vector<2x8x8x20xf32>
    %204 = vector.shape_cast %203 : vector<2x8x8x20xf32> to vector<128x20xf32>
    %205 = arith.truncf %204 : vector<128x20xf32> to vector<128x20xbf16>
    %c0_280 = arith.constant 0 : index
    %c0_281 = arith.constant 0 : index
    %c0_282 = arith.constant 0 : index
    %206 = vector.load %arg4[%c0_280, %c0_281, %c0_282] : memref<25x20x50xbf16, #tpu.memory_space<vmem>>, vector<1x20x50xbf16>
    %207 = vector.shape_cast %206 : vector<1x20x50xbf16> to vector<20x50xbf16>
    %cst_283 = arith.constant dense<0.000000e+00> : vector<128x50xf32>
    %208 = tpu.matmul %205, %207, %cst_283 {dimension_numbers = #tpu.dot_dimension_numbers<[1], [0], [0], [1], [0, 0, 1, 1], [], []>} : vector<128x20xbf16>, vector<20x50xbf16>, vector<128x50xf32> -> vector<128x50xf32>
    %209 = arith.addf %202, %208 : vector<128x50xf32>
    %c0_284 = arith.constant 0 : index
    %c0_285 = arith.constant 0 : index
    %c1_286 = arith.constant 1 : index
    %c0_287 = arith.constant 0 : index
    %210 = vector.load %arg13[%c0_284, %c0_285, %c1_286, %c0_287] : memref<2x12x12x20xf32, #tpu.memory_space<vmem>>, vector<2x8x8x20xf32>
    %211 = vector.shape_cast %210 : vector<2x8x8x20xf32> to vector<128x20xf32>
    %212 = arith.truncf %211 : vector<128x20xf32> to vector<128x20xbf16>
    %c1_288 = arith.constant 1 : index
    %c0_289 = arith.constant 0 : index
    %c0_290 = arith.constant 0 : index
    %213 = vector.load %arg4[%c1_288, %c0_289, %c0_290] : memref<25x20x50xbf16, #tpu.memory_space<vmem>>, vector<1x20x50xbf16>
    %214 = vector.shape_cast %213 : vector<1x20x50xbf16> to vector<20x50xbf16>
    %cst_291 = arith.constant dense<0.000000e+00> : vector<128x50xf32>
    %215 = tpu.matmul %212, %214, %cst_291 {dimension_numbers = #tpu.dot_dimension_numbers<[1], [0], [0], [1], [0, 0, 1, 1], [], []>} : vector<128x20xbf16>, vector<20x50xbf16>, vector<128x50xf32> -> vector<128x50xf32>
    %216 = arith.addf %209, %215 : vector<128x50xf32>
    %c0_292 = arith.constant 0 : index
    %c0_293 = arith.constant 0 : index
    %c2_294 = arith.constant 2 : index
    %c0_295 = arith.constant 0 : index
    %217 = vector.load %arg13[%c0_292, %c0_293, %c2_294, %c0_295] : memref<2x12x12x20xf32, #tpu.memory_space<vmem>>, vector<2x8x8x20xf32>
    %218 = vector.shape_cast %217 : vector<2x8x8x20xf32> to vector<128x20xf32>
    %219 = arith.truncf %218 : vector<128x20xf32> to vector<128x20xbf16>
    %c2_296 = arith.constant 2 : index
    %c0_297 = arith.constant 0 : index
    %c0_298 = arith.constant 0 : index
    %220 = vector.load %arg4[%c2_296, %c0_297, %c0_298] : memref<25x20x50xbf16, #tpu.memory_space<vmem>>, vector<1x20x50xbf16>
    %221 = vector.shape_cast %220 : vector<1x20x50xbf16> to vector<20x50xbf16>
    %cst_299 = arith.constant dense<0.000000e+00> : vector<128x50xf32>
    %222 = tpu.matmul %219, %221, %cst_299 {dimension_numbers = #tpu.dot_dimension_numbers<[1], [0], [0], [1], [0, 0, 1, 1], [], []>} : vector<128x20xbf16>, vector<20x50xbf16>, vector<128x50xf32> -> vector<128x50xf32>
    %223 = arith.addf %216, %222 : vector<128x50xf32>
    %c0_300 = arith.constant 0 : index
    %c0_301 = arith.constant 0 : index
    %c3_302 = arith.constant 3 : index
    %c0_303 = arith.constant 0 : index
    %224 = vector.load %arg13[%c0_300, %c0_301, %c3_302, %c0_303] : memref<2x12x12x20xf32, #tpu.memory_space<vmem>>, vector<2x8x8x20xf32>
    %225 = vector.shape_cast %224 : vector<2x8x8x20xf32> to vector<128x20xf32>
    %226 = arith.truncf %225 : vector<128x20xf32> to vector<128x20xbf16>
    %c3_304 = arith.constant 3 : index
    %c0_305 = arith.constant 0 : index
    %c0_306 = arith.constant 0 : index
    %227 = vector.load %arg4[%c3_304, %c0_305, %c0_306] : memref<25x20x50xbf16, #tpu.memory_space<vmem>>, vector<1x20x50xbf16>
    %228 = vector.shape_cast %227 : vector<1x20x50xbf16> to vector<20x50xbf16>
    %cst_307 = arith.constant dense<0.000000e+00> : vector<128x50xf32>
    %229 = tpu.matmul %226, %228, %cst_307 {dimension_numbers = #tpu.dot_dimension_numbers<[1], [0], [0], [1], [0, 0, 1, 1], [], []>} : vector<128x20xbf16>, vector<20x50xbf16>, vector<128x50xf32> -> vector<128x50xf32>
    %230 = arith.addf %223, %229 : vector<128x50xf32>
    %c0_308 = arith.constant 0 : index
    %c0_309 = arith.constant 0 : index
    %c4_310 = arith.constant 4 : index
    %c0_311 = arith.constant 0 : index
    %231 = vector.load %arg13[%c0_308, %c0_309, %c4_310, %c0_311] : memref<2x12x12x20xf32, #tpu.memory_space<vmem>>, vector<2x8x8x20xf32>
    %232 = vector.shape_cast %231 : vector<2x8x8x20xf32> to vector<128x20xf32>
    %233 = arith.truncf %232 : vector<128x20xf32> to vector<128x20xbf16>
    %c4_312 = arith.constant 4 : index
    %c0_313 = arith.constant 0 : index
    %c0_314 = arith.constant 0 : index
    %234 = vector.load %arg4[%c4_312, %c0_313, %c0_314] : memref<25x20x50xbf16, #tpu.memory_space<vmem>>, vector<1x20x50xbf16>
    %235 = vector.shape_cast %234 : vector<1x20x50xbf16> to vector<20x50xbf16>
    %cst_315 = arith.constant dense<0.000000e+00> : vector<128x50xf32>
    %236 = tpu.matmul %233, %235, %cst_315 {dimension_numbers = #tpu.dot_dimension_numbers<[1], [0], [0], [1], [0, 0, 1, 1], [], []>} : vector<128x20xbf16>, vector<20x50xbf16>, vector<128x50xf32> -> vector<128x50xf32>
    %237 = arith.addf %230, %236 : vector<128x50xf32>
    %c0_316 = arith.constant 0 : index
    %c1_317 = arith.constant 1 : index
    %c0_318 = arith.constant 0 : index
    %c0_319 = arith.constant 0 : index
    %238 = vector.load %arg13[%c0_316, %c1_317, %c0_318, %c0_319] : memref<2x12x12x20xf32, #tpu.memory_space<vmem>>, vector<2x8x8x20xf32>
    %239 = vector.shape_cast %238 : vector<2x8x8x20xf32> to vector<128x20xf32>
    %240 = arith.truncf %239 : vector<128x20xf32> to vector<128x20xbf16>
    %c5_320 = arith.constant 5 : index
    %c0_321 = arith.constant 0 : index
    %c0_322 = arith.constant 0 : index
    %241 = vector.load %arg4[%c5_320, %c0_321, %c0_322] : memref<25x20x50xbf16, #tpu.memory_space<vmem>>, vector<1x20x50xbf16>
    %242 = vector.shape_cast %241 : vector<1x20x50xbf16> to vector<20x50xbf16>
    %cst_323 = arith.constant dense<0.000000e+00> : vector<128x50xf32>
    %243 = tpu.matmul %240, %242, %cst_323 {dimension_numbers = #tpu.dot_dimension_numbers<[1], [0], [0], [1], [0, 0, 1, 1], [], []>} : vector<128x20xbf16>, vector<20x50xbf16>, vector<128x50xf32> -> vector<128x50xf32>
    %244 = arith.addf %237, %243 : vector<128x50xf32>
    %c0_324 = arith.constant 0 : index
    %c1_325 = arith.constant 1 : index
    %c1_326 = arith.constant 1 : index
    %c0_327 = arith.constant 0 : index
    %245 = vector.load %arg13[%c0_324, %c1_325, %c1_326, %c0_327] : memref<2x12x12x20xf32, #tpu.memory_space<vmem>>, vector<2x8x8x20xf32>
    %246 = vector.shape_cast %245 : vector<2x8x8x20xf32> to vector<128x20xf32>
    %247 = arith.truncf %246 : vector<128x20xf32> to vector<128x20xbf16>
    %c6_328 = arith.constant 6 : index
    %c0_329 = arith.constant 0 : index
    %c0_330 = arith.constant 0 : index
    %248 = vector.load %arg4[%c6_328, %c0_329, %c0_330] : memref<25x20x50xbf16, #tpu.memory_space<vmem>>, vector<1x20x50xbf16>
    %249 = vector.shape_cast %248 : vector<1x20x50xbf16> to vector<20x50xbf16>
    %cst_331 = arith.constant dense<0.000000e+00> : vector<128x50xf32>
    %250 = tpu.matmul %247, %249, %cst_331 {dimension_numbers = #tpu.dot_dimension_numbers<[1], [0], [0], [1], [0, 0, 1, 1], [], []>} : vector<128x20xbf16>, vector<20x50xbf16>, vector<128x50xf32> -> vector<128x50xf32>
    %251 = arith.addf %244, %250 : vector<128x50xf32>
    %c0_332 = arith.constant 0 : index
    %c1_333 = arith.constant 1 : index
    %c2_334 = arith.constant 2 : index
    %c0_335 = arith.constant 0 : index
    %252 = vector.load %arg13[%c0_332, %c1_333, %c2_334, %c0_335] : memref<2x12x12x20xf32, #tpu.memory_space<vmem>>, vector<2x8x8x20xf32>
    %253 = vector.shape_cast %252 : vector<2x8x8x20xf32> to vector<128x20xf32>
    %254 = arith.truncf %253 : vector<128x20xf32> to vector<128x20xbf16>
    %c7_336 = arith.constant 7 : index
    %c0_337 = arith.constant 0 : index
    %c0_338 = arith.constant 0 : index
    %255 = vector.load %arg4[%c7_336, %c0_337, %c0_338] : memref<25x20x50xbf16, #tpu.memory_space<vmem>>, vector<1x20x50xbf16>
    %256 = vector.shape_cast %255 : vector<1x20x50xbf16> to vector<20x50xbf16>
    %cst_339 = arith.constant dense<0.000000e+00> : vector<128x50xf32>
    %257 = tpu.matmul %254, %256, %cst_339 {dimension_numbers = #tpu.dot_dimension_numbers<[1], [0], [0], [1], [0, 0, 1, 1], [], []>} : vector<128x20xbf16>, vector<20x50xbf16>, vector<128x50xf32> -> vector<128x50xf32>
    %258 = arith.addf %251, %257 : vector<128x50xf32>
    %c0_340 = arith.constant 0 : index
    %c1_341 = arith.constant 1 : index
    %c3_342 = arith.constant 3 : index
    %c0_343 = arith.constant 0 : index
    %259 = vector.load %arg13[%c0_340, %c1_341, %c3_342, %c0_343] : memref<2x12x12x20xf32, #tpu.memory_space<vmem>>, vector<2x8x8x20xf32>
    %260 = vector.shape_cast %259 : vector<2x8x8x20xf32> to vector<128x20xf32>
    %261 = arith.truncf %260 : vector<128x20xf32> to vector<128x20xbf16>
    %c8_344 = arith.constant 8 : index
    %c0_345 = arith.constant 0 : index
    %c0_346 = arith.constant 0 : index
    %262 = vector.load %arg4[%c8_344, %c0_345, %c0_346] : memref<25x20x50xbf16, #tpu.memory_space<vmem>>, vector<1x20x50xbf16>
    %263 = vector.shape_cast %262 : vector<1x20x50xbf16> to vector<20x50xbf16>
    %cst_347 = arith.constant dense<0.000000e+00> : vector<128x50xf32>
    %264 = tpu.matmul %261, %263, %cst_347 {dimension_numbers = #tpu.dot_dimension_numbers<[1], [0], [0], [1], [0, 0, 1, 1], [], []>} : vector<128x20xbf16>, vector<20x50xbf16>, vector<128x50xf32> -> vector<128x50xf32>
    %265 = arith.addf %258, %264 : vector<128x50xf32>
    %c0_348 = arith.constant 0 : index
    %c1_349 = arith.constant 1 : index
    %c4_350 = arith.constant 4 : index
    %c0_351 = arith.constant 0 : index
    %266 = vector.load %arg13[%c0_348, %c1_349, %c4_350, %c0_351] : memref<2x12x12x20xf32, #tpu.memory_space<vmem>>, vector<2x8x8x20xf32>
    %267 = vector.shape_cast %266 : vector<2x8x8x20xf32> to vector<128x20xf32>
    %268 = arith.truncf %267 : vector<128x20xf32> to vector<128x20xbf16>
    %c9_352 = arith.constant 9 : index
    %c0_353 = arith.constant 0 : index
    %c0_354 = arith.constant 0 : index
    %269 = vector.load %arg4[%c9_352, %c0_353, %c0_354] : memref<25x20x50xbf16, #tpu.memory_space<vmem>>, vector<1x20x50xbf16>
    %270 = vector.shape_cast %269 : vector<1x20x50xbf16> to vector<20x50xbf16>
    %cst_355 = arith.constant dense<0.000000e+00> : vector<128x50xf32>
    %271 = tpu.matmul %268, %270, %cst_355 {dimension_numbers = #tpu.dot_dimension_numbers<[1], [0], [0], [1], [0, 0, 1, 1], [], []>} : vector<128x20xbf16>, vector<20x50xbf16>, vector<128x50xf32> -> vector<128x50xf32>
    %272 = arith.addf %265, %271 : vector<128x50xf32>
    %c0_356 = arith.constant 0 : index
    %c2_357 = arith.constant 2 : index
    %c0_358 = arith.constant 0 : index
    %c0_359 = arith.constant 0 : index
    %273 = vector.load %arg13[%c0_356, %c2_357, %c0_358, %c0_359] : memref<2x12x12x20xf32, #tpu.memory_space<vmem>>, vector<2x8x8x20xf32>
    %274 = vector.shape_cast %273 : vector<2x8x8x20xf32> to vector<128x20xf32>
    %275 = arith.truncf %274 : vector<128x20xf32> to vector<128x20xbf16>
    %c10_360 = arith.constant 10 : index
    %c0_361 = arith.constant 0 : index
    %c0_362 = arith.constant 0 : index
    %276 = vector.load %arg4[%c10_360, %c0_361, %c0_362] : memref<25x20x50xbf16, #tpu.memory_space<vmem>>, vector<1x20x50xbf16>
    %277 = vector.shape_cast %276 : vector<1x20x50xbf16> to vector<20x50xbf16>
    %cst_363 = arith.constant dense<0.000000e+00> : vector<128x50xf32>
    %278 = tpu.matmul %275, %277, %cst_363 {dimension_numbers = #tpu.dot_dimension_numbers<[1], [0], [0], [1], [0, 0, 1, 1], [], []>} : vector<128x20xbf16>, vector<20x50xbf16>, vector<128x50xf32> -> vector<128x50xf32>
    %279 = arith.addf %272, %278 : vector<128x50xf32>
    %c0_364 = arith.constant 0 : index
    %c2_365 = arith.constant 2 : index
    %c1_366 = arith.constant 1 : index
    %c0_367 = arith.constant 0 : index
    %280 = vector.load %arg13[%c0_364, %c2_365, %c1_366, %c0_367] : memref<2x12x12x20xf32, #tpu.memory_space<vmem>>, vector<2x8x8x20xf32>
    %281 = vector.shape_cast %280 : vector<2x8x8x20xf32> to vector<128x20xf32>
    %282 = arith.truncf %281 : vector<128x20xf32> to vector<128x20xbf16>
    %c11_368 = arith.constant 11 : index
    %c0_369 = arith.constant 0 : index
    %c0_370 = arith.constant 0 : index
    %283 = vector.load %arg4[%c11_368, %c0_369, %c0_370] : memref<25x20x50xbf16, #tpu.memory_space<vmem>>, vector<1x20x50xbf16>
    %284 = vector.shape_cast %283 : vector<1x20x50xbf16> to vector<20x50xbf16>
    %cst_371 = arith.constant dense<0.000000e+00> : vector<128x50xf32>
    %285 = tpu.matmul %282, %284, %cst_371 {dimension_numbers = #tpu.dot_dimension_numbers<[1], [0], [0], [1], [0, 0, 1, 1], [], []>} : vector<128x20xbf16>, vector<20x50xbf16>, vector<128x50xf32> -> vector<128x50xf32>
    %286 = arith.addf %279, %285 : vector<128x50xf32>
    %c0_372 = arith.constant 0 : index
    %c2_373 = arith.constant 2 : index
    %c2_374 = arith.constant 2 : index
    %c0_375 = arith.constant 0 : index
    %287 = vector.load %arg13[%c0_372, %c2_373, %c2_374, %c0_375] : memref<2x12x12x20xf32, #tpu.memory_space<vmem>>, vector<2x8x8x20xf32>
    %288 = vector.shape_cast %287 : vector<2x8x8x20xf32> to vector<128x20xf32>
    %289 = arith.truncf %288 : vector<128x20xf32> to vector<128x20xbf16>
    %c12_376 = arith.constant 12 : index
    %c0_377 = arith.constant 0 : index
    %c0_378 = arith.constant 0 : index
    %290 = vector.load %arg4[%c12_376, %c0_377, %c0_378] : memref<25x20x50xbf16, #tpu.memory_space<vmem>>, vector<1x20x50xbf16>
    %291 = vector.shape_cast %290 : vector<1x20x50xbf16> to vector<20x50xbf16>
    %cst_379 = arith.constant dense<0.000000e+00> : vector<128x50xf32>
    %292 = tpu.matmul %289, %291, %cst_379 {dimension_numbers = #tpu.dot_dimension_numbers<[1], [0], [0], [1], [0, 0, 1, 1], [], []>} : vector<128x20xbf16>, vector<20x50xbf16>, vector<128x50xf32> -> vector<128x50xf32>
    %293 = arith.addf %286, %292 : vector<128x50xf32>
    %c0_380 = arith.constant 0 : index
    %c2_381 = arith.constant 2 : index
    %c3_382 = arith.constant 3 : index
    %c0_383 = arith.constant 0 : index
    %294 = vector.load %arg13[%c0_380, %c2_381, %c3_382, %c0_383] : memref<2x12x12x20xf32, #tpu.memory_space<vmem>>, vector<2x8x8x20xf32>
    %295 = vector.shape_cast %294 : vector<2x8x8x20xf32> to vector<128x20xf32>
    %296 = arith.truncf %295 : vector<128x20xf32> to vector<128x20xbf16>
    %c13_384 = arith.constant 13 : index
    %c0_385 = arith.constant 0 : index
    %c0_386 = arith.constant 0 : index
    %297 = vector.load %arg4[%c13_384, %c0_385, %c0_386] : memref<25x20x50xbf16, #tpu.memory_space<vmem>>, vector<1x20x50xbf16>
    %298 = vector.shape_cast %297 : vector<1x20x50xbf16> to vector<20x50xbf16>
    %cst_387 = arith.constant dense<0.000000e+00> : vector<128x50xf32>
    %299 = tpu.matmul %296, %298, %cst_387 {dimension_numbers = #tpu.dot_dimension_numbers<[1], [0], [0], [1], [0, 0, 1, 1], [], []>} : vector<128x20xbf16>, vector<20x50xbf16>, vector<128x50xf32> -> vector<128x50xf32>
    %300 = arith.addf %293, %299 : vector<128x50xf32>
    %c0_388 = arith.constant 0 : index
    %c2_389 = arith.constant 2 : index
    %c4_390 = arith.constant 4 : index
    %c0_391 = arith.constant 0 : index
    %301 = vector.load %arg13[%c0_388, %c2_389, %c4_390, %c0_391] : memref<2x12x12x20xf32, #tpu.memory_space<vmem>>, vector<2x8x8x20xf32>
    %302 = vector.shape_cast %301 : vector<2x8x8x20xf32> to vector<128x20xf32>
    %303 = arith.truncf %302 : vector<128x20xf32> to vector<128x20xbf16>
    %c14_392 = arith.constant 14 : index
    %c0_393 = arith.constant 0 : index
    %c0_394 = arith.constant 0 : index
    %304 = vector.load %arg4[%c14_392, %c0_393, %c0_394] : memref<25x20x50xbf16, #tpu.memory_space<vmem>>, vector<1x20x50xbf16>
    %305 = vector.shape_cast %304 : vector<1x20x50xbf16> to vector<20x50xbf16>
    %cst_395 = arith.constant dense<0.000000e+00> : vector<128x50xf32>
    %306 = tpu.matmul %303, %305, %cst_395 {dimension_numbers = #tpu.dot_dimension_numbers<[1], [0], [0], [1], [0, 0, 1, 1], [], []>} : vector<128x20xbf16>, vector<20x50xbf16>, vector<128x50xf32> -> vector<128x50xf32>
    %307 = arith.addf %300, %306 : vector<128x50xf32>
    %c0_396 = arith.constant 0 : index
    %c3_397 = arith.constant 3 : index
    %c0_398 = arith.constant 0 : index
    %c0_399 = arith.constant 0 : index
    %308 = vector.load %arg13[%c0_396, %c3_397, %c0_398, %c0_399] : memref<2x12x12x20xf32, #tpu.memory_space<vmem>>, vector<2x8x8x20xf32>
    %309 = vector.shape_cast %308 : vector<2x8x8x20xf32> to vector<128x20xf32>
    %310 = arith.truncf %309 : vector<128x20xf32> to vector<128x20xbf16>
    %c15_400 = arith.constant 15 : index
    %c0_401 = arith.constant 0 : index
    %c0_402 = arith.constant 0 : index
    %311 = vector.load %arg4[%c15_400, %c0_401, %c0_402] : memref<25x20x50xbf16, #tpu.memory_space<vmem>>, vector<1x20x50xbf16>
    %312 = vector.shape_cast %311 : vector<1x20x50xbf16> to vector<20x50xbf16>
    %cst_403 = arith.constant dense<0.000000e+00> : vector<128x50xf32>
    %313 = tpu.matmul %310, %312, %cst_403 {dimension_numbers = #tpu.dot_dimension_numbers<[1], [0], [0], [1], [0, 0, 1, 1], [], []>} : vector<128x20xbf16>, vector<20x50xbf16>, vector<128x50xf32> -> vector<128x50xf32>
    %314 = arith.addf %307, %313 : vector<128x50xf32>
    %c0_404 = arith.constant 0 : index
    %c3_405 = arith.constant 3 : index
    %c1_406 = arith.constant 1 : index
    %c0_407 = arith.constant 0 : index
    %315 = vector.load %arg13[%c0_404, %c3_405, %c1_406, %c0_407] : memref<2x12x12x20xf32, #tpu.memory_space<vmem>>, vector<2x8x8x20xf32>
    %316 = vector.shape_cast %315 : vector<2x8x8x20xf32> to vector<128x20xf32>
    %317 = arith.truncf %316 : vector<128x20xf32> to vector<128x20xbf16>
    %c16_408 = arith.constant 16 : index
    %c0_409 = arith.constant 0 : index
    %c0_410 = arith.constant 0 : index
    %318 = vector.load %arg4[%c16_408, %c0_409, %c0_410] : memref<25x20x50xbf16, #tpu.memory_space<vmem>>, vector<1x20x50xbf16>
    %319 = vector.shape_cast %318 : vector<1x20x50xbf16> to vector<20x50xbf16>
    %cst_411 = arith.constant dense<0.000000e+00> : vector<128x50xf32>
    %320 = tpu.matmul %317, %319, %cst_411 {dimension_numbers = #tpu.dot_dimension_numbers<[1], [0], [0], [1], [0, 0, 1, 1], [], []>} : vector<128x20xbf16>, vector<20x50xbf16>, vector<128x50xf32> -> vector<128x50xf32>
    %321 = arith.addf %314, %320 : vector<128x50xf32>
    %c0_412 = arith.constant 0 : index
    %c3_413 = arith.constant 3 : index
    %c2_414 = arith.constant 2 : index
    %c0_415 = arith.constant 0 : index
    %322 = vector.load %arg13[%c0_412, %c3_413, %c2_414, %c0_415] : memref<2x12x12x20xf32, #tpu.memory_space<vmem>>, vector<2x8x8x20xf32>
    %323 = vector.shape_cast %322 : vector<2x8x8x20xf32> to vector<128x20xf32>
    %324 = arith.truncf %323 : vector<128x20xf32> to vector<128x20xbf16>
    %c17_416 = arith.constant 17 : index
    %c0_417 = arith.constant 0 : index
    %c0_418 = arith.constant 0 : index
    %325 = vector.load %arg4[%c17_416, %c0_417, %c0_418] : memref<25x20x50xbf16, #tpu.memory_space<vmem>>, vector<1x20x50xbf16>
    %326 = vector.shape_cast %325 : vector<1x20x50xbf16> to vector<20x50xbf16>
    %cst_419 = arith.constant dense<0.000000e+00> : vector<128x50xf32>
    %327 = tpu.matmul %324, %326, %cst_419 {dimension_numbers = #tpu.dot_dimension_numbers<[1], [0], [0], [1], [0, 0, 1, 1], [], []>} : vector<128x20xbf16>, vector<20x50xbf16>, vector<128x50xf32> -> vector<128x50xf32>
    %328 = arith.addf %321, %327 : vector<128x50xf32>
    %c0_420 = arith.constant 0 : index
    %c3_421 = arith.constant 3 : index
    %c3_422 = arith.constant 3 : index
    %c0_423 = arith.constant 0 : index
    %329 = vector.load %arg13[%c0_420, %c3_421, %c3_422, %c0_423] : memref<2x12x12x20xf32, #tpu.memory_space<vmem>>, vector<2x8x8x20xf32>
    %330 = vector.shape_cast %329 : vector<2x8x8x20xf32> to vector<128x20xf32>
    %331 = arith.truncf %330 : vector<128x20xf32> to vector<128x20xbf16>
    %c18_424 = arith.constant 18 : index
    %c0_425 = arith.constant 0 : index
    %c0_426 = arith.constant 0 : index
    %332 = vector.load %arg4[%c18_424, %c0_425, %c0_426] : memref<25x20x50xbf16, #tpu.memory_space<vmem>>, vector<1x20x50xbf16>
    %333 = vector.shape_cast %332 : vector<1x20x50xbf16> to vector<20x50xbf16>
    %cst_427 = arith.constant dense<0.000000e+00> : vector<128x50xf32>
    %334 = tpu.matmul %331, %333, %cst_427 {dimension_numbers = #tpu.dot_dimension_numbers<[1], [0], [0], [1], [0, 0, 1, 1], [], []>} : vector<128x20xbf16>, vector<20x50xbf16>, vector<128x50xf32> -> vector<128x50xf32>
    %335 = arith.addf %328, %334 : vector<128x50xf32>
    %c0_428 = arith.constant 0 : index
    %c3_429 = arith.constant 3 : index
    %c4_430 = arith.constant 4 : index
    %c0_431 = arith.constant 0 : index
    %336 = vector.load %arg13[%c0_428, %c3_429, %c4_430, %c0_431] : memref<2x12x12x20xf32, #tpu.memory_space<vmem>>, vector<2x8x8x20xf32>
    %337 = vector.shape_cast %336 : vector<2x8x8x20xf32> to vector<128x20xf32>
    %338 = arith.truncf %337 : vector<128x20xf32> to vector<128x20xbf16>
    %c19_432 = arith.constant 19 : index
    %c0_433 = arith.constant 0 : index
    %c0_434 = arith.constant 0 : index
    %339 = vector.load %arg4[%c19_432, %c0_433, %c0_434] : memref<25x20x50xbf16, #tpu.memory_space<vmem>>, vector<1x20x50xbf16>
    %340 = vector.shape_cast %339 : vector<1x20x50xbf16> to vector<20x50xbf16>
    %cst_435 = arith.constant dense<0.000000e+00> : vector<128x50xf32>
    %341 = tpu.matmul %338, %340, %cst_435 {dimension_numbers = #tpu.dot_dimension_numbers<[1], [0], [0], [1], [0, 0, 1, 1], [], []>} : vector<128x20xbf16>, vector<20x50xbf16>, vector<128x50xf32> -> vector<128x50xf32>
    %342 = arith.addf %335, %341 : vector<128x50xf32>
    %c0_436 = arith.constant 0 : index
    %c4_437 = arith.constant 4 : index
    %c0_438 = arith.constant 0 : index
    %c0_439 = arith.constant 0 : index
    %343 = vector.load %arg13[%c0_436, %c4_437, %c0_438, %c0_439] : memref<2x12x12x20xf32, #tpu.memory_space<vmem>>, vector<2x8x8x20xf32>
    %344 = vector.shape_cast %343 : vector<2x8x8x20xf32> to vector<128x20xf32>
    %345 = arith.truncf %344 : vector<128x20xf32> to vector<128x20xbf16>
    %c20_440 = arith.constant 20 : index
    %c0_441 = arith.constant 0 : index
    %c0_442 = arith.constant 0 : index
    %346 = vector.load %arg4[%c20_440, %c0_441, %c0_442] : memref<25x20x50xbf16, #tpu.memory_space<vmem>>, vector<1x20x50xbf16>
    %347 = vector.shape_cast %346 : vector<1x20x50xbf16> to vector<20x50xbf16>
    %cst_443 = arith.constant dense<0.000000e+00> : vector<128x50xf32>
    %348 = tpu.matmul %345, %347, %cst_443 {dimension_numbers = #tpu.dot_dimension_numbers<[1], [0], [0], [1], [0, 0, 1, 1], [], []>} : vector<128x20xbf16>, vector<20x50xbf16>, vector<128x50xf32> -> vector<128x50xf32>
    %349 = arith.addf %342, %348 : vector<128x50xf32>
    %c0_444 = arith.constant 0 : index
    %c4_445 = arith.constant 4 : index
    %c1_446 = arith.constant 1 : index
    %c0_447 = arith.constant 0 : index
    %350 = vector.load %arg13[%c0_444, %c4_445, %c1_446, %c0_447] : memref<2x12x12x20xf32, #tpu.memory_space<vmem>>, vector<2x8x8x20xf32>
    %351 = vector.shape_cast %350 : vector<2x8x8x20xf32> to vector<128x20xf32>
    %352 = arith.truncf %351 : vector<128x20xf32> to vector<128x20xbf16>
    %c21_448 = arith.constant 21 : index
    %c0_449 = arith.constant 0 : index
    %c0_450 = arith.constant 0 : index
    %353 = vector.load %arg4[%c21_448, %c0_449, %c0_450] : memref<25x20x50xbf16, #tpu.memory_space<vmem>>, vector<1x20x50xbf16>
    %354 = vector.shape_cast %353 : vector<1x20x50xbf16> to vector<20x50xbf16>
    %cst_451 = arith.constant dense<0.000000e+00> : vector<128x50xf32>
    %355 = tpu.matmul %352, %354, %cst_451 {dimension_numbers = #tpu.dot_dimension_numbers<[1], [0], [0], [1], [0, 0, 1, 1], [], []>} : vector<128x20xbf16>, vector<20x50xbf16>, vector<128x50xf32> -> vector<128x50xf32>
    %356 = arith.addf %349, %355 : vector<128x50xf32>
    %c0_452 = arith.constant 0 : index
    %c4_453 = arith.constant 4 : index
    %c2_454 = arith.constant 2 : index
    %c0_455 = arith.constant 0 : index
    %357 = vector.load %arg13[%c0_452, %c4_453, %c2_454, %c0_455] : memref<2x12x12x20xf32, #tpu.memory_space<vmem>>, vector<2x8x8x20xf32>
    %358 = vector.shape_cast %357 : vector<2x8x8x20xf32> to vector<128x20xf32>
    %359 = arith.truncf %358 : vector<128x20xf32> to vector<128x20xbf16>
    %c22_456 = arith.constant 22 : index
    %c0_457 = arith.constant 0 : index
    %c0_458 = arith.constant 0 : index
    %360 = vector.load %arg4[%c22_456, %c0_457, %c0_458] : memref<25x20x50xbf16, #tpu.memory_space<vmem>>, vector<1x20x50xbf16>
    %361 = vector.shape_cast %360 : vector<1x20x50xbf16> to vector<20x50xbf16>
    %cst_459 = arith.constant dense<0.000000e+00> : vector<128x50xf32>
    %362 = tpu.matmul %359, %361, %cst_459 {dimension_numbers = #tpu.dot_dimension_numbers<[1], [0], [0], [1], [0, 0, 1, 1], [], []>} : vector<128x20xbf16>, vector<20x50xbf16>, vector<128x50xf32> -> vector<128x50xf32>
    %363 = arith.addf %356, %362 : vector<128x50xf32>
    %c0_460 = arith.constant 0 : index
    %c4_461 = arith.constant 4 : index
    %c3_462 = arith.constant 3 : index
    %c0_463 = arith.constant 0 : index
    %364 = vector.load %arg13[%c0_460, %c4_461, %c3_462, %c0_463] : memref<2x12x12x20xf32, #tpu.memory_space<vmem>>, vector<2x8x8x20xf32>
    %365 = vector.shape_cast %364 : vector<2x8x8x20xf32> to vector<128x20xf32>
    %366 = arith.truncf %365 : vector<128x20xf32> to vector<128x20xbf16>
    %c23_464 = arith.constant 23 : index
    %c0_465 = arith.constant 0 : index
    %c0_466 = arith.constant 0 : index
    %367 = vector.load %arg4[%c23_464, %c0_465, %c0_466] : memref<25x20x50xbf16, #tpu.memory_space<vmem>>, vector<1x20x50xbf16>
    %368 = vector.shape_cast %367 : vector<1x20x50xbf16> to vector<20x50xbf16>
    %cst_467 = arith.constant dense<0.000000e+00> : vector<128x50xf32>
    %369 = tpu.matmul %366, %368, %cst_467 {dimension_numbers = #tpu.dot_dimension_numbers<[1], [0], [0], [1], [0, 0, 1, 1], [], []>} : vector<128x20xbf16>, vector<20x50xbf16>, vector<128x50xf32> -> vector<128x50xf32>
    %370 = arith.addf %363, %369 : vector<128x50xf32>
    %c0_468 = arith.constant 0 : index
    %c4_469 = arith.constant 4 : index
    %c4_470 = arith.constant 4 : index
    %c0_471 = arith.constant 0 : index
    %371 = vector.load %arg13[%c0_468, %c4_469, %c4_470, %c0_471] : memref<2x12x12x20xf32, #tpu.memory_space<vmem>>, vector<2x8x8x20xf32>
    %372 = vector.shape_cast %371 : vector<2x8x8x20xf32> to vector<128x20xf32>
    %373 = arith.truncf %372 : vector<128x20xf32> to vector<128x20xbf16>
    %c24 = arith.constant 24 : index
    %c0_472 = arith.constant 0 : index
    %c0_473 = arith.constant 0 : index
    %374 = vector.load %arg4[%c24, %c0_472, %c0_473] : memref<25x20x50xbf16, #tpu.memory_space<vmem>>, vector<1x20x50xbf16>
    %375 = vector.shape_cast %374 : vector<1x20x50xbf16> to vector<20x50xbf16>
    %cst_474 = arith.constant dense<0.000000e+00> : vector<128x50xf32>
    %376 = tpu.matmul %373, %375, %cst_474 {dimension_numbers = #tpu.dot_dimension_numbers<[1], [0], [0], [1], [0, 0, 1, 1], [], []>} : vector<128x20xbf16>, vector<20x50xbf16>, vector<128x50xf32> -> vector<128x50xf32>
    %377 = arith.addf %370, %376 : vector<128x50xf32>
    %c0_475 = arith.constant 0 : index
    %c0_476 = arith.constant 0 : index
    %378 = vector.load %arg5[%c0_475, %c0_476] : memref<1x50xf32, #tpu.memory_space<vmem>>, vector<1x50xf32>
    %379 = vector.broadcast %378 : vector<1x50xf32> to vector<128x50xf32>
    %380 = arith.addf %377, %379 : vector<128x50xf32>
    %cst_477 = arith.constant 0.000000e+00 : f32
    %381 = vector.broadcast %cst_477 : f32 to vector<128x50xf32>
    %382 = arith.maximumf %380, %381 : vector<128x50xf32>
    %383 = vector.shape_cast %382 : vector<128x50xf32> to vector<2x8x8x50xf32>
    %c0_478 = arith.constant 0 : index
    %c0_479 = arith.constant 0 : index
    %c0_480 = arith.constant 0 : index
    %c0_481 = arith.constant 0 : index
    %384 = vector.load %arg14[%c0_478, %c0_479, %c0_480, %c0_481] : memref<2x8x8x50xf32, #tpu.memory_space<vmem>>, vector<2x8x8x50xf32>
    tpu.vector_store %arg14[%c0_478, %c0_479, %c0_480, %c0_481], %383 {strides = array<i32>} : memref<2x8x8x50xf32, #tpu.memory_space<vmem>>, vector<2x8x8x50xf32>,
    %c0_482 = arith.constant 0 : index
    %c0_483 = arith.constant 0 : index
    %c0_484 = arith.constant 0 : index
    %c0_485 = arith.constant 0 : index
    %385 = vector.load %arg14[%c0_482, %c0_483, %c0_484, %c0_485] : memref<2x8x8x50xf32, #tpu.memory_space<vmem>>, vector<2x1x8x50xf32>
    %386 = vector.shape_cast %385 : vector<2x1x8x50xf32> to vector<2x8x50xf32>
    %c0_486 = arith.constant 0 : index
    %c1_487 = arith.constant 1 : index
    %c0_488 = arith.constant 0 : index
    %c0_489 = arith.constant 0 : index
    %387 = vector.load %arg14[%c0_486, %c1_487, %c0_488, %c0_489] : memref<2x8x8x50xf32, #tpu.memory_space<vmem>>, vector<2x1x8x50xf32>
    %388 = vector.shape_cast %387 : vector<2x1x8x50xf32> to vector<2x8x50xf32>
    %389 = arith.maximumf %386, %388 : vector<2x8x50xf32>
    %c0_490 = arith.constant 0 : index
    %c0_491 = arith.constant 0 : index
    %c0_492 = arith.constant 0 : index
    %c0_493 = arith.constant 0 : index
    %390 = vector.load %arg15[%c0_490, %c0_491, %c0_492, %c0_493] : memref<2x4x8x50xf32, #tpu.memory_space<vmem>>, vector<2x1x8x50xf32>
    %391 = vector.shape_cast %390 : vector<2x1x8x50xf32> to vector<2x8x50xf32>
    %392 = vector.shape_cast %389 : vector<2x8x50xf32> to vector<2x1x8x50xf32>
    tpu.vector_store %arg15[%c0_490, %c0_491, %c0_492, %c0_493], %392 {strides = array<i32>} : memref<2x4x8x50xf32, #tpu.memory_space<vmem>>, vector<2x1x8x50xf32>,
    %c0_494 = arith.constant 0 : index
    %c2_495 = arith.constant 2 : index
    %c0_496 = arith.constant 0 : index
    %c0_497 = arith.constant 0 : index
    %393 = vector.load %arg14[%c0_494, %c2_495, %c0_496, %c0_497] : memref<2x8x8x50xf32, #tpu.memory_space<vmem>>, vector<2x1x8x50xf32>
    %394 = vector.shape_cast %393 : vector<2x1x8x50xf32> to vector<2x8x50xf32>
    %c0_498 = arith.constant 0 : index
    %c3_499 = arith.constant 3 : index
    %c0_500 = arith.constant 0 : index
    %c0_501 = arith.constant 0 : index
    %395 = vector.load %arg14[%c0_498, %c3_499, %c0_500, %c0_501] : memref<2x8x8x50xf32, #tpu.memory_space<vmem>>, vector<2x1x8x50xf32>
    %396 = vector.shape_cast %395 : vector<2x1x8x50xf32> to vector<2x8x50xf32>
    %397 = arith.maximumf %394, %396 : vector<2x8x50xf32>
    %c0_502 = arith.constant 0 : index
    %c1_503 = arith.constant 1 : index
    %c0_504 = arith.constant 0 : index
    %c0_505 = arith.constant 0 : index
    %398 = vector.load %arg15[%c0_502, %c1_503, %c0_504, %c0_505] : memref<2x4x8x50xf32, #tpu.memory_space<vmem>>, vector<2x1x8x50xf32>
    %399 = vector.shape_cast %398 : vector<2x1x8x50xf32> to vector<2x8x50xf32>
    %400 = vector.shape_cast %397 : vector<2x8x50xf32> to vector<2x1x8x50xf32>
    tpu.vector_store %arg15[%c0_502, %c1_503, %c0_504, %c0_505], %400 {strides = array<i32>} : memref<2x4x8x50xf32, #tpu.memory_space<vmem>>, vector<2x1x8x50xf32>,
    %c0_506 = arith.constant 0 : index
    %c4_507 = arith.constant 4 : index
    %c0_508 = arith.constant 0 : index
    %c0_509 = arith.constant 0 : index
    %401 = vector.load %arg14[%c0_506, %c4_507, %c0_508, %c0_509] : memref<2x8x8x50xf32, #tpu.memory_space<vmem>>, vector<2x1x8x50xf32>
    %402 = vector.shape_cast %401 : vector<2x1x8x50xf32> to vector<2x8x50xf32>
    %c0_510 = arith.constant 0 : index
    %c5_511 = arith.constant 5 : index
    %c0_512 = arith.constant 0 : index
    %c0_513 = arith.constant 0 : index
    %403 = vector.load %arg14[%c0_510, %c5_511, %c0_512, %c0_513] : memref<2x8x8x50xf32, #tpu.memory_space<vmem>>, vector<2x1x8x50xf32>
    %404 = vector.shape_cast %403 : vector<2x1x8x50xf32> to vector<2x8x50xf32>
    %405 = arith.maximumf %402, %404 : vector<2x8x50xf32>
    %c0_514 = arith.constant 0 : index
    %c2_515 = arith.constant 2 : index
    %c0_516 = arith.constant 0 : index
    %c0_517 = arith.constant 0 : index
    %406 = vector.load %arg15[%c0_514, %c2_515, %c0_516, %c0_517] : memref<2x4x8x50xf32, #tpu.memory_space<vmem>>, vector<2x1x8x50xf32>
    %407 = vector.shape_cast %406 : vector<2x1x8x50xf32> to vector<2x8x50xf32>
    %408 = vector.shape_cast %405 : vector<2x8x50xf32> to vector<2x1x8x50xf32>
    tpu.vector_store %arg15[%c0_514, %c2_515, %c0_516, %c0_517], %408 {strides = array<i32>} : memref<2x4x8x50xf32, #tpu.memory_space<vmem>>, vector<2x1x8x50xf32>,
    %c0_518 = arith.constant 0 : index
    %c6_519 = arith.constant 6 : index
    %c0_520 = arith.constant 0 : index
    %c0_521 = arith.constant 0 : index
    %409 = vector.load %arg14[%c0_518, %c6_519, %c0_520, %c0_521] : memref<2x8x8x50xf32, #tpu.memory_space<vmem>>, vector<2x1x8x50xf32>
    %410 = vector.shape_cast %409 : vector<2x1x8x50xf32> to vector<2x8x50xf32>
    %c0_522 = arith.constant 0 : index
    %c7_523 = arith.constant 7 : index
    %c0_524 = arith.constant 0 : index
    %c0_525 = arith.constant 0 : index
    %411 = vector.load %arg14[%c0_522, %c7_523, %c0_524, %c0_525] : memref<2x8x8x50xf32, #tpu.memory_space<vmem>>, vector<2x1x8x50xf32>
    %412 = vector.shape_cast %411 : vector<2x1x8x50xf32> to vector<2x8x50xf32>
    %413 = arith.maximumf %410, %412 : vector<2x8x50xf32>
    %c0_526 = arith.constant 0 : index
    %c3_527 = arith.constant 3 : index
    %c0_528 = arith.constant 0 : index
    %c0_529 = arith.constant 0 : index
    %414 = vector.load %arg15[%c0_526, %c3_527, %c0_528, %c0_529] : memref<2x4x8x50xf32, #tpu.memory_space<vmem>>, vector<2x1x8x50xf32>
    %415 = vector.shape_cast %414 : vector<2x1x8x50xf32> to vector<2x8x50xf32>
    %416 = vector.shape_cast %413 : vector<2x8x50xf32> to vector<2x1x8x50xf32>
    tpu.vector_store %arg15[%c0_526, %c3_527, %c0_528, %c0_529], %416 {strides = array<i32>} : memref<2x4x8x50xf32, #tpu.memory_space<vmem>>, vector<2x1x8x50xf32>,
    %c0_530 = arith.constant 0 : index
    %c0_531 = arith.constant 0 : index
    %c0_532 = arith.constant 0 : index
    %c0_533 = arith.constant 0 : index
    %417 = vector.load %arg15[%c0_530, %c0_531, %c0_532, %c0_533] : memref<2x4x8x50xf32, #tpu.memory_space<vmem>>, vector<2x4x1x50xf32>
    %418 = vector.shape_cast %417 : vector<2x4x1x50xf32> to vector<2x4x50xf32>
    %c0_534 = arith.constant 0 : index
    %c0_535 = arith.constant 0 : index
    %c1_536 = arith.constant 1 : index
    %c0_537 = arith.constant 0 : index
    %419 = vector.load %arg15[%c0_534, %c0_535, %c1_536, %c0_537] : memref<2x4x8x50xf32, #tpu.memory_space<vmem>>, vector<2x4x1x50xf32>
    %420 = vector.shape_cast %419 : vector<2x4x1x50xf32> to vector<2x4x50xf32>
    %421 = arith.maximumf %418, %420 : vector<2x4x50xf32>
    %c0_538 = arith.constant 0 : index
    %c0_539 = arith.constant 0 : index
    %c0_540 = arith.constant 0 : index
    %c0_541 = arith.constant 0 : index
    %422 = vector.load %arg16[%c0_538, %c0_539, %c0_540, %c0_541] : memref<2x4x4x50xf32, #tpu.memory_space<vmem>>, vector<2x4x1x50xf32>
    %423 = vector.shape_cast %422 : vector<2x4x1x50xf32> to vector<2x4x50xf32>
    %424 = vector.shape_cast %421 : vector<2x4x50xf32> to vector<2x4x1x50xf32>
    tpu.vector_store %arg16[%c0_538, %c0_539, %c0_540, %c0_541], %424 {strides = array<i32>} : memref<2x4x4x50xf32, #tpu.memory_space<vmem>>, vector<2x4x1x50xf32>,
    %c0_542 = arith.constant 0 : index
    %c0_543 = arith.constant 0 : index
    %c2_544 = arith.constant 2 : index
    %c0_545 = arith.constant 0 : index
    %425 = vector.load %arg15[%c0_542, %c0_543, %c2_544, %c0_545] : memref<2x4x8x50xf32, #tpu.memory_space<vmem>>, vector<2x4x1x50xf32>
    %426 = vector.shape_cast %425 : vector<2x4x1x50xf32> to vector<2x4x50xf32>
    %c0_546 = arith.constant 0 : index
    %c0_547 = arith.constant 0 : index
    %c3_548 = arith.constant 3 : index
    %c0_549 = arith.constant 0 : index
    %427 = vector.load %arg15[%c0_546, %c0_547, %c3_548, %c0_549] : memref<2x4x8x50xf32, #tpu.memory_space<vmem>>, vector<2x4x1x50xf32>
    %428 = vector.shape_cast %427 : vector<2x4x1x50xf32> to vector<2x4x50xf32>
    %429 = arith.maximumf %426, %428 : vector<2x4x50xf32>
    %c0_550 = arith.constant 0 : index
    %c0_551 = arith.constant 0 : index
    %c1_552 = arith.constant 1 : index
    %c0_553 = arith.constant 0 : index
    %430 = vector.load %arg16[%c0_550, %c0_551, %c1_552, %c0_553] : memref<2x4x4x50xf32, #tpu.memory_space<vmem>>, vector<2x4x1x50xf32>
    %431 = vector.shape_cast %430 : vector<2x4x1x50xf32> to vector<2x4x50xf32>
    %432 = vector.shape_cast %429 : vector<2x4x50xf32> to vector<2x4x1x50xf32>
    tpu.vector_store %arg16[%c0_550, %c0_551, %c1_552, %c0_553], %432 {strides = array<i32>} : memref<2x4x4x50xf32, #tpu.memory_space<vmem>>, vector<2x4x1x50xf32>,
    %c0_554 = arith.constant 0 : index
    %c0_555 = arith.constant 0 : index
    %c4_556 = arith.constant 4 : index
    %c0_557 = arith.constant 0 : index
    %433 = vector.load %arg15[%c0_554, %c0_555, %c4_556, %c0_557] : memref<2x4x8x50xf32, #tpu.memory_space<vmem>>, vector<2x4x1x50xf32>
    %434 = vector.shape_cast %433 : vector<2x4x1x50xf32> to vector<2x4x50xf32>
    %c0_558 = arith.constant 0 : index
    %c0_559 = arith.constant 0 : index
    %c5_560 = arith.constant 5 : index
    %c0_561 = arith.constant 0 : index
    %435 = vector.load %arg15[%c0_558, %c0_559, %c5_560, %c0_561] : memref<2x4x8x50xf32, #tpu.memory_space<vmem>>, vector<2x4x1x50xf32>
    %436 = vector.shape_cast %435 : vector<2x4x1x50xf32> to vector<2x4x50xf32>
    %437 = arith.maximumf %434, %436 : vector<2x4x50xf32>
    %c0_562 = arith.constant 0 : index
    %c0_563 = arith.constant 0 : index
    %c2_564 = arith.constant 2 : index
    %c0_565 = arith.constant 0 : index
    %438 = vector.load %arg16[%c0_562, %c0_563, %c2_564, %c0_565] : memref<2x4x4x50xf32, #tpu.memory_space<vmem>>, vector<2x4x1x50xf32>
    %439 = vector.shape_cast %438 : vector<2x4x1x50xf32> to vector<2x4x50xf32>
    %440 = vector.shape_cast %437 : vector<2x4x50xf32> to vector<2x4x1x50xf32>
    tpu.vector_store %arg16[%c0_562, %c0_563, %c2_564, %c0_565], %440 {strides = array<i32>} : memref<2x4x4x50xf32, #tpu.memory_space<vmem>>, vector<2x4x1x50xf32>,
    %c0_566 = arith.constant 0 : index
    %c0_567 = arith.constant 0 : index
    %c6_568 = arith.constant 6 : index
    %c0_569 = arith.constant 0 : index
    %441 = vector.load %arg15[%c0_566, %c0_567, %c6_568, %c0_569] : memref<2x4x8x50xf32, #tpu.memory_space<vmem>>, vector<2x4x1x50xf32>
    %442 = vector.shape_cast %441 : vector<2x4x1x50xf32> to vector<2x4x50xf32>
    %c0_570 = arith.constant 0 : index
    %c0_571 = arith.constant 0 : index
    %c7_572 = arith.constant 7 : index
    %c0_573 = arith.constant 0 : index
    %443 = vector.load %arg15[%c0_570, %c0_571, %c7_572, %c0_573] : memref<2x4x8x50xf32, #tpu.memory_space<vmem>>, vector<2x4x1x50xf32>
    %444 = vector.shape_cast %443 : vector<2x4x1x50xf32> to vector<2x4x50xf32>
    %445 = arith.maximumf %442, %444 : vector<2x4x50xf32>
    %c0_574 = arith.constant 0 : index
    %c0_575 = arith.constant 0 : index
    %c3_576 = arith.constant 3 : index
    %c0_577 = arith.constant 0 : index
    %446 = vector.load %arg16[%c0_574, %c0_575, %c3_576, %c0_577] : memref<2x4x4x50xf32, #tpu.memory_space<vmem>>, vector<2x4x1x50xf32>
    %447 = vector.shape_cast %446 : vector<2x4x1x50xf32> to vector<2x4x50xf32>
    %448 = vector.shape_cast %445 : vector<2x4x50xf32> to vector<2x4x1x50xf32>
    tpu.vector_store %arg16[%c0_574, %c0_575, %c3_576, %c0_577], %448 {strides = array<i32>} : memref<2x4x4x50xf32, #tpu.memory_space<vmem>>, vector<2x4x1x50xf32>,
    %cst_578 = arith.constant 0.000000e+00 : f32
    %449 = vector.broadcast %cst_578 : f32 to vector<2x500xf32>
    %c0_579 = arith.constant 0 : index
    %c0_580 = arith.constant 0 : index
    %c0_581 = arith.constant 0 : index
    %c0_582 = arith.constant 0 : index
    %450 = vector.load %arg16[%c0_579, %c0_580, %c0_581, %c0_582] : memref<2x4x4x50xf32, #tpu.memory_space<vmem>>, vector<2x1x1x50xf32>
    %451 = vector.shape_cast %450 : vector<2x1x1x50xf32> to vector<2x50xf32>
    %452 = arith.truncf %451 : vector<2x50xf32> to vector<2x50xbf16>
    %c0_583 = arith.constant 0 : index
    %c0_584 = arith.constant 0 : index
    %c0_585 = arith.constant 0 : index
    %453 = vector.load %arg6[%c0_583, %c0_584, %c0_585] : memref<16x50x500xbf16, #tpu.memory_space<vmem>>, vector<1x50x500xbf16>
    %454 = vector.shape_cast %453 : vector<1x50x500xbf16> to vector<50x500xbf16>
    %cst_586 = arith.constant dense<0.000000e+00> : vector<2x500xf32>
    %455 = tpu.matmul %452, %454, %cst_586 {dimension_numbers = #tpu.dot_dimension_numbers<[1], [0], [0], [1], [0, 0, 1, 1], [], []>} : vector<2x50xbf16>, vector<50x500xbf16>, vector<2x500xf32> -> vector<2x500xf32>
    %456 = arith.addf %449, %455 : vector<2x500xf32>
    %c0_587 = arith.constant 0 : index
    %c0_588 = arith.constant 0 : index
    %c1_589 = arith.constant 1 : index
    %c0_590 = arith.constant 0 : index
    %457 = vector.load %arg16[%c0_587, %c0_588, %c1_589, %c0_590] : memref<2x4x4x50xf32, #tpu.memory_space<vmem>>, vector<2x1x1x50xf32>
    %458 = vector.shape_cast %457 : vector<2x1x1x50xf32> to vector<2x50xf32>
    %459 = arith.truncf %458 : vector<2x50xf32> to vector<2x50xbf16>
    %c1_591 = arith.constant 1 : index
    %c0_592 = arith.constant 0 : index
    %c0_593 = arith.constant 0 : index
    %460 = vector.load %arg6[%c1_591, %c0_592, %c0_593] : memref<16x50x500xbf16, #tpu.memory_space<vmem>>, vector<1x50x500xbf16>
    %461 = vector.shape_cast %460 : vector<1x50x500xbf16> to vector<50x500xbf16>
    %cst_594 = arith.constant dense<0.000000e+00> : vector<2x500xf32>
    %462 = tpu.matmul %459, %461, %cst_594 {dimension_numbers = #tpu.dot_dimension_numbers<[1], [0], [0], [1], [0, 0, 1, 1], [], []>} : vector<2x50xbf16>, vector<50x500xbf16>, vector<2x500xf32> -> vector<2x500xf32>
    %463 = arith.addf %456, %462 : vector<2x500xf32>
    %c0_595 = arith.constant 0 : index
    %c0_596 = arith.constant 0 : index
    %c2_597 = arith.constant 2 : index
    %c0_598 = arith.constant 0 : index
    %464 = vector.load %arg16[%c0_595, %c0_596, %c2_597, %c0_598] : memref<2x4x4x50xf32, #tpu.memory_space<vmem>>, vector<2x1x1x50xf32>
    %465 = vector.shape_cast %464 : vector<2x1x1x50xf32> to vector<2x50xf32>
    %466 = arith.truncf %465 : vector<2x50xf32> to vector<2x50xbf16>
    %c2_599 = arith.constant 2 : index
    %c0_600 = arith.constant 0 : index
    %c0_601 = arith.constant 0 : index
    %467 = vector.load %arg6[%c2_599, %c0_600, %c0_601] : memref<16x50x500xbf16, #tpu.memory_space<vmem>>, vector<1x50x500xbf16>
    %468 = vector.shape_cast %467 : vector<1x50x500xbf16> to vector<50x500xbf16>
    %cst_602 = arith.constant dense<0.000000e+00> : vector<2x500xf32>
    %469 = tpu.matmul %466, %468, %cst_602 {dimension_numbers = #tpu.dot_dimension_numbers<[1], [0], [0], [1], [0, 0, 1, 1], [], []>} : vector<2x50xbf16>, vector<50x500xbf16>, vector<2x500xf32> -> vector<2x500xf32>
    %470 = arith.addf %463, %469 : vector<2x500xf32>
    %c0_603 = arith.constant 0 : index
    %c0_604 = arith.constant 0 : index
    %c3_605 = arith.constant 3 : index
    %c0_606 = arith.constant 0 : index
    %471 = vector.load %arg16[%c0_603, %c0_604, %c3_605, %c0_606] : memref<2x4x4x50xf32, #tpu.memory_space<vmem>>, vector<2x1x1x50xf32>
    %472 = vector.shape_cast %471 : vector<2x1x1x50xf32> to vector<2x50xf32>
    %473 = arith.truncf %472 : vector<2x50xf32> to vector<2x50xbf16>
    %c3_607 = arith.constant 3 : index
    %c0_608 = arith.constant 0 : index
    %c0_609 = arith.constant 0 : index
    %474 = vector.load %arg6[%c3_607, %c0_608, %c0_609] : memref<16x50x500xbf16, #tpu.memory_space<vmem>>, vector<1x50x500xbf16>
    %475 = vector.shape_cast %474 : vector<1x50x500xbf16> to vector<50x500xbf16>
    %cst_610 = arith.constant dense<0.000000e+00> : vector<2x500xf32>
    %476 = tpu.matmul %473, %475, %cst_610 {dimension_numbers = #tpu.dot_dimension_numbers<[1], [0], [0], [1], [0, 0, 1, 1], [], []>} : vector<2x50xbf16>, vector<50x500xbf16>, vector<2x500xf32> -> vector<2x500xf32>
    %477 = arith.addf %470, %476 : vector<2x500xf32>
    %c0_611 = arith.constant 0 : index
    %c1_612 = arith.constant 1 : index
    %c0_613 = arith.constant 0 : index
    %c0_614 = arith.constant 0 : index
    %478 = vector.load %arg16[%c0_611, %c1_612, %c0_613, %c0_614] : memref<2x4x4x50xf32, #tpu.memory_space<vmem>>, vector<2x1x1x50xf32>
    %479 = vector.shape_cast %478 : vector<2x1x1x50xf32> to vector<2x50xf32>
    %480 = arith.truncf %479 : vector<2x50xf32> to vector<2x50xbf16>
    %c4_615 = arith.constant 4 : index
    %c0_616 = arith.constant 0 : index
    %c0_617 = arith.constant 0 : index
    %481 = vector.load %arg6[%c4_615, %c0_616, %c0_617] : memref<16x50x500xbf16, #tpu.memory_space<vmem>>, vector<1x50x500xbf16>
    %482 = vector.shape_cast %481 : vector<1x50x500xbf16> to vector<50x500xbf16>
    %cst_618 = arith.constant dense<0.000000e+00> : vector<2x500xf32>
    %483 = tpu.matmul %480, %482, %cst_618 {dimension_numbers = #tpu.dot_dimension_numbers<[1], [0], [0], [1], [0, 0, 1, 1], [], []>} : vector<2x50xbf16>, vector<50x500xbf16>, vector<2x500xf32> -> vector<2x500xf32>
    %484 = arith.addf %477, %483 : vector<2x500xf32>
    %c0_619 = arith.constant 0 : index
    %c1_620 = arith.constant 1 : index
    %c1_621 = arith.constant 1 : index
    %c0_622 = arith.constant 0 : index
    %485 = vector.load %arg16[%c0_619, %c1_620, %c1_621, %c0_622] : memref<2x4x4x50xf32, #tpu.memory_space<vmem>>, vector<2x1x1x50xf32>
    %486 = vector.shape_cast %485 : vector<2x1x1x50xf32> to vector<2x50xf32>
    %487 = arith.truncf %486 : vector<2x50xf32> to vector<2x50xbf16>
    %c5_623 = arith.constant 5 : index
    %c0_624 = arith.constant 0 : index
    %c0_625 = arith.constant 0 : index
    %488 = vector.load %arg6[%c5_623, %c0_624, %c0_625] : memref<16x50x500xbf16, #tpu.memory_space<vmem>>, vector<1x50x500xbf16>
    %489 = vector.shape_cast %488 : vector<1x50x500xbf16> to vector<50x500xbf16>
    %cst_626 = arith.constant dense<0.000000e+00> : vector<2x500xf32>
    %490 = tpu.matmul %487, %489, %cst_626 {dimension_numbers = #tpu.dot_dimension_numbers<[1], [0], [0], [1], [0, 0, 1, 1], [], []>} : vector<2x50xbf16>, vector<50x500xbf16>, vector<2x500xf32> -> vector<2x500xf32>
    %491 = arith.addf %484, %490 : vector<2x500xf32>
    %c0_627 = arith.constant 0 : index
    %c1_628 = arith.constant 1 : index
    %c2_629 = arith.constant 2 : index
    %c0_630 = arith.constant 0 : index
    %492 = vector.load %arg16[%c0_627, %c1_628, %c2_629, %c0_630] : memref<2x4x4x50xf32, #tpu.memory_space<vmem>>, vector<2x1x1x50xf32>
    %493 = vector.shape_cast %492 : vector<2x1x1x50xf32> to vector<2x50xf32>
    %494 = arith.truncf %493 : vector<2x50xf32> to vector<2x50xbf16>
    %c6_631 = arith.constant 6 : index
    %c0_632 = arith.constant 0 : index
    %c0_633 = arith.constant 0 : index
    %495 = vector.load %arg6[%c6_631, %c0_632, %c0_633] : memref<16x50x500xbf16, #tpu.memory_space<vmem>>, vector<1x50x500xbf16>
    %496 = vector.shape_cast %495 : vector<1x50x500xbf16> to vector<50x500xbf16>
    %cst_634 = arith.constant dense<0.000000e+00> : vector<2x500xf32>
    %497 = tpu.matmul %494, %496, %cst_634 {dimension_numbers = #tpu.dot_dimension_numbers<[1], [0], [0], [1], [0, 0, 1, 1], [], []>} : vector<2x50xbf16>, vector<50x500xbf16>, vector<2x500xf32> -> vector<2x500xf32>
    %498 = arith.addf %491, %497 : vector<2x500xf32>
    %c0_635 = arith.constant 0 : index
    %c1_636 = arith.constant 1 : index
    %c3_637 = arith.constant 3 : index
    %c0_638 = arith.constant 0 : index
    %499 = vector.load %arg16[%c0_635, %c1_636, %c3_637, %c0_638] : memref<2x4x4x50xf32, #tpu.memory_space<vmem>>, vector<2x1x1x50xf32>
    %500 = vector.shape_cast %499 : vector<2x1x1x50xf32> to vector<2x50xf32>
    %501 = arith.truncf %500 : vector<2x50xf32> to vector<2x50xbf16>
    %c7_639 = arith.constant 7 : index
    %c0_640 = arith.constant 0 : index
    %c0_641 = arith.constant 0 : index
    %502 = vector.load %arg6[%c7_639, %c0_640, %c0_641] : memref<16x50x500xbf16, #tpu.memory_space<vmem>>, vector<1x50x500xbf16>
    %503 = vector.shape_cast %502 : vector<1x50x500xbf16> to vector<50x500xbf16>
    %cst_642 = arith.constant dense<0.000000e+00> : vector<2x500xf32>
    %504 = tpu.matmul %501, %503, %cst_642 {dimension_numbers = #tpu.dot_dimension_numbers<[1], [0], [0], [1], [0, 0, 1, 1], [], []>} : vector<2x50xbf16>, vector<50x500xbf16>, vector<2x500xf32> -> vector<2x500xf32>
    %505 = arith.addf %498, %504 : vector<2x500xf32>
    %c0_643 = arith.constant 0 : index
    %c2_644 = arith.constant 2 : index
    %c0_645 = arith.constant 0 : index
    %c0_646 = arith.constant 0 : index
    %506 = vector.load %arg16[%c0_643, %c2_644, %c0_645, %c0_646] : memref<2x4x4x50xf32, #tpu.memory_space<vmem>>, vector<2x1x1x50xf32>
    %507 = vector.shape_cast %506 : vector<2x1x1x50xf32> to vector<2x50xf32>
    %508 = arith.truncf %507 : vector<2x50xf32> to vector<2x50xbf16>
    %c8_647 = arith.constant 8 : index
    %c0_648 = arith.constant 0 : index
    %c0_649 = arith.constant 0 : index
    %509 = vector.load %arg6[%c8_647, %c0_648, %c0_649] : memref<16x50x500xbf16, #tpu.memory_space<vmem>>, vector<1x50x500xbf16>
    %510 = vector.shape_cast %509 : vector<1x50x500xbf16> to vector<50x500xbf16>
    %cst_650 = arith.constant dense<0.000000e+00> : vector<2x500xf32>
    %511 = tpu.matmul %508, %510, %cst_650 {dimension_numbers = #tpu.dot_dimension_numbers<[1], [0], [0], [1], [0, 0, 1, 1], [], []>} : vector<2x50xbf16>, vector<50x500xbf16>, vector<2x500xf32> -> vector<2x500xf32>
    %512 = arith.addf %505, %511 : vector<2x500xf32>
    %c0_651 = arith.constant 0 : index
    %c2_652 = arith.constant 2 : index
    %c1_653 = arith.constant 1 : index
    %c0_654 = arith.constant 0 : index
    %513 = vector.load %arg16[%c0_651, %c2_652, %c1_653, %c0_654] : memref<2x4x4x50xf32, #tpu.memory_space<vmem>>, vector<2x1x1x50xf32>
    %514 = vector.shape_cast %513 : vector<2x1x1x50xf32> to vector<2x50xf32>
    %515 = arith.truncf %514 : vector<2x50xf32> to vector<2x50xbf16>
    %c9_655 = arith.constant 9 : index
    %c0_656 = arith.constant 0 : index
    %c0_657 = arith.constant 0 : index
    %516 = vector.load %arg6[%c9_655, %c0_656, %c0_657] : memref<16x50x500xbf16, #tpu.memory_space<vmem>>, vector<1x50x500xbf16>
    %517 = vector.shape_cast %516 : vector<1x50x500xbf16> to vector<50x500xbf16>
    %cst_658 = arith.constant dense<0.000000e+00> : vector<2x500xf32>
    %518 = tpu.matmul %515, %517, %cst_658 {dimension_numbers = #tpu.dot_dimension_numbers<[1], [0], [0], [1], [0, 0, 1, 1], [], []>} : vector<2x50xbf16>, vector<50x500xbf16>, vector<2x500xf32> -> vector<2x500xf32>
    %519 = arith.addf %512, %518 : vector<2x500xf32>
    %c0_659 = arith.constant 0 : index
    %c2_660 = arith.constant 2 : index
    %c2_661 = arith.constant 2 : index
    %c0_662 = arith.constant 0 : index
    %520 = vector.load %arg16[%c0_659, %c2_660, %c2_661, %c0_662] : memref<2x4x4x50xf32, #tpu.memory_space<vmem>>, vector<2x1x1x50xf32>
    %521 = vector.shape_cast %520 : vector<2x1x1x50xf32> to vector<2x50xf32>
    %522 = arith.truncf %521 : vector<2x50xf32> to vector<2x50xbf16>
    %c10_663 = arith.constant 10 : index
    %c0_664 = arith.constant 0 : index
    %c0_665 = arith.constant 0 : index
    %523 = vector.load %arg6[%c10_663, %c0_664, %c0_665] : memref<16x50x500xbf16, #tpu.memory_space<vmem>>, vector<1x50x500xbf16>
    %524 = vector.shape_cast %523 : vector<1x50x500xbf16> to vector<50x500xbf16>
    %cst_666 = arith.constant dense<0.000000e+00> : vector<2x500xf32>
    %525 = tpu.matmul %522, %524, %cst_666 {dimension_numbers = #tpu.dot_dimension_numbers<[1], [0], [0], [1], [0, 0, 1, 1], [], []>} : vector<2x50xbf16>, vector<50x500xbf16>, vector<2x500xf32> -> vector<2x500xf32>
    %526 = arith.addf %519, %525 : vector<2x500xf32>
    %c0_667 = arith.constant 0 : index
    %c2_668 = arith.constant 2 : index
    %c3_669 = arith.constant 3 : index
    %c0_670 = arith.constant 0 : index
    %527 = vector.load %arg16[%c0_667, %c2_668, %c3_669, %c0_670] : memref<2x4x4x50xf32, #tpu.memory_space<vmem>>, vector<2x1x1x50xf32>
    %528 = vector.shape_cast %527 : vector<2x1x1x50xf32> to vector<2x50xf32>
    %529 = arith.truncf %528 : vector<2x50xf32> to vector<2x50xbf16>
    %c11_671 = arith.constant 11 : index
    %c0_672 = arith.constant 0 : index
    %c0_673 = arith.constant 0 : index
    %530 = vector.load %arg6[%c11_671, %c0_672, %c0_673] : memref<16x50x500xbf16, #tpu.memory_space<vmem>>, vector<1x50x500xbf16>
    %531 = vector.shape_cast %530 : vector<1x50x500xbf16> to vector<50x500xbf16>
    %cst_674 = arith.constant dense<0.000000e+00> : vector<2x500xf32>
    %532 = tpu.matmul %529, %531, %cst_674 {dimension_numbers = #tpu.dot_dimension_numbers<[1], [0], [0], [1], [0, 0, 1, 1], [], []>} : vector<2x50xbf16>, vector<50x500xbf16>, vector<2x500xf32> -> vector<2x500xf32>
    %533 = arith.addf %526, %532 : vector<2x500xf32>
    %c0_675 = arith.constant 0 : index
    %c3_676 = arith.constant 3 : index
    %c0_677 = arith.constant 0 : index
    %c0_678 = arith.constant 0 : index
    %534 = vector.load %arg16[%c0_675, %c3_676, %c0_677, %c0_678] : memref<2x4x4x50xf32, #tpu.memory_space<vmem>>, vector<2x1x1x50xf32>
    %535 = vector.shape_cast %534 : vector<2x1x1x50xf32> to vector<2x50xf32>
    %536 = arith.truncf %535 : vector<2x50xf32> to vector<2x50xbf16>
    %c12_679 = arith.constant 12 : index
    %c0_680 = arith.constant 0 : index
    %c0_681 = arith.constant 0 : index
    %537 = vector.load %arg6[%c12_679, %c0_680, %c0_681] : memref<16x50x500xbf16, #tpu.memory_space<vmem>>, vector<1x50x500xbf16>
    %538 = vector.shape_cast %537 : vector<1x50x500xbf16> to vector<50x500xbf16>
    %cst_682 = arith.constant dense<0.000000e+00> : vector<2x500xf32>
    %539 = tpu.matmul %536, %538, %cst_682 {dimension_numbers = #tpu.dot_dimension_numbers<[1], [0], [0], [1], [0, 0, 1, 1], [], []>} : vector<2x50xbf16>, vector<50x500xbf16>, vector<2x500xf32> -> vector<2x500xf32>
    %540 = arith.addf %533, %539 : vector<2x500xf32>
    %c0_683 = arith.constant 0 : index
    %c3_684 = arith.constant 3 : index
    %c1_685 = arith.constant 1 : index
    %c0_686 = arith.constant 0 : index
    %541 = vector.load %arg16[%c0_683, %c3_684, %c1_685, %c0_686] : memref<2x4x4x50xf32, #tpu.memory_space<vmem>>, vector<2x1x1x50xf32>
    %542 = vector.shape_cast %541 : vector<2x1x1x50xf32> to vector<2x50xf32>
    %543 = arith.truncf %542 : vector<2x50xf32> to vector<2x50xbf16>
    %c13_687 = arith.constant 13 : index
    %c0_688 = arith.constant 0 : index
    %c0_689 = arith.constant 0 : index
    %544 = vector.load %arg6[%c13_687, %c0_688, %c0_689] : memref<16x50x500xbf16, #tpu.memory_space<vmem>>, vector<1x50x500xbf16>
    %545 = vector.shape_cast %544 : vector<1x50x500xbf16> to vector<50x500xbf16>
    %cst_690 = arith.constant dense<0.000000e+00> : vector<2x500xf32>
    %546 = tpu.matmul %543, %545, %cst_690 {dimension_numbers = #tpu.dot_dimension_numbers<[1], [0], [0], [1], [0, 0, 1, 1], [], []>} : vector<2x50xbf16>, vector<50x500xbf16>, vector<2x500xf32> -> vector<2x500xf32>
    %547 = arith.addf %540, %546 : vector<2x500xf32>
    %c0_691 = arith.constant 0 : index
    %c3_692 = arith.constant 3 : index
    %c2_693 = arith.constant 2 : index
    %c0_694 = arith.constant 0 : index
    %548 = vector.load %arg16[%c0_691, %c3_692, %c2_693, %c0_694] : memref<2x4x4x50xf32, #tpu.memory_space<vmem>>, vector<2x1x1x50xf32>
    %549 = vector.shape_cast %548 : vector<2x1x1x50xf32> to vector<2x50xf32>
    %550 = arith.truncf %549 : vector<2x50xf32> to vector<2x50xbf16>
    %c14_695 = arith.constant 14 : index
    %c0_696 = arith.constant 0 : index
    %c0_697 = arith.constant 0 : index
    %551 = vector.load %arg6[%c14_695, %c0_696, %c0_697] : memref<16x50x500xbf16, #tpu.memory_space<vmem>>, vector<1x50x500xbf16>
    %552 = vector.shape_cast %551 : vector<1x50x500xbf16> to vector<50x500xbf16>
    %cst_698 = arith.constant dense<0.000000e+00> : vector<2x500xf32>
    %553 = tpu.matmul %550, %552, %cst_698 {dimension_numbers = #tpu.dot_dimension_numbers<[1], [0], [0], [1], [0, 0, 1, 1], [], []>} : vector<2x50xbf16>, vector<50x500xbf16>, vector<2x500xf32> -> vector<2x500xf32>
    %554 = arith.addf %547, %553 : vector<2x500xf32>
    %c0_699 = arith.constant 0 : index
    %c3_700 = arith.constant 3 : index
    %c3_701 = arith.constant 3 : index
    %c0_702 = arith.constant 0 : index
    %555 = vector.load %arg16[%c0_699, %c3_700, %c3_701, %c0_702] : memref<2x4x4x50xf32, #tpu.memory_space<vmem>>, vector<2x1x1x50xf32>
    %556 = vector.shape_cast %555 : vector<2x1x1x50xf32> to vector<2x50xf32>
    %557 = arith.truncf %556 : vector<2x50xf32> to vector<2x50xbf16>
    %c15_703 = arith.constant 15 : index
    %c0_704 = arith.constant 0 : index
    %c0_705 = arith.constant 0 : index
    %558 = vector.load %arg6[%c15_703, %c0_704, %c0_705] : memref<16x50x500xbf16, #tpu.memory_space<vmem>>, vector<1x50x500xbf16>
    %559 = vector.shape_cast %558 : vector<1x50x500xbf16> to vector<50x500xbf16>
    %cst_706 = arith.constant dense<0.000000e+00> : vector<2x500xf32>
    %560 = tpu.matmul %557, %559, %cst_706 {dimension_numbers = #tpu.dot_dimension_numbers<[1], [0], [0], [1], [0, 0, 1, 1], [], []>} : vector<2x50xbf16>, vector<50x500xbf16>, vector<2x500xf32> -> vector<2x500xf32>
    %561 = arith.addf %554, %560 : vector<2x500xf32>
    %c0_707 = arith.constant 0 : index
    %c0_708 = arith.constant 0 : index
    %562 = vector.load %arg7[%c0_707, %c0_708] : memref<1x500xf32, #tpu.memory_space<vmem>>, vector<1x500xf32>
    %563 = vector.broadcast %562 : vector<1x500xf32> to vector<2x500xf32>
    %564 = arith.addf %561, %563 : vector<2x500xf32>
    %cst_709 = arith.constant 0.000000e+00 : f32
    %565 = vector.broadcast %cst_709 : f32 to vector<2x500xf32>
    %566 = arith.maximumf %564, %565 : vector<2x500xf32>
    %567 = arith.truncf %566 : vector<2x500xf32> to vector<2x500xbf16>
    %c0_710 = arith.constant 0 : index
    %c0_711 = arith.constant 0 : index
    %568 = vector.load %arg8[%c0_710, %c0_711] : memref<500x10xbf16, #tpu.memory_space<vmem>>, vector<500x10xbf16>
    %cst_712 = arith.constant dense<0.000000e+00> : vector<2x10xf32>
    %569 = tpu.matmul %567, %568, %cst_712 {dimension_numbers = #tpu.dot_dimension_numbers<[1], [0], [0], [1], [0, 0, 1, 1], [], []>} : vector<2x500xbf16>, vector<500x10xbf16>, vector<2x10xf32> -> vector<2x10xf32>
    %c0_713 = arith.constant 0 : index
    %c0_714 = arith.constant 0 : index
    %570 = vector.load %arg9[%c0_713, %c0_714] : memref<1x10xf32, #tpu.memory_space<vmem>>, vector<1x10xf32>
    %571 = vector.broadcast %570 : vector<1x10xf32> to vector<2x10xf32>
    %572 = arith.addf %569, %571 : vector<2x10xf32>
    %cst_715 = arith.constant dense<0xFF800000> : vector<2xf32>
    %573 = vector.multi_reduction <maximumf>, %572, %cst_715 [1] : vector<2x10xf32> to vector<2xf32>
    %574 = vector.shape_cast %573 : vector<2xf32> to vector<2x1xf32>
    %575 = vector.broadcast %574 : vector<2x1xf32> to vector<2x10xf32>
    %576 = arith.subf %572, %575 : vector<2x10xf32>
    %577 = math.exp %576 : vector<2x10xf32>
    %cst_716 = arith.constant dense<0.000000e+00> : vector<2xf32>
    %578 = vector.multi_reduction <add>, %577, %cst_716 [1] : vector<2x10xf32> to vector<2xf32>
    %579 = vector.shape_cast %578 : vector<2xf32> to vector<2x1xf32>
    %580 = math.log %579 : vector<2x1xf32>
    %581 = vector.broadcast %580 : vector<2x1xf32> to vector<2x10xf32>
    %582 = arith.subf %576, %581 : vector<2x10xf32>
    %c0_717 = arith.constant 0 : index
    %c0_718 = arith.constant 0 : index
    %583 = vector.load %arg10[%c0_717, %c0_718] : memref<2x10xf32, #tpu.memory_space<vmem>>, vector<2x10xf32>
    tpu.vector_store %arg10[%c0_717, %c0_718], %582 {strides = array<i32>} : memref<2x10xf32, #tpu.memory_space<vmem>>, vector<2x10xf32>,
    return
  }
  func.func @transform_0(%arg0: i32) -> (i32, i32) {
    %c0_i32 = arith.constant 0 : i32
    %c0_i32_0 = arith.constant 0 : i32
    return %arg0, %c0_i32 : i32, i32
  }
  func.func @transform_1(%arg0: i32) -> (i32, i32) {
    %c0_i32 = arith.constant 0 : i32
    %c0_i32_0 = arith.constant 0 : i32
    %c0_i32_1 = arith.constant 0 : i32
    return %c0_i32, %c0_i32_0 : i32, i32
  }
  func.func @transform_2(%arg0: i32) -> (i32, i32) {
    %c0_i32 = arith.constant 0 : i32
    %c0_i32_0 = arith.constant 0 : i32
    %c0_i32_1 = arith.constant 0 : i32
    return %c0_i32, %c0_i32_0 : i32, i32
  }
  func.func @transform_3(%arg0: i32) -> (i32, i32, i32) {
    %c0_i32 = arith.constant 0 : i32
    %c0_i32_0 = arith.constant 0 : i32
    %c0_i32_1 = arith.constant 0 : i32
    %c0_i32_2 = arith.constant 0 : i32
    return %c0_i32, %c0_i32_0, %c0_i32_1 : i32, i32, i32
  }
  func.func @transform_4(%arg0: i32) -> (i32, i32) {
    %c0_i32 = arith.constant 0 : i32
    %c0_i32_0 = arith.constant 0 : i32
    %c0_i32_1 = arith.constant 0 : i32
    return %c0_i32, %c0_i32_0 : i32, i32
  }
  func.func @transform_5(%arg0: i32) -> (i32, i32, i32) {
    %c0_i32 = arith.constant 0 : i32
    %c0_i32_0 = arith.constant 0 : i32
    %c0_i32_1 = arith.constant 0 : i32
    %c0_i32_2 = arith.constant 0 : i32
    return %c0_i32, %c0_i32_0, %c0_i32_1 : i32, i32, i32
  }
  func.func @transform_6(%arg0: i32) -> (i32, i32) {
    %c0_i32 = arith.constant 0 : i32
    %c0_i32_0 = arith.constant 0 : i32
    %c0_i32_1 = arith.constant 0 : i32
    return %c0_i32, %c0_i32_0 : i32, i32
  }
  func.func @transform_7(%arg0: i32) -> (i32, i32) {
    %c0_i32 = arith.constant 0 : i32
    %c0_i32_0 = arith.constant 0 : i32
    %c0_i32_1 = arith.constant 0 : i32
    return %c0_i32, %c0_i32_0 : i32, i32
  }
  func.func @transform_8(%arg0: i32) -> (i32, i32) {
    %c0_i32 = arith.constant 0 : i32
    %c0_i32_0 = arith.constant 0 : i32
    %c0_i32_1 = arith.constant 0 : i32
    return %c0_i32, %c0_i32_0 : i32, i32
  }
  func.func @transform_9(%arg0: i32) -> (i32, i32) {
    %c0_i32 = arith.constant 0 : i32
    %c0_i32_0 = arith.constant 0 : i32
    return %arg0, %c0_i32 : i32, i32
  }
}

</mosaic_0001>

<bundles_post_ra>
// kernel: net_forward.1
= control target key start
LH: loop header
LB: loop body
LE: loop exit
PB: predicated region body
PF: predicated region fallthrough
CT: control target
= control target key end

     0   :  { %vm777_vm0 = vcmask 1043456   ;;  %vm778_vm1 = vcmask 1044480   ;;  %v14412_v2 = vmov 65535   ;;  %vm560_vm2 = vcmask 203776   ;;  %s17542_s0 = inlined_call_operand.vmem [shape: bf16[1152,25], index: 0, kind: input, shape index: {}]   ;;  %s17543_s1 = inlined_call_operand.vmem [shape: bf16[25,20], index: 1, kind: input, shape index: {}]   ;;  %s17544_s2 = inlined_call_operand.vmem [shape: f32[1,20], index: 2, kind: input, shape index: {}]   ;;  %s17545_s3 = inlined_call_operand.vmem [shape: bf16[25,20,50], index: 3, kind: input, shape index: {}]   ;;  %s17546_s4 = inlined_call_operand.vmem [shape: f32[1,50], index: 4, kind: input, shape index: {}]   ;;  %s17547_s5 = inlined_call_operand.vmem [shape: bf16[16,50,500], index: 5, kind: input, shape index: {}]   ;;  %s17548_s6 = inlined_call_operand.vmem [shape: f32[1,500], index: 6, kind: input, shape index: {}]   ;;  %s17549_s7 = inlined_call_operand.vmem [shape: bf16[500,10], index: 7, kind: input, shape index: {}]   ;;  %s17550_s8 = inlined_call_operand.vmem [shape: f32[1,10], index: 8, kind: input, shape index: {}]   ;;  %s17551_s9 = inlined_call_operand.hbm [shape: f32[2,10], index: 9, kind: output, shape index: {}]  }
   0x1   :  { %v13804_v0 = vld [vmem:[%s17543_s1] sm:$0xff]   ;;  %v13805_v1 = vld [vmem:[%s17543_s1 + $0x8] sm:$0x1f]   ;;  %v779_v3 = vsel %vm777_vm0, 4294967295, %v14412_v2  ;;  %v13808_v8 = vld [vmem:[%s17542_s0 + $0x10] sm:$0xff]   ;;  %vm3245_vm3 = vcmask 1041408  }
   0x2   :  { %12739 = vmatprep.subr.bf16.mxu0 %v13804_v0  ;;  %13387 = vmatprep.subr.bf16.mxu1 %v13804_v0  ;;  %v13806_v4 = vld [vmem:[%s17542_s0] sm:$0xff]   ;;  %v780_v5 = vsel %vm778_vm1, %v779_v3, 0  ;;  %v13807_v7 = vld [vmem:[%s17542_s0 + $0x8] sm:$0xff]   ;;  %v13809_v9 = vld [vmem:[%s17542_s0 + $0x18] sm:$0xff]  }
   0x3   :  { %12740 = vmatpush3.bf16.msra.mxu0 %v13804_v0  ;;  %13389 = vmatpush3.bf16.msra.mxu1 %v13804_v0  ;;  %v782_v6 = vand.u32 %v13805_v1, %v780_v5  ;;  %v13810_v10 = vld [vmem:[%s17542_s0 + $0x20] sm:$0xff]   ;;  %v13811_v11 = vld [vmem:[%s17542_s0 + $0x28] sm:$0xff]   ;;  %v13812_v12 = vld [vmem:[%s17542_s0 + $0x30] sm:$0xff]  }
   0x4   :  { %12743 = vmatprep.mubr.msk.bf16.mxu0 %vm560_vm2, %v13806_v4  ;;  %v13813_v13 = vld [vmem:[%s17542_s0 + $0x38] sm:$0xff]   ;;  %v13814_v14 = vld [vmem:[%s17542_s0 + $0x40] sm:$0xff]   ;;  %v13815_v15 = vld [vmem:[%s17542_s0 + $0x48] sm:$0xff]  }
   0x5   :  { %12741 = vmatprep.subr.bf16.mxu0 %v782_v6  ;;  %13388 = vmatprep.subr.bf16.mxu1 %v782_v6  ;;  %v13816_v16 = vld [vmem:[%s17542_s0 + $0x50] sm:$0xff]   ;;  %v13817_v17 = vld [vmem:[%s17542_s0 + $0x58] sm:$0xff]   ;;  %v13818_v18 = vld [vmem:[%s17542_s0 + $0x60] sm:$0xff]  }
   0x6   :  { %v13819_v19 = vld [vmem:[%s17542_s0 + $0x68] sm:$0xff]   ;;  %v13820_v20 = vld [vmem:[%s17542_s0 + $0x70] sm:$0xff]   ;;  %v13821_v21 = vld [vmem:[%s17542_s0 + $0x78] sm:$0xff]  }
   0x7   :  { %12742 = vmatpush3.bf16.msra.mxu0 %v782_v6  ;;  %13390 = vmatpush3.bf16.msra.mxu1 %v782_v6  ;;  %v13822_v22 = vld [vmem:[%s17542_s0 + $0x80] sm:$0xff]   ;;  %v13823_v23 = vld [vmem:[%s17542_s0 + $0x88] sm:$0xff]   ;;  %v13824_v24 = vld [vmem:[%s17542_s0 + $0x90] sm:$0xff]  }
   0x8   :  { %v13825_v25 = vld [vmem:[%s17542_s0 + $0x98] sm:$0xff]   ;;  %v13826_v26 = vld [vmem:[%s17542_s0 + $0xa0] sm:$0xff]   ;;  %v13827_v27 = vld [vmem:[%s17542_s0 + $0xa8] sm:$0xff]  }
   0x9   :  { %v13828_v28 = vld [vmem:[%s17542_s0 + $0xb0] sm:$0xff]   ;;  %v13829_v29 = vld [vmem:[%s17542_s0 + $0xb8] sm:$0xff]   ;;  %v13830_v30 = vld [vmem:[%s17542_s0 + $0xc0] sm:$0xff]  }
   0xa   :  { %12744 = vmatmul.mubr.msk.bf16.vlgmr.msra.gmra.mrb[0].mxu0 %vm560_vm2, %v13807_v7  ;;  %v13831_v31 = vld [vmem:[%s17542_s0 + $0xc8] sm:$0xff]   ;;  %v13832_v32 = vld [vmem:[%s17542_s0 + $0xd0] sm:$0xff]   ;;  %v13833_v33 = vld [vmem:[%s17542_s0 + $0xd8] sm:$0xff]  }
   0xb   :  { %12747 = vmatprep.mubr.msk.bf16.mxu0 %vm560_vm2, %v13808_v8  ;;  %v13834_v34 = vld [vmem:[%s17542_s0 + $0xe0] sm:$0xff]   ;;  %v13835_v35 = vld [vmem:[%s17542_s0 + $0xe8] sm:$0xff]   ;;  %v13836_v36 = vld [vmem:[%s17542_s0 + $0xf0] sm:$0xff]  }
   0xc   :  { %v13837_v37 = vld [vmem:[%s17542_s0 + $0xf8] sm:$0xff]   ;;  %v13838_v38 = vld [vmem:[%s17542_s0 + $0x100] sm:$0xff]   ;;  %v13839_v39 = vld [vmem:[%s17542_s0 + $0x108] sm:$0xff]  }
   0xd   :  { %v13840_v40 = vld [vmem:[%s17542_s0 + $0x110] sm:$0xff]   ;;  %v13841_v41 = vld [vmem:[%s17542_s0 + $0x118] sm:$0xff]   ;;  %v13842_v42 = vld [vmem:[%s17542_s0 + $0x120] sm:$0xff]  }
   0xe   :  { %v13870_v43 = vld [vmem:[%s17542_s0 + $0x230] sm:$0xff]   ;;  %v13871_v44 = vld [vmem:[%s17542_s0 + $0x238] sm:$0xff]   ;;  %v13843_v45 = vld [vmem:[%s17542_s0 + $0x128] sm:$0xff]  }
   0xf   :  { %12883 = vmatprep.mubr.msk.bf16.mxu1 %vm560_vm2, %v13870_v43  ;;  %v13844_v46 = vld [vmem:[%s17542_s0 + $0x130] sm:$0xff]   ;;  %v13845_v47 = vld [vmem:[%s17542_s0 + $0x138] sm:$0xff]   ;;  %v13846_v48 = vld [vmem:[%s17542_s0 + $0x140] sm:$0xff]  }
  0x10   :  { %12884 = vmatmul.mubr.msk.bf16.vlgmr.msra.gmra.mrb[0].mxu1 %vm560_vm2, %v13871_v44  ;;  %v13847_v49 = vld [vmem:[%s17542_s0 + $0x148] sm:$0xff]   ;;  %v13848_v50 = vld [vmem:[%s17542_s0 + $0x150] sm:$0xff]   ;;  %v13849_v53 = vld [vmem:[%s17542_s0 + $0x158] sm:$0xff]  }
  0x11   :  { %v13872_v51 = vld [vmem:[%s17545_s3 + $0xc] sm:$0xff]   ;;  %v13873_v52 = vld [vmem:[%s17545_s3 + $0x14] ss:$0 sps:$4 sm:$0x33]   ;;  %v13850_v54 = vld [vmem:[%s17542_s0 + $0x160] sm:$0xff]  }
  0x12   :  { %12748 = vmatmul.mubr.msk.bf16.gmra.mrb[4].mxu0 %vm560_vm2, %v13809_v9  ;;  %12887 = vmatprep.subr.bf16.mxu1 %v13872_v51  ;;  %v3247_v55 = vsel %vm3245_vm3, %v13873_v52, 0  ;;  %v13851_v56 = vld [vmem:[%s17542_s0 + $0x168] sm:$0xff]   ;;  %v13852_v57 = vld [vmem:[%s17542_s0 + $0x170] sm:$0xff]  }
  0x13   :  { %12751 = vmatprep.mubr.msk.bf16.mxu0 %vm560_vm2, %v13810_v10  ;;  %12888 = vmatpush3.bf16.msra.mxu1 %v13872_v51 }
  0x14   :  { %13775 = vmatprep.subr.msk.bf16.mxu1 %vm3245_vm3, %v13873_v52 }
  0x17   :  { %12890 = vmatpush3.bf16.msra.mxu1 %v3247_v55 }
  0x1a   :  { %12752 = vmatmul.mubr.msk.bf16.gmra.mrb[8].mxu0 %vm560_vm2, %v13811_v11 }
  0x1b   :  { %12755 = vmatprep.mubr.msk.bf16.mxu0 %vm560_vm2, %v13812_v12 }
  0x22   :  { %12756 = vmatmul.mubr.msk.bf16.gmra.mrb[12].mxu0 %vm560_vm2, %v13813_v13 }
  0x23   :  { %12759 = vmatprep.mubr.msk.bf16.mxu0 %vm560_vm2, %v13814_v14 }
  0x2a   :  { %12760 = vmatmul.mubr.msk.bf16.gmra.mrb[16].mxu0 %vm560_vm2, %v13815_v15 }
  0x2b   :  { %12763 = vmatprep.mubr.msk.bf16.mxu0 %vm560_vm2, %v13816_v16 }
  0x32   :  { %12764 = vmatmul.mubr.msk.bf16.gmra.mrb[20].mxu0 %vm560_vm2, %v13817_v17 }
  0x33   :  { %12767 = vmatprep.mubr.msk.bf16.mxu0 %vm560_vm2, %v13818_v18 }
  0x3a   :  { %12768 = vmatmul.mubr.msk.bf16.gmra.mrb[24].mxu0 %vm560_vm2, %v13819_v19 }
  0x3b   :  { %12771 = vmatprep.mubr.msk.bf16.mxu0 %vm560_vm2, %v13820_v20 }
  0x42   :  { %12772 = vmatmul.mubr.msk.bf16.gmra.mrb[28].mxu0 %vm560_vm2, %v13821_v21 }
  0x43   :  { %12775 = vmatprep.mubr.msk.bf16.mxu0 %vm560_vm2, %v13822_v22 }
  0x4a   :  { %12776 = vmatmul.mubr.msk.bf16.gmra.mrb[32].mxu0 %vm560_vm2, %v13823_v23 }
  0x4b   :  { %12779 = vmatprep.mubr.msk.bf16.mxu0 %vm560_vm2, %v13824_v24 }
  0x52   :  { %12780 = vmatmul.mubr.msk.bf16.gmra.mrb[36].mxu0 %vm560_vm2, %v13825_v25 }
  0x53   :  { %12783 = vmatprep.mubr.msk.bf16.mxu0 %vm560_vm2, %v13826_v26 }
  0x5a   :  { %12784 = vmatmul.mubr.msk.bf16.gmra.mrb[40].mxu0 %vm560_vm2, %v13827_v27 }
  0x5b   :  { %12787 = vmatprep.mubr.msk.bf16.mxu0 %vm560_vm2, %v13828_v28 }
  0x62   :  { %12788 = vmatmul.mubr.msk.bf16.gmra.mrb[44].mxu0 %vm560_vm2, %v13829_v29 }
  0x63   :  { %12791 = vmatprep.mubr.msk.bf16.mxu0 %vm560_vm2, %v13830_v30 }
  0x6a   :  { %12792 = vmatmul.mubr.msk.bf16.gmra.mrb[48].mxu0 %vm560_vm2, %v13831_v31 }
  0x6b   :  { %12795 = vmatprep.mubr.msk.bf16.mxu0 %vm560_vm2, %v13832_v32 }
  0x72   :  { %12796 = vmatmul.mubr.msk.bf16.gmra.mrb[52].mxu0 %vm560_vm2, %v13833_v33 }
  0x73   :  { %12799 = vmatprep.mubr.msk.bf16.mxu0 %vm560_vm2, %v13834_v34 }
  0x7a   :  { %12800 = vmatmul.mubr.msk.bf16.gmra.mrb[56].mxu0 %vm560_vm2, %v13835_v35 }
  0x7b   :  { %12803 = vmatprep.mubr.msk.bf16.mxu0 %vm560_vm2, %v13836_v36 }
  0x82   :  { %12804 = vmatmul.mubr.msk.bf16.gmra.mrb[60].mxu0 %vm560_vm2, %v13837_v37 }
  0x83   :  { %12807 = vmatprep.mubr.msk.bf16.mxu0 %vm560_vm2, %v13838_v38 }
  0x8a   :  { %12808 = vmatmul.mubr.msk.bf16.gmra.mrb[64].mxu0 %vm560_vm2, %v13839_v39 }
  0x8b   :  { %12811 = vmatprep.mubr.msk.bf16.mxu0 %vm560_vm2, %v13840_v40 }
  0x92   :  { %12812 = vmatmul.mubr.msk.bf16.gmra.mrb[68].mxu0 %vm560_vm2, %v13841_v41 }
  0x93   :  { %12815 = vmatprep.mubr.msk.bf16.mxu0 %vm560_vm2, %v13842_v42 }
  0x9a   :  { %12816 = vmatmul.mubr.msk.bf16.gmra.mrb[72].mxu0 %vm560_vm2, %v13843_v45 }
  0x9b   :  { %12819 = vmatprep.mubr.msk.bf16.mxu0 %vm560_vm2, %v13844_v46 }
  0xa2   :  { %12820 = vmatmul.mubr.msk.bf16.gmra.mrb[76].mxu0 %vm560_vm2, %v13845_v47 }
  0xa3   :  { %12823 = vmatprep.mubr.msk.bf16.mxu0 %vm560_vm2, %v13846_v48 }
  0xaa   :  { %12824 = vmatmul.mubr.msk.bf16.gmra.mrb[80].mxu0 %vm560_vm2, %v13847_v49 }
  0xab   :  { %12827 = vmatprep.mubr.msk.bf16.mxu0 %vm560_vm2, %v13848_v50 }
  0xb2   :  { %12828 = vmatmul.mubr.msk.bf16.gmra.mrb[84].mxu0 %vm560_vm2, %v13849_v53 }
  0xb3   :  { %12831 = vmatprep.mubr.msk.bf16.mxu0 %vm560_vm2, %v13850_v54 }
  0xb4   :  { %14 = vsyncpa [#allocation9], 0  ;;  %v13853_v58 = vld [vmem:[%s17542_s0 + $0x178] sm:$0xff]   ;;  %v13854_v59 = vld [vmem:[%s17542_s0 + $0x180] sm:$0xff]   ;;  %vm1537_vm4 = vcmask 162816   ;;  %vm2076_vm5 = vcmask 155648  }
  0xb5   :  { %v13855_v60 = vld [vmem:[%s17542_s0 + $0x188] sm:$0xff]   ;;  %v13856_v61 = vld [vmem:[%s17542_s0 + $0x190] sm:$0xff]   ;;  %v13857_v62 = vld [vmem:[%s17542_s0 + $0x198] sm:$0xff]   ;;  %vm7899_vm6 = vcmask 1040384   ;;  %vm7593_vm7 = vcmask 408576   ;;  %vm7676_vm8 = vcmask 401408  }
  0xb6   :  { %v13858_v63 = vld [vmem:[%s17542_s0 + $0x1a0] sm:$0xff]   ;;  %v13859_v0 = vld [vmem:[%s17542_s0 + $0x1a8] sm:$0xff]   ;;  %v13860_v1 = vld [vmem:[%s17542_s0 + $0x1b0] sm:$0xff]   ;;  %vm7823_vm9 = vcmask 1041409   ;;  %vm11222_vm10 = vcmask 949248   ;;  %vm11309_vm11 = vcmask 74752  }
  0xb7   :  { %v14709_v2 = vld [vmem:[%s17544_s2] ss:$0 sm:$0xff]  ;;  %v13861_v6 = vld [vmem:[%s17542_s0 + $0x1b8] sm:$0xff]   ;;  %v13863_v20 = vld [vmem:[%s17542_s0 + $0x1c8] sm:$0xff]  }
  0xb8   :  { %v13862_v9 = vld [vmem:[%s17542_s0 + $0x1c0] sm:$0xff]   ;;  %v13864_v23 = vld [vmem:[%s17542_s0 + $0x1d0] sm:$0xff]   ;;  %v13865_v37 = vld [vmem:[%s17542_s0 + $0x1d8] sm:$0xff]  }
  0xb9   :  { %v13866_v40 = vld [vmem:[%s17542_s0 + $0x1e0] sm:$0xff]  }
  0xba   :  { %12832 = vmatmul.mubr.msk.bf16.gmra.mrb[88].mxu0 %vm560_vm2, %v13851_v56 }
  0xbb   :  { %12835 = vmatprep.mubr.msk.bf16.mxu0 %vm560_vm2, %v13852_v57 }
  0xc2   :  { %12836 = vmatmul.mubr.msk.bf16.gmra.mrb[92].mxu0 %vm560_vm2, %v13853_v58 }
  0xc3   :  { %12839 = vmatprep.mubr.msk.bf16.mxu0 %vm560_vm2, %v13854_v59  ;;  %v13867_v59 = vld [vmem:[%s17542_s0 + $0x1e8] sm:$0xff]  }
  0xca   :  { %12840 = vmatmul.mubr.msk.bf16.gmra.mrb[96].mxu0 %vm560_vm2, %v13855_v60 }
  0xcb   :  { %12843 = vmatprep.mubr.msk.bf16.mxu0 %vm560_vm2, %v13856_v61 }
  0xd2   :  { %12844 = vmatmul.mubr.msk.bf16.gmra.mrb[100].mxu0 %vm560_vm2, %v13857_v62 }
  0xd3   :  { %12847 = vmatprep.mubr.msk.bf16.mxu0 %vm560_vm2, %v13858_v63 }
  0xda   :  { %12848 = vmatmul.mubr.msk.bf16.gmra.mrb[104].mxu0 %vm560_vm2, %v13859_v0 }
  0xdb   :  { %12851 = vmatprep.mubr.msk.bf16.mxu0 %vm560_vm2, %v13860_v1  ;;  %v13868_v1 = vld [vmem:[%s17542_s0 + $0x1f0] sm:$0xff]  }
  0xdd   :  { %v12745_v3 = vpop.f32.mrb[0].mxu0 }
  0xde   :  { %v827_v4 = vadd.f32 %v12745_v3, %v14709_v2  ;;  %v818_v5 = vpop.f32.mrb[1].mxu0 }
  0xdf   :  { %v819_v7 = vadd.f32 %v14709_v2, %v818_v5  ;;  %v12746_v8 = vpop.f32.mrb[2].mxu0 }
  0xe0   :  { %v1395_v10 = vmax.f32 %v827_v4, 0.0  ;;  %v830_v11 = vadd.f32 %v12746_v8, %v14709_v2  ;;  %v821_v12 = vpop.f32.mrb[3].mxu0 }
  0xe1   :  { %v1393_v13 = vmax.f32 %v819_v7, 0.0  ;;  %v822_v14 = vadd.f32 %v14709_v2, %v821_v12 }
  0xe2   :  { %1540 = vst.msk [vmem:[#allocation2 + $0x10] sm:$0xff] %vm1537_vm4, %v1395_v10  ;;  %v1396_v15 = vmax.f32 %v830_v11, 0.0  ;;  %12852 = vmatmul.mubr.msk.bf16.gmra.mrb[108].mxu0 %vm560_vm2, %v13861_v6 }
  0xe3   :  { %1538 = vst.msk [vmem:[#allocation2] sm:$0xff] %vm1537_vm4, %v1393_v13  ;;  %v1394_v16 = vmax.f32 %v822_v14, 0.0  ;;  %12855 = vmatprep.mubr.msk.bf16.mxu0 %vm560_vm2, %v13862_v9 }
  0xe4   :  { %1541 = vst.msk [vmem:[#allocation2 + $0x18] sm:$0xff] %vm1537_vm4, %v1396_v15 }
  0xe5   :  { %1539 = vst.msk [vmem:[#allocation2 + $0x8] sm:$0xff] %vm1537_vm4, %v1394_v16  ;;  %v12749_v17 = vpop.f32.mrb[4].mxu0 }
  0xe6   :  { %v843_v18 = vadd.f32 %v12749_v17, %v14709_v2  ;;  %v834_v19 = vpop.f32.mrb[5].mxu0 }
  0xe7   :  { %v835_v21 = vadd.f32 %v14709_v2, %v834_v19  ;;  %v12750_v22 = vpop.f32.mrb[6].mxu0 }
  0xe8   :  { %v1399_v24 = vmax.f32 %v843_v18, 0.0  ;;  %v846_v25 = vadd.f32 %v12750_v22, %v14709_v2  ;;  %v837_v26 = vpop.f32.mrb[7].mxu0 }
  0xe9   :  { %v1397_v27 = vmax.f32 %v835_v21, 0.0  ;;  %v838_v28 = vadd.f32 %v14709_v2, %v837_v26  ;;  %v1684_v51 = vld [vmem:[#allocation2 + $0x10] sm:$0xff] }
  0xea   :  { %v1682_v29 = vld [vmem:[#allocation2] sm:$0xff]  ;;  %1544 = vst.msk [vmem:[#allocation2 + $0x30] sm:$0xff] %vm1537_vm4, %v1399_v24  ;;  %v1400_v30 = vmax.f32 %v846_v25, 0.0  ;;  %12856 = vmatmul.mubr.msk.bf16.gmra.mrb[112].mxu0 %vm560_vm2, %v13863_v20 }
  0xeb   :  { %v1689_v31 = vld [vmem:[#allocation2 + $0x18] sm:$0xff]  ;;  %1542 = vst.msk [vmem:[#allocation2 + $0x20] sm:$0xff] %vm1537_vm4, %v1397_v27  ;;  %v1398_v32 = vmax.f32 %v838_v28, 0.0  ;;  %12859 = vmatprep.mubr.msk.bf16.mxu0 %vm560_vm2, %v13864_v23 }
  0xec   :  { %v1695_v33 = vmax.f32 %v1682_v29, %v1689_v31  ;;  %1545 = vst.msk [vmem:[#allocation2 + $0x38] sm:$0xff] %vm1537_vm4, %v1400_v30  ;;  %v1683_v46 = vld [vmem:[#allocation2 + $0x8] sm:$0xff] }
  0xed   :  { %1543 = vst.msk [vmem:[#allocation2 + $0x28] sm:$0xff] %vm1537_vm4, %v1398_v32  ;;  %v12753_v34 = vpop.f32.mrb[8].mxu0 }
  0xee   :  { %1701 = vst.msk [vmem:[#allocation3] sm:$0xff] %vm1537_vm4, %v1695_v33  ;;  %v859_v35 = vadd.f32 %v12753_v34, %v14709_v2  ;;  %v850_v36 = vpop.f32.mrb[9].mxu0  ;;  %v13869_v34 = vld [vmem:[%s17542_s0 + $0x1f8] sm:$0xff]  }
  0xef   :  { %v851_v38 = vadd.f32 %v14709_v2, %v850_v36  ;;  %v12754_v39 = vpop.f32.mrb[10].mxu0 }
  0xf0   :  { %v1403_v41 = vmax.f32 %v859_v35, 0.0  ;;  %v862_v42 = vadd.f32 %v12754_v39, %v14709_v2  ;;  %v853_v43 = vpop.f32.mrb[11].mxu0 }
  0xf1   :  { %v1401_v44 = vmax.f32 %v851_v38, 0.0  ;;  %v854_v45 = vadd.f32 %v14709_v2, %v853_v43  ;;  %v1708_v20 = vld [vmem:[#allocation2 + $0x30] sm:$0xff] }
  0xf2   :  { %v1690_v47 = vld [vmem:[#allocation2 + $0x20] sm:$0xff]  ;;  %1548 = vst.msk [vmem:[#allocation2 + $0x50] sm:$0xff] %vm1537_vm4, %v1403_v41  ;;  %v1404_v48 = vmax.f32 %v862_v42, 0.0  ;;  %12860 = vmatmul.mubr.msk.bf16.gmra.mrb[116].mxu0 %vm560_vm2, %v13865_v37 }
  0xf3   :  { %v1696_v49 = vmax.f32 %v1683_v46, %v1690_v47  ;;  %1546 = vst.msk [vmem:[#allocation2 + $0x40] sm:$0xff] %vm1537_vm4, %v1401_v44  ;;  %v1402_v50 = vmax.f32 %v854_v45, 0.0  ;;  %12863 = vmatprep.mubr.msk.bf16.mxu0 %vm560_vm2, %v13866_v40  ;;  %v1709_v12 = vld [vmem:[#allocation2 + $0x38] sm:$0xff] }
  0xf4   :  { %v1691_v52 = vld [vmem:[#allocation2 + $0x28] sm:$0xff]  ;;  %1549 = vst.msk [vmem:[#allocation2 + $0x58] sm:$0xff] %vm1537_vm4, %v1404_v48 }
  0xf5   :  { %1702 = vst.msk [vmem:[#allocation3 + $0x8] sm:$0xff] %vm1537_vm4, %v1696_v49  ;;  %v1697_v53 = vmax.f32 %v1684_v51, %v1691_v52  ;;  %1547 = vst.msk [vmem:[#allocation2 + $0x48] sm:$0xff] %vm1537_vm4, %v1402_v50  ;;  %v12757_v54 = vpop.f32.mrb[12].mxu0  ;;  %v2101_v55 = vld [vmem:[#allocation3 + $0x2] sm:$0x1] }
  0xf6   :  { %v2125_v56 = vld [vmem:[#allocation3 + $0x3] sm:$0x1]  ;;  %v875_v57 = vadd.f32 %v12757_v54, %v14709_v2  ;;  %v866_v58 = vpop.f32.mrb[13].mxu0  ;;  %v2197_v61 = vld [vmem:[#allocation3 + $0x4] sm:$0x1] }
  0xf7   :  { %v2149_v60 = vmax.f32 %v2101_v55, %v2125_v56  ;;  %v2221_v62 = vld [vmem:[#allocation3 + $0x5] sm:$0x1]  ;;  %1703 = vst.msk [vmem:[#allocation3 + $0x10] sm:$0xff] %vm1537_vm4, %v1697_v53  ;;  %v867_v63 = vadd.f32 %v14709_v2, %v866_v58  ;;  %v12758_v0 = vpop.f32.mrb[14].mxu0  ;;  %v2293_v4 = vld [vmem:[#allocation3 + $0x6] sm:$0x1] }
  0xf8   :  { %v2245_v3 = vmax.f32 %v2197_v61, %v2221_v62  ;;  %v2317_v5 = vld [vmem:[#allocation3 + $0x7] sm:$0x1]  ;;  %v1407_v6 = vmax.f32 %v875_v57, 0.0  ;;  %v878_v7 = vadd.f32 %v12758_v0, %v14709_v2  ;;  %v869_v8 = vpop.f32.mrb[15].mxu0  ;;  %v2004_v10 = vld [vmem:[#allocation3] sm:$0x1] }
  0xf9   :  { %2173 = vst.msk [vmem:[#allocation4 + $0x1] sm:$0x1] %vm2076_vm5, %v2149_v60  ;;  %v2341_v9 = vmax.f32 %v2293_v4, %v2317_v5  ;;  %v2028_v11 = vld [vmem:[#allocation3 + $0x1] sm:$0x1]  ;;  %v1716_v13 = vld [vmem:[#allocation2 + $0x50] sm:$0xff]  ;;  %v1405_v14 = vmax.f32 %v867_v63, 0.0  ;;  %v870_v15 = vadd.f32 %v14709_v2, %v869_v8 }
  0xfa   :  { %2269 = vst.msk [vmem:[#allocation4 + $0x2] sm:$0x1] %vm2076_vm5, %v2245_v3  ;;  %v2052_v16 = vmax.f32 %v2004_v10, %v2028_v11  ;;  %v1722_v17 = vmax.f32 %v1709_v12, %v1716_v13  ;;  %v1710_v18 = vld [vmem:[#allocation2 + $0x40] sm:$0xff]  ;;  %v1408_v19 = vmax.f32 %v878_v7, 0.0  ;;  %12864 = vmatmul.mubr.msk.bf16.gmra.mrb[120].mxu0 %vm560_vm2, %v13867_v59 }
  0xfb   :  { %1552 = vst.msk [vmem:[#allocation2 + $0x70] sm:$0xff] %vm1537_vm4, %v1407_v6  ;;  %v1717_v21 = vld [vmem:[#allocation2 + $0x58] sm:$0xff]  ;;  %1550 = vst.msk [vmem:[#allocation2 + $0x60] sm:$0xff] %vm1537_vm4, %v1405_v14  ;;  %v1406_v22 = vmax.f32 %v870_v15, 0.0  ;;  %12867 = vmatprep.mubr.msk.bf16.mxu0 %vm560_vm2, %v13868_v1  ;;  %v13875_v15 = vld [vmem:[%s17542_s0 + $0x208] sm:$0xff]  }
  0xfc   :  { %2365 = vst.msk [vmem:[#allocation4 + $0x3] sm:$0x1] %vm2076_vm5, %v2341_v9  ;;  %2077 = vst.msk [vmem:[#allocation4] sm:$0x1] %vm2076_vm5, %v2052_v16  ;;  %v1723_v23 = vmax.f32 %v1710_v18, %v1717_v21  ;;  %v1715_v24 = vld [vmem:[#allocation2 + $0x48] sm:$0xff]  ;;  %v13874_v9 = vld [vmem:[%s17542_s0 + $0x200] sm:$0xff]  }
  0xfd   :  { %1729 = vst.msk [vmem:[#allocation3 + $0x20] sm:$0xff] %vm1537_vm4, %v1722_v17  ;;  %1553 = vst.msk [vmem:[#allocation2 + $0x78] sm:$0xff] %vm1537_vm4, %v1408_v19  ;;  %v2389_v25 = vld [vmem:[#allocation3 + $0x8] sm:$0x1]  ;;  %v2413_v26 = vld [vmem:[#allocation3 + $0x9] sm:$0x1]  ;;  %v1721_v27 = vmax.f32 %v1708_v20, %v1715_v24 }
  0xfe   :  { %1551 = vst.msk [vmem:[#allocation2 + $0x68] sm:$0xff] %vm1537_vm4, %v1406_v22  ;;  %v12761_v28 = vpop.f32.mrb[16].mxu0  ;;  %v2437_v29 = vmax.f32 %v2389_v25, %v2413_v26  ;;  %v2485_v30 = vld [vmem:[#allocation3 + $0xa] sm:$0x1]  ;;  %v2509_v31 = vld [vmem:[#allocation3 + $0xb] sm:$0x1] }
  0xff   :  { %1730 = vst.msk [vmem:[#allocation3 + $0x28] sm:$0xff] %vm1537_vm4, %v1723_v23  ;;  %v891_v32 = vadd.f32 %v12761_v28, %v14709_v2  ;;  %v882_v33 = vpop.f32.mrb[17].mxu0  ;;  %v2533_v35 = vmax.f32 %v2485_v30, %v2509_v31  ;;  %v2581_v36 = vld [vmem:[#allocation3 + $0xc] sm:$0x1]  ;;  %v2605_v37 = vld [vmem:[#allocation3 + $0xd] sm:$0x1] }
 0x100   :  { %1728 = vst.msk [vmem:[#allocation3 + $0x18] sm:$0xff] %vm1537_vm4, %v1721_v27  ;;  %v883_v38 = vadd.f32 %v14709_v2, %v882_v33  ;;  %v12762_v39 = vpop.f32.mrb[18].mxu0  ;;  %v2629_v40 = vmax.f32 %v2581_v36, %v2605_v37  ;;  %v2677_v41 = vld [vmem:[#allocation3 + $0xe] sm:$0x1]  ;;  %v2701_v42 = vld [vmem:[#allocation3 + $0xf] sm:$0x1] }
 0x101   :  { %2461 = vst.msk [vmem:[#allocation4 + $0x4] sm:$0x1] %vm2076_vm5, %v2437_v29  ;;  %v1411_v43 = vmax.f32 %v891_v32, 0.0  ;;  %v894_v44 = vadd.f32 %v12762_v39, %v14709_v2  ;;  %v885_v45 = vpop.f32.mrb[19].mxu0  ;;  %2557 = vst.msk [vmem:[#allocation4 + $0x5] sm:$0x1] %vm2076_vm5, %v2533_v35  ;;  %v2725_v46 = vmax.f32 %v2677_v41, %v2701_v42 }
 0x102   :  { %v2773_v47 = vld [vmem:[#allocation3 + $0x10] sm:$0x1]  ;;  %v2797_v48 = vld [vmem:[#allocation3 + $0x11] sm:$0x1]  ;;  %v1409_v49 = vmax.f32 %v883_v38, 0.0  ;;  %v886_v50 = vadd.f32 %v14709_v2, %v885_v45  ;;  %v1735_v54 = vld [vmem:[#allocation2 + $0x60] sm:$0xff]  ;;  %12868 = vmatmul.mubr.msk.bf16.gmra.mrb[124].mxu0 %vm560_vm2, %v13869_v34 }
 0x103   :  { %2653 = vst.msk [vmem:[#allocation4 + $0x6] sm:$0x1] %vm2076_vm5, %v2629_v40  ;;  %v2821_v51 = vmax.f32 %v2773_v47, %v2797_v48  ;;  %v2869_v52 = vld [vmem:[#allocation3 + $0x12] sm:$0x1]  ;;  %v2893_v53 = vld [vmem:[#allocation3 + $0x13] sm:$0x1]  ;;  %12871 = vmatprep.mubr.msk.bf16.mxu0 %vm560_vm2, %v13874_v9 }
 0x104   :  { %1556 = vst.msk [vmem:[#allocation2 + $0x90] sm:$0xff] %vm1537_vm4, %v1411_v43  ;;  %v1412_v55 = vmax.f32 %v894_v44, 0.0  ;;  %v2917_v56 = vmax.f32 %v2869_v52, %v2893_v53  ;;  %v2965_v57 = vld [vmem:[#allocation3 + $0x14] sm:$0x1]  ;;  %v2989_v58 = vld [vmem:[#allocation3 + $0x15] sm:$0x1] }
 0x105   :  { %2749 = vst.msk [vmem:[#allocation4 + $0x7] sm:$0x1] %vm2076_vm5, %v2725_v46  ;;  %v1742_v59 = vld [vmem:[#allocation2 + $0x78] sm:$0xff]  ;;  %v1410_v60 = vmax.f32 %v886_v50, 0.0  ;;  %v2390_v61 = vld [vmem:[#allocation3 + $0x20] sm:$0x1]  ;;  %v3013_v63 = vmax.f32 %v2965_v57, %v2989_v58 }
 0x106   :  { %1554 = vst.msk [vmem:[#allocation2 + $0x80] sm:$0xff] %vm1537_vm4, %v1409_v49  ;;  %v2414_v62 = vld [vmem:[#allocation3 + $0x21] sm:$0x1]  ;;  %v1748_v0 = vmax.f32 %v1735_v54, %v1742_v59  ;;  %1557 = vst.msk [vmem:[#allocation2 + $0x98] sm:$0xff] %vm1537_vm4, %v1412_v55  ;;  %v2486_v3 = vld [vmem:[#allocation3 + $0x22] sm:$0x1] }
 0x107   :  { %2845 = vst.msk [vmem:[#allocation4 + $0x8] sm:$0x1] %vm2076_vm5, %v2821_v51  ;;  %v2438_v1 = vmax.f32 %v2390_v61, %v2414_v62  ;;  %v2510_v4 = vld [vmem:[#allocation3 + $0x23] sm:$0x1]  ;;  %2941 = vst.msk [vmem:[#allocation4 + $0x9] sm:$0x1] %vm2076_vm5, %v2917_v56 }
 0x108   :  { %1555 = vst.msk [vmem:[#allocation2 + $0x88] sm:$0xff] %vm1537_vm4, %v1410_v60  ;;  %v12765_v5 = vpop.f32.mrb[20].mxu0  ;;  %v2534_v6 = vmax.f32 %v2486_v3, %v2510_v4  ;;  %v2582_v7 = vld [vmem:[#allocation3 + $0x24] sm:$0x1]  ;;  %v2606_v8 = vld [vmem:[#allocation3 + $0x25] sm:$0x1] }
 0x109   :  { %3037 = vst.msk [vmem:[#allocation4 + $0xa] sm:$0x1] %vm2076_vm5, %v3013_v63  ;;  %v907_v10 = vadd.f32 %v12765_v5, %v14709_v2  ;;  %v898_v11 = vpop.f32.mrb[21].mxu0  ;;  %v2102_v12 = vld [vmem:[#allocation3 + $0x1a] sm:$0x1]  ;;  %v2630_v14 = vmax.f32 %v2582_v7, %v2606_v8  ;;  %v1736_v27 = vld [vmem:[#allocation2 + $0x68] sm:$0xff] }
 0x10a   :  { %1755 = vst.msk [vmem:[#allocation3 + $0x30] sm:$0xff] %vm1537_vm4, %v1748_v0  ;;  %v2126_v13 = vld [vmem:[#allocation3 + $0x1b] sm:$0x1]  ;;  %v899_v16 = vadd.f32 %v14709_v2, %v898_v11  ;;  %v12766_v17 = vpop.f32.mrb[22].mxu0  ;;  %v2198_v19 = vld [vmem:[#allocation3 + $0x1c] sm:$0x1]  ;;  %12872 = vmatmul.mubr.msk.bf16.gmra.mrb[128].mxu0 %vm560_vm2, %v13875_v15 }
 0x10b   :  { %2462 = vst.msk [vmem:[#allocation4 + $0x14] sm:$0x1] %vm2076_vm5, %v2438_v1  ;;  %v2150_v18 = vmax.f32 %v2102_v12, %v2126_v13  ;;  %v2222_v20 = vld [vmem:[#allocation3 + $0x1d] sm:$0x1]  ;;  %2558 = vst.msk [vmem:[#allocation4 + $0x15] sm:$0x1] %vm2076_vm5, %v2534_v6  ;;  %v910_v22 = vadd.f32 %v12766_v17, %v14709_v2 }
 0x10c   :  { %v1415_v21 = vmax.f32 %v907_v10, 0.0  ;;  %v901_v23 = vpop.f32.mrb[23].mxu0  ;;  %v2246_v24 = vmax.f32 %v2198_v19, %v2222_v20  ;;  %v2294_v25 = vld [vmem:[#allocation3 + $0x1e] sm:$0x1]  ;;  %v2318_v26 = vld [vmem:[#allocation3 + $0x1f] sm:$0x1] }
 0x10d   :  { %2654 = vst.msk [vmem:[#allocation4 + $0x16] sm:$0x1] %vm2076_vm5, %v2630_v14  ;;  %v1413_v28 = vmax.f32 %v899_v16, 0.0  ;;  %v902_v29 = vadd.f32 %v14709_v2, %v901_v23  ;;  %2174 = vst.msk [vmem:[#allocation4 + $0x11] sm:$0x1] %vm2076_vm5, %v2150_v18  ;;  %v2342_v30 = vmax.f32 %v2294_v25, %v2318_v26  ;;  %v1743_v33 = vld [vmem:[#allocation2 + $0x80] sm:$0xff] }
 0x10e   :  { %v2678_v31 = vld [vmem:[#allocation3 + $0x26] sm:$0x1]  ;;  %v2702_v32 = vld [vmem:[#allocation3 + $0x27] sm:$0x1]  ;;  %1560 = vst.msk [vmem:[#allocation2 + $0xb0] sm:$0xff] %vm1537_vm4, %v1415_v21  ;;  %v1416_v34 = vmax.f32 %v910_v22, 0.0  ;;  %v1749_v38 = vmax.f32 %v1736_v27, %v1743_v33 }
 0x10f   :  { %2270 = vst.msk [vmem:[#allocation4 + $0x12] sm:$0x1] %vm2076_vm5, %v2246_v24  ;;  %v2726_v35 = vmax.f32 %v2678_v31, %v2702_v32  ;;  %v2774_v36 = vld [vmem:[#allocation3 + $0x28] sm:$0x1]  ;;  %v2798_v37 = vld [vmem:[#allocation3 + $0x29] sm:$0x1] }
 0x110   :  { %v1737_v39 = vld [vmem:[#allocation2 + $0x70] sm:$0xff]  ;;  %1558 = vst.msk [vmem:[#allocation2 + $0xa0] sm:$0xff] %vm1537_vm4, %v1413_v28  ;;  %v1414_v40 = vmax.f32 %v902_v29, 0.0  ;;  %v2822_v41 = vmax.f32 %v2774_v36, %v2798_v37  ;;  %v2005_v42 = vld [vmem:[#allocation3 + $0x18] sm:$0x1]  ;;  %v1744_v43 = vld [vmem:[#allocation2 + $0x88] sm:$0xff] }
 0x111   :  { %2366 = vst.msk [vmem:[#allocation4 + $0x13] sm:$0x1] %vm2076_vm5, %v2342_v30  ;;  %2750 = vst.msk [vmem:[#allocation4 + $0x17] sm:$0x1] %vm2076_vm5, %v2726_v35  ;;  %v13876_v44 = vld [vmem:[%s17542_s0 + $0x210] sm:$0xff]   ;;  %v1750_v46 = vmax.f32 %v1737_v39, %v1744_v43  ;;  %v12769_v47 = vpop.f32.mrb[24].mxu0 }
 0x112   :  { %1561 = vst.msk [vmem:[#allocation2 + $0xb8] sm:$0xff] %vm1537_vm4, %v1416_v34  ;;  %v2029_v45 = vld [vmem:[#allocation3 + $0x19] sm:$0x1]  ;;  %1756 = vst.msk [vmem:[#allocation3 + $0x38] sm:$0xff] %vm1537_vm4, %v1749_v38  ;;  %v2103_v48 = vld [vmem:[#allocation3 + $0x32] sm:$0x1]  ;;  %v923_v51 = vadd.f32 %v12769_v47, %v14709_v2  ;;  %12875 = vmatprep.mubr.msk.bf16.mxu0 %vm560_vm2, %v13876_v44 }
 0x113   :  { %1559 = vst.msk [vmem:[#allocation2 + $0xa8] sm:$0xff] %vm1537_vm4, %v1414_v40  ;;  %v2127_v49 = vld [vmem:[#allocation3 + $0x33] sm:$0x1]  ;;  %v2053_v50 = vmax.f32 %v2005_v42, %v2029_v45  ;;  %v914_v52 = vpop.f32.mrb[25].mxu0  ;;  %v2199_v54 = vld [vmem:[#allocation3 + $0x34] sm:$0x1] }
 0x114   :  { %2846 = vst.msk [vmem:[#allocation4 + $0x18] sm:$0x1] %vm2076_vm5, %v2822_v41  ;;  %v2151_v53 = vmax.f32 %v2103_v48, %v2127_v49  ;;  %v2223_v55 = vld [vmem:[#allocation3 + $0x35] sm:$0x1]  ;;  %v13877_v56 = vld [vmem:[%s17542_s0 + $0x218] sm:$0xff]   ;;  %v915_v58 = vadd.f32 %v14709_v2, %v914_v52  ;;  %v12770_v59 = vpop.f32.mrb[26].mxu0 }
 0x115   :  { %v1763_v57 = vld [vmem:[#allocation2 + $0x98] sm:$0xff]  ;;  %1757 = vst.msk [vmem:[#allocation3 + $0x40] sm:$0xff] %vm1537_vm4, %v1750_v46  ;;  %v2247_v60 = vmax.f32 %v2199_v54, %v2223_v55  ;;  %v2295_v61 = vld [vmem:[#allocation3 + $0x36] sm:$0x1]  ;;  %v2319_v62 = vld [vmem:[#allocation3 + $0x37] sm:$0x1]  ;;  %v926_v0 = vadd.f32 %v12770_v59, %v14709_v2  ;;  %12876 = vmatmul.mubr.msk.bf16.gmra.mrb[132].mxu0 %vm560_vm2, %v13877_v56 }
 0x116   :  { %2078 = vst.msk [vmem:[#allocation4 + $0x10] sm:$0x1] %vm2076_vm5, %v2053_v50  ;;  %v1419_v63 = vmax.f32 %v923_v51, 0.0  ;;  %v917_v1 = vpop.f32.mrb[27].mxu0  ;;  %2175 = vst.msk [vmem:[#allocation4 + $0x21] sm:$0x1] %vm2076_vm5, %v2151_v53  ;;  %v2343_v3 = vmax.f32 %v2295_v61, %v2319_v62 }
 0x117   :  { %v2006_v4 = vld [vmem:[#allocation3 + $0x30] sm:$0x1]  ;;  %v2030_v5 = vld [vmem:[#allocation3 + $0x31] sm:$0x1]  ;;  %v1417_v7 = vmax.f32 %v915_v58, 0.0  ;;  %v918_v8 = vadd.f32 %v14709_v2, %v917_v1  ;;  %v1764_v13 = vld [vmem:[#allocation2 + $0xa0] sm:$0xff] }
 0x118   :  { %v1770_v6 = vld [vmem:[#allocation2 + $0xb0] sm:$0xff]  ;;  %2271 = vst.msk [vmem:[#allocation4 + $0x22] sm:$0x1] %vm2076_vm5, %v2247_v60  ;;  %v2054_v9 = vmax.f32 %v2006_v4, %v2030_v5  ;;  %v2870_v10 = vld [vmem:[#allocation3 + $0x2a] sm:$0x1]  ;;  %v1420_v14 = vmax.f32 %v926_v0, 0.0 }
 0x119   :  { %v2894_v11 = vld [vmem:[#allocation3 + $0x2b] sm:$0x1]  ;;  %v1776_v12 = vmax.f32 %v1763_v57, %v1770_v6  ;;  %1564 = vst.msk [vmem:[#allocation2 + $0xd0] sm:$0xff] %vm1537_vm4, %v1419_v63  ;;  %v2966_v16 = vld [vmem:[#allocation3 + $0x2c] sm:$0x1]  ;;  %v1762_v18 = vld [vmem:[#allocation2 + $0x90] sm:$0xff] }
 0x11a   :  { %2367 = vst.msk [vmem:[#allocation4 + $0x23] sm:$0x1] %vm2076_vm5, %v2343_v3  ;;  %v2918_v15 = vmax.f32 %v2870_v10, %v2894_v11  ;;  %v2990_v17 = vld [vmem:[#allocation3 + $0x2d] sm:$0x1]  ;;  %v1771_v19 = vld [vmem:[#allocation2 + $0xb8] sm:$0xff]  ;;  %v1418_v20 = vmax.f32 %v918_v8, 0.0 }
 0x11b   :  { %1562 = vst.msk [vmem:[#allocation2 + $0xc0] sm:$0xff] %vm1537_vm4, %v1417_v7  ;;  %v3184_v21 = vld [vmem:[#allocation4 + $0x1] sm:$0xff]  ;;  %v3014_v22 = vmax.f32 %v2966_v16, %v2990_v17  ;;  %1783 = vst.msk [vmem:[#allocation3 + $0x50] sm:$0xff] %vm1537_vm4, %v1776_v12  ;;  %v1777_v23 = vmax.f32 %v1764_v13, %v1771_v19  ;;  %v3185_v25 = vld [vmem:[#allocation4 + $0x11] sm:$0xff]  ;;  %v12773_v29 = vpop.f32.mrb[28].mxu0 }
 0x11c   :  { %2079 = vst.msk [vmem:[#allocation4 + $0x20] sm:$0x1] %vm2076_vm5, %v2054_v9  ;;  %v1769_v24 = vld [vmem:[#allocation2 + $0xa8] sm:$0xff]  ;;  %v2391_v26 = vld [vmem:[#allocation3 + $0x38] sm:$0x1]  ;;  %v3200_v28 = vpack.c.bf16 %v3185_v25, %v3184_v21  ;;  %v13878_v32 = vld [vmem:[%s17542_s0 + $0x220] sm:$0xff]   ;;  %v939_v33 = vadd.f32 %v12773_v29, %v14709_v2 }
 0x11d   :  { %1565 = vst.msk [vmem:[#allocation2 + $0xd8] sm:$0xff] %vm1537_vm4, %v1420_v14  ;;  %v1775_v27 = vmax.f32 %v1762_v18, %v1769_v24  ;;  %1563 = vst.msk [vmem:[#allocation2 + $0xc8] sm:$0xff] %vm1537_vm4, %v1418_v20  ;;  %v2415_v30 = vld [vmem:[#allocation3 + $0x39] sm:$0x1]  ;;  %v2487_v31 = vld [vmem:[#allocation3 + $0x3a] sm:$0x1]  ;;  %12879 = vmatprep.mubr.msk.bf16.mxu0 %vm560_vm2, %v13878_v32 }
 0x11e   :  { %2942 = vst.msk [vmem:[#allocation4 + $0x19] sm:$0x1] %vm2076_vm5, %v2918_v15  ;;  %3038 = vst.msk [vmem:[#allocation4 + $0x1a] sm:$0x1] %vm2076_vm5, %v3014_v22  ;;  %v930_v34 = vpop.f32.mrb[29].mxu0  ;;  %v2439_v35 = vmax.f32 %v2391_v26, %v2415_v30  ;;  %v13879_v38 = vld [vmem:[%s17542_s0 + $0x228] sm:$0xff]   ;;  %12891 = vmatprep.mubr.msk.bf16.mxu1 %vm1537_vm4, %v3200_v28 }
 0x11f   :  { %1784 = vst.msk [vmem:[#allocation3 + $0x58] sm:$0xff] %vm1537_vm4, %v1777_v23  ;;  %v2511_v36 = vld [vmem:[#allocation3 + $0x3b] sm:$0x1]  ;;  %v2583_v37 = vld [vmem:[#allocation3 + $0x3c] sm:$0x1]  ;;  %1782 = vst.msk [vmem:[#allocation3 + $0x48] sm:$0xff] %vm1537_vm4, %v1775_v27  ;;  %v931_v39 = vadd.f32 %v14709_v2, %v930_v34  ;;  %12880 = vmatmul.mubr.msk.bf16.gmra.mrb[136].mxu0 %vm560_vm2, %v13879_v38 }
 0x120   :  { %v12774_v40 = vpop.f32.mrb[30].mxu0  ;;  %v2535_v41 = vmax.f32 %v2487_v31, %v2511_v36  ;;  %v2607_v42 = vld [vmem:[#allocation3 + $0x3d] sm:$0x1]  ;;  %v2679_v43 = vld [vmem:[#allocation3 + $0x3e] sm:$0x1]  ;;  %v1423_v44 = vmax.f32 %v939_v33, 0.0 }
 0x121   :  { %v942_v45 = vadd.f32 %v12774_v40, %v14709_v2  ;;  %v933_v46 = vpop.f32.mrb[31].mxu0  ;;  %2463 = vst.msk [vmem:[#allocation4 + $0x24] sm:$0x1] %vm2076_vm5, %v2439_v35  ;;  %v2631_v47 = vmax.f32 %v2583_v37, %v2607_v42  ;;  %v2703_v48 = vld [vmem:[#allocation3 + $0x3f] sm:$0x1]  ;;  %v1421_v50 = vmax.f32 %v931_v39, 0.0 }
 0x122   :  { %v2775_v49 = vld [vmem:[#allocation3 + $0x40] sm:$0x1]  ;;  %v934_v51 = vadd.f32 %v14709_v2, %v933_v46  ;;  %2559 = vst.msk [vmem:[#allocation4 + $0x25] sm:$0x1] %vm2076_vm5, %v2535_v41  ;;  %v2727_v52 = vmax.f32 %v2679_v43, %v2703_v48  ;;  %v2799_v53 = vld [vmem:[#allocation3 + $0x41] sm:$0x1] }
 0x123   :  { %v2871_v54 = vld [vmem:[#allocation3 + $0x42] sm:$0x1]  ;;  %1568 = vst.msk [vmem:[#allocation2 + $0xf0] sm:$0xff] %vm1537_vm4, %v1423_v44  ;;  %v1424_v56 = vmax.f32 %v942_v45, 0.0  ;;  %v2823_v57 = vmax.f32 %v2775_v49, %v2799_v53  ;;  %v2895_v58 = vld [vmem:[#allocation3 + $0x43] sm:$0x1] }
 0x124   :  { %v1789_v55 = vld [vmem:[#allocation2 + $0xc0] sm:$0xff]  ;;  %2655 = vst.msk [vmem:[#allocation4 + $0x26] sm:$0x1] %vm2076_vm5, %v2631_v47  ;;  %v1796_v59 = vld [vmem:[#allocation2 + $0xd8] sm:$0xff]  ;;  %v1422_v60 = vmax.f32 %v934_v51, 0.0  ;;  %v2919_v63 = vmax.f32 %v2871_v54, %v2895_v58  ;;  %v12777_v5 = vpop.f32.mrb[32].mxu0 }
 0x125   :  { %1566 = vst.msk [vmem:[#allocation2 + $0xe0] sm:$0xff] %vm1537_vm4, %v1421_v50  ;;  %v2392_v61 = vld [vmem:[#allocation3 + $0x50] sm:$0x1]  ;;  %v2416_v62 = vld [vmem:[#allocation3 + $0x51] sm:$0x1]  ;;  %v1802_v0 = vmax.f32 %v1789_v55, %v1796_v59  ;;  %1569 = vst.msk [vmem:[#allocation2 + $0xf8] sm:$0xff] %vm1537_vm4, %v1424_v56  ;;  %v955_v9 = vadd.f32 %v12777_v5, %v14709_v2 }
 0x126   :  { %2751 = vst.msk [vmem:[#allocation4 + $0x27] sm:$0x1] %vm2076_vm5, %v2727_v52  ;;  %v2440_v1 = vmax.f32 %v2392_v61, %v2416_v62  ;;  %v2488_v3 = vld [vmem:[#allocation3 + $0x52] sm:$0x1]  ;;  %v2512_v4 = vld [vmem:[#allocation3 + $0x53] sm:$0x1] }
 0x127   :  { %2847 = vst.msk [vmem:[#allocation4 + $0x28] sm:$0x1] %vm2076_vm5, %v2823_v57  ;;  %v2536_v6 = vmax.f32 %v2488_v3, %v2512_v4  ;;  %v2584_v7 = vld [vmem:[#allocation3 + $0x54] sm:$0x1]  ;;  %v2608_v8 = vld [vmem:[#allocation3 + $0x55] sm:$0x1] }
 0x128   :  { %1567 = vst.msk [vmem:[#allocation2 + $0xe8] sm:$0xff] %vm1537_vm4, %v1422_v60  ;;  %1809 = vst.msk [vmem:[#allocation3 + $0x60] sm:$0xff] %vm1537_vm4, %v1802_v0  ;;  %v946_v10 = vpop.f32.mrb[33].mxu0  ;;  %v2104_v11 = vld [vmem:[#allocation3 + $0x4a] sm:$0x1]  ;;  %v2632_v13 = vmax.f32 %v2584_v7, %v2608_v8  ;;  %v1427_v19 = vmax.f32 %v955_v9, 0.0 }
 0x129   :  { %2943 = vst.msk [vmem:[#allocation4 + $0x29] sm:$0x1] %vm2076_vm5, %v2919_v63  ;;  %v2128_v12 = vld [vmem:[#allocation3 + $0x4b] sm:$0x1]  ;;  %2464 = vst.msk [vmem:[#allocation4 + $0x34] sm:$0x1] %vm2076_vm5, %v2440_v1  ;;  %v947_v14 = vadd.f32 %v14709_v2, %v946_v10 }
 0x12a   :  { %v12778_v15 = vpop.f32.mrb[34].mxu0  ;;  %v2152_v16 = vmax.f32 %v2104_v11, %v2128_v12  ;;  %v2200_v17 = vld [vmem:[#allocation3 + $0x4c] sm:$0x1]  ;;  %v2224_v18 = vld [vmem:[#allocation3 + $0x4d] sm:$0x1]  ;;  %1572 = vst.msk [vmem:[#allocation2 + $0x110] sm:$0xff] %vm1537_vm4, %v1427_v19 }
 0x12b   :  { %2560 = vst.msk [vmem:[#allocation4 + $0x35] sm:$0x1] %vm2076_vm5, %v2536_v6  ;;  %v958_v20 = vadd.f32 %v12778_v15, %v14709_v2  ;;  %v949_v21 = vpop.f32.mrb[35].mxu0  ;;  %v2248_v22 = vmax.f32 %v2200_v17, %v2224_v18  ;;  %v2296_v23 = vld [vmem:[#allocation3 + $0x4e] sm:$0x1]  ;;  %v1425_v26 = vmax.f32 %v947_v14, 0.0 }
 0x12c   :  { %v2320_v24 = vld [vmem:[#allocation3 + $0x4f] sm:$0x1]  ;;  %2656 = vst.msk [vmem:[#allocation4 + $0x36] sm:$0x1] %vm2076_vm5, %v2632_v13  ;;  %v950_v27 = vadd.f32 %v14709_v2, %v949_v21  ;;  %2176 = vst.msk [vmem:[#allocation4 + $0x31] sm:$0x1] %vm2076_vm5, %v2152_v16 }
 0x12d   :  { %v1790_v25 = vld [vmem:[#allocation2 + $0xc8] sm:$0xff]  ;;  %v2344_v28 = vmax.f32 %v2296_v23, %v2320_v24  ;;  %v2680_v29 = vld [vmem:[#allocation3 + $0x56] sm:$0x1]  ;;  %v2704_v30 = vld [vmem:[#allocation3 + $0x57] sm:$0x1]  ;;  %v1428_v32 = vmax.f32 %v958_v20, 0.0 }
 0x12e   :  { %v1797_v31 = vld [vmem:[#allocation2 + $0xe0] sm:$0xff]  ;;  %2272 = vst.msk [vmem:[#allocation4 + $0x32] sm:$0x1] %vm2076_vm5, %v2248_v22  ;;  %v2728_v33 = vmax.f32 %v2680_v29, %v2704_v30  ;;  %v2776_v34 = vld [vmem:[#allocation3 + $0x58] sm:$0x1]  ;;  %v1791_v36 = vld [vmem:[#allocation2 + $0xd0] sm:$0xff] }
 0x12f   :  { %v2800_v35 = vld [vmem:[#allocation3 + $0x59] sm:$0x1]  ;;  %v1803_v37 = vmax.f32 %v1790_v25, %v1797_v31  ;;  %1570 = vst.msk [vmem:[#allocation2 + $0x100] sm:$0xff] %vm1537_vm4, %v1425_v26  ;;  %v1426_v38 = vmax.f32 %v950_v27, 0.0  ;;  %v14894_v40 = vld [vmem:[#allocation4 + $0x10] sm:$0xff]  ;;  %v1798_v42 = vld [vmem:[#allocation2 + $0xe8] sm:$0xff] }
 0x130   :  { %2368 = vst.msk [vmem:[#allocation4 + $0x33] sm:$0x1] %vm2076_vm5, %v2344_v28  ;;  %v2824_v39 = vmax.f32 %v2776_v34, %v2800_v35  ;;  %v2007_v41 = vld [vmem:[#allocation3 + $0x48] sm:$0x1]  ;;  %2752 = vst.msk [vmem:[#allocation4 + $0x37] sm:$0x1] %vm2076_vm5, %v2728_v33  ;;  %v1804_v45 = vmax.f32 %v1791_v36, %v1798_v42 }
 0x131   :  { %1573 = vst.msk [vmem:[#allocation2 + $0x118] sm:$0xff] %vm1537_vm4, %v1428_v32  ;;  %v2031_v43 = vld [vmem:[#allocation3 + $0x49] sm:$0x1]  ;;  %v14898_v44 = vld [vmem:[#allocation4 + $0x20] sm:$0xff]  ;;  %1810 = vst.msk [vmem:[#allocation3 + $0x68] sm:$0xff] %vm1537_vm4, %v1803_v37  ;;  %v12781_v46 = vpop.f32.mrb[36].mxu0 }
 0x132   :  { %1571 = vst.msk [vmem:[#allocation2 + $0x108] sm:$0xff] %vm1537_vm4, %v1426_v38  ;;  %v2105_v47 = vld [vmem:[#allocation3 + $0x62] sm:$0x1]  ;;  %v2129_v48 = vld [vmem:[#allocation3 + $0x63] sm:$0x1]  ;;  %v2055_v49 = vmax.f32 %v2007_v41, %v2031_v43  ;;  %v971_v51 = vadd.f32 %v12781_v46, %v14709_v2  ;;  %v962_v52 = vpop.f32.mrb[37].mxu0 }
 0x133   :  { %2848 = vst.msk [vmem:[#allocation4 + $0x38] sm:$0x1] %vm2076_vm5, %v2824_v39  ;;  %v2153_v53 = vmax.f32 %v2105_v47, %v2129_v48  ;;  %v2201_v54 = vld [vmem:[#allocation3 + $0x64] sm:$0x1]  ;;  %v2225_v55 = vld [vmem:[#allocation3 + $0x65] sm:$0x1]  ;;  %v963_v58 = vadd.f32 %v14709_v2, %v962_v52 }
 0x134   :  { %v2967_v56 = vld [vmem:[#allocation3 + $0x44] sm:$0x1]  ;;  %v1817_v57 = vld [vmem:[#allocation2 + $0xf8] sm:$0xff]  ;;  %1811 = vst.msk [vmem:[#allocation3 + $0x70] sm:$0xff] %vm1537_vm4, %v1804_v45  ;;  %v12782_v59 = vpop.f32.mrb[38].mxu0  ;;  %v2249_v60 = vmax.f32 %v2201_v54, %v2225_v55  ;;  %v1431_v63 = vmax.f32 %v971_v51, 0.0 }
 0x135   :  { %v2297_v61 = vld [vmem:[#allocation3 + $0x66] sm:$0x1]  ;;  %v2321_v62 = vld [vmem:[#allocation3 + $0x67] sm:$0x1]  ;;  %2080 = vst.msk [vmem:[#allocation4 + $0x30] sm:$0x1] %vm2076_vm5, %v2055_v49  ;;  %v974_v0 = vadd.f32 %v12782_v59, %v14709_v2 }
 0x136   :  { %v965_v1 = vpop.f32.mrb[39].mxu0  ;;  %2177 = vst.msk [vmem:[#allocation4 + $0x41] sm:$0x1] %vm2076_vm5, %v2153_v53  ;;  %v2345_v3 = vmax.f32 %v2297_v61, %v2321_v62  ;;  %v2008_v4 = vld [vmem:[#allocation3 + $0x60] sm:$0x1]  ;;  %v1824_v6 = vld [vmem:[#allocation2 + $0x110] sm:$0xff] }
 0x137   :  { %v2032_v5 = vld [vmem:[#allocation3 + $0x61] sm:$0x1]  ;;  %v1429_v7 = vmax.f32 %v963_v58, 0.0  ;;  %v966_v8 = vadd.f32 %v14709_v2, %v965_v1  ;;  %2273 = vst.msk [vmem:[#allocation4 + $0x42] sm:$0x1] %vm2076_vm5, %v2249_v60  ;;  %v1816_v12 = vld [vmem:[#allocation2 + $0xf0] sm:$0xff]  ;;  %v1830_v13 = vmax.f32 %v1817_v57, %v1824_v6 }
 0x138   :  { %v2056_v9 = vmax.f32 %v2008_v4, %v2032_v5  ;;  %v2872_v10 = vld [vmem:[#allocation3 + $0x5a] sm:$0x1]  ;;  %v2896_v11 = vld [vmem:[#allocation3 + $0x5b] sm:$0x1]  ;;  %v1818_v14 = vld [vmem:[#allocation2 + $0x100] sm:$0xff]  ;;  %1576 = vst.msk [vmem:[#allocation2 + $0x130] sm:$0xff] %vm1537_vm4, %v1431_v63 }
 0x139   :  { %v1432_v15 = vmax.f32 %v974_v0, 0.0  ;;  %v3186_v16 = vld [vmem:[#allocation4 + $0x21] sm:$0xff]  ;;  %2369 = vst.msk [vmem:[#allocation4 + $0x43] sm:$0x1] %vm2076_vm5, %v2345_v3  ;;  %v2920_v17 = vmax.f32 %v2872_v10, %v2896_v11  ;;  %v2968_v18 = vld [vmem:[#allocation3 + $0x5c] sm:$0x1] }
 0x13a   :  { %v2991_v19 = vld [vmem:[#allocation3 + $0x45] sm:$0x1]  ;;  %v1825_v20 = vld [vmem:[#allocation2 + $0x118] sm:$0xff]  ;;  %1574 = vst.msk [vmem:[#allocation2 + $0x120] sm:$0xff] %vm1537_vm4, %v1429_v7  ;;  %v1430_v21 = vmax.f32 %v966_v8, 0.0  ;;  %1837 = vst.msk [vmem:[#allocation3 + $0x80] sm:$0xff] %vm1537_vm4, %v1830_v13 }
 0x13b   :  { %2081 = vst.msk [vmem:[#allocation4 + $0x40] sm:$0x1] %vm2076_vm5, %v2056_v9  ;;  %v2992_v22 = vld [vmem:[#allocation3 + $0x5d] sm:$0x1]  ;;  %v3015_v23 = vmax.f32 %v2967_v56, %v2991_v19  ;;  %v14917_v24 = vld [vmem:[#allocation4 + $0x21] sm:$0xff]  ;;  %v1831_v25 = vmax.f32 %v1818_v14, %v1825_v20  ;;  %v3187_v27 = vld [vmem:[#allocation4 + $0x31] sm:$0xff] }
 0x13c   :  { %17624 = vst [vmem:[#allocation11_spill] sm:$0xff] %v14917_v24  ;;  %v1823_v26 = vld [vmem:[#allocation2 + $0x108] sm:$0xff]  ;;  %1577 = vst.msk [vmem:[#allocation2 + $0x138] sm:$0xff] %vm1537_vm4, %v1432_v15  ;;  %v3016_v29 = vmax.f32 %v2968_v18, %v2992_v22  ;;  %v3201_v31 = vpack.c.bf16 %v3187_v27, %v3186_v16  ;;  %v12785_v32 = vpop.f32.mrb[40].mxu0  ;;  %v14924_v35 = vld [vmem:[#allocation4 + $0x31] sm:$0xff] }
 0x13d   :  { %v2393_v28 = vld [vmem:[#allocation3 + $0x68] sm:$0x1]  ;;  %2944 = vst.msk [vmem:[#allocation4 + $0x39] sm:$0x1] %vm2076_vm5, %v2920_v17  ;;  %v1829_v30 = vmax.f32 %v1816_v12, %v1823_v26  ;;  %v2417_v33 = vld [vmem:[#allocation3 + $0x69] sm:$0x1]  ;;  %v987_v36 = vadd.f32 %v12785_v32, %v14709_v2 }
 0x13e   :  { %1575 = vst.msk [vmem:[#allocation2 + $0x128] sm:$0xff] %vm1537_vm4, %v1430_v21  ;;  %v2489_v34 = vld [vmem:[#allocation3 + $0x6a] sm:$0x1]  ;;  %17625 = vst [vmem:[#allocation12_spill] sm:$0xff] %v14924_v35  ;;  %v978_v37 = vpop.f32.mrb[41].mxu0  ;;  %v2441_v38 = vmax.f32 %v2393_v28, %v2417_v33  ;;  %12892 = vmatmul.mubr.msk.bf16.vlgmr.msra.gmra.mrb[4].mxu1 %vm1537_vm4, %v3201_v31  ;;  %v14946_v14 = vld [vmem:[#allocation4 + $0x13] sm:$0xff] }
 0x13f   :  { %3039 = vst.msk [vmem:[#allocation4 + $0x2a] sm:$0x1] %vm2076_vm5, %v3015_v23  ;;  %v2513_v39 = vld [vmem:[#allocation3 + $0x6b] sm:$0x1]  ;;  %v2585_v41 = vld [vmem:[#allocation3 + $0x6c] sm:$0x1]  ;;  %v979_v43 = vadd.f32 %v14709_v2, %v978_v37 }
 0x140   :  { %1838 = vst.msk [vmem:[#allocation3 + $0x88] sm:$0xff] %vm1537_vm4, %v1831_v25  ;;  %1836 = vst.msk [vmem:[#allocation3 + $0x78] sm:$0xff] %vm1537_vm4, %v1829_v30  ;;  %v12786_v45 = vpop.f32.mrb[42].mxu0  ;;  %v2537_v46 = vmax.f32 %v2489_v34, %v2513_v39  ;;  %v2609_v47 = vld [vmem:[#allocation3 + $0x6d] sm:$0x1]  ;;  %v1435_v49 = vmax.f32 %v987_v36, 0.0 }
 0x141   :  { %3040 = vst.msk [vmem:[#allocation4 + $0x3a] sm:$0x1] %vm2076_vm5, %v3016_v29  ;;  %v2681_v48 = vld [vmem:[#allocation3 + $0x6e] sm:$0x1]  ;;  %v990_v51 = vadd.f32 %v12786_v45, %v14709_v2  ;;  %v981_v52 = vpop.f32.mrb[43].mxu0  ;;  %v2633_v53 = vmax.f32 %v2585_v41, %v2609_v47  ;;  %v1433_v56 = vmax.f32 %v979_v43, 0.0 }
 0x142   :  { %2465 = vst.msk [vmem:[#allocation4 + $0x44] sm:$0x1] %vm2076_vm5, %v2441_v38  ;;  %v2705_v54 = vld [vmem:[#allocation3 + $0x6f] sm:$0x1]  ;;  %v2777_v55 = vld [vmem:[#allocation3 + $0x70] sm:$0x1]  ;;  %v982_v57 = vadd.f32 %v14709_v2, %v981_v52 }
 0x143   :  { %2561 = vst.msk [vmem:[#allocation4 + $0x45] sm:$0x1] %vm2076_vm5, %v2537_v46  ;;  %v2729_v58 = vmax.f32 %v2681_v48, %v2705_v54  ;;  %v2801_v59 = vld [vmem:[#allocation3 + $0x71] sm:$0x1]  ;;  %v2873_v60 = vld [vmem:[#allocation3 + $0x72] sm:$0x1] }
 0x144   :  { %v1843_v61 = vld [vmem:[#allocation2 + $0x120] sm:$0xff]  ;;  %1580 = vst.msk [vmem:[#allocation2 + $0x150] sm:$0xff] %vm1537_vm4, %v1435_v49  ;;  %v1436_v62 = vmax.f32 %v990_v51, 0.0  ;;  %v2825_v63 = vmax.f32 %v2777_v55, %v2801_v59  ;;  %v2897_v0 = vld [vmem:[#allocation3 + $0x73] sm:$0x1]  ;;  %v1850_v1 = vld [vmem:[#allocation2 + $0x138] sm:$0xff] }
 0x145   :  { %2657 = vst.msk [vmem:[#allocation4 + $0x46] sm:$0x1] %vm2076_vm5, %v2633_v53  ;;  %v1434_v3 = vmax.f32 %v982_v57, 0.0  ;;  %v2394_v4 = vld [vmem:[#allocation3 + $0x80] sm:$0x1]  ;;  %v2921_v2 = vmax.f32 %v2873_v60, %v2897_v0  ;;  %v1856_v6 = vmax.f32 %v1843_v61, %v1850_v1  ;;  %v12789_v10 = vpop.f32.mrb[44].mxu0 }
 0x146   :  { %1578 = vst.msk [vmem:[#allocation2 + $0x140] sm:$0xff] %vm1537_vm4, %v1433_v56  ;;  %v2418_v5 = vld [vmem:[#allocation3 + $0x81] sm:$0x1]  ;;  %1581 = vst.msk [vmem:[#allocation2 + $0x158] sm:$0xff] %vm1537_vm4, %v1436_v62  ;;  %v2490_v8 = vld [vmem:[#allocation3 + $0x82] sm:$0x1] }
 0x147   :  { %2753 = vst.msk [vmem:[#allocation4 + $0x47] sm:$0x1] %vm2076_vm5, %v2729_v58  ;;  %v2442_v7 = vmax.f32 %v2394_v4, %v2418_v5  ;;  %v2514_v9 = vld [vmem:[#allocation3 + $0x83] sm:$0x1]  ;;  %2849 = vst.msk [vmem:[#allocation4 + $0x48] sm:$0x1] %vm2076_vm5, %v2825_v63 }
 0x148   :  { %1579 = vst.msk [vmem:[#allocation2 + $0x148] sm:$0xff] %vm1537_vm4, %v1434_v3  ;;  %v2538_v11 = vmax.f32 %v2490_v8, %v2514_v9  ;;  %v2586_v12 = vld [vmem:[#allocation3 + $0x84] sm:$0x1]  ;;  %v2610_v13 = vld [vmem:[#allocation3 + $0x85] sm:$0x1]  ;;  %1863 = vst.msk [vmem:[#allocation3 + $0x90] sm:$0xff] %vm1537_vm4, %v1856_v6 }
 0x149   :  { %2945 = vst.msk [vmem:[#allocation4 + $0x49] sm:$0x1] %vm2076_vm5, %v2921_v2  ;;  %v14952_v15 = vld [vmem:[%s17544_s2] ss:$0 sm:$0xff]  ;;  %v994_v17 = vpop.f32.mrb[45].mxu0  ;;  %v2634_v20 = vmax.f32 %v2586_v12, %v2610_v13  ;;  %v14956_v21 = vld [vmem:[#allocation4 + $0x23] sm:$0xff] }
 0x14a   :  { %v1003_v16 = vadd.f32 %v14952_v15, %v12789_v10  ;;  %v2106_v18 = vld [vmem:[#allocation3 + $0x7a] sm:$0x1]  ;;  %v2130_v19 = vld [vmem:[#allocation3 + $0x7b] sm:$0x1]  ;;  %2466 = vst.msk [vmem:[#allocation4 + $0x54] sm:$0x1] %vm2076_vm5, %v2442_v7  ;;  %v995_v22 = vadd.f32 %v14952_v15, %v994_v17 }
 0x14b   :  { %v12790_v23 = vpop.f32.mrb[46].mxu0  ;;  %v2154_v25 = vmax.f32 %v2106_v18, %v2130_v19  ;;  %v2202_v26 = vld [vmem:[#allocation3 + $0x7c] sm:$0x1]  ;;  %v2226_v27 = vld [vmem:[#allocation3 + $0x7d] sm:$0x1]  ;;  %v1844_v36 = vld [vmem:[#allocation2 + $0x128] sm:$0xff] }
 0x14c   :  { %2562 = vst.msk [vmem:[#allocation4 + $0x55] sm:$0x1] %vm2076_vm5, %v2538_v11  ;;  %v1439_v29 = vmax.f32 %v1003_v16, 0.0  ;;  %v1006_v30 = vadd.f32 %v14952_v15, %v12790_v23  ;;  %v997_v31 = vpop.f32.mrb[47].mxu0  ;;  %v2250_v32 = vmax.f32 %v2202_v26, %v2226_v27  ;;  %v2298_v33 = vld [vmem:[#allocation3 + $0x7e] sm:$0x1] }
 0x14d   :  { %v2322_v34 = vld [vmem:[#allocation3 + $0x7f] sm:$0x1]  ;;  %2658 = vst.msk [vmem:[#allocation4 + $0x56] sm:$0x1] %vm2076_vm5, %v2634_v20  ;;  %v1437_v37 = vmax.f32 %v995_v22, 0.0  ;;  %v998_v38 = vadd.f32 %v14952_v15, %v997_v31  ;;  %v1851_v45 = vld [vmem:[#allocation2 + $0x140] sm:$0xff] }
 0x14e   :  { %2178 = vst.msk [vmem:[#allocation4 + $0x51] sm:$0x1] %vm2076_vm5, %v2154_v25  ;;  %v2346_v39 = vmax.f32 %v2298_v33, %v2322_v34  ;;  %v2682_v41 = vld [vmem:[#allocation3 + $0x86] sm:$0x1]  ;;  %v2706_v43 = vld [vmem:[#allocation3 + $0x87] sm:$0x1]  ;;  %v1857_v52 = vmax.f32 %v1844_v36, %v1851_v45 }
 0x14f   :  { %1584 = vst.msk [vmem:[#allocation2 + $0x170] sm:$0xff] %vm1537_vm4, %v1439_v29  ;;  %v1440_v46 = vmax.f32 %v1006_v30, 0.0  ;;  %v2730_v47 = vmax.f32 %v2682_v41, %v2706_v43  ;;  %v2778_v48 = vld [vmem:[#allocation3 + $0x88] sm:$0x1]  ;;  %v2802_v49 = vld [vmem:[#allocation3 + $0x89] sm:$0x1] }
 0x150   :  { %2274 = vst.msk [vmem:[#allocation4 + $0x52] sm:$0x1] %vm2076_vm5, %v2250_v32  ;;  %v1845_v51 = vld [vmem:[#allocation2 + $0x130] sm:$0xff]  ;;  %v1438_v53 = vmax.f32 %v998_v38, 0.0  ;;  %2370 = vst.msk [vmem:[#allocation4 + $0x53] sm:$0x1] %vm2076_vm5, %v2346_v39  ;;  %v2826_v54 = vmax.f32 %v2778_v48, %v2802_v49 }
 0x151   :  { %1582 = vst.msk [vmem:[#allocation2 + $0x160] sm:$0xff] %vm1537_vm4, %v1437_v37  ;;  %v14970_v55 = vld [vmem:[#allocation4 + $0x30] sm:$0xff]  ;;  %v2009_v56 = vld [vmem:[#allocation3 + $0x78] sm:$0x1]  ;;  %v1852_v57 = vld [vmem:[#allocation2 + $0x148] sm:$0xff]  ;;  %v12793_v61 = vpop.f32.mrb[48].mxu0 }
 0x152   :  { %1585 = vst.msk [vmem:[#allocation2 + $0x178] sm:$0xff] %vm1537_vm4, %v1440_v46  ;;  %v2033_v58 = vld [vmem:[#allocation3 + $0x79] sm:$0x1]  ;;  %v14974_v59 = vld [vmem:[#allocation4 + $0x40] sm:$0xff]  ;;  %1864 = vst.msk [vmem:[#allocation3 + $0x98] sm:$0xff] %vm1537_vm4, %v1857_v52  ;;  %v1858_v60 = vmax.f32 %v1845_v51, %v1852_v57  ;;  %v1019_v3 = vadd.f32 %v14952_v15, %v12793_v61  ;;  %v1010_v4 = vpop.f32.mrb[49].mxu0 }
 0x153   :  { %2754 = vst.msk [vmem:[#allocation4 + $0x57] sm:$0x1] %vm2076_vm5, %v2730_v47  ;;  %2850 = vst.msk [vmem:[#allocation4 + $0x58] sm:$0x1] %vm2076_vm5, %v2826_v54  ;;  %v2107_v62 = vld [vmem:[#allocation3 + $0x92] sm:$0x1]  ;;  %v2057_v0 = vmax.f32 %v2009_v56, %v2033_v58  ;;  %v1011_v10 = vadd.f32 %v14952_v15, %v1010_v4 }
 0x154   :  { %1583 = vst.msk [vmem:[#allocation2 + $0x168] sm:$0xff] %vm1537_vm4, %v1438_v53  ;;  %v2131_v63 = vld [vmem:[#allocation3 + $0x93] sm:$0x1]  ;;  %v2203_v2 = vld [vmem:[#allocation3 + $0x94] sm:$0x1]  ;;  %v14982_v8 = vld [vmem:[#allocation4 + $0x22] sm:$0xff] }
 0x155   :  { %v2155_v5 = vmax.f32 %v2107_v62, %v2131_v63  ;;  %v2227_v6 = vld [vmem:[#allocation3 + $0x95] sm:$0x1]  ;;  %v2969_v7 = vld [vmem:[#allocation3 + $0x74] sm:$0x1]  ;;  %17626 = vst [vmem:[#allocation13_spill] sm:$0xff] %v14982_v8  ;;  %v1871_v9 = vld [vmem:[#allocation2 + $0x158] sm:$0xff] }
 0x156   :  { %1865 = vst.msk [vmem:[#allocation3 + $0xa0] sm:$0xff] %vm1537_vm4, %v1858_v60  ;;  %v12794_v11 = vpop.f32.mrb[50].mxu0  ;;  %v2251_v12 = vmax.f32 %v2203_v2, %v2227_v6  ;;  %v2299_v13 = vld [vmem:[#allocation3 + $0x96] sm:$0x1]  ;;  %v2323_v16 = vld [vmem:[#allocation3 + $0x97] sm:$0x1] }
 0x157   :  { %2082 = vst.msk [vmem:[#allocation4 + $0x50] sm:$0x1] %vm2076_vm5, %v2057_v0  ;;  %v3061_v17 = vld [vmem:[#allocation3 + $0x16] sm:$0x1]  ;;  %v1443_v19 = vmax.f32 %v1019_v3, 0.0  ;;  %v1022_v20 = vadd.f32 %v14952_v15, %v12794_v11  ;;  %v1013_v22 = vpop.f32.mrb[51].mxu0  ;;  %v2347_v23 = vmax.f32 %v2299_v13, %v2323_v16 }
 0x158   :  { %v14987_v18 = vld [vmem:[#allocation4 + $0x32] sm:$0xff]  ;;  %2179 = vst.msk [vmem:[#allocation4 + $0x61] sm:$0x1] %vm2076_vm5, %v2155_v5  ;;  %v2010_v25 = vld [vmem:[#allocation3 + $0x90] sm:$0x1]  ;;  %v1441_v30 = vmax.f32 %v1011_v10, 0.0  ;;  %v1014_v31 = vadd.f32 %v14952_v15, %v1013_v22 }
 0x159   :  { %17627 = vst [vmem:[#allocation14_spill] sm:$0xff] %v14987_v18  ;;  %v2034_v26 = vld [vmem:[#allocation3 + $0x91] sm:$0x1]  ;;  %2275 = vst.msk [vmem:[#allocation4 + $0x62] sm:$0x1] %vm2076_vm5, %v2251_v12  ;;  %v1872_v38 = vld [vmem:[#allocation2 + $0x160] sm:$0xff] }
 0x15a   :  { %v1878_v29 = vld [vmem:[#allocation2 + $0x170] sm:$0xff]  ;;  %v2058_v32 = vmax.f32 %v2010_v25, %v2034_v26  ;;  %v2874_v33 = vld [vmem:[#allocation3 + $0x8a] sm:$0x1]  ;;  %v2898_v34 = vld [vmem:[#allocation3 + $0x8b] sm:$0x1]  ;;  %1588 = vst.msk [vmem:[#allocation2 + $0x190] sm:$0xff] %vm1537_vm4, %v1443_v19 }
 0x15b   :  { %v1870_v36 = vld [vmem:[#allocation2 + $0x150] sm:$0xff]  ;;  %v1884_v37 = vmax.f32 %v1871_v9, %v1878_v29  ;;  %v1444_v39 = vmax.f32 %v1022_v20, 0.0  ;;  %v3188_v41 = vld [vmem:[#allocation4 + $0x41] sm:$0xff]  ;;  %2371 = vst.msk [vmem:[#allocation4 + $0x63] sm:$0x1] %vm2076_vm5, %v2347_v23  ;;  %v2922_v43 = vmax.f32 %v2874_v33, %v2898_v34  ;;  %v1879_v47 = vld [vmem:[#allocation2 + $0x178] sm:$0xff] }
 0x15c   :  { %v2970_v45 = vld [vmem:[#allocation3 + $0x8c] sm:$0x1]  ;;  %v2993_v46 = vld [vmem:[#allocation3 + $0x75] sm:$0x1]  ;;  %1586 = vst.msk [vmem:[#allocation2 + $0x180] sm:$0xff] %vm1537_vm4, %v1441_v30  ;;  %v1442_v48 = vmax.f32 %v1014_v31, 0.0  ;;  %v1885_v54 = vmax.f32 %v1872_v38, %v1879_v47 }
 0x15d   :  { %2083 = vst.msk [vmem:[#allocation4 + $0x60] sm:$0x1] %vm2076_vm5, %v2058_v32  ;;  %v2994_v49 = vld [vmem:[#allocation3 + $0x8d] sm:$0x1]  ;;  %v3017_v51 = vmax.f32 %v2969_v7, %v2993_v46  ;;  %v3085_v52 = vld [vmem:[#allocation3 + $0x17] sm:$0x1] }
 0x15e   :  { %v14999_v53 = vld [vmem:[#allocation4 + $0x41] sm:$0xff]  ;;  %1891 = vst.msk [vmem:[#allocation3 + $0xb0] sm:$0xff] %vm1537_vm4, %v1884_v37  ;;  %1589 = vst.msk [vmem:[#allocation2 + $0x198] sm:$0xff] %vm1537_vm4, %v1444_v39  ;;  %v3189_v57 = vld [vmem:[#allocation4 + $0x51] sm:$0xff]  ;;  %v3018_v60 = vmax.f32 %v2970_v45, %v2994_v49  ;;  %v3109_v61 = vmax.f32 %v3061_v17, %v3085_v52  ;;  %v12797_v0 = vpop.f32.mrb[52].mxu0 }
 0x15f   :  { %17628 = vst [vmem:[#allocation15_spill] sm:$0xff] %v14999_v53  ;;  %v1877_v56 = vld [vmem:[#allocation2 + $0x168] sm:$0xff]  ;;  %v2395_v58 = vld [vmem:[#allocation3 + $0x98] sm:$0x1]  ;;  %2946 = vst.msk [vmem:[#allocation4 + $0x59] sm:$0x1] %vm2076_vm5, %v2922_v43  ;;  %v3202_v63 = vpack.c.bf16 %v3189_v57, %v3188_v41  ;;  %v1035_v2 = vadd.f32 %v14952_v15, %v12797_v0 }
 0x160   :  { %v1883_v62 = vmax.f32 %v1870_v36, %v1877_v56  ;;  %1587 = vst.msk [vmem:[#allocation2 + $0x188] sm:$0xff] %vm1537_vm4, %v1442_v48  ;;  %v2419_v3 = vld [vmem:[#allocation3 + $0x99] sm:$0x1]  ;;  %v2491_v4 = vld [vmem:[#allocation3 + $0x9a] sm:$0x1]  ;;  %v15006_v5 = vld [vmem:[#allocation4 + $0x51] sm:$0xff] }
 0x161   :  { %3041 = vst.msk [vmem:[#allocation4 + $0x4a] sm:$0x1] %vm2076_vm5, %v3017_v51  ;;  %17629 = vst [vmem:[#allocation16_spill] sm:$0xff] %v15006_v5  ;;  %v1026_v6 = vpop.f32.mrb[53].mxu0  ;;  %v2443_v7 = vmax.f32 %v2395_v58, %v2419_v3  ;;  %v2515_v9 = vld [vmem:[#allocation3 + $0x9b] sm:$0x1]  ;;  %12895 = vmatprep.mubr.msk.bf16.mxu1 %vm1537_vm4, %v3202_v63 }
 0x162   :  { %1892 = vst.msk [vmem:[#allocation3 + $0xb8] sm:$0xff] %vm1537_vm4, %v1885_v54  ;;  %v2587_v10 = vld [vmem:[#allocation3 + $0x9c] sm:$0x1]  ;;  %1890 = vst.msk [vmem:[#allocation3 + $0xa8] sm:$0xff] %vm1537_vm4, %v1883_v62  ;;  %v1027_v12 = vadd.f32 %v14952_v15, %v1026_v6  ;;  %v12798_v13 = vpop.f32.mrb[54].mxu0  ;;  %v2539_v16 = vmax.f32 %v2491_v4, %v2515_v9  ;;  %v1447_v20 = vmax.f32 %v1035_v2, 0.0 }
 0x163   :  { %3042 = vst.msk [vmem:[#allocation4 + $0x5a] sm:$0x1] %vm2076_vm5, %v3018_v60  ;;  %3133 = vst.msk [vmem:[#allocation4 + $0xb] sm:$0x1] %vm2076_vm5, %v3109_v61  ;;  %v2611_v17 = vld [vmem:[#allocation3 + $0x9d] sm:$0x1]  ;;  %v1038_v22 = vadd.f32 %v14952_v15, %v12798_v13 }
 0x164   :  { %v2683_v19 = vld [vmem:[#allocation3 + $0x9e] sm:$0x1]  ;;  %v1029_v23 = vpop.f32.mrb[55].mxu0  ;;  %2467 = vst.msk [vmem:[#allocation4 + $0x64] sm:$0x1] %vm2076_vm5, %v2443_v7  ;;  %v2635_v25 = vmax.f32 %v2587_v10, %v2611_v17  ;;  %v1445_v30 = vmax.f32 %v1027_v12, 0.0 }
 0x165   :  { %v2707_v26 = vld [vmem:[#allocation3 + $0x9f] sm:$0x1]  ;;  %v2779_v29 = vld [vmem:[#allocation3 + $0xa0] sm:$0x1]  ;;  %v1030_v31 = vadd.f32 %v14952_v15, %v1029_v23  ;;  %2563 = vst.msk [vmem:[#allocation4 + $0x65] sm:$0x1] %vm2076_vm5, %v2539_v16 }
 0x166   :  { %v2731_v32 = vmax.f32 %v2683_v19, %v2707_v26  ;;  %v2803_v33 = vld [vmem:[#allocation3 + $0xa1] sm:$0x1]  ;;  %v2875_v34 = vld [vmem:[#allocation3 + $0xa2] sm:$0x1]  ;;  %1592 = vst.msk [vmem:[#allocation2 + $0x1b0] sm:$0xff] %vm1537_vm4, %v1447_v20  ;;  %v1448_v37 = vmax.f32 %v1038_v22, 0.0 }
 0x167   :  { %v1897_v36 = vld [vmem:[#allocation2 + $0x180] sm:$0xff]  ;;  %2659 = vst.msk [vmem:[#allocation4 + $0x66] sm:$0x1] %vm2076_vm5, %v2635_v25  ;;  %v2827_v38 = vmax.f32 %v2779_v29, %v2803_v33  ;;  %v1904_v41 = vld [vmem:[#allocation2 + $0x198] sm:$0xff]  ;;  %v1446_v43 = vmax.f32 %v1030_v31, 0.0  ;;  %v12801_v54 = vpop.f32.mrb[56].mxu0 }
 0x168   :  { %v2899_v39 = vld [vmem:[#allocation3 + $0xa3] sm:$0x1]  ;;  %1590 = vst.msk [vmem:[#allocation2 + $0x1a0] sm:$0xff] %vm1537_vm4, %v1445_v30  ;;  %v2396_v45 = vld [vmem:[#allocation3 + $0xb0] sm:$0x1]  ;;  %v1910_v48 = vmax.f32 %v1897_v36, %v1904_v41  ;;  %1593 = vst.msk [vmem:[#allocation2 + $0x1b8] sm:$0xff] %vm1537_vm4, %v1448_v37  ;;  %v1051_v61 = vadd.f32 %v14952_v15, %v12801_v54 }
 0x169   :  { %v2420_v46 = vld [vmem:[#allocation3 + $0xb1] sm:$0x1]  ;;  %2755 = vst.msk [vmem:[#allocation4 + $0x67] sm:$0x1] %vm2076_vm5, %v2731_v32  ;;  %v2923_v47 = vmax.f32 %v2875_v34, %v2899_v39  ;;  %v2492_v51 = vld [vmem:[#allocation3 + $0xb2] sm:$0x1] }
 0x16a   :  { %v2444_v49 = vmax.f32 %v2396_v45, %v2420_v46  ;;  %v2516_v52 = vld [vmem:[#allocation3 + $0xb3] sm:$0x1]  ;;  %2851 = vst.msk [vmem:[#allocation4 + $0x68] sm:$0x1] %vm2076_vm5, %v2827_v38  ;;  %v2588_v57 = vld [vmem:[#allocation3 + $0xb4] sm:$0x1] }
 0x16b   :  { %1591 = vst.msk [vmem:[#allocation2 + $0x1a8] sm:$0xff] %vm1537_vm4, %v1446_v43  ;;  %v2540_v56 = vmax.f32 %v2492_v51, %v2516_v52  ;;  %v2612_v58 = vld [vmem:[#allocation3 + $0xb5] sm:$0x1]  ;;  %1917 = vst.msk [vmem:[#allocation3 + $0xc0] sm:$0xff] %vm1537_vm4, %v1910_v48  ;;  %v1042_v62 = vpop.f32.mrb[57].mxu0  ;;  %v15034_v4 = vld [vmem:[#allocation4 + $0x43] sm:$0xff] }
 0x16c   :  { %2947 = vst.msk [vmem:[#allocation4 + $0x69] sm:$0x1] %vm2076_vm5, %v2923_v47  ;;  %v15029_v60 = vld [vmem:[#allocation4 + $0x33] sm:$0xff]  ;;  %v2108_v63 = vld [vmem:[#allocation3 + $0xaa] sm:$0x1]  ;;  %v2636_v3 = vmax.f32 %v2588_v57, %v2612_v58  ;;  %v1043_v2 = vadd.f32 %v14952_v15, %v1042_v62  ;;  %v12802_v6 = vpop.f32.mrb[58].mxu0 }
 0x16d   :  { %v2132_v0 = vld [vmem:[#allocation3 + $0xab] sm:$0x1]  ;;  %2468 = vst.msk [vmem:[#allocation4 + $0x74] sm:$0x1] %vm2076_vm5, %v2444_v49  ;;  %v2204_v9 = vld [vmem:[#allocation3 + $0xac] sm:$0x1]  ;;  %v1054_v16 = vadd.f32 %v14952_v15, %v12802_v6 }
 0x16e   :  { %v2156_v7 = vmax.f32 %v2108_v63, %v2132_v0  ;;  %v2228_v10 = vld [vmem:[#allocation3 + $0xad] sm:$0x1]  ;;  %2564 = vst.msk [vmem:[#allocation4 + $0x75] sm:$0x1] %vm2076_vm5, %v2540_v56  ;;  %v1451_v13 = vmax.f32 %v1051_v61, 0.0  ;;  %v1045_v17 = vpop.f32.mrb[59].mxu0 }
 0x16f   :  { %v2252_v19 = vmax.f32 %v2204_v9, %v2228_v10  ;;  %v2300_v20 = vld [vmem:[#allocation3 + $0xae] sm:$0x1]  ;;  %v2324_v22 = vld [vmem:[#allocation3 + $0xaf] sm:$0x1]  ;;  %2660 = vst.msk [vmem:[#allocation4 + $0x76] sm:$0x1] %vm2076_vm5, %v2636_v3  ;;  %v1046_v26 = vadd.f32 %v14952_v15, %v1045_v17 }
 0x170   :  { %v1898_v23 = vld [vmem:[#allocation2 + $0x188] sm:$0xff]  ;;  %v1449_v25 = vmax.f32 %v1043_v2, 0.0  ;;  %2180 = vst.msk [vmem:[#allocation4 + $0x71] sm:$0x1] %vm2076_vm5, %v2156_v7  ;;  %v2348_v29 = vmax.f32 %v2300_v20, %v2324_v22  ;;  %v2684_v30 = vld [vmem:[#allocation3 + $0xb6] sm:$0x1] }
 0x171   :  { %v2708_v31 = vld [vmem:[#allocation3 + $0xb7] sm:$0x1]  ;;  %v1905_v32 = vld [vmem:[#allocation2 + $0x1a0] sm:$0xff]  ;;  %1596 = vst.msk [vmem:[#allocation2 + $0x1d0] sm:$0xff] %vm1537_vm4, %v1451_v13  ;;  %v1452_v33 = vmax.f32 %v1054_v16, 0.0  ;;  %v1450_v43 = vmax.f32 %v1046_v26, 0.0 }
 0x172   :  { %2276 = vst.msk [vmem:[#allocation4 + $0x72] sm:$0x1] %vm2076_vm5, %v2252_v19  ;;  %v2732_v34 = vmax.f32 %v2684_v30, %v2708_v31  ;;  %v2780_v36 = vld [vmem:[#allocation3 + $0xb8] sm:$0x1]  ;;  %v2804_v37 = vld [vmem:[#allocation3 + $0xb9] sm:$0x1]  ;;  %v1911_v41 = vmax.f32 %v1898_v23, %v1905_v32 }
 0x173   :  { %v15046_v38 = vld [vmem:[#allocation4 + $0x50] sm:$0xff]  ;;  %1594 = vst.msk [vmem:[#allocation2 + $0x1c0] sm:$0xff] %vm1537_vm4, %v1449_v25  ;;  %v2828_v45 = vmax.f32 %v2780_v36, %v2804_v37  ;;  %v2011_v46 = vld [vmem:[#allocation3 + $0xa8] sm:$0x1]  ;;  %v2971_v47 = vld [vmem:[#allocation3 + $0xa4] sm:$0x1] }
 0x174   :  { %v1899_v39 = vld [vmem:[#allocation2 + $0x190] sm:$0xff]  ;;  %2372 = vst.msk [vmem:[#allocation4 + $0x73] sm:$0x1] %vm2076_vm5, %v2348_v29  ;;  %v3062_v48 = vld [vmem:[#allocation3 + $0x2e] sm:$0x1]  ;;  %v15052_v52 = vld [vmem:[#allocation4 + $0x60] sm:$0xff] }
 0x175   :  { %v1906_v49 = vld [vmem:[#allocation2 + $0x1a8] sm:$0xff]  ;;  %1597 = vst.msk [vmem:[#allocation2 + $0x1d8] sm:$0xff] %vm1537_vm4, %v1452_v33  ;;  %1918 = vst.msk [vmem:[#allocation3 + $0xc8] sm:$0xff] %vm1537_vm4, %v1911_v41  ;;  %v12805_v56 = vpop.f32.mrb[60].mxu0  ;;  %v2876_v58 = vld [vmem:[#allocation3 + $0xba] sm:$0x1] }
 0x176   :  { %2756 = vst.msk [vmem:[#allocation4 + $0x77] sm:$0x1] %vm2076_vm5, %v2732_v34  ;;  %v2035_v51 = vld [vmem:[#allocation3 + $0xa9] sm:$0x1]  ;;  %v1912_v54 = vmax.f32 %v1899_v39, %v1906_v49  ;;  %2852 = vst.msk [vmem:[#allocation4 + $0x78] sm:$0x1] %vm2076_vm5, %v2828_v45  ;;  %v1067_v63 = vadd.f32 %v14952_v15, %v12805_v56 }
 0x177   :  { %1595 = vst.msk [vmem:[#allocation2 + $0x1c8] sm:$0xff] %vm1537_vm4, %v1450_v43  ;;  %v2059_v57 = vmax.f32 %v2011_v46, %v2035_v51  ;;  %v2900_v61 = vld [vmem:[#allocation3 + $0xbb] sm:$0x1]  ;;  %v1058_v0 = vpop.f32.mrb[61].mxu0  ;;  %v2972_v2 = vld [vmem:[#allocation3 + $0xbc] sm:$0x1] }
 0x178   :  { %v2924_v3 = vmax.f32 %v2876_v58, %v2900_v61  ;;  %v2995_v6 = vld [vmem:[#allocation3 + $0xa5] sm:$0x1]  ;;  %v1925_v7 = vld [vmem:[#allocation2 + $0x1b8] sm:$0xff]  ;;  %1919 = vst.msk [vmem:[#allocation3 + $0xd0] sm:$0xff] %vm1537_vm4, %v1912_v54  ;;  %v1059_v9 = vadd.f32 %v14952_v15, %v1058_v0  ;;  %v12806_v10 = vpop.f32.mrb[62].mxu0  ;;  %v1455_v19 = vmax.f32 %v1067_v63, 0.0 }
 0x179   :  { %2084 = vst.msk [vmem:[#allocation4 + $0x70] sm:$0x1] %vm2076_vm5, %v2059_v57  ;;  %v2996_v13 = vld [vmem:[#allocation3 + $0xbd] sm:$0x1]  ;;  %v3019_v16 = vmax.f32 %v2971_v47, %v2995_v6  ;;  %v3086_v17 = vld [vmem:[#allocation3 + $0x2f] sm:$0x1]  ;;  %v1070_v20 = vadd.f32 %v14952_v15, %v12806_v10 }
 0x17a   :  { %v1061_v22 = vpop.f32.mrb[63].mxu0  ;;  %2948 = vst.msk [vmem:[#allocation4 + $0x79] sm:$0x1] %vm2076_vm5, %v2924_v3  ;;  %v3020_v23 = vmax.f32 %v2972_v2, %v2996_v13  ;;  %v3110_v25 = vmax.f32 %v3062_v48, %v3086_v17  ;;  %v3063_v26 = vld [vmem:[#allocation3 + $0x46] sm:$0x1]  ;;  %v1932_v30 = vld [vmem:[#allocation2 + $0x1d0] sm:$0xff] }
 0x17b   :  { %v3064_v29 = vld [vmem:[#allocation3 + $0x5e] sm:$0x1]  ;;  %v1453_v31 = vmax.f32 %v1059_v9, 0.0  ;;  %v1062_v32 = vadd.f32 %v14952_v15, %v1061_v22  ;;  %3043 = vst.msk [vmem:[#allocation4 + $0x6a] sm:$0x1] %vm2076_vm5, %v3019_v16  ;;  %v1924_v36 = vld [vmem:[#allocation2 + $0x1b0] sm:$0xff]  ;;  %v1938_v37 = vmax.f32 %v1925_v7, %v1932_v30 }
 0x17c   :  { %v3087_v33 = vld [vmem:[#allocation3 + $0x47] sm:$0x1]  ;;  %v3088_v34 = vld [vmem:[#allocation3 + $0x5f] sm:$0x1]  ;;  %1600 = vst.msk [vmem:[#allocation2 + $0x1f0] sm:$0xff] %vm1537_vm4, %v1455_v19  ;;  %v1456_v41 = vmax.f32 %v1070_v20, 0.0 }
 0x17d   :  { %v1926_v39 = vld [vmem:[#allocation2 + $0x1c0] sm:$0xff]  ;;  %3044 = vst.msk [vmem:[#allocation4 + $0x7a] sm:$0x1] %vm2076_vm5, %v3020_v23  ;;  %3134 = vst.msk [vmem:[#allocation4 + $0x1b] sm:$0x1] %vm2076_vm5, %v3110_v25  ;;  %v3111_v46 = vmax.f32 %v3063_v26, %v3087_v33  ;;  %v3112_v47 = vmax.f32 %v3064_v29, %v3088_v34  ;;  %v1933_v49 = vld [vmem:[#allocation2 + $0x1d8] sm:$0xff] }
 0x17e   :  { %v3190_v43 = vld [vmem:[#allocation4 + $0x61] sm:$0xff]  ;;  %v3065_v48 = vld [vmem:[#allocation3 + $0x76] sm:$0x1]  ;;  %1598 = vst.msk [vmem:[#allocation2 + $0x1e0] sm:$0xff] %vm1537_vm4, %v1453_v31  ;;  %v1454_v51 = vmax.f32 %v1062_v32, 0.0  ;;  %1945 = vst.msk [vmem:[#allocation3 + $0xe0] sm:$0xff] %vm1537_vm4, %v1938_v37  ;;  %v1939_v58 = vmax.f32 %v1926_v39, %v1933_v49 }
 0x17f   :  { %v13880_v45 = vld [vmem:[%s17545_s3] sm:$0xff]   ;;  %v3066_v54 = vld [vmem:[#allocation3 + $0x8e] sm:$0x1]  ;;  %v3089_v56 = vld [vmem:[#allocation3 + $0x77] sm:$0x1]  ;;  %1601 = vst.msk [vmem:[#allocation2 + $0x1f8] sm:$0xff] %vm1537_vm4, %v1456_v41 }
 0x180   :  { %v15074_v57 = vld [vmem:[#allocation4 + $0x61] sm:$0xff]  ;;  %v3191_v63 = vld [vmem:[#allocation4 + $0x71] sm:$0xff]  ;;  %12907 = vmatprep.subr.bf16.mxu1 %v13880_v45  ;;  %3135 = vst.msk [vmem:[#allocation4 + $0x2b] sm:$0x1] %vm2076_vm5, %v3111_v46  ;;  %3136 = vst.msk [vmem:[#allocation4 + $0x3b] sm:$0x1] %vm2076_vm5, %v3112_v47  ;;  %v3113_v3 = vmax.f32 %v3065_v48, %v3089_v56 }
 0x181   :  { %17630 = vst [vmem:[#allocation17_spill] sm:$0xff] %v15074_v57  ;;  %v1931_v61 = vld [vmem:[#allocation2 + $0x1c8] sm:$0xff]  ;;  %1599 = vst.msk [vmem:[#allocation2 + $0x1e8] sm:$0xff] %vm1537_vm4, %v1454_v51  ;;  %v3203_v6 = vpack.c.bf16 %v3191_v63, %v3190_v43  ;;  %v12809_v7 = vpop.f32.mrb[64].mxu0  ;;  %12908 = vmatpush3.bf16.msra.mxu1 %v13880_v45  ;;  %v3067_v10 = vld [vmem:[#allocation3 + $0xa6] sm:$0x1] }
 0x182   :  { %v3090_v0 = vld [vmem:[#allocation3 + $0x8f] sm:$0x1]  ;;  %v1937_v2 = vmax.f32 %v1924_v36, %v1931_v61  ;;  %v3068_v13 = vld [vmem:[#allocation3 + $0xbe] sm:$0x1]  ;;  %v15081_v16 = vld [vmem:[#allocation4 + $0x71] sm:$0xff]  ;;  %1946 = vst.msk [vmem:[#allocation3 + $0xe8] sm:$0xff] %vm1537_vm4, %v1939_v58  ;;  %v1083_v17 = vadd.f32 %v14952_v15, %v12809_v7 }
 0x183   :  { %v3114_v9 = vmax.f32 %v3066_v54, %v3090_v0  ;;  %17631 = vst [vmem:[#allocation18_spill] sm:$0xff] %v15081_v16  ;;  %v1074_v19 = vpop.f32.mrb[65].mxu0  ;;  %3137 = vst.msk [vmem:[#allocation4 + $0x4b] sm:$0x1] %vm2076_vm5, %v3113_v3  ;;  %v3091_v20 = vld [vmem:[#allocation3 + $0xa7] sm:$0x1]  ;;  %12896 = vmatmul.mubr.msk.bf16.gmra.mrb[8].mxu1 %vm1537_vm4, %v3203_v6 }
 0x184   :  { %v3092_v22 = vld [vmem:[#allocation3 + $0xbf] sm:$0x1]  ;;  %v15086_v23 = vld [vmem:[#allocation4 + $0x42] sm:$0xff]  ;;  %1944 = vst.msk [vmem:[#allocation3 + $0xd8] sm:$0xff] %vm1537_vm4, %v1937_v2  ;;  %v1075_v26 = vadd.f32 %v14952_v15, %v1074_v19  ;;  %v12810_v29 = vpop.f32.mrb[66].mxu0  ;;  %v15093_v30 = vld [vmem:[#allocation4 + $0x53] sm:$0xff]  ;;  %v3115_v31 = vmax.f32 %v3067_v10, %v3091_v20 }
 0x185   :  { %17632 = vst [vmem:[#allocation19_spill] sm:$0xff] %v15086_v23  ;;  %3138 = vst.msk [vmem:[#allocation4 + $0x5b] sm:$0x1] %vm2076_vm5, %v3114_v9  ;;  %v3116_v32 = vmax.f32 %v3068_v13, %v3092_v22  ;;  %v2012_v33 = vld [vmem:[#allocation3 + $0xc0] sm:$0x1]  ;;  %v1459_v36 = vmax.f32 %v1083_v17, 0.0  ;;  %v1086_v37 = vadd.f32 %v14952_v15, %v12810_v29 }
 0x186   :  { %v2036_v34 = vld [vmem:[#allocation3 + $0xc1] sm:$0x1]  ;;  %v1077_v39 = vpop.f32.mrb[67].mxu0  ;;  %v15097_v41 = vld [vmem:[#allocation4 + $0x63] sm:$0xff]  ;;  %v2109_v45 = vld [vmem:[#allocation3 + $0xc2] sm:$0x1] }
 0x187   :  { %v2060_v43 = vmax.f32 %v2012_v33, %v2036_v34  ;;  %v15099_v46 = vld [vmem:[#allocation4 + $0x52] sm:$0xff]  ;;  %v1457_v47 = vmax.f32 %v1075_v26, 0.0  ;;  %v1078_v48 = vadd.f32 %v14952_v15, %v1077_v39  ;;  %3139 = vst.msk [vmem:[#allocation4 + $0x6b] sm:$0x1] %vm2076_vm5, %v3115_v31  ;;  %3140 = vst.msk [vmem:[#allocation4 + $0x7b] sm:$0x1] %vm2076_vm5, %v3116_v32 }
 0x188   :  { %17633 = vst [vmem:[#allocation20_spill] sm:$0xff] %v15099_v46  ;;  %v1951_v54 = vld [vmem:[#allocation2 + $0x1e0] sm:$0xff]  ;;  %1604 = vst.msk [vmem:[#allocation2 + $0x210] sm:$0xff] %vm1537_vm4, %v1459_v36  ;;  %v1460_v56 = vmax.f32 %v1086_v37, 0.0  ;;  %v1958_v63 = vld [vmem:[#allocation2 + $0x1f8] sm:$0xff]  ;;  %v12813_v19 = vpop.f32.mrb[68].mxu0 }
 0x189   :  { %2085 = vst.msk [vmem:[#allocation4 + $0x80] sm:$0x1] %vm2076_vm5, %v2060_v43  ;;  %v2133_v58 = vld [vmem:[#allocation3 + $0xc3] sm:$0x1]  ;;  %v2205_v61 = vld [vmem:[#allocation3 + $0xc4] sm:$0x1]  ;;  %v1964_v7 = vmax.f32 %v1951_v54, %v1958_v63  ;;  %v1099_v31 = vadd.f32 %v14952_v15, %v12813_v19 }
 0x18a   :  { %1602 = vst.msk [vmem:[#allocation2 + $0x200] sm:$0xff] %vm1537_vm4, %v1457_v47  ;;  %v1458_v0 = vmax.f32 %v1078_v48, 0.0  ;;  %v15111_v3 = vld [vmem:[#allocation4 + $0x14] sm:$0xff]  ;;  %v15113_v2 = vld [vmem:[#allocation4 + $0x24] sm:$0xff]  ;;  %v2157_v6 = vmax.f32 %v2109_v45, %v2133_v58  ;;  %1605 = vst.msk [vmem:[#allocation2 + $0x218] sm:$0xff] %vm1537_vm4, %v1460_v56  ;;  %v1090_v32 = vpop.f32.mrb[69].mxu0 }
 0x18b   :  { %17634 = vst [vmem:[#allocation21_spill] sm:$0xff] %v15111_v3  ;;  %v15116_v9 = vld [vmem:[#allocation4 + $0x34] sm:$0xff]  ;;  %v2229_v10 = vld [vmem:[#allocation3 + $0xc5] sm:$0x1]  ;;  %v2301_v13 = vld [vmem:[#allocation3 + $0xc6] sm:$0x1]  ;;  %v1091_v39 = vadd.f32 %v14952_v15, %v1090_v32 }
 0x18c   :  { %17635 = vst [vmem:[#allocation22_spill] sm:$0xff] %v15116_v9  ;;  %1603 = vst.msk [vmem:[#allocation2 + $0x208] sm:$0xff] %vm1537_vm4, %v1458_v0  ;;  %v15121_v20 = vld [vmem:[#allocation4 + $0x44] sm:$0xff]  ;;  %v2253_v22 = vmax.f32 %v2205_v61, %v2229_v10  ;;  %v12814_v43 = vpop.f32.mrb[70].mxu0  ;;  %v1463_v54 = vmax.f32 %v1099_v31, 0.0  ;;  %v15140_v19 = vld [vmem:[#allocation4 + $0x54] sm:$0xff] }
 0x18d   :  { %17636 = vst [vmem:[#allocation23_spill] sm:$0xff] %v15121_v20  ;;  %2181 = vst.msk [vmem:[#allocation4 + $0x81] sm:$0x1] %vm2076_vm5, %v2157_v6  ;;  %v2325_v26 = vld [vmem:[#allocation3 + $0xc7] sm:$0x1]  ;;  %v1102_v56 = vadd.f32 %v14952_v15, %v12814_v43  ;;  %v1093_v58 = vpop.f32.mrb[71].mxu0 }
 0x18e   :  { %v2397_v29 = vld [vmem:[#allocation3 + $0xc8] sm:$0x1]  ;;  %1971 = vst.msk [vmem:[#allocation3 + $0xf0] sm:$0xff] %vm1537_vm4, %v1964_v7  ;;  %v2349_v33 = vmax.f32 %v2301_v13, %v2325_v26  ;;  %v2421_v34 = vld [vmem:[#allocation3 + $0xc9] sm:$0x1]  ;;  %v1461_v7 = vmax.f32 %v1091_v39, 0.0  ;;  %v1094_v10 = vadd.f32 %v14952_v15, %v1093_v58 }
 0x18f   :  { %v2493_v36 = vld [vmem:[#allocation3 + $0xca] sm:$0x1]  ;;  %v13881_v45 = vld [vmem:[%s17545_s3 + $0x8] ss:$0 sps:$4 sm:$0x33]   ;;  %v2445_v47 = vmax.f32 %v2397_v29, %v2421_v34  ;;  %17638 = vst [vmem:[#allocation25_spill] sm:$0xff] %v15140_v19 }
 0x190   :  { %2277 = vst.msk [vmem:[#allocation4 + $0x82] sm:$0x1] %vm2076_vm5, %v2253_v22  ;;  %v2517_v48 = vld [vmem:[#allocation3 + $0xcb] sm:$0x1]  ;;  %2373 = vst.msk [vmem:[#allocation4 + $0x83] sm:$0x1] %vm2076_vm5, %v2349_v33  ;;  %13776 = vmatprep.subr.msk.bf16.mxu1 %vm3245_vm3, %v13881_v45 }
 0x191   :  { %v15134_v61 = vld [vmem:[#allocation4 + $0x64] sm:$0xff]  ;;  %v2541_v63 = vmax.f32 %v2493_v36, %v2517_v48  ;;  %v2589_v0 = vld [vmem:[#allocation3 + $0xcc] sm:$0x1]  ;;  %v3380_v13 = vsel %vm3245_vm3, %v13881_v45, 0  ;;  %2469 = vst.msk [vmem:[#allocation4 + $0x84] sm:$0x1] %vm2076_vm5, %v2445_v47 }
 0x192   :  { %17637 = vst [vmem:[#allocation24_spill] sm:$0xff] %v15134_v61  ;;  %v1952_v6 = vld [vmem:[#allocation2 + $0x1e8] sm:$0xff]  ;;  %v1953_v26 = vld [vmem:[#allocation2 + $0x1f0] sm:$0xff]  ;;  %v1959_v29 = vld [vmem:[#allocation2 + $0x200] sm:$0xff]  ;;  %v1464_v31 = vmax.f32 %v1102_v56, 0.0  ;;  %12910 = vmatpush3.bf16.msra.mxu1 %v3380_v13  ;;  %v1462_v43 = vmax.f32 %v1094_v10, 0.0 }
 0x193   :  { %v2613_v22 = vld [vmem:[#allocation3 + $0xcd] sm:$0x1]  ;;  %1608 = vst.msk [vmem:[#allocation2 + $0x230] sm:$0xff] %vm1537_vm4, %v1463_v54  ;;  %v2685_v33 = vld [vmem:[#allocation3 + $0xce] sm:$0x1]  ;;  %v1965_v39 = vmax.f32 %v1952_v6, %v1959_v29  ;;  %1606 = vst.msk [vmem:[#allocation2 + $0x220] sm:$0xff] %vm1537_vm4, %v1461_v7 }
 0x194   :  { %2565 = vst.msk [vmem:[#allocation4 + $0x85] sm:$0x1] %vm2076_vm5, %v2541_v63  ;;  %v2637_v32 = vmax.f32 %v2589_v0, %v2613_v22  ;;  %v2709_v34 = vld [vmem:[#allocation3 + $0xcf] sm:$0x1]  ;;  %v2781_v47 = vld [vmem:[#allocation3 + $0xd0] sm:$0x1] }
 0x195   :  { %v2733_v45 = vmax.f32 %v2685_v33, %v2709_v34  ;;  %v2805_v48 = vld [vmem:[#allocation3 + $0xd1] sm:$0x1]  ;;  %v15148_v58 = vld [vmem:[#allocation4 + $0x62] sm:$0xff]  ;;  %1609 = vst.msk [vmem:[#allocation2 + $0x238] sm:$0xff] %vm1537_vm4, %v1464_v31  ;;  %v2877_v63 = vld [vmem:[#allocation3 + $0xd2] sm:$0x1] }
 0x196   :  { %17639 = vst [vmem:[#allocation26_spill] sm:$0xff] %v15148_v58  ;;  %v1960_v54 = vld [vmem:[#allocation2 + $0x208] sm:$0xff]  ;;  %2661 = vst.msk [vmem:[#allocation4 + $0x86] sm:$0x1] %vm2076_vm5, %v2637_v32  ;;  %v2829_v56 = vmax.f32 %v2781_v47, %v2805_v48  ;;  %v2901_v0 = vld [vmem:[#allocation3 + $0xd3] sm:$0x1] }
 0x197   :  { %1972 = vst.msk [vmem:[#allocation3 + $0xf8] sm:$0xff] %vm1537_vm4, %v1965_v39  ;;  %v1966_v13 = vmax.f32 %v1953_v26, %v1960_v54  ;;  %1607 = vst.msk [vmem:[#allocation2 + $0x228] sm:$0xff] %vm1537_vm4, %v1462_v43  ;;  %v12817_v6 = vpop.f32.mrb[72].mxu0  ;;  %v2925_v7 = vmax.f32 %v2877_v63, %v2901_v0  ;;  %v15155_v10 = vld [vmem:[#allocation4 + $0x72] sm:$0xff]  ;;  %v15169_v63 = vld [vmem:[#allocation4 + $0x40] sm:$0xff] }
 0x198   :  { %2757 = vst.msk [vmem:[#allocation4 + $0x87] sm:$0x1] %vm2076_vm5, %v2733_v45  ;;  %17640 = vst [vmem:[#allocation27_spill] sm:$0xff] %v15155_v10  ;;  %v2973_v22 = vld [vmem:[#allocation3 + $0xd4] sm:$0x1]  ;;  %v1115_v31 = vadd.f32 %v14952_v15, %v12817_v6  ;;  %v1106_v33 = vpop.f32.mrb[73].mxu0 }
 0x199   :  { %v2997_v29 = vld [vmem:[#allocation3 + $0xd5] sm:$0x1]  ;;  %v13882_v32 = vld [vmem:[%s17545_s3 + $0x18] sm:$0xff]   ;;  %2853 = vst.msk [vmem:[#allocation4 + $0x88] sm:$0x1] %vm2076_vm5, %v2829_v56  ;;  %v1107_v45 = vadd.f32 %v14952_v15, %v1106_v33  ;;  %v12818_v47 = vpop.f32.mrb[74].mxu0 }
 0x19a   :  { %v3021_v26 = vmax.f32 %v2973_v22, %v2997_v29  ;;  %v3069_v34 = vld [vmem:[#allocation3 + $0xd6] sm:$0x1]  ;;  %v3093_v39 = vld [vmem:[#allocation3 + $0xd7] sm:$0x1]  ;;  %1973 = vst.msk [vmem:[#allocation3 + $0x100] sm:$0xff] %vm1537_vm4, %v1966_v13  ;;  %17642 = vst [vmem:[#allocation29_spill] sm:$0xff] %v15169_v63  ;;  %v1118_v6 = vadd.f32 %v14952_v15, %v12818_v47  ;;  %12927 = vmatprep.subr.bf16.mxu1 %v13882_v32 }
 0x19b   :  { %2949 = vst.msk [vmem:[#allocation4 + $0x89] sm:$0x1] %vm2076_vm5, %v2925_v7  ;;  %v3117_v48 = vmax.f32 %v3069_v34, %v3093_v39  ;;  %v15167_v54 = vld [vmem:[#allocation4 + $0x30] sm:$0xff]  ;;  %v1979_v0 = vld [vmem:[#allocation2 + $0x218] sm:$0xff]  ;;  %v1467_v56 = vmax.f32 %v1115_v31, 0.0  ;;  %v1109_v22 = vpop.f32.mrb[75].mxu0 }
 0x19c   :  { %17641 = vst [vmem:[#allocation28_spill] sm:$0xff] %v15167_v54  ;;  %3045 = vst.msk [vmem:[#allocation4 + $0x8a] sm:$0x1] %vm2076_vm5, %v3021_v26  ;;  %v15173_v29 = vld [vmem:[#allocation4 + $0x50] sm:$0xff]  ;;  %v15175_v13 = vld [vmem:[#allocation4 + $0x60] sm:$0xff]  ;;  %v1465_v34 = vmax.f32 %v1107_v45, 0.0  ;;  %v1110_v39 = vadd.f32 %v14952_v15, %v1109_v22 }
 0x19d   :  { %17643 = vst [vmem:[#allocation30_spill] sm:$0xff] %v15173_v29  ;;  %17644 = vst [vmem:[#allocation31_spill] sm:$0xff] %v15175_v13  ;;  %v1986_v33 = vld [vmem:[#allocation2 + $0x230] sm:$0xff]  ;;  %v2013_v31 = vld [vmem:[#allocation3 + $0xd8] sm:$0x1]  ;;  %v1468_v32 = vmax.f32 %v1118_v6, 0.0 }
 0x19e   :  { %3141 = vst.msk [vmem:[#allocation4 + $0x8b] sm:$0x1] %vm2076_vm5, %v3117_v48  ;;  %v2037_v43 = vld [vmem:[#allocation3 + $0xd9] sm:$0x1]  ;;  %v1992_v47 = vmax.f32 %v1979_v0, %v1986_v33  ;;  %v1980_v51 = vld [vmem:[#allocation2 + $0x220] sm:$0xff]  ;;  %v1466_v45 = vmax.f32 %v1110_v39, 0.0 }
 0x19f   :  { %1612 = vst.msk [vmem:[#allocation2 + $0x250] sm:$0xff] %vm1537_vm4, %v1467_v56  ;;  %v2061_v26 = vmax.f32 %v2013_v31, %v2037_v43  ;;  %v2110_v27 = vld [vmem:[#allocation3 + $0xda] sm:$0x1]  ;;  %v2134_v25 = vld [vmem:[#allocation3 + $0xdb] sm:$0x1]  ;;  %1610 = vst.msk [vmem:[#allocation2 + $0x240] sm:$0xff] %vm1537_vm4, %v1465_v34 }
 0x1a0   :  { %v1987_v7 = vld [vmem:[#allocation2 + $0x238] sm:$0xff]  ;;  %v2158_v22 = vmax.f32 %v2110_v27, %v2134_v25  ;;  %v1978_v36 = vld [vmem:[#allocation2 + $0x210] sm:$0xff]  ;;  %1999 = vst.msk [vmem:[#allocation3 + $0x110] sm:$0xff] %vm1537_vm4, %v1992_v47  ;;  %v1985_v33 = vld [vmem:[#allocation2 + $0x228] sm:$0xff]  ;;  %v12821_v31 = vpop.f32.mrb[76].mxu0 }
 0x1a1   :  { %v2206_v42 = vld [vmem:[#allocation3 + $0xdc] sm:$0x1]  ;;  %v2230_v48 = vld [vmem:[#allocation3 + $0xdd] sm:$0x1]  ;;  %v1993_v0 = vmax.f32 %v1980_v51, %v1987_v7  ;;  %1613 = vst.msk [vmem:[#allocation2 + $0x258] sm:$0xff] %vm1537_vm4, %v1468_v32  ;;  %v1991_v6 = vmax.f32 %v1978_v36, %v1985_v33  ;;  %1611 = vst.msk [vmem:[#allocation2 + $0x248] sm:$0xff] %vm1537_vm4, %v1466_v45  ;;  %v1131_v34 = vadd.f32 %v14952_v15, %v12821_v31 }
 0x1a2   :  { %2086 = vst.msk [vmem:[#allocation4 + $0x90] sm:$0x1] %vm2076_vm5, %v2061_v26  ;;  %v2254_v43 = vmax.f32 %v2206_v42, %v2230_v48  ;;  %v2302_v56 = vld [vmem:[#allocation3 + $0xde] sm:$0x1]  ;;  %2182 = vst.msk [vmem:[#allocation4 + $0x91] sm:$0x1] %vm2076_vm5, %v2158_v22 }
 0x1a3   :  { %v2326_v27 = vld [vmem:[#allocation3 + $0xdf] sm:$0x1]  ;;  %v2398_v25 = vld [vmem:[#allocation3 + $0xe0] sm:$0x1]  ;;  %2000 = vst.msk [vmem:[#allocation3 + $0x118] sm:$0xff] %vm1537_vm4, %v1993_v0  ;;  %v1122_v51 = vpop.f32.mrb[77].mxu0 }
 0x1a4   :  { %2278 = vst.msk [vmem:[#allocation4 + $0x92] sm:$0x1] %vm2076_vm5, %v2254_v43  ;;  %v2350_v7 = vmax.f32 %v2302_v56, %v2326_v27  ;;  %v2422_v39 = vld [vmem:[#allocation3 + $0xe1] sm:$0x1]  ;;  %v2494_v47 = vld [vmem:[#allocation3 + $0xe2] sm:$0x1]  ;;  %v1123_v42 = vadd.f32 %v14952_v15, %v1122_v51 }
 0x1a5   :  { %1998 = vst.msk [vmem:[#allocation3 + $0x108] sm:$0xff] %vm1537_vm4, %v1991_v6  ;;  %v12822_v36 = vpop.f32.mrb[78].mxu0  ;;  %v2446_v32 = vmax.f32 %v2398_v25, %v2422_v39  ;;  %v2518_v26 = vld [vmem:[#allocation3 + $0xe3] sm:$0x1]  ;;  %v2590_v45 = vld [vmem:[#allocation3 + $0xe4] sm:$0x1] }
 0x1a6   :  { %v1471_v22 = vmax.f32 %v1131_v34, 0.0  ;;  %v1134_v48 = vadd.f32 %v14952_v15, %v12822_v36  ;;  %v1125_v0 = vpop.f32.mrb[79].mxu0  ;;  %2374 = vst.msk [vmem:[#allocation4 + $0x93] sm:$0x1] %vm2076_vm5, %v2350_v7  ;;  %v2542_v33 = vmax.f32 %v2494_v47, %v2518_v26  ;;  %v2614_v31 = vld [vmem:[#allocation3 + $0xe5] sm:$0x1] }
 0x1a7   :  { %v1469_v43 = vmax.f32 %v1123_v42, 0.0  ;;  %v1126_v56 = vadd.f32 %v14952_v15, %v1125_v0  ;;  %2470 = vst.msk [vmem:[#allocation4 + $0x94] sm:$0x1] %vm2076_vm5, %v2446_v32  ;;  %v2638_v6 = vmax.f32 %v2590_v45, %v2614_v31  ;;  %v2686_v27 = vld [vmem:[#allocation3 + $0xe6] sm:$0x1]  ;;  %v15244_v12 = vld [vmem:[#allocation4 + $0x33] sm:$0xff] }
 0x1a8   :  { %v2710_v51 = vld [vmem:[#allocation3 + $0xe7] sm:$0x1]  ;;  %1616 = vst.msk [vmem:[#allocation2 + $0x270] sm:$0xff] %vm1537_vm4, %v1471_v22  ;;  %v1472_v25 = vmax.f32 %v1134_v48, 0.0  ;;  %v2782_v39 = vld [vmem:[#allocation3 + $0xe8] sm:$0x1] }
 0x1a9   :  { %v1685_v11 = vld [vmem:[#allocation2 + $0x240] sm:$0xff]  ;;  %2566 = vst.msk [vmem:[#allocation4 + $0x95] sm:$0x1] %vm2076_vm5, %v2542_v33  ;;  %v2734_v34 = vmax.f32 %v2686_v27, %v2710_v51  ;;  %v2806_v36 = vld [vmem:[#allocation3 + $0xe9] sm:$0x1]  ;;  %v1692_v7 = vld [vmem:[#allocation2 + $0x258] sm:$0xff] }
 0x1aa   :  { %1614 = vst.msk [vmem:[#allocation2 + $0x260] sm:$0xff] %vm1537_vm4, %v1469_v43  ;;  %v1470_v47 = vmax.f32 %v1126_v56, 0.0  ;;  %v2830_v15 = vmax.f32 %v2782_v39, %v2806_v36  ;;  %v2878_v42 = vld [vmem:[#allocation3 + $0xea] sm:$0x1]  ;;  %v2902_v32 = vld [vmem:[#allocation3 + $0xeb] sm:$0x1]  ;;  %v1698_v26 = vmax.f32 %v1685_v11, %v1692_v7 }
 0x1ab   :  { %2662 = vst.msk [vmem:[#allocation4 + $0x96] sm:$0x1] %vm2076_vm5, %v2638_v6  ;;  %2758 = vst.msk [vmem:[#allocation4 + $0x97] sm:$0x1] %vm2076_vm5, %v2734_v34  ;;  %v2926_v45 = vmax.f32 %v2878_v42, %v2902_v32  ;;  %v12825_v22 = vpop.f32.mrb[80].mxu0  ;;  %v1686_v7 = vld [vmem:[#allocation2 + $0x248] sm:$0xff] }
 0x1ac   :  { %1617 = vst.msk [vmem:[#allocation2 + $0x278] sm:$0xff] %vm1537_vm4, %v1472_v25  ;;  %1615 = vst.msk [vmem:[#allocation2 + $0x268] sm:$0xff] %vm1537_vm4, %v1470_v47  ;;  %v15211_v48 = vld [vmem:[%s17544_s2] ss:$0 sm:$0xff]  ;;  %v1138_v11 = vpop.f32.mrb[81].mxu0  ;;  %v15303_v1 = vld [vmem:[#allocation4 + $0x63] sm:$0xff] }
 0x1ad   :  { %2854 = vst.msk [vmem:[#allocation4 + $0x98] sm:$0x1] %vm2076_vm5, %v2830_v15  ;;  %v1147_v0 = vadd.f32 %v15211_v48, %v12825_v22  ;;  %2950 = vst.msk [vmem:[#allocation4 + $0x99] sm:$0x1] %vm2076_vm5, %v2926_v45  ;;  %v2974_v33 = vld [vmem:[#allocation3 + $0xec] sm:$0x1]  ;;  %v1139_v31 = vadd.f32 %v15211_v48, %v1138_v11 }
 0x1ae   :  { %1704 = vst.msk [vmem:[#allocation3 + $0x120] sm:$0xff] %vm1537_vm4, %v1698_v26  ;;  %v12826_v43 = vpop.f32.mrb[82].mxu0  ;;  %v2998_v56 = vld [vmem:[#allocation3 + $0xed] sm:$0x1]  ;;  %v3070_v36 = vld [vmem:[#allocation3 + $0xee] sm:$0x1] }
 0x1af   :  { %v1475_v6 = vmax.f32 %v1147_v0, 0.0  ;;  %v1150_v27 = vadd.f32 %v15211_v48, %v12826_v43  ;;  %v1141_v51 = vpop.f32.mrb[83].mxu0  ;;  %v3022_v25 = vmax.f32 %v2974_v33, %v2998_v56  ;;  %v1473_v34 = vmax.f32 %v1139_v31, 0.0  ;;  %v3094_v42 = vld [vmem:[#allocation3 + $0xef] sm:$0x1]  ;;  %v1687_v0 = vld [vmem:[#allocation2 + $0x250] sm:$0xff] }
 0x1b0   :  { %v1142_v39 = vadd.f32 %v15211_v48, %v1141_v51  ;;  %v3118_v45 = vmax.f32 %v3070_v36, %v3094_v42  ;;  %v2014_v22 = vld [vmem:[#allocation3 + $0xf0] sm:$0x1]  ;;  %v2038_v33 = vld [vmem:[#allocation3 + $0xf1] sm:$0x1]  ;;  %v12829_v43 = vpop.f32.mrb[84].mxu0  ;;  %17647 = vst [vmem:[#allocation34_spill] sm:$0xff] %v15244_v12 }
 0x1b1   :  { %v1693_v47 = vld [vmem:[#allocation2 + $0x260] sm:$0xff]  ;;  %1620 = vst.msk [vmem:[#allocation2 + $0x290] sm:$0xff] %vm1537_vm4, %v1475_v6  ;;  %v1476_v15 = vmax.f32 %v1150_v27, 0.0  ;;  %1618 = vst.msk [vmem:[#allocation2 + $0x280] sm:$0xff] %vm1537_vm4, %v1473_v34  ;;  %v2062_v27 = vmax.f32 %v2014_v22, %v2038_v33  ;;  %v1163_v51 = vadd.f32 %v15211_v48, %v12829_v43  ;;  %v2424_v35 = vld [vmem:[#allocation3 + $0x111] sm:$0x1] }
 0x1b2   :  { %3046 = vst.msk [vmem:[#allocation4 + $0x9a] sm:$0x1] %vm2076_vm5, %v3022_v25  ;;  %v1699_v32 = vmax.f32 %v1686_v7, %v1693_v47  ;;  %v1474_v26 = vmax.f32 %v1142_v39, 0.0  ;;  %3142 = vst.msk [vmem:[#allocation4 + $0x9b] sm:$0x1] %vm2076_vm5, %v3118_v45  ;;  %v1154_v25 = vpop.f32.mrb[85].mxu0 }
 0x1b3   :  { %v1694_v11 = vld [vmem:[#allocation2 + $0x268] sm:$0xff]  ;;  %1621 = vst.msk [vmem:[#allocation2 + $0x298] sm:$0xff] %vm1537_vm4, %v1476_v15  ;;  %v1155_v7 = vadd.f32 %v15211_v48, %v1154_v25  ;;  %v12830_v47 = vpop.f32.mrb[86].mxu0  ;;  %v1712_v43 = vld [vmem:[#allocation2 + $0x278] sm:$0xff]  ;;  %17651 = vst [vmem:[#allocation38_spill] sm:$0xff] %v15303_v1 }
 0x1b4   :  { %1705 = vst.msk [vmem:[#allocation3 + $0x128] sm:$0xff] %vm1537_vm4, %v1699_v32  ;;  %v1700_v31 = vmax.f32 %v1687_v0, %v1694_v11  ;;  %1619 = vst.msk [vmem:[#allocation2 + $0x288] sm:$0xff] %vm1537_vm4, %v1474_v26  ;;  %v1479_v26 = vmax.f32 %v1163_v51, 0.0  ;;  %v1166_v45 = vadd.f32 %v15211_v48, %v12830_v47  ;;  %v1157_v22 = vpop.f32.mrb[87].mxu0  ;;  %v3157_v8 = vld [vmem:[#allocation4] sm:$0xff] }
 0x1b5   :  { %v2113_v56 = vld [vmem:[#allocation3 + $0x122] sm:$0x1]  ;;  %v2137_v6 = vld [vmem:[#allocation3 + $0x123] sm:$0x1]  ;;  %v2209_v39 = vld [vmem:[#allocation3 + $0x124] sm:$0x1] }
 0x1b6   :  { %v2161_v34 = vmax.f32 %v2113_v56, %v2137_v6  ;;  %v2233_v36 = vld [vmem:[#allocation3 + $0x125] sm:$0x1]  ;;  %1706 = vst.msk [vmem:[#allocation3 + $0x130] sm:$0xff] %vm1537_vm4, %v1700_v31  ;;  %v2305_v42 = vld [vmem:[#allocation3 + $0x126] sm:$0x1]  ;;  %v1477_v31 = vmax.f32 %v1155_v7, 0.0  ;;  %v1158_v6 = vadd.f32 %v15211_v48, %v1157_v22 }
 0x1b7   :  { %v2257_v15 = vmax.f32 %v2209_v39, %v2233_v36  ;;  %v2329_v32 = vld [vmem:[#allocation3 + $0x127] sm:$0x1]  ;;  %2087 = vst.msk [vmem:[#allocation4 + $0xa0] sm:$0x1] %vm2076_vm5, %v2062_v27  ;;  %v2016_v11 = vld [vmem:[#allocation3 + $0x120] sm:$0x1] }
 0x1b8   :  { %2185 = vst.msk [vmem:[#allocation4 + $0xc1] sm:$0x1] %vm2076_vm5, %v2161_v34  ;;  %v2353_v0 = vmax.f32 %v2305_v42, %v2329_v32  ;;  %v2040_v33 = vld [vmem:[#allocation3 + $0x121] sm:$0x1]  ;;  %v1719_v56 = vld [vmem:[#allocation2 + $0x290] sm:$0xff]  ;;  %v15233_v39 = vld [vmem:[#allocation4 + $0x43] sm:$0xff] }
 0x1b9   :  { %2281 = vst.msk [vmem:[#allocation4 + $0xc2] sm:$0x1] %vm2076_vm5, %v2257_v15  ;;  %v2064_v25 = vmax.f32 %v2016_v11, %v2040_v33  ;;  %17645 = vst [vmem:[#allocation32_spill] sm:$0xff] %v15233_v39  ;;  %v2111_v27 = vld [vmem:[#allocation3 + $0xf2] sm:$0x1]  ;;  %v1725_v51 = vmax.f32 %v1712_v43, %v1719_v56  ;;  %v1713_v36 = vld [vmem:[#allocation2 + $0x280] sm:$0xff] }
 0x1ba   :  { %1624 = vst.msk [vmem:[#allocation2 + $0x2b0] sm:$0xff] %vm1537_vm4, %v1479_v26  ;;  %v1480_v47 = vmax.f32 %v1166_v45, 0.0  ;;  %v15237_v34 = vld [vmem:[#allocation4 + $0x44] sm:$0xff]  ;;  %v2135_v42 = vld [vmem:[#allocation3 + $0xf3] sm:$0x1]  ;;  %v1720_v37 = vld [vmem:[#allocation2 + $0x298] sm:$0xff] }
 0x1bb   :  { %2377 = vst.msk [vmem:[#allocation4 + $0xc3] sm:$0x1] %vm2076_vm5, %v2353_v0  ;;  %17646 = vst [vmem:[#allocation33_spill] sm:$0xff] %v15237_v34  ;;  %v2207_v32 = vld [vmem:[#allocation3 + $0xf4] sm:$0x1]  ;;  %v1478_v15 = vmax.f32 %v1158_v6, 0.0  ;;  %v2159_v22 = vmax.f32 %v2111_v27, %v2135_v42  ;;  %v1726_v33 = vmax.f32 %v1713_v36, %v1720_v37 }
 0x1bc   :  { %v1711_v7 = vld [vmem:[#allocation2 + $0x270] sm:$0xff]  ;;  %1622 = vst.msk [vmem:[#allocation2 + $0x2a0] sm:$0xff] %vm1537_vm4, %v1477_v31  ;;  %1732 = vst.msk [vmem:[#allocation3 + $0x140] sm:$0xff] %vm1537_vm4, %v1725_v51  ;;  %v1718_v26 = vld [vmem:[#allocation2 + $0x288] sm:$0xff]  ;;  %v12833_v17 = vpop.f32.mrb[88].mxu0 }
 0x1bd   :  { %2089 = vst.msk [vmem:[#allocation4 + $0xc0] sm:$0x1] %vm2076_vm5, %v2064_v25  ;;  %v2231_v11 = vld [vmem:[#allocation3 + $0xf5] sm:$0x1]  ;;  %v2401_v45 = vld [vmem:[#allocation3 + $0x128] sm:$0x1]  ;;  %v1724_v56 = vmax.f32 %v1711_v7, %v1718_v26  ;;  %v1179_v37 = vadd.f32 %v15211_v48, %v12833_v17 }
 0x1be   :  { %1625 = vst.msk [vmem:[#allocation2 + $0x2b8] sm:$0xff] %vm1537_vm4, %v1480_v47  ;;  %v2425_v0 = vld [vmem:[#allocation3 + $0x129] sm:$0x1]  ;;  %v2255_v43 = vmax.f32 %v2207_v32, %v2231_v11  ;;  %1623 = vst.msk [vmem:[#allocation2 + $0x2a8] sm:$0xff] %vm1537_vm4, %v1478_v15  ;;  %v2497_v31 = vld [vmem:[#allocation3 + $0x12a] sm:$0x1] }
 0x1bf   :  { %v2449_v49 = vmax.f32 %v2401_v45, %v2425_v0  ;;  %v2521_v6 = vld [vmem:[#allocation3 + $0x12b] sm:$0x1]  ;;  %2183 = vst.msk [vmem:[#allocation4 + $0xa1] sm:$0x1] %vm2076_vm5, %v2159_v22  ;;  %v1170_v25 = vpop.f32.mrb[89].mxu0  ;;  %v15249_v47 = vld [vmem:[#allocation4 + $0x34] sm:$0xff] }
 0x1c0   :  { %1733 = vst.msk [vmem:[#allocation3 + $0x148] sm:$0xff] %vm1537_vm4, %v1726_v33  ;;  %v2545_v27 = vmax.f32 %v2497_v31, %v2521_v6  ;;  %v2593_v51 = vld [vmem:[#allocation3 + $0x12c] sm:$0x1]  ;;  %v2617_v36 = vld [vmem:[#allocation3 + $0x12d] sm:$0x1]  ;;  %17648 = vst [vmem:[#allocation35_spill] sm:$0xff] %v15249_v47  ;;  %v1171_v32 = vadd.f32 %v15211_v48, %v1170_v25 }
 0x1c1   :  { %2279 = vst.msk [vmem:[#allocation4 + $0xa2] sm:$0x1] %vm2076_vm5, %v2255_v43  ;;  %v12834_v7 = vpop.f32.mrb[90].mxu0  ;;  %2473 = vst.msk [vmem:[#allocation4 + $0xc4] sm:$0x1] %vm2076_vm5, %v2449_v49  ;;  %v2641_v15 = vmax.f32 %v2593_v51, %v2617_v36  ;;  %v1483_v33 = vmax.f32 %v1179_v37, 0.0 }
 0x1c2   :  { %1731 = vst.msk [vmem:[#allocation3 + $0x138] sm:$0xff] %vm1537_vm4, %v1724_v56  ;;  %v2689_v17 = vld [vmem:[#allocation3 + $0x12e] sm:$0x1]  ;;  %v2713_v22 = vld [vmem:[#allocation3 + $0x12f] sm:$0x1]  ;;  %v1182_v26 = vadd.f32 %v15211_v48, %v12834_v7  ;;  %v1173_v45 = vpop.f32.mrb[91].mxu0 }
 0x1c3   :  { %2569 = vst.msk [vmem:[#allocation4 + $0xc5] sm:$0x1] %vm2076_vm5, %v2545_v27  ;;  %v2737_v0 = vmax.f32 %v2689_v17, %v2713_v22  ;;  %v2785_v43 = vld [vmem:[#allocation3 + $0x130] sm:$0x1]  ;;  %v2809_v56 = vld [vmem:[#allocation3 + $0x131] sm:$0x1]  ;;  %v1174_v6 = vadd.f32 %v15211_v48, %v1173_v45 }
 0x1c4   :  { %v1481_v31 = vmax.f32 %v1171_v32, 0.0  ;;  %2665 = vst.msk [vmem:[#allocation4 + $0xc6] sm:$0x1] %vm2076_vm5, %v2641_v15  ;;  %v2833_v49 = vmax.f32 %v2785_v43, %v2809_v56  ;;  %v2881_v25 = vld [vmem:[#allocation3 + $0x132] sm:$0x1]  ;;  %v1738_v36 = vld [vmem:[#allocation2 + $0x2a0] sm:$0xff] }
 0x1c5   :  { %v2905_v51 = vld [vmem:[#allocation3 + $0x133] sm:$0x1]  ;;  %1628 = vst.msk [vmem:[#allocation2 + $0x2d0] sm:$0xff] %vm1537_vm4, %v1483_v33  ;;  %v1484_v37 = vmax.f32 %v1182_v26, 0.0  ;;  %v2977_v11 = vld [vmem:[#allocation3 + $0x134] sm:$0x1] }
 0x1c6   :  { %2761 = vst.msk [vmem:[#allocation4 + $0xc7] sm:$0x1] %vm2076_vm5, %v2737_v0  ;;  %v2929_v7 = vmax.f32 %v2881_v25, %v2905_v51  ;;  %v3001_v27 = vld [vmem:[#allocation3 + $0x135] sm:$0x1]  ;;  %v1745_v17 = vld [vmem:[#allocation2 + $0x2b8] sm:$0xff]  ;;  %v1482_v32 = vmax.f32 %v1174_v6, 0.0 }
 0x1c7   :  { %1626 = vst.msk [vmem:[#allocation2 + $0x2c0] sm:$0xff] %vm1537_vm4, %v1481_v31  ;;  %v2402_v22 = vld [vmem:[#allocation3 + $0x140] sm:$0x1]  ;;  %v2426_v45 = vld [vmem:[#allocation3 + $0x141] sm:$0x1]  ;;  %v3025_v15 = vmax.f32 %v2977_v11, %v3001_v27  ;;  %v1751_v43 = vmax.f32 %v1738_v36, %v1745_v17  ;;  %1629 = vst.msk [vmem:[#allocation2 + $0x2d8] sm:$0xff] %vm1537_vm4, %v1484_v37 }
 0x1c8   :  { %2857 = vst.msk [vmem:[#allocation4 + $0xc8] sm:$0x1] %vm2076_vm5, %v2833_v49  ;;  %v2450_v56 = vmax.f32 %v2402_v22, %v2426_v45  ;;  %v2498_v33 = vld [vmem:[#allocation3 + $0x142] sm:$0x1]  ;;  %v2522_v26 = vld [vmem:[#allocation3 + $0x143] sm:$0x1] }
 0x1c9   :  { %2953 = vst.msk [vmem:[#allocation4 + $0xc9] sm:$0x1] %vm2076_vm5, %v2929_v7  ;;  %v12837_v0 = vpop.f32.mrb[92].mxu0  ;;  %v2546_v25 = vmax.f32 %v2498_v33, %v2522_v26  ;;  %v2594_v51 = vld [vmem:[#allocation3 + $0x144] sm:$0x1]  ;;  %v1739_v42 = vld [vmem:[#allocation2 + $0x2a8] sm:$0xff] }
 0x1ca   :  { %1627 = vst.msk [vmem:[#allocation2 + $0x2c8] sm:$0xff] %vm1537_vm4, %v1482_v32  ;;  %v2618_v31 = vld [vmem:[#allocation3 + $0x145] sm:$0x1]  ;;  %1758 = vst.msk [vmem:[#allocation3 + $0x150] sm:$0xff] %vm1537_vm4, %v1751_v43  ;;  %v1195_v11 = vadd.f32 %v15211_v48, %v12837_v0  ;;  %v1186_v6 = vpop.f32.mrb[93].mxu0 }
 0x1cb   :  { %3049 = vst.msk [vmem:[#allocation4 + $0xca] sm:$0x1] %vm2076_vm5, %v3025_v15  ;;  %v2114_v49 = vld [vmem:[#allocation3 + $0x13a] sm:$0x1]  ;;  %v2138_v36 = vld [vmem:[#allocation3 + $0x13b] sm:$0x1]  ;;  %v2642_v37 = vmax.f32 %v2594_v51, %v2618_v31  ;;  %v1187_v7 = vadd.f32 %v15211_v48, %v1186_v6 }
 0x1cc   :  { %2474 = vst.msk [vmem:[#allocation4 + $0xd4] sm:$0x1] %vm2076_vm5, %v2450_v56  ;;  %v12838_v27 = vpop.f32.mrb[94].mxu0  ;;  %v2162_v17 = vmax.f32 %v2114_v49, %v2138_v36  ;;  %v2210_v32 = vld [vmem:[#allocation3 + $0x13c] sm:$0x1]  ;;  %v1487_v45 = vmax.f32 %v1195_v11, 0.0 }
 0x1cd   :  { %v2234_v22 = vld [vmem:[#allocation3 + $0x13d] sm:$0x1]  ;;  %2570 = vst.msk [vmem:[#allocation4 + $0xd5] sm:$0x1] %vm2076_vm5, %v2546_v25  ;;  %v1198_v15 = vadd.f32 %v15211_v48, %v12838_v27  ;;  %v1189_v43 = vpop.f32.mrb[95].mxu0  ;;  %v1485_v56 = vmax.f32 %v1187_v7, 0.0 }
 0x1ce   :  { %v2258_v33 = vmax.f32 %v2210_v32, %v2234_v22  ;;  %v2306_v26 = vld [vmem:[#allocation3 + $0x13e] sm:$0x1]  ;;  %v2330_v0 = vld [vmem:[#allocation3 + $0x13f] sm:$0x1]  ;;  %2666 = vst.msk [vmem:[#allocation4 + $0xd6] sm:$0x1] %vm2076_vm5, %v2642_v37  ;;  %v1190_v51 = vadd.f32 %v15211_v48, %v1189_v43 }
 0x1cf   :  { %2186 = vst.msk [vmem:[#allocation4 + $0xd1] sm:$0x1] %vm2076_vm5, %v2162_v17  ;;  %v2354_v31 = vmax.f32 %v2306_v26, %v2330_v0  ;;  %v2690_v6 = vld [vmem:[#allocation3 + $0x146] sm:$0x1]  ;;  %v2714_v49 = vld [vmem:[#allocation3 + $0x147] sm:$0x1] }
 0x1d0   :  { %v1746_v36 = vld [vmem:[#allocation2 + $0x2c0] sm:$0xff]  ;;  %1632 = vst.msk [vmem:[#allocation2 + $0x2f0] sm:$0xff] %vm1537_vm4, %v1487_v45  ;;  %v1488_v25 = vmax.f32 %v1198_v15, 0.0  ;;  %v2738_v11 = vmax.f32 %v2690_v6, %v2714_v49  ;;  %v2786_v27 = vld [vmem:[#allocation3 + $0x148] sm:$0x1]  ;;  %1630 = vst.msk [vmem:[#allocation2 + $0x2e0] sm:$0xff] %vm1537_vm4, %v1485_v56 }
 0x1d1   :  { %2282 = vst.msk [vmem:[#allocation4 + $0xd2] sm:$0x1] %vm2076_vm5, %v2258_v33  ;;  %v2810_v32 = vld [vmem:[#allocation3 + $0x149] sm:$0x1]  ;;  %v1752_v22 = vmax.f32 %v1739_v42, %v1746_v36  ;;  %v1486_v37 = vmax.f32 %v1190_v51, 0.0  ;;  %v15284_v43 = vld [vmem:[#allocation4 + $0x51] sm:$0xff] }
 0x1d2   :  { %2378 = vst.msk [vmem:[#allocation4 + $0xd3] sm:$0x1] %vm2076_vm5, %v2354_v31  ;;  %v2834_v7 = vmax.f32 %v2786_v27, %v2810_v32  ;;  %v2017_v17 = vld [vmem:[#allocation3 + $0x138] sm:$0x1]  ;;  %17649 = vst [vmem:[#allocation36_spill] sm:$0xff] %v15284_v43  ;;  %v1740_v26 = vld [vmem:[#allocation2 + $0x2b0] sm:$0xff] }
 0x1d3   :  { %v1747_v0 = vld [vmem:[#allocation2 + $0x2c8] sm:$0xff]  ;;  %1633 = vst.msk [vmem:[#allocation2 + $0x2f8] sm:$0xff] %vm1537_vm4, %v1488_v25  ;;  %v2041_v45 = vld [vmem:[#allocation3 + $0x139] sm:$0x1]  ;;  %1759 = vst.msk [vmem:[#allocation3 + $0x158] sm:$0xff] %vm1537_vm4, %v1752_v22  ;;  %v12841_v42 = vpop.f32.mrb[96].mxu0 }
 0x1d4   :  { %2762 = vst.msk [vmem:[#allocation4 + $0xd7] sm:$0x1] %vm2076_vm5, %v2738_v11  ;;  %v1753_v15 = vmax.f32 %v1740_v26, %v1747_v0  ;;  %2858 = vst.msk [vmem:[#allocation4 + $0xd8] sm:$0x1] %vm2076_vm5, %v2834_v7  ;;  %v2115_v33 = vld [vmem:[#allocation3 + $0x152] sm:$0x1]  ;;  %v2065_v51 = vmax.f32 %v2017_v17, %v2041_v45  ;;  %v1211_v6 = vadd.f32 %v15211_v48, %v12841_v42 }
 0x1d5   :  { %1631 = vst.msk [vmem:[#allocation2 + $0x2e8] sm:$0xff] %vm1537_vm4, %v1486_v37  ;;  %v2139_v56 = vld [vmem:[#allocation3 + $0x153] sm:$0x1]  ;;  %v15291_v31 = vld [vmem:[#allocation4 + $0x41] sm:$0xff]  ;;  %v1202_v49 = vpop.f32.mrb[97].mxu0  ;;  %v1766_v32 = vld [vmem:[#allocation2 + $0x2d8] sm:$0xff] }
 0x1d6   :  { %17650 = vst [vmem:[#allocation37_spill] sm:$0xff] %v15291_v31  ;;  %v2163_v36 = vmax.f32 %v2115_v33, %v2139_v56  ;;  %v2211_v25 = vld [vmem:[#allocation3 + $0x154] sm:$0x1]  ;;  %v2235_v11 = vld [vmem:[#allocation3 + $0x155] sm:$0x1]  ;;  %1760 = vst.msk [vmem:[#allocation3 + $0x160] sm:$0xff] %vm1537_vm4, %v1753_v15  ;;  %v1203_v22 = vadd.f32 %v15211_v48, %v1202_v49 }
 0x1d7   :  { %v12842_v37 = vpop.f32.mrb[98].mxu0  ;;  %v2259_v7 = vmax.f32 %v2211_v25, %v2235_v11  ;;  %v2307_v26 = vld [vmem:[#allocation3 + $0x156] sm:$0x1]  ;;  %v2331_v17 = vld [vmem:[#allocation3 + $0x157] sm:$0x1]  ;;  %v1491_v0 = vmax.f32 %v1211_v6, 0.0 }
 0x1d8   :  { %2090 = vst.msk [vmem:[#allocation4 + $0xd0] sm:$0x1] %vm2076_vm5, %v2065_v51  ;;  %v1214_v45 = vadd.f32 %v15211_v48, %v12842_v37  ;;  %v1205_v42 = vpop.f32.mrb[99].mxu0  ;;  %2187 = vst.msk [vmem:[#allocation4 + $0xe1] sm:$0x1] %vm2076_vm5, %v2163_v36  ;;  %v2355_v33 = vmax.f32 %v2307_v26, %v2331_v17  ;;  %v1773_v28 = vld [vmem:[#allocation2 + $0x2f0] sm:$0xff] }
 0x1d9   :  { %v2018_v56 = vld [vmem:[#allocation3 + $0x150] sm:$0x1]  ;;  %v2042_v27 = vld [vmem:[#allocation3 + $0x151] sm:$0x1]  ;;  %v1489_v62 = vmax.f32 %v1203_v22, 0.0  ;;  %v1206_v15 = vadd.f32 %v15211_v48, %v1205_v42  ;;  %v15305_v51 = vld [vmem:[#allocation4 + $0x64] sm:$0xff]  ;;  %v1779_v37 = vmax.f32 %v1766_v32, %v1773_v28 }
 0x1da   :  { %2283 = vst.msk [vmem:[#allocation4 + $0xe2] sm:$0x1] %vm2076_vm5, %v2259_v7  ;;  %v2066_v49 = vmax.f32 %v2018_v56, %v2042_v27  ;;  %v2882_v25 = vld [vmem:[#allocation3 + $0x14a] sm:$0x1]  ;;  %v2906_v11 = vld [vmem:[#allocation3 + $0x14b] sm:$0x1] }
 0x1db   :  { %17652 = vst [vmem:[#allocation39_spill] sm:$0xff] %v15305_v51  ;;  %v1765_v6 = vld [vmem:[#allocation2 + $0x2d0] sm:$0xff]  ;;  %v1767_v50 = vld [vmem:[#allocation2 + $0x2e0] sm:$0xff]  ;;  %1636 = vst.msk [vmem:[#allocation2 + $0x310] sm:$0xff] %vm1537_vm4, %v1491_v0  ;;  %v1492_v36 = vmax.f32 %v1214_v45, 0.0  ;;  %v2930_v22 = vmax.f32 %v2882_v25, %v2906_v11  ;;  %v1490_v27 = vmax.f32 %v1206_v15, 0.0 }
 0x1dc   :  { %v3192_v26 = vld [vmem:[#allocation4 + $0xc1] sm:$0xff]  ;;  %2379 = vst.msk [vmem:[#allocation4 + $0xe3] sm:$0x1] %vm2076_vm5, %v2355_v33  ;;  %v1774_v17 = vld [vmem:[#allocation2 + $0x2f8] sm:$0xff]  ;;  %2091 = vst.msk [vmem:[#allocation4 + $0xe0] sm:$0x1] %vm2076_vm5, %v2066_v49 }
 0x1dd   :  { %1634 = vst.msk [vmem:[#allocation2 + $0x300] sm:$0xff] %vm1537_vm4, %v1489_v62  ;;  %v2978_v7 = vld [vmem:[#allocation3 + $0x14c] sm:$0x1]  ;;  %v3002_v42 = vld [vmem:[#allocation3 + $0x14d] sm:$0x1]  ;;  %v15311_v56 = vld [vmem:[#allocation4 + $0x53] sm:$0xff]  ;;  %v1780_v28 = vmax.f32 %v1767_v50, %v1774_v17 }
 0x1de   :  { %17653 = vst [vmem:[#allocation40_spill] sm:$0xff] %v15311_v56  ;;  %1786 = vst.msk [vmem:[#allocation3 + $0x170] sm:$0xff] %vm1537_vm4, %v1779_v37  ;;  %v1772_v32 = vld [vmem:[#allocation2 + $0x2e8] sm:$0xff]  ;;  %v3193_v0 = vld [vmem:[#allocation4 + $0xd1] sm:$0xff]  ;;  %v3026_v33 = vmax.f32 %v2978_v7, %v3002_v42  ;;  %v12845_v15 = vpop.f32.mrb[100].mxu0 }
 0x1df   :  { %1637 = vst.msk [vmem:[#allocation2 + $0x318] sm:$0xff] %vm1537_vm4, %v1492_v36  ;;  %v2403_v45 = vld [vmem:[#allocation3 + $0x158] sm:$0x1]  ;;  %v1778_v25 = vmax.f32 %v1765_v6, %v1772_v32  ;;  %1635 = vst.msk [vmem:[#allocation2 + $0x308] sm:$0xff] %vm1537_vm4, %v1490_v27  ;;  %v3204_v62 = vpack.c.bf16 %v3193_v0, %v3192_v26  ;;  %v2427_v49 = vld [vmem:[#allocation3 + $0x159] sm:$0x1]  ;;  %v1227_v50 = vadd.f32 %v15211_v48, %v12845_v15 }
 0x1e0   :  { %2954 = vst.msk [vmem:[#allocation4 + $0xd9] sm:$0x1] %vm2076_vm5, %v2930_v22  ;;  %v2499_v11 = vld [vmem:[#allocation3 + $0x15a] sm:$0x1]  ;;  %v1218_v37 = vpop.f32.mrb[101].mxu0  ;;  %v2451_v36 = vmax.f32 %v2403_v45, %v2427_v49  ;;  %v3487_v19 = vld [vmem:[#allocation4 + $0xc2] sm:$0xff] }
 0x1e1   :  { %v15317_v31 = vld [vmem:[#allocation4 + $0x54] sm:$0xff]  ;;  %1787 = vst.msk [vmem:[#allocation3 + $0x178] sm:$0xff] %vm1537_vm4, %v1780_v28  ;;  %v2595_v43 = vld [vmem:[#allocation3 + $0x15c] sm:$0x1]  ;;  %1785 = vst.msk [vmem:[#allocation3 + $0x168] sm:$0xff] %vm1537_vm4, %v1778_v25  ;;  %12899 = vmatprep.mubr.msk.bf16.mxu1 %vm1537_vm4, %v3204_v62  ;;  %v1219_v22 = vadd.f32 %v15211_v48, %v1218_v37  ;;  %v12846_v27 = vpop.f32.mrb[102].mxu0 }
 0x1e2   :  { %17654 = vst [vmem:[#allocation41_spill] sm:$0xff] %v15317_v31  ;;  %v2523_v17 = vld [vmem:[#allocation3 + $0x15b] sm:$0x1]  ;;  %3050 = vst.msk [vmem:[#allocation4 + $0xda] sm:$0x1] %vm2076_vm5, %v3026_v33  ;;  %v1495_v32 = vmax.f32 %v1227_v50, 0.0  ;;  %v1230_v0 = vadd.f32 %v15211_v48, %v12846_v27 }
 0x1e3   :  { %v2547_v7 = vmax.f32 %v2499_v11, %v2523_v17  ;;  %v2619_v42 = vld [vmem:[#allocation3 + $0x15d] sm:$0x1]  ;;  %v2691_v28 = vld [vmem:[#allocation3 + $0x15e] sm:$0x1]  ;;  %v1221_v45 = vpop.f32.mrb[103].mxu0  ;;  %v1493_v26 = vmax.f32 %v1219_v22, 0.0 }
 0x1e4   :  { %2475 = vst.msk [vmem:[#allocation4 + $0xe4] sm:$0x1] %vm2076_vm5, %v2451_v36  ;;  %v2643_v33 = vmax.f32 %v2595_v43, %v2619_v42  ;;  %v2715_v15 = vld [vmem:[#allocation3 + $0x15f] sm:$0x1]  ;;  %v2787_v49 = vld [vmem:[#allocation3 + $0x160] sm:$0x1]  ;;  %v1222_v25 = vadd.f32 %v15211_v48, %v1221_v45 }
 0x1e5   :  { %2571 = vst.msk [vmem:[#allocation4 + $0xe5] sm:$0x1] %vm2076_vm5, %v2547_v7  ;;  %v2739_v62 = vmax.f32 %v2691_v28, %v2715_v15  ;;  %v2811_v37 = vld [vmem:[#allocation3 + $0x161] sm:$0x1]  ;;  %v2883_v6 = vld [vmem:[#allocation3 + $0x162] sm:$0x1] }
 0x1e6   :  { %v1792_v11 = vld [vmem:[#allocation2 + $0x300] sm:$0xff]  ;;  %1640 = vst.msk [vmem:[#allocation2 + $0x330] sm:$0xff] %vm1537_vm4, %v1495_v32  ;;  %v1496_v50 = vmax.f32 %v1230_v0, 0.0  ;;  %v2835_v17 = vmax.f32 %v2787_v49, %v2811_v37  ;;  %v1799_v36 = vld [vmem:[#allocation2 + $0x318] sm:$0xff]  ;;  %1638 = vst.msk [vmem:[#allocation2 + $0x320] sm:$0xff] %vm1537_vm4, %v1493_v26  ;;  %v1494_v43 = vmax.f32 %v1222_v25, 0.0 }
 0x1e7   :  { %2667 = vst.msk [vmem:[#allocation4 + $0xe6] sm:$0x1] %vm2076_vm5, %v2643_v33  ;;  %v2907_v27 = vld [vmem:[#allocation3 + $0x163] sm:$0x1]  ;;  %v2404_v22 = vld [vmem:[#allocation3 + $0x170] sm:$0x1]  ;;  %v1805_v28 = vmax.f32 %v1792_v11, %v1799_v36 }
 0x1e8   :  { %v2428_v42 = vld [vmem:[#allocation3 + $0x171] sm:$0x1]  ;;  %2763 = vst.msk [vmem:[#allocation4 + $0xe7] sm:$0x1] %vm2076_vm5, %v2739_v62  ;;  %v2931_v7 = vmax.f32 %v2883_v6, %v2907_v27  ;;  %v2500_v15 = vld [vmem:[#allocation3 + $0x172] sm:$0x1] }
 0x1e9   :  { %1641 = vst.msk [vmem:[#allocation2 + $0x338] sm:$0xff] %vm1537_vm4, %v1496_v50  ;;  %v2452_v45 = vmax.f32 %v2404_v22, %v2428_v42  ;;  %v2524_v32 = vld [vmem:[#allocation3 + $0x173] sm:$0x1]  ;;  %1639 = vst.msk [vmem:[#allocation2 + $0x328] sm:$0xff] %vm1537_vm4, %v1494_v43  ;;  %v12849_v0 = vpop.f32.mrb[104].mxu0 }
 0x1ea   :  { %2859 = vst.msk [vmem:[#allocation4 + $0xe8] sm:$0x1] %vm2076_vm5, %v2835_v17  ;;  %v2548_v33 = vmax.f32 %v2500_v15, %v2524_v32  ;;  %v2596_v49 = vld [vmem:[#allocation3 + $0x174] sm:$0x1]  ;;  %v2620_v26 = vld [vmem:[#allocation3 + $0x175] sm:$0x1]  ;;  %v1243_v6 = vadd.f32 %v15211_v48, %v12849_v0 }
 0x1eb   :  { %2955 = vst.msk [vmem:[#allocation4 + $0xe9] sm:$0x1] %vm2076_vm5, %v2931_v7  ;;  %v1234_v25 = vpop.f32.mrb[105].mxu0  ;;  %v2116_v62 = vld [vmem:[#allocation3 + $0x16a] sm:$0x1]  ;;  %v2644_v11 = vmax.f32 %v2596_v49, %v2620_v26 }
 0x1ec   :  { %1812 = vst.msk [vmem:[#allocation3 + $0x180] sm:$0xff] %vm1537_vm4, %v1805_v28  ;;  %v2140_v37 = vld [vmem:[#allocation3 + $0x16b] sm:$0x1]  ;;  %v1235_v50 = vadd.f32 %v15211_v48, %v1234_v25  ;;  %v12850_v17 = vpop.f32.mrb[106].mxu0  ;;  %v2212_v36 = vld [vmem:[#allocation3 + $0x16c] sm:$0x1] }
 0x1ed   :  { %2476 = vst.msk [vmem:[#allocation4 + $0xf4] sm:$0x1] %vm2076_vm5, %v2452_v45  ;;  %v2164_v27 = vmax.f32 %v2116_v62, %v2140_v37  ;;  %v2236_v43 = vld [vmem:[#allocation3 + $0x16d] sm:$0x1]  ;;  %2572 = vst.msk [vmem:[#allocation4 + $0xf5] sm:$0x1] %vm2076_vm5, %v2548_v33  ;;  %v1246_v42 = vadd.f32 %v15211_v48, %v12850_v17 }
 0x1ee   :  { %v1499_v22 = vmax.f32 %v1243_v6, 0.0  ;;  %v1237_v7 = vpop.f32.mrb[107].mxu0  ;;  %v2260_v28 = vmax.f32 %v2212_v36, %v2236_v43  ;;  %v2308_v15 = vld [vmem:[#allocation3 + $0x16e] sm:$0x1]  ;;  %v2332_v32 = vld [vmem:[#allocation3 + $0x16f] sm:$0x1] }
 0x1ef   :  { %2668 = vst.msk [vmem:[#allocation4 + $0xf6] sm:$0x1] %vm2076_vm5, %v2644_v11  ;;  %v1793_v0 = vld [vmem:[#allocation2 + $0x308] sm:$0xff]  ;;  %v1497_v45 = vmax.f32 %v1235_v50, 0.0  ;;  %v1238_v49 = vadd.f32 %v15211_v48, %v1237_v7  ;;  %2188 = vst.msk [vmem:[#allocation4 + $0xf1] sm:$0x1] %vm2076_vm5, %v2164_v27  ;;  %v2356_v26 = vmax.f32 %v2308_v15, %v2332_v32 }
 0x1f0   :  { %v2692_v25 = vld [vmem:[#allocation3 + $0x176] sm:$0x1]  ;;  %v2716_v62 = vld [vmem:[#allocation3 + $0x177] sm:$0x1]  ;;  %v1800_v33 = vld [vmem:[#allocation2 + $0x320] sm:$0xff]  ;;  %1644 = vst.msk [vmem:[#allocation2 + $0x350] sm:$0xff] %vm1537_vm4, %v1499_v22 }
 0x1f1   :  { %v15350_v37 = vld [vmem:[#allocation4 + $0x71] sm:$0xff]  ;;  %v1500_v6 = vmax.f32 %v1246_v42, 0.0  ;;  %2284 = vst.msk [vmem:[#allocation4 + $0xf2] sm:$0x1] %vm2076_vm5, %v2260_v28  ;;  %v2740_v17 = vmax.f32 %v2692_v25, %v2716_v62  ;;  %v2812_v11 = vld [vmem:[#allocation3 + $0x179] sm:$0x1]  ;;  %v1806_v50 = vmax.f32 %v1793_v0, %v1800_v33 }
 0x1f2   :  { %17655 = vst [vmem:[#allocation42_spill] sm:$0xff] %v15350_v37  ;;  %v2788_v36 = vld [vmem:[#allocation3 + $0x178] sm:$0x1]  ;;  %v1794_v43 = vld [vmem:[#allocation2 + $0x310] sm:$0xff]  ;;  %1642 = vst.msk [vmem:[#allocation2 + $0x340] sm:$0xff] %vm1537_vm4, %v1497_v45  ;;  %v1498_v7 = vmax.f32 %v1238_v49, 0.0 }
 0x1f3   :  { %2380 = vst.msk [vmem:[#allocation4 + $0xf3] sm:$0x1] %vm2076_vm5, %v2356_v26  ;;  %v2836_v27 = vmax.f32 %v2788_v36, %v2812_v11  ;;  %v15356_v15 = vld [vmem:[#allocation4 + $0xd0] sm:$0xff]  ;;  %v2019_v32 = vld [vmem:[#allocation3 + $0x168] sm:$0x1]  ;;  %v15360_v42 = vld [vmem:[#allocation4 + $0xe0] sm:$0xff] }
 0x1f4   :  { %v1801_v31 = vld [vmem:[#allocation2 + $0x328] sm:$0xff]  ;;  %1645 = vst.msk [vmem:[#allocation2 + $0x358] sm:$0xff] %vm1537_vm4, %v1500_v6  ;;  %1813 = vst.msk [vmem:[#allocation3 + $0x188] sm:$0xff] %vm1537_vm4, %v1806_v50  ;;  %v12853_v0 = vpop.f32.mrb[108].mxu0  ;;  %v2117_v45 = vld [vmem:[#allocation3 + $0x182] sm:$0x1] }
 0x1f5   :  { %2764 = vst.msk [vmem:[#allocation4 + $0xf7] sm:$0x1] %vm2076_vm5, %v2740_v17  ;;  %v2043_v22 = vld [vmem:[#allocation3 + $0x169] sm:$0x1]  ;;  %v1807_v28 = vmax.f32 %v1794_v43, %v1801_v31  ;;  %2860 = vst.msk [vmem:[#allocation4 + $0xf8] sm:$0x1] %vm2076_vm5, %v2836_v27  ;;  %v1259_v33 = vadd.f32 %v15211_v48, %v12853_v0 }
 0x1f6   :  { %1643 = vst.msk [vmem:[#allocation2 + $0x348] sm:$0xff] %vm1537_vm4, %v1498_v7  ;;  %v2141_v49 = vld [vmem:[#allocation3 + $0x183] sm:$0x1]  ;;  %v2067_v26 = vmax.f32 %v2019_v32, %v2043_v22  ;;  %v1250_v6 = vpop.f32.mrb[109].mxu0  ;;  %v2213_v36 = vld [vmem:[#allocation3 + $0x184] sm:$0x1] }
 0x1f7   :  { %v15367_v62 = vld [vmem:[#allocation4 + $0x61] sm:$0xff]  ;;  %v2165_v17 = vmax.f32 %v2117_v45, %v2141_v49  ;;  %v1820_v50 = vld [vmem:[#allocation2 + $0x338] sm:$0xff]  ;;  %1814 = vst.msk [vmem:[#allocation3 + $0x190] sm:$0xff] %vm1537_vm4, %v1807_v28  ;;  %v1251_v7 = vadd.f32 %v15211_v48, %v1250_v6  ;;  %v12854_v27 = vpop.f32.mrb[110].mxu0  ;;  %v1503_v0 = vmax.f32 %v1259_v33, 0.0  ;;  %v1819_v34 = vld [vmem:[#allocation2 + $0x330] sm:$0xff] }
 0x1f8   :  { %17656 = vst [vmem:[#allocation43_spill] sm:$0xff] %v15367_v62  ;;  %v2237_v11 = vld [vmem:[#allocation3 + $0x185] sm:$0x1]  ;;  %v2979_v31 = vld [vmem:[#allocation3 + $0x164] sm:$0x1]  ;;  %v1262_v45 = vadd.f32 %v15211_v48, %v12854_v27  ;;  %v1253_v49 = vpop.f32.mrb[111].mxu0 }
 0x1f9   :  { %v2261_v32 = vmax.f32 %v2213_v36, %v2237_v11  ;;  %v2309_v22 = vld [vmem:[#allocation3 + $0x186] sm:$0x1]  ;;  %v2333_v25 = vld [vmem:[#allocation3 + $0x187] sm:$0x1]  ;;  %2092 = vst.msk [vmem:[#allocation4 + $0xf0] sm:$0x1] %vm2076_vm5, %v2067_v26  ;;  %v1254_v28 = vadd.f32 %v15211_v48, %v1253_v49 }
 0x1fa   :  { %2189 = vst.msk [vmem:[#allocation4 + $0x101] sm:$0x1] %vm2076_vm5, %v2165_v17  ;;  %v2357_v51 = vmax.f32 %v2309_v22, %v2333_v25  ;;  %v2020_v47 = vld [vmem:[#allocation3 + $0x180] sm:$0x1]  ;;  %v2044_v43 = vld [vmem:[#allocation3 + $0x181] sm:$0x1] }
 0x1fb   :  { %v1827_v62 = vld [vmem:[#allocation2 + $0x350] sm:$0xff]  ;;  %v1501_v37 = vmax.f32 %v1251_v7, 0.0  ;;  %2285 = vst.msk [vmem:[#allocation4 + $0x102] sm:$0x1] %vm2076_vm5, %v2261_v32  ;;  %v2068_v6 = vmax.f32 %v2020_v47, %v2044_v43  ;;  %v2884_v36 = vld [vmem:[#allocation3 + $0x17a] sm:$0x1] }
 0x1fc   :  { %v2908_v11 = vld [vmem:[#allocation3 + $0x17b] sm:$0x1]  ;;  %v1833_v26 = vmax.f32 %v1820_v50, %v1827_v62  ;;  %v1821_v33 = vld [vmem:[#allocation2 + $0x340] sm:$0xff]  ;;  %1648 = vst.msk [vmem:[#allocation2 + $0x370] sm:$0xff] %vm1537_vm4, %v1503_v0  ;;  %v1504_v27 = vmax.f32 %v1262_v45, 0.0  ;;  %v1502_v49 = vmax.f32 %v1254_v28, 0.0 }
 0x1fd   :  { %v3194_v56 = vld [vmem:[#allocation4 + $0xe1] sm:$0xff]  ;;  %2381 = vst.msk [vmem:[#allocation4 + $0x103] sm:$0x1] %vm2076_vm5, %v2357_v51  ;;  %v2932_v25 = vmax.f32 %v2884_v36, %v2908_v11  ;;  %v2980_v17 = vld [vmem:[#allocation3 + $0x17c] sm:$0x1]  ;;  %v3195_v51 = vld [vmem:[#allocation4 + $0xf1] sm:$0xff] }
 0x1fe   :  { %v3003_v22 = vld [vmem:[#allocation3 + $0x165] sm:$0x1]  ;;  %v1828_v7 = vld [vmem:[#allocation2 + $0x358] sm:$0xff]  ;;  %1646 = vst.msk [vmem:[#allocation2 + $0x360] sm:$0xff] %vm1537_vm4, %v1501_v37  ;;  %1840 = vst.msk [vmem:[#allocation3 + $0x1a0] sm:$0xff] %vm1537_vm4, %v1833_v26  ;;  %v3205_v37 = vpack.c.bf16 %v3195_v51, %v3194_v56  ;;  %v12857_v28 = vpop.f32.mrb[112].mxu0 }
 0x1ff   :  { %2093 = vst.msk [vmem:[#allocation4 + $0x100] sm:$0x1] %vm2076_vm5, %v2068_v6  ;;  %v3004_v47 = vld [vmem:[#allocation3 + $0x17d] sm:$0x1]  ;;  %v3027_v43 = vmax.f32 %v2979_v31, %v3003_v22  ;;  %v15383_v32 = vld [vmem:[#allocation4 + $0xe1] sm:$0xff]  ;;  %v1834_v62 = vmax.f32 %v1821_v33, %v1828_v7  ;;  %v15390_v11 = vld [vmem:[#allocation4 + $0xf1] sm:$0xff]  ;;  %v1275_v26 = vadd.f32 %v15211_v48, %v12857_v28 }
 0x200   :  { %17657 = vst [vmem:[#allocation44_spill] sm:$0xff] %v15383_v32  ;;  %v1826_v50 = vld [vmem:[#allocation2 + $0x348] sm:$0xff]  ;;  %1649 = vst.msk [vmem:[#allocation2 + $0x378] sm:$0xff] %vm1537_vm4, %v1504_v27  ;;  %v3028_v45 = vmax.f32 %v2980_v17, %v3004_v47  ;;  %v1266_v33 = vpop.f32.mrb[113].mxu0  ;;  %12900 = vmatmul.mubr.msk.bf16.gmra.mrb[12].mxu1 %vm1537_vm4, %v3205_v37 }
 0x201   :  { %v2405_v0 = vld [vmem:[#allocation3 + $0x188] sm:$0x1]  ;;  %2956 = vst.msk [vmem:[#allocation4 + $0xf9] sm:$0x1] %vm2076_vm5, %v2932_v25  ;;  %v1832_v36 = vmax.f32 %v1819_v34, %v1826_v50  ;;  %v2429_v6 = vld [vmem:[#allocation3 + $0x189] sm:$0x1]  ;;  %v1267_v56 = vadd.f32 %v15211_v48, %v1266_v33 }
 0x202   :  { %1647 = vst.msk [vmem:[#allocation2 + $0x368] sm:$0xff] %vm1537_vm4, %v1502_v49  ;;  %v2501_v31 = vld [vmem:[#allocation3 + $0x18a] sm:$0x1]  ;;  %17658 = vst [vmem:[#allocation45_spill] sm:$0xff] %v15390_v11  ;;  %v2453_v27 = vmax.f32 %v2405_v0, %v2429_v6  ;;  %v2525_v22 = vld [vmem:[#allocation3 + $0x18b] sm:$0x1] }
 0x203   :  { %3051 = vst.msk [vmem:[#allocation4 + $0xea] sm:$0x1] %vm2076_vm5, %v3027_v43  ;;  %v2597_v25 = vld [vmem:[#allocation3 + $0x18c] sm:$0x1]  ;;  %3052 = vst.msk [vmem:[#allocation4 + $0xfa] sm:$0x1] %vm2076_vm5, %v3028_v45  ;;  %v2549_v7 = vmax.f32 %v2501_v31, %v2525_v22 }
 0x204   :  { %1841 = vst.msk [vmem:[#allocation3 + $0x1a8] sm:$0xff] %vm1537_vm4, %v1834_v62  ;;  %1839 = vst.msk [vmem:[#allocation3 + $0x198] sm:$0xff] %vm1537_vm4, %v1832_v36  ;;  %v12858_v17 = vpop.f32.mrb[114].mxu0  ;;  %v2621_v49 = vld [vmem:[#allocation3 + $0x18d] sm:$0x1]  ;;  %v1507_v43 = vmax.f32 %v1275_v26, 0.0 }
 0x205   :  { %v2693_v47 = vld [vmem:[#allocation3 + $0x18e] sm:$0x1]  ;;  %v1278_v62 = vadd.f32 %v15211_v48, %v12858_v17  ;;  %v1269_v50 = vpop.f32.mrb[115].mxu0  ;;  %2477 = vst.msk [vmem:[#allocation4 + $0x104] sm:$0x1] %vm2076_vm5, %v2453_v27  ;;  %v2645_v51 = vmax.f32 %v2597_v25, %v2621_v49  ;;  %v1505_v28 = vmax.f32 %v1267_v56, 0.0 }
 0x206   :  { %v2717_v0 = vld [vmem:[#allocation3 + $0x18f] sm:$0x1]  ;;  %v2789_v45 = vld [vmem:[#allocation3 + $0x190] sm:$0x1]  ;;  %v1270_v36 = vadd.f32 %v15211_v48, %v1269_v50  ;;  %2573 = vst.msk [vmem:[#allocation4 + $0x105] sm:$0x1] %vm2076_vm5, %v2549_v7 }
 0x207   :  { %v2741_v37 = vmax.f32 %v2693_v47, %v2717_v0  ;;  %v2813_v6 = vld [vmem:[#allocation3 + $0x191] sm:$0x1]  ;;  %v2885_v33 = vld [vmem:[#allocation3 + $0x192] sm:$0x1]  ;;  %v1846_v31 = vld [vmem:[#allocation2 + $0x360] sm:$0xff]  ;;  %1652 = vst.msk [vmem:[#allocation2 + $0x390] sm:$0xff] %vm1537_vm4, %v1507_v43 }
 0x208   :  { %v1508_v26 = vmax.f32 %v1278_v62, 0.0  ;;  %2669 = vst.msk [vmem:[#allocation4 + $0x106] sm:$0x1] %vm2076_vm5, %v2645_v51  ;;  %v2837_v22 = vmax.f32 %v2789_v45, %v2813_v6  ;;  %v2909_v17 = vld [vmem:[#allocation3 + $0x193] sm:$0x1]  ;;  %v1853_v27 = vld [vmem:[#allocation2 + $0x378] sm:$0xff] }
 0x209   :  { %1650 = vst.msk [vmem:[#allocation2 + $0x380] sm:$0xff] %vm1537_vm4, %v1505_v28  ;;  %v1506_v25 = vmax.f32 %v1270_v36, 0.0  ;;  %v2406_v56 = vld [vmem:[#allocation3 + $0x1a0] sm:$0x1]  ;;  %v2430_v49 = vld [vmem:[#allocation3 + $0x1a1] sm:$0x1]  ;;  %v2933_v7 = vmax.f32 %v2885_v33, %v2909_v17  ;;  %v1859_v47 = vmax.f32 %v1846_v31, %v1853_v27 }
 0x20a   :  { %2765 = vst.msk [vmem:[#allocation4 + $0x107] sm:$0x1] %vm2076_vm5, %v2741_v37  ;;  %v2454_v50 = vmax.f32 %v2406_v56, %v2430_v49  ;;  %v2502_v0 = vld [vmem:[#allocation3 + $0x1a2] sm:$0x1]  ;;  %v2526_v43 = vld [vmem:[#allocation3 + $0x1a3] sm:$0x1] }
 0x20b   :  { %1653 = vst.msk [vmem:[#allocation2 + $0x398] sm:$0xff] %vm1537_vm4, %v1508_v26  ;;  %1651 = vst.msk [vmem:[#allocation2 + $0x388] sm:$0xff] %vm1537_vm4, %v1506_v25  ;;  %v12861_v62 = vpop.f32.mrb[116].mxu0  ;;  %v2550_v51 = vmax.f32 %v2502_v0, %v2526_v43  ;;  %v2598_v45 = vld [vmem:[#allocation3 + $0x1a4] sm:$0x1]  ;;  %v15412_v36 = vld [vmem:[#allocation4 + $0xd3] sm:$0xff] }
 0x20c   :  { %2861 = vst.msk [vmem:[#allocation4 + $0x108] sm:$0x1] %vm2076_vm5, %v2837_v22  ;;  %v2622_v28 = vld [vmem:[#allocation3 + $0x1a5] sm:$0x1]  ;;  %2957 = vst.msk [vmem:[#allocation4 + $0x109] sm:$0x1] %vm2076_vm5, %v2933_v7  ;;  %v1291_v37 = vadd.f32 %v15211_v48, %v12861_v62 }
 0x20d   :  { %1866 = vst.msk [vmem:[#allocation3 + $0x1b0] sm:$0xff] %vm1537_vm4, %v1859_v47  ;;  %v1282_v6 = vpop.f32.mrb[117].mxu0  ;;  %v2118_v33 = vld [vmem:[#allocation3 + $0x19a] sm:$0x1]  ;;  %v2142_v31 = vld [vmem:[#allocation3 + $0x19b] sm:$0x1]  ;;  %v2646_v26 = vmax.f32 %v2598_v45, %v2622_v28 }
 0x20e   :  { %2478 = vst.msk [vmem:[#allocation4 + $0x114] sm:$0x1] %vm2076_vm5, %v2454_v50  ;;  %v15417_v22 = vld [vmem:[#allocation4 + $0xe3] sm:$0xff]  ;;  %v1283_v17 = vadd.f32 %v15211_v48, %v1282_v6  ;;  %v12862_v27 = vpop.f32.mrb[118].mxu0  ;;  %v2166_v25 = vmax.f32 %v2118_v33, %v2142_v31  ;;  %v2214_v56 = vld [vmem:[#allocation3 + $0x19c] sm:$0x1] }
 0x20f   :  { %v2238_v49 = vld [vmem:[#allocation3 + $0x19d] sm:$0x1]  ;;  %2574 = vst.msk [vmem:[#allocation4 + $0x115] sm:$0x1] %vm2076_vm5, %v2550_v51  ;;  %v1511_v47 = vmax.f32 %v1291_v37, 0.0  ;;  %v1294_v0 = vadd.f32 %v15211_v48, %v12862_v27  ;;  %v1285_v43 = vpop.f32.mrb[119].mxu0 }
 0x210   :  { %v2262_v62 = vmax.f32 %v2214_v56, %v2238_v49  ;;  %v2310_v50 = vld [vmem:[#allocation3 + $0x19e] sm:$0x1]  ;;  %v2334_v45 = vld [vmem:[#allocation3 + $0x19f] sm:$0x1]  ;;  %2670 = vst.msk [vmem:[#allocation4 + $0x116] sm:$0x1] %vm2076_vm5, %v2646_v26 }
 0x211   :  { %v1847_v28 = vld [vmem:[#allocation2 + $0x368] sm:$0xff]  ;;  %v1509_v6 = vmax.f32 %v1283_v17, 0.0  ;;  %v15428_v33 = vld [vmem:[%s17544_s2] ss:$0 sm:$0xff]  ;;  %2190 = vst.msk [vmem:[#allocation4 + $0x111] sm:$0x1] %vm2076_vm5, %v2166_v25  ;;  %v2358_v37 = vmax.f32 %v2310_v50, %v2334_v45 }
 0x212   :  { %v1286_v51 = vadd.f32 %v15428_v33, %v1285_v43  ;;  %v2694_v31 = vld [vmem:[#allocation3 + $0x1a6] sm:$0x1]  ;;  %v2718_v48 = vld [vmem:[#allocation3 + $0x1a7] sm:$0x1]  ;;  %1656 = vst.msk [vmem:[#allocation2 + $0x3b0] sm:$0xff] %vm1537_vm4, %v1511_v47  ;;  %v1512_v56 = vmax.f32 %v1294_v0, 0.0 }
 0x213   :  { %v1854_v27 = vld [vmem:[#allocation2 + $0x380] sm:$0xff]  ;;  %2286 = vst.msk [vmem:[#allocation4 + $0x112] sm:$0x1] %vm2076_vm5, %v2262_v62  ;;  %v2742_v26 = vmax.f32 %v2694_v31, %v2718_v48  ;;  %v2790_v17 = vld [vmem:[#allocation3 + $0x1a8] sm:$0x1]  ;;  %v1848_v34 = vld [vmem:[#allocation2 + $0x370] sm:$0xff] }
 0x214   :  { %v2814_v49 = vld [vmem:[#allocation3 + $0x1a9] sm:$0x1]  ;;  %v1860_v7 = vmax.f32 %v1847_v28, %v1854_v27  ;;  %1654 = vst.msk [vmem:[#allocation2 + $0x3a0] sm:$0xff] %vm1537_vm4, %v1509_v6  ;;  %v1510_v1 = vmax.f32 %v1286_v51, 0.0  ;;  %v15436_v43 = vld [vmem:[#allocation4 + $0xf0] sm:$0xff]  ;;  %1657 = vst.msk [vmem:[#allocation2 + $0x3b8] sm:$0xff] %vm1537_vm4, %v1512_v56 }
 0x215   :  { %2382 = vst.msk [vmem:[#allocation4 + $0x113] sm:$0x1] %vm2076_vm5, %v2358_v37  ;;  %v2838_v25 = vmax.f32 %v2790_v17, %v2814_v49  ;;  %v2021_v50 = vld [vmem:[#allocation3 + $0x198] sm:$0x1]  ;;  %v1855_v45 = vld [vmem:[#allocation2 + $0x388] sm:$0xff]  ;;  %v15440_v0 = vld [vmem:[#allocation4 + $0x100] sm:$0xff] }
 0x216   :  { %2766 = vst.msk [vmem:[#allocation4 + $0x117] sm:$0x1] %vm2076_vm5, %v2742_v26  ;;  %v2045_v47 = vld [vmem:[#allocation3 + $0x199] sm:$0x1]  ;;  %v1861_v62 = vmax.f32 %v1848_v34, %v1855_v45  ;;  %v12865_v28 = vpop.f32.mrb[120].mxu0  ;;  %v15453_v39 = vld [vmem:[#allocation4 + $0xe2] sm:$0xff] }
 0x217   :  { %1867 = vst.msk [vmem:[#allocation3 + $0x1b8] sm:$0xff] %vm1537_vm4, %v1860_v7  ;;  %1655 = vst.msk [vmem:[#allocation2 + $0x3a8] sm:$0xff] %vm1537_vm4, %v1510_v1  ;;  %v2119_v6 = vld [vmem:[#allocation3 + $0x1b2] sm:$0x1]  ;;  %v2143_v51 = vld [vmem:[#allocation3 + $0x1b3] sm:$0x1]  ;;  %v2069_v37 = vmax.f32 %v2021_v50, %v2045_v47  ;;  %v1307_v48 = vadd.f32 %v15428_v33, %v12865_v28 }
 0x218   :  { %2862 = vst.msk [vmem:[#allocation4 + $0x118] sm:$0x1] %vm2076_vm5, %v2838_v25  ;;  %v1298_v27 = vpop.f32.mrb[121].mxu0  ;;  %v2167_v56 = vmax.f32 %v2119_v6, %v2143_v51  ;;  %v2215_v26 = vld [vmem:[#allocation3 + $0x1b4] sm:$0x1]  ;;  %v1874_v49 = vld [vmem:[#allocation2 + $0x398] sm:$0xff] }
 0x219   :  { %v2239_v17 = vld [vmem:[#allocation3 + $0x1b5] sm:$0x1]  ;;  %1868 = vst.msk [vmem:[#allocation3 + $0x1c0] sm:$0xff] %vm1537_vm4, %v1861_v62  ;;  %v1299_v1 = vadd.f32 %v15428_v33, %v1298_v27  ;;  %v12866_v34 = vpop.f32.mrb[122].mxu0  ;;  %v2311_v25 = vld [vmem:[#allocation3 + $0x1b6] sm:$0x1] }
 0x21a   :  { %v2263_v7 = vmax.f32 %v2215_v26, %v2239_v17  ;;  %v2335_v45 = vld [vmem:[#allocation3 + $0x1b7] sm:$0x1]  ;;  %2094 = vst.msk [vmem:[#allocation4 + $0x110] sm:$0x1] %vm2076_vm5, %v2069_v37  ;;  %v2981_v50 = vld [vmem:[#allocation3 + $0x194] sm:$0x1]  ;;  %v1310_v31 = vadd.f32 %v15428_v33, %v12866_v34 }
 0x21b   :  { %v1515_v47 = vmax.f32 %v1307_v48, 0.0  ;;  %v1301_v28 = vpop.f32.mrb[123].mxu0  ;;  %2191 = vst.msk [vmem:[#allocation4 + $0x121] sm:$0x1] %vm2076_vm5, %v2167_v56  ;;  %v2359_v6 = vmax.f32 %v2311_v25, %v2335_v45  ;;  %v2022_v51 = vld [vmem:[#allocation3 + $0x1b0] sm:$0x1] }
 0x21c   :  { %v2046_v12 = vld [vmem:[#allocation3 + $0x1b1] sm:$0x1]  ;;  %17659 = vst [vmem:[#allocation46_spill] sm:$0xff] %v15453_v39  ;;  %v1513_v27 = vmax.f32 %v1299_v1, 0.0  ;;  %v1302_v26 = vadd.f32 %v15428_v33, %v1301_v28  ;;  %2287 = vst.msk [vmem:[#allocation4 + $0x122] sm:$0x1] %vm2076_vm5, %v2263_v7 }
 0x21d   :  { %v1881_v62 = vld [vmem:[#allocation2 + $0x3b0] sm:$0xff]  ;;  %v2070_v17 = vmax.f32 %v2022_v51, %v2046_v12  ;;  %v2886_v37 = vld [vmem:[#allocation3 + $0x1aa] sm:$0x1]  ;;  %v2910_v29 = vld [vmem:[#allocation3 + $0x1ab] sm:$0x1]  ;;  %1660 = vst.msk [vmem:[#allocation2 + $0x3d0] sm:$0xff] %vm1537_vm4, %v1515_v47 }
 0x21e   :  { %v1873_v48 = vld [vmem:[#allocation2 + $0x390] sm:$0xff]  ;;  %v1887_v13 = vmax.f32 %v1874_v49, %v1881_v62  ;;  %v1875_v34 = vld [vmem:[#allocation2 + $0x3a0] sm:$0xff]  ;;  %v1516_v56 = vmax.f32 %v1310_v31, 0.0  ;;  %2383 = vst.msk [vmem:[#allocation4 + $0x123] sm:$0x1] %vm2076_vm5, %v2359_v6  ;;  %v2934_v45 = vmax.f32 %v2886_v37, %v2910_v29  ;;  %v1882_v1 = vld [vmem:[#allocation2 + $0x3b8] sm:$0xff] }
 0x21f   :  { %v3196_v25 = vld [vmem:[#allocation4 + $0x101] sm:$0xff]  ;;  %v15459_v54 = vld [vmem:[#allocation4 + $0xf2] sm:$0xff]  ;;  %1658 = vst.msk [vmem:[#allocation2 + $0x3c0] sm:$0xff] %vm1537_vm4, %v1513_v27  ;;  %v1514_v28 = vmax.f32 %v1302_v26, 0.0  ;;  %v1888_v31 = vmax.f32 %v1875_v34, %v1882_v1  ;;  %v12869_v26 = vpop.f32.mrb[124].mxu0 }
 0x220   :  { %17660 = vst [vmem:[#allocation47_spill] sm:$0xff] %v15459_v54  ;;  %2095 = vst.msk [vmem:[#allocation4 + $0x120] sm:$0x1] %vm2076_vm5, %v2070_v17  ;;  %v3005_v12 = vld [vmem:[#allocation3 + $0x195] sm:$0x1]  ;;  %v15463_v7 = vld [vmem:[#allocation4 + $0x101] sm:$0xff] }
 0x221   :  { %17661 = vst [vmem:[#allocation48_spill] sm:$0xff] %v15463_v7  ;;  %1894 = vst.msk [vmem:[#allocation3 + $0x1d0] sm:$0xff] %vm1537_vm4, %v1887_v13  ;;  %v1880_v47 = vld [vmem:[#allocation2 + $0x3a8] sm:$0xff]  ;;  %v3197_v29 = vld [vmem:[#allocation4 + $0x111] sm:$0xff]  ;;  %v3029_v51 = vmax.f32 %v2981_v50, %v3005_v12  ;;  %v1323_v13 = vadd.f32 %v15428_v33, %v12869_v26  ;;  %v1314_v34 = vpop.f32.mrb[125].mxu0 }
 0x222   :  { %1661 = vst.msk [vmem:[#allocation2 + $0x3d8] sm:$0xff] %vm1537_vm4, %v1516_v56  ;;  %v2407_v6 = vld [vmem:[#allocation3 + $0x1b8] sm:$0x1]  ;;  %v1886_v62 = vmax.f32 %v1873_v48, %v1880_v47  ;;  %v3206_v27 = vpack.c.bf16 %v3197_v29, %v3196_v25  ;;  %1659 = vst.msk [vmem:[#allocation2 + $0x3c8] sm:$0xff] %vm1537_vm4, %v1514_v28  ;;  %v2431_v17 = vld [vmem:[#allocation3 + $0x1b9] sm:$0x1]  ;;  %v1315_v48 = vadd.f32 %v15428_v33, %v1314_v34 }
 0x223   :  { %2958 = vst.msk [vmem:[#allocation4 + $0x119] sm:$0x1] %vm2076_vm5, %v2934_v45  ;;  %v2503_v37 = vld [vmem:[#allocation3 + $0x1ba] sm:$0x1]  ;;  %v15471_v63 = vld [vmem:[#allocation4 + $0x111] sm:$0xff]  ;;  %v2455_v56 = vmax.f32 %v2407_v6, %v2431_v17  ;;  %v12870_v25 = vpop.f32.mrb[126].mxu0 }
 0x224   :  { %17662 = vst [vmem:[#allocation49_spill] sm:$0xff] %v15471_v63  ;;  %1895 = vst.msk [vmem:[#allocation3 + $0x1d8] sm:$0xff] %vm1537_vm4, %v1888_v31  ;;  %v2527_v1 = vld [vmem:[#allocation3 + $0x1bb] sm:$0x1]  ;;  %v2599_v49 = vld [vmem:[#allocation3 + $0x1bc] sm:$0x1]  ;;  %12903 = vmatprep.mubr.msk.bf16.mxu1 %vm1537_vm4, %v3206_v27  ;;  %v1326_v47 = vadd.f32 %v15428_v33, %v12870_v25 }
 0x225   :  { %v2982_v39 = vld [vmem:[#allocation3 + $0x1ac] sm:$0x1]  ;;  %3053 = vst.msk [vmem:[#allocation4 + $0x10a] sm:$0x1] %vm2076_vm5, %v3029_v51  ;;  %v2551_v45 = vmax.f32 %v2503_v37, %v2527_v1  ;;  %v2623_v28 = vld [vmem:[#allocation3 + $0x1bd] sm:$0x1] }
 0x226   :  { %1893 = vst.msk [vmem:[#allocation3 + $0x1c8] sm:$0xff] %vm1537_vm4, %v1886_v62  ;;  %v2695_v12 = vld [vmem:[#allocation3 + $0x1be] sm:$0x1]  ;;  %v1519_v31 = vmax.f32 %v1323_v13, 0.0  ;;  %v1317_v29 = vpop.f32.mrb[127].mxu0  ;;  %v2647_v6 = vmax.f32 %v2599_v49, %v2623_v28  ;;  %v1517_v17 = vmax.f32 %v1315_v48, 0.0 }
 0x227   :  { %2479 = vst.msk [vmem:[#allocation4 + $0x124] sm:$0x1] %vm2076_vm5, %v2455_v56  ;;  %v2719_v51 = vld [vmem:[#allocation3 + $0x1bf] sm:$0x1]  ;;  %v2791_v26 = vld [vmem:[#allocation3 + $0x1c0] sm:$0x1]  ;;  %v1318_v62 = vadd.f32 %v15428_v33, %v1317_v29 }
 0x228   :  { %2575 = vst.msk [vmem:[#allocation4 + $0x125] sm:$0x1] %vm2076_vm5, %v2551_v45  ;;  %v2743_v27 = vmax.f32 %v2695_v12, %v2719_v51  ;;  %v2815_v34 = vld [vmem:[#allocation3 + $0x1c1] sm:$0x1]  ;;  %v2887_v50 = vld [vmem:[#allocation3 + $0x1c2] sm:$0x1] }
 0x229   :  { %v1900_v37 = vld [vmem:[#allocation2 + $0x3c0] sm:$0xff]  ;;  %1664 = vst.msk [vmem:[#allocation2 + $0x3f0] sm:$0xff] %vm1537_vm4, %v1519_v31  ;;  %v1520_v13 = vmax.f32 %v1326_v47, 0.0  ;;  %v2839_v1 = vmax.f32 %v2791_v26, %v2815_v34  ;;  %v3006_v56 = vld [vmem:[#allocation3 + $0x1ad] sm:$0x1]  ;;  %v1907_v49 = vld [vmem:[#allocation2 + $0x3d8] sm:$0xff] }
 0x22a   :  { %2671 = vst.msk [vmem:[#allocation4 + $0x126] sm:$0x1] %vm2076_vm5, %v2647_v6  ;;  %v2911_v25 = vld [vmem:[#allocation3 + $0x1c3] sm:$0x1]  ;;  %v1518_v48 = vmax.f32 %v1318_v62, 0.0  ;;  %v3030_v12 = vmax.f32 %v2982_v39, %v3006_v56  ;;  %v1913_v51 = vmax.f32 %v1900_v37, %v1907_v49  ;;  %v1901_v39 = vld [vmem:[#allocation2 + $0x3c8] sm:$0xff] }
 0x22b   :  { %1662 = vst.msk [vmem:[#allocation2 + $0x3e0] sm:$0xff] %vm1537_vm4, %v1517_v17  ;;  %v2408_v28 = vld [vmem:[#allocation3 + $0x1d0] sm:$0x1]  ;;  %v2432_v29 = vld [vmem:[#allocation3 + $0x1d1] sm:$0x1]  ;;  %v2935_v45 = vmax.f32 %v2887_v50, %v2911_v25  ;;  %1665 = vst.msk [vmem:[#allocation2 + $0x3f8] sm:$0xff] %vm1537_vm4, %v1520_v13 }
 0x22c   :  { %2767 = vst.msk [vmem:[#allocation4 + $0x127] sm:$0x1] %vm2076_vm5, %v2743_v27  ;;  %v2456_v31 = vmax.f32 %v2408_v28, %v2432_v29  ;;  %v2504_v47 = vld [vmem:[#allocation3 + $0x1d2] sm:$0x1]  ;;  %v2528_v54 = vld [vmem:[#allocation3 + $0x1d3] sm:$0x1] }
 0x22d   :  { %2863 = vst.msk [vmem:[#allocation4 + $0x128] sm:$0x1] %vm2076_vm5, %v2839_v1  ;;  %v2552_v6 = vmax.f32 %v2504_v47, %v2528_v54  ;;  %v2600_v26 = vld [vmem:[#allocation3 + $0x1d4] sm:$0x1]  ;;  %v2624_v17 = vld [vmem:[#allocation3 + $0x1d5] sm:$0x1] }
 0x22e   :  { %1663 = vst.msk [vmem:[#allocation2 + $0x3e8] sm:$0xff] %vm1537_vm4, %v1518_v48  ;;  %v2696_v62 = vld [vmem:[#allocation3 + $0x1d6] sm:$0x1]  ;;  %1920 = vst.msk [vmem:[#allocation3 + $0x1e0] sm:$0xff] %vm1537_vm4, %v1913_v51  ;;  %v2120_v50 = vld [vmem:[#allocation3 + $0x1ca] sm:$0x1]  ;;  %v2648_v37 = vmax.f32 %v2600_v26, %v2624_v17 }
 0x22f   :  { %2959 = vst.msk [vmem:[#allocation4 + $0x129] sm:$0x1] %vm2076_vm5, %v2935_v45  ;;  %3054 = vst.msk [vmem:[#allocation4 + $0x11a] sm:$0x1] %vm2076_vm5, %v3030_v12  ;;  %v2144_v27 = vld [vmem:[#allocation3 + $0x1cb] sm:$0x1] }
 0x230   :  { %v2216_v34 = vld [vmem:[#allocation3 + $0x1cc] sm:$0x1]  ;;  %2480 = vst.msk [vmem:[#allocation4 + $0x134] sm:$0x1] %vm2076_vm5, %v2456_v31  ;;  %v2168_v13 = vmax.f32 %v2120_v50, %v2144_v27  ;;  %v2240_v1 = vld [vmem:[#allocation3 + $0x1cd] sm:$0x1] }
 0x231   :  { %v2312_v25 = vld [vmem:[#allocation3 + $0x1ce] sm:$0x1]  ;;  %v2336_v54 = vld [vmem:[#allocation3 + $0x1cf] sm:$0x1]  ;;  %2576 = vst.msk [vmem:[#allocation4 + $0x135] sm:$0x1] %vm2076_vm5, %v2552_v6  ;;  %v2264_v56 = vmax.f32 %v2216_v34, %v2240_v1 }
 0x232   :  { %v2360_v49 = vmax.f32 %v2312_v25, %v2336_v54  ;;  %2672 = vst.msk [vmem:[#allocation4 + $0x136] sm:$0x1] %vm2076_vm5, %v2648_v37  ;;  %v2720_v48 = vld [vmem:[#allocation3 + $0x1d7] sm:$0x1]  ;;  %v2792_v28 = vld [vmem:[#allocation3 + $0x1d8] sm:$0x1] }
 0x233   :  { %v2816_v29 = vld [vmem:[#allocation3 + $0x1d9] sm:$0x1]  ;;  %2192 = vst.msk [vmem:[#allocation4 + $0x131] sm:$0x1] %vm2076_vm5, %v2168_v13  ;;  %v2744_v45 = vmax.f32 %v2696_v62, %v2720_v48  ;;  %v15499_v51 = vld [vmem:[#allocation4 + $0x110] sm:$0xff]  ;;  %v12873_v26 = vpop.f32.mrb[128].mxu0 }
 0x234   :  { %v2840_v12 = vmax.f32 %v2792_v28, %v2816_v29  ;;  %v2023_v31 = vld [vmem:[#allocation3 + $0x1c8] sm:$0x1]  ;;  %v2047_v47 = vld [vmem:[#allocation3 + $0x1c9] sm:$0x1]  ;;  %v1902_v17 = vld [vmem:[#allocation2 + $0x3d0] sm:$0xff]  ;;  %v1339_v34 = vadd.f32 %v15428_v33, %v12873_v26  ;;  %v1330_v37 = vpop.f32.mrb[129].mxu0 }
 0x235   :  { %v1908_v50 = vld [vmem:[#allocation2 + $0x3e0] sm:$0xff]  ;;  %2288 = vst.msk [vmem:[#allocation4 + $0x132] sm:$0x1] %vm2076_vm5, %v2264_v56  ;;  %2384 = vst.msk [vmem:[#allocation4 + $0x133] sm:$0x1] %vm2076_vm5, %v2360_v49  ;;  %v2071_v6 = vmax.f32 %v2023_v31, %v2047_v47  ;;  %v1331_v25 = vadd.f32 %v15428_v33, %v1330_v37  ;;  %v12874_v54 = vpop.f32.mrb[130].mxu0 }
 0x236   :  { %v15503_v27 = vld [vmem:[#allocation4 + $0x120] sm:$0xff]  ;;  %v1914_v13 = vmax.f32 %v1901_v39, %v1908_v50  ;;  %2768 = vst.msk [vmem:[#allocation4 + $0x137] sm:$0x1] %vm2076_vm5, %v2744_v45  ;;  %2864 = vst.msk [vmem:[#allocation4 + $0x138] sm:$0x1] %vm2076_vm5, %v2840_v12  ;;  %v1909_v49 = vld [vmem:[#allocation2 + $0x3e8] sm:$0xff]  ;;  %v1342_v29 = vadd.f32 %v15428_v33, %v12874_v54 }
 0x237   :  { %v2888_v62 = vld [vmem:[#allocation3 + $0x1da] sm:$0x1]  ;;  %v3073_v1 = vld [vmem:[#allocation3 + $0x136] sm:$0x1]  ;;  %2096 = vst.msk [vmem:[#allocation4 + $0x130] sm:$0x1] %vm2076_vm5, %v2071_v6  ;;  %v1915_v45 = vmax.f32 %v1902_v17, %v1909_v49 }
 0x238   :  { %v2912_v48 = vld [vmem:[#allocation3 + $0x1db] sm:$0x1]  ;;  %v1523_v28 = vmax.f32 %v1339_v34, 0.0  ;;  %v1333_v39 = vpop.f32.mrb[131].mxu0  ;;  %1921 = vst.msk [vmem:[#allocation3 + $0x1e8] sm:$0xff] %vm1537_vm4, %v1914_v13  ;;  %v15514_v31 = vld [vmem:[#allocation4 + $0xf3] sm:$0xff] }
 0x239   :  { %v2936_v12 = vmax.f32 %v2888_v62, %v2912_v48  ;;  %v15516_v47 = vld [vmem:[#allocation4 + $0x103] sm:$0xff]  ;;  %v1521_v50 = vmax.f32 %v1331_v25, 0.0  ;;  %v1334_v37 = vadd.f32 %v15428_v33, %v1333_v39  ;;  %v12877_v56 = vpop.f32.mrb[132].mxu0  ;;  %v2984_v58 = vld [vmem:[#allocation3 + $0x1dc] sm:$0x1]  ;;  %1922 = vst.msk [vmem:[#allocation3 + $0x1f0] sm:$0xff] %vm1537_vm4, %v1915_v45 }
 0x23a   :  { %v2983_v26 = vld [vmem:[#allocation3 + $0x1c4] sm:$0x1]  ;;  %v3007_v6 = vld [vmem:[#allocation3 + $0x1c5] sm:$0x1]  ;;  %v3008_v10 = vld [vmem:[#allocation3 + $0x1dd] sm:$0x1]  ;;  %v1355_v34 = vadd.f32 %v15428_v33, %v12877_v56 }
 0x23b   :  { %1668 = vst.msk [vmem:[#allocation2 + $0x410] sm:$0xff] %vm1537_vm4, %v1523_v28  ;;  %v3031_v13 = vmax.f32 %v2983_v26, %v3007_v6  ;;  %v3032_v62 = vmax.f32 %v2984_v58, %v3008_v10  ;;  %v3074_v25 = vld [vmem:[#allocation3 + $0x14e] sm:$0x1]  ;;  %v3097_v54 = vld [vmem:[#allocation3 + $0x137] sm:$0x1]  ;;  %1666 = vst.msk [vmem:[#allocation2 + $0x400] sm:$0xff] %vm1537_vm4, %v1521_v50 }
 0x23c   :  { %2960 = vst.msk [vmem:[#allocation4 + $0x139] sm:$0x1] %vm2076_vm5, %v2936_v12  ;;  %v3098_v49 = vld [vmem:[#allocation3 + $0x14f] sm:$0x1]  ;;  %v3198_v48 = vld [vmem:[#allocation4 + $0x121] sm:$0xff]  ;;  %v3121_v39 = vmax.f32 %v3073_v1, %v3097_v54  ;;  %v1524_v28 = vmax.f32 %v1342_v29, 0.0 }
 0x23d   :  { %v3122_v23 = vmax.f32 %v3074_v25, %v3098_v49  ;;  %v1522_v46 = vmax.f32 %v1334_v37, 0.0  ;;  %v1346_v56 = vpop.f32.mrb[133].mxu0  ;;  %3055 = vst.msk [vmem:[#allocation4 + $0x12a] sm:$0x1] %vm2076_vm5, %v3031_v13  ;;  %3056 = vst.msk [vmem:[#allocation4 + $0x13a] sm:$0x1] %vm2076_vm5, %v3032_v62 }
 0x23e   :  { %v1527_v45 = vmax.f32 %v1355_v34, 0.0  ;;  %v1347_v12 = vadd.f32 %v15428_v33, %v1346_v56  ;;  %v12878_v58 = vpop.f32.mrb[134].mxu0  ;;  %v3075_v10 = vld [vmem:[#allocation3 + $0x166] sm:$0x1]  ;;  %v3076_v26 = vld [vmem:[#allocation3 + $0x17e] sm:$0x1] }
 0x23f   :  { %v3199_v6 = vld [vmem:[#allocation4 + $0x131] sm:$0xff]  ;;  %3145 = vst.msk [vmem:[#allocation4 + $0xcb] sm:$0x1] %vm2076_vm5, %v3121_v39  ;;  %3146 = vst.msk [vmem:[#allocation4 + $0xdb] sm:$0x1] %vm2076_vm5, %v3122_v23  ;;  %v1358_v1 = vadd.f32 %v15428_v33, %v12878_v58  ;;  %v1349_v29 = vpop.f32.mrb[135].mxu0 }
 0x240   :  { %1669 = vst.msk [vmem:[#allocation2 + $0x418] sm:$0xff] %vm1537_vm4, %v1524_v28  ;;  %1667 = vst.msk [vmem:[#allocation2 + $0x408] sm:$0xff] %vm1537_vm4, %v1522_v46  ;;  %v3099_v50 = vld [vmem:[#allocation3 + $0x167] sm:$0x1]  ;;  %v3100_v37 = vld [vmem:[#allocation3 + $0x17f] sm:$0x1]  ;;  %v3207_v13 = vpack.c.bf16 %v3199_v6, %v3198_v48  ;;  %v1350_v25 = vadd.f32 %v15428_v33, %v1349_v29 }
 0x241   :  { %v1928_v34 = vld [vmem:[#allocation2 + $0x3f8] sm:$0xff]  ;;  %1672 = vst.msk [vmem:[#allocation2 + $0x430] sm:$0xff] %vm1537_vm4, %v1527_v45  ;;  %v1525_v62 = vmax.f32 %v1347_v12, 0.0  ;;  %v3123_v54 = vmax.f32 %v3075_v10, %v3099_v50  ;;  %v3077_v49 = vld [vmem:[#allocation3 + $0x196] sm:$0x1]  ;;  %v1528_v28 = vmax.f32 %v1358_v1, 0.0  ;;  %v3124_v17 = vmax.f32 %v3076_v26, %v3100_v37 }
 0x242   :  { %v3078_v39 = vld [vmem:[#allocation3 + $0x1ae] sm:$0x1]  ;;  %v14319_v23 = vld [vmem:[#allocation4 + $0x10] sm:$0xff]  ;;  %v3102_v18 = vld [vmem:[#allocation3 + $0x1af] sm:$0x1]  ;;  %12904 = vmatmul.mubr.msk.bf16.gmra.mrb[16].mxu1 %vm1537_vm4, %v3207_v13  ;;  %v1526_v48 = vmax.f32 %v1350_v25, 0.0 }
 0x243   :  { %v3173_v56 = vpack.c.bf16 %v14319_v23, %v3157_v8  ;;  %v3101_v46 = vld [vmem:[#allocation3 + $0x197] sm:$0x1]  ;;  %1670 = vst.msk [vmem:[#allocation2 + $0x420] sm:$0xff] %vm1537_vm4, %v1525_v62  ;;  %v12881_v45 = vpop.f32.mrb[136].mxu0  ;;  %v3126_v6 = vmax.f32 %v3078_v39, %v3102_v18  ;;  %v3079_v10 = vld [vmem:[#allocation3 + $0x1c6] sm:$0x1] }
 0x244   :  { %v1935_v58 = vld [vmem:[#allocation2 + $0x410] sm:$0xff]  ;;  %3147 = vst.msk [vmem:[#allocation4 + $0xeb] sm:$0x1] %vm2076_vm5, %v3123_v54  ;;  %v3125_v12 = vmax.f32 %v3077_v49, %v3101_v46  ;;  %3148 = vst.msk [vmem:[#allocation4 + $0xfb] sm:$0x1] %vm2076_vm5, %v3124_v17  ;;  %v1371_v26 = vadd.f32 %v15428_v33, %v12881_v45  ;;  %v1362_v1 = vpop.f32.mrb[137].mxu0 }
 0x245   :  { %v1927_v29 = vld [vmem:[#allocation2 + $0x3f0] sm:$0xff]  ;;  %12911 = vmatprep.mubr.msk.bf16.mxu1 %vm1537_vm4, %v3173_v56  ;;  %v1941_v8 = vmax.f32 %v1928_v34, %v1935_v58  ;;  %1673 = vst.msk [vmem:[#allocation2 + $0x438] sm:$0xff] %vm1537_vm4, %v1528_v28  ;;  %v3080_v50 = vld [vmem:[#allocation3 + $0x1de] sm:$0x1]  ;;  %v1929_v37 = vld [vmem:[#allocation2 + $0x400] sm:$0xff]  ;;  %v1363_v18 = vadd.f32 %v15428_v33, %v1362_v1  ;;  %v12882_v13 = vpop.f32.mrb[138].mxu0 }
 0x246   :  { %1671 = vst.msk [vmem:[#allocation2 + $0x428] sm:$0xff] %vm1537_vm4, %v1526_v48  ;;  %v3103_v62 = vld [vmem:[#allocation3 + $0x1c7] sm:$0x1]  ;;  %v3104_v34 = vld [vmem:[#allocation3 + $0x1df] sm:$0x1]  ;;  %v15547_v25 = vld [vmem:[#allocation4 + $0x113] sm:$0xff]  ;;  %v1374_v49 = vadd.f32 %v15428_v33, %v12882_v13 }
 0x247   :  { %3149 = vst.msk [vmem:[#allocation4 + $0x10b] sm:$0x1] %vm2076_vm5, %v3125_v12  ;;  %3150 = vst.msk [vmem:[#allocation4 + $0x11b] sm:$0x1] %vm2076_vm5, %v3126_v6  ;;  %v15549_v54 = vld [vmem:[#allocation4 + $0x123] sm:$0xff]  ;;  %v1531_v17 = vmax.f32 %v1371_v26, 0.0  ;;  %v3127_v23 = vmax.f32 %v3079_v10, %v3103_v62  ;;  %v3128_v56 = vmax.f32 %v3080_v50, %v3104_v34 }
 0x248   :  { %1948 = vst.msk [vmem:[#allocation3 + $0x200] sm:$0xff] %vm1537_vm4, %v1941_v8  ;;  %v1365_v39 = vpop.f32.mrb[139].mxu0  ;;  %v2024_v28 = vld [vmem:[#allocation3 + $0x1e0] sm:$0x1]  ;;  %v1936_v58 = vld [vmem:[#allocation2 + $0x418] sm:$0xff]  ;;  %v1529_v48 = vmax.f32 %v1363_v18, 0.0 }
 0x249   :  { %v13883_v46 = vld [vmem:[%s17545_s3 + $0x20] ss:$0 sps:$4 sm:$0x33]   ;;  %v1366_v45 = vadd.f32 %v15428_v33, %v1365_v39  ;;  %v15557_v12 = vld [vmem:[#allocation4 + $0x121] sm:$0xff]  ;;  %v15561_v8 = vld [vmem:[#allocation4 + $0xd4] sm:$0xff]  ;;  %v1942_v26 = vmax.f32 %v1929_v37, %v1936_v58  ;;  %1676 = vst.msk [vmem:[#allocation2 + $0x450] sm:$0xff] %vm1537_vm4, %v1531_v17 }
 0x24a   :  { %v1934_v1 = vld [vmem:[#allocation2 + $0x408] sm:$0xff]  ;;  %v1532_v10 = vmax.f32 %v1374_v49, 0.0  ;;  %3151 = vst.msk [vmem:[#allocation4 + $0x12b] sm:$0x1] %vm2076_vm5, %v3127_v23  ;;  %3152 = vst.msk [vmem:[#allocation4 + $0x13b] sm:$0x1] %vm2076_vm5, %v3128_v56 }
 0x24b   :  { %v2048_v50 = vld [vmem:[#allocation3 + $0x1e1] sm:$0x1]  ;;  %v14321_v13 = vld [vmem:[#allocation4 + $0x30] sm:$0xff]  ;;  %v1940_v34 = vmax.f32 %v1927_v29, %v1934_v1  ;;  %1674 = vst.msk [vmem:[#allocation2 + $0x440] sm:$0xff] %vm1537_vm4, %v1529_v48  ;;  %v1530_v39 = vmax.f32 %v1366_v45, 0.0  ;;  %1949 = vst.msk [vmem:[#allocation3 + $0x208] sm:$0xff] %vm1537_vm4, %v1942_v26 }
 0x24c   :  { %v14320_v18 = vld [vmem:[#allocation4 + $0x20] sm:$0xff]  ;;  %v2072_v6 = vmax.f32 %v2024_v28, %v2048_v50  ;;  %v15567_v37 = vld [vmem:[#allocation4 + $0x131] sm:$0xff]  ;;  %1677 = vst.msk [vmem:[#allocation2 + $0x458] sm:$0xff] %vm1537_vm4, %v1532_v10  ;;  %v3541_v10 = vsel %vm3245_vm3, %v13883_v46, 0  ;;  %v2529_v48 = vld [vmem:[#allocation3 + $0x1eb] sm:$0x1] }
 0x24d   :  { %v3174_v62 = vpack.c.bf16 %v14321_v13, %v14320_v18  ;;  %v2121_v7 = vld [vmem:[#allocation3 + $0x1e2] sm:$0x1]  ;;  %v2145_v63 = vld [vmem:[#allocation3 + $0x1e3] sm:$0x1]  ;;  %v14323_v17 = vld [vmem:[#allocation4 + $0x50] sm:$0xff]  ;;  %1947 = vst.msk [vmem:[#allocation3 + $0x1f8] sm:$0xff] %vm1537_vm4, %v1940_v34 }
 0x24e   :  { %v14322_v58 = vld [vmem:[#allocation4 + $0x40] sm:$0xff]  ;;  %v2169_v18 = vmax.f32 %v2121_v7, %v2145_v63  ;;  %v1961_v45 = vld [vmem:[#allocation2 + $0x438] sm:$0xff]  ;;  %1675 = vst.msk [vmem:[#allocation2 + $0x448] sm:$0xff] %vm1537_vm4, %v1530_v39  ;;  %v15590_v1 = vld [vmem:[#allocation4 + $0x70] sm:$0xff] }
 0x24f   :  { %v3175_v49 = vpack.c.bf16 %v14323_v17, %v14322_v58  ;;  %v1954_v23 = vld [vmem:[#allocation2 + $0x420] sm:$0xff]  ;;  %12912 = vmatmul.mubr.msk.bf16.vlgmr.msra.gmra.mrb[4].mxu1 %vm1537_vm4, %v3174_v62  ;;  %2097 = vst.msk [vmem:[#allocation4 + $0x140] sm:$0x1] %vm2076_vm5, %v2072_v6  ;;  %v14324_v7 = vld [vmem:[%s17545_s3 + $0x18] sm:$0xff]   ;;  %v1955_v13 = vld [vmem:[#allocation2 + $0x428] sm:$0xff] }
 0x250   :  { %v15570_v56 = vld [vmem:[#allocation4 + $0xe4] sm:$0xff]  ;;  %12928 = vmatpush3.bf16.msra.mxu1 %v14324_v7  ;;  %v1967_v50 = vmax.f32 %v1954_v23, %v1961_v45  ;;  %v15593_v62 = vld [vmem:[#allocation4 + $0xf4] sm:$0xff]  ;;  %2193 = vst.msk [vmem:[#allocation4 + $0x141] sm:$0x1] %vm2076_vm5, %v2169_v18  ;;  %v2817_v5 = vld [vmem:[#allocation3 + $0x1f1] sm:$0x1] }
 0x251   :  { %v2217_v29 = vld [vmem:[#allocation3 + $0x1e4] sm:$0x1]  ;;  %v2241_v26 = vld [vmem:[#allocation3 + $0x1e5] sm:$0x1]  ;;  %12915 = vmatprep.mubr.msk.bf16.mxu1 %vm1537_vm4, %v3175_v49  ;;  %13777 = vmatprep.subr.msk.bf16.mxu1 %vm3245_vm3, %v13883_v46  ;;  %v2313_v39 = vld [vmem:[#allocation3 + $0x1e6] sm:$0x1] }
 0x252   :  { %v15579_v28 = vld [vmem:[%s17545_s3 + $0x24] sm:$0xff]   ;;  %v2265_v34 = vmax.f32 %v2217_v29, %v2241_v26  ;;  %1974 = vst.msk [vmem:[#allocation3 + $0x210] sm:$0xff] %vm1537_vm4, %v1967_v50  ;;  %v1956_v32 = vld [vmem:[#allocation2 + $0x430] sm:$0xff]  ;;  %v2601_v49 = vld [vmem:[#allocation3 + $0x1ec] sm:$0x1] }
 0x253   :  { %v15595_v6 = vld [vmem:[#allocation4 + $0x104] sm:$0xff]  ;;  %v15603_v18 = vld [vmem:[#allocation4 + $0x114] sm:$0xff]  ;;  %v2625_v50 = vld [vmem:[#allocation3 + $0x1ed] sm:$0x1] }
 0x254   :  { %v2337_v58 = vld [vmem:[#allocation3 + $0x1e7] sm:$0x1]  ;;  %v2409_v17 = vld [vmem:[#allocation3 + $0x1e8] sm:$0x1]  ;;  %2289 = vst.msk [vmem:[#allocation4 + $0x142] sm:$0x1] %vm2076_vm5, %v2265_v34  ;;  %12930 = vmatpush3.bf16.msra.mxu1 %v3541_v10 }
 0x255   :  { %v2361_v23 = vmax.f32 %v2313_v39, %v2337_v58  ;;  %v2433_v45 = vld [vmem:[#allocation3 + $0x1e9] sm:$0x1]  ;;  %v2505_v7 = vld [vmem:[#allocation3 + $0x1ea] sm:$0x1]  ;;  %v3165_v63 = vld [vmem:[#allocation4 + $0xc0] sm:$0xff]  ;;  %12947 = vmatprep.subr.bf16.mxu1 %v15579_v28 }
 0x256   :  { %v15605_v29 = vld [vmem:[#allocation4 + $0x124] sm:$0xff]  ;;  %v2457_v46 = vmax.f32 %v2409_v17, %v2433_v45  ;;  %v2553_v26 = vmax.f32 %v2505_v7, %v2529_v48  ;;  %v2649_v48 = vmax.f32 %v2601_v49, %v2625_v50  ;;  %v2697_v10 = vld [vmem:[#allocation3 + $0x1ee] sm:$0x1]  ;;  %v2721_v17 = vld [vmem:[#allocation3 + $0x1ef] sm:$0x1] }
 0x257   :  { %v1962_v11 = vld [vmem:[#allocation2 + $0x440] sm:$0xff]  ;;  %2385 = vst.msk [vmem:[#allocation4 + $0x143] sm:$0x1] %vm2076_vm5, %v2361_v23  ;;  %v14326_v23 = vld [vmem:[#allocation4 + $0xd0] sm:$0xff]  ;;  %v1963_v16 = vld [vmem:[#allocation2 + $0x448] sm:$0xff]  ;;  %v2745_v53 = vmax.f32 %v2697_v10, %v2721_v17 }
 0x258   :  { %v14325_v39 = vld [vmem:[#allocation4 + $0x60] sm:$0xff]  ;;  %v1968_v57 = vmax.f32 %v1955_v13, %v1962_v11  ;;  %2481 = vst.msk [vmem:[#allocation4 + $0x144] sm:$0x1] %vm2076_vm5, %v2457_v46  ;;  %2577 = vst.msk [vmem:[#allocation4 + $0x145] sm:$0x1] %vm2076_vm5, %v2553_v26  ;;  %v3177_v7 = vpack.c.bf16 %v14326_v23, %v3165_v63  ;;  %v1969_v11 = vmax.f32 %v1956_v32, %v1963_v16  ;;  %v15619_v46 = vld [vmem:[#allocation4 + $0x112] sm:$0xff] }
 0x259   :  { %v3176_v58 = vpack.c.bf16 %v15590_v1, %v14325_v39  ;;  %v15614_v45 = vld [vmem:[#allocation4 + $0x102] sm:$0xff]  ;;  %v2793_v34 = vld [vmem:[#allocation3 + $0x1f0] sm:$0x1]  ;;  %2673 = vst.msk [vmem:[#allocation4 + $0x146] sm:$0x1] %vm2076_vm5, %v2649_v48 }
 0x25a   :  { %1975 = vst.msk [vmem:[#allocation3 + $0x218] sm:$0xff] %vm1537_vm4, %v1968_v57  ;;  %v2841_v13 = vmax.f32 %v2793_v34, %v2817_v5  ;;  %v2889_v49 = vld [vmem:[#allocation3 + $0x1f2] sm:$0x1]  ;;  %v2913_v26 = vld [vmem:[#allocation3 + $0x1f3] sm:$0x1]  ;;  %1976 = vst.msk [vmem:[#allocation3 + $0x220] sm:$0xff] %vm1537_vm4, %v1969_v11 }
 0x25b   :  { %12916 = vmatmul.mubr.msk.bf16.gmra.mrb[8].mxu1 %vm1537_vm4, %v3176_v58  ;;  %2769 = vst.msk [vmem:[#allocation4 + $0x147] sm:$0x1] %vm2076_vm5, %v2745_v53  ;;  %v2937_v63 = vmax.f32 %v2889_v49, %v2913_v26  ;;  %v2985_v50 = vld [vmem:[#allocation3 + $0x1f4] sm:$0x1]  ;;  %v3009_v57 = vld [vmem:[#allocation3 + $0x1f5] sm:$0x1] }
 0x25c   :  { %12919 = vmatprep.mubr.msk.bf16.mxu1 %vm1537_vm4, %v3177_v7  ;;  %2865 = vst.msk [vmem:[#allocation4 + $0x148] sm:$0x1] %vm2076_vm5, %v2841_v13  ;;  %v3081_v16 = vld [vmem:[#allocation3 + $0x1f6] sm:$0x1]  ;;  %v3105_v5 = vld [vmem:[#allocation3 + $0x1f7] sm:$0x1]  ;;  %v3033_v32 = vmax.f32 %v2985_v50, %v3009_v57  ;;  %v3179_v13 = vpack.c.bf16 %v15499_v51, %v15440_v0 }
 0x25d   :  { %2961 = vst.msk [vmem:[#allocation4 + $0x149] sm:$0x1] %vm2076_vm5, %v2937_v63  ;;  %v3129_v34 = vmax.f32 %v3081_v16, %v3105_v5  ;;  %v15628_v58 = vld [vmem:[#allocation4 + $0xf0] sm:$0xff]  ;;  %v15630_v48 = vld [vmem:[#allocation4 + $0x100] sm:$0xff]  ;;  %v2399_v50 = vld [vmem:[#allocation3 + $0xf8] sm:$0x1] }
 0x25e   :  { %17663 = vst [vmem:[#allocation50_spill] sm:$0xff] %v15628_v58  ;;  %17664 = vst [vmem:[#allocation51_spill] sm:$0xff] %v15630_v48  ;;  %v15632_v53 = vld [vmem:[#allocation4 + $0x110] sm:$0xff]  ;;  %v15634_v10 = vld [vmem:[#allocation4 + $0x120] sm:$0xff] }
 0x25f   :  { %17665 = vst [vmem:[#allocation52_spill] sm:$0xff] %v15632_v53  ;;  %17666 = vst [vmem:[#allocation53_spill] sm:$0xff] %v15634_v10  ;;  %v14327_v7 = vld [vmem:[#allocation4 + $0xe0] sm:$0xff]  ;;  %v2303_v49 = vld [vmem:[#allocation3 + $0xf6] sm:$0x1] }
 0x260   :  { %3057 = vst.msk [vmem:[#allocation4 + $0x14a] sm:$0x1] %vm2076_vm5, %v3033_v32  ;;  %3153 = vst.msk [vmem:[#allocation4 + $0x14b] sm:$0x1] %vm2076_vm5, %v3129_v34  ;;  %v3178_v11 = vpack.c.bf16 %v15436_v43, %v14327_v7  ;;  %v15647_v26 = vld [vmem:[#allocation4 + $0x130] sm:$0xff]  ;;  %v3479_v10 = vld [vmem:[#allocation4 + $0x2] sm:$0xff] }
 0x261   :  { %v2327_v63 = vld [vmem:[#allocation3 + $0xf7] sm:$0x1]  ;;  %v2423_v16 = vld [vmem:[#allocation3 + $0xf9] sm:$0x1]  ;;  %v2495_v5 = vld [vmem:[#allocation3 + $0xfa] sm:$0x1] }
 0x262   :  { %v2351_v57 = vmax.f32 %v2303_v49, %v2327_v63  ;;  %v2519_v32 = vld [vmem:[#allocation3 + $0xfb] sm:$0x1]  ;;  %v3480_v34 = vld [vmem:[#allocation4 + $0x12] sm:$0xff]  ;;  %v2447_v23 = vmax.f32 %v2399_v50, %v2423_v16  ;;  %v2591_v7 = vld [vmem:[#allocation3 + $0xfc] sm:$0x1] }
 0x263   :  { %12920 = vmatmul.mubr.msk.bf16.gmra.mrb[12].mxu1 %vm1537_vm4, %v3178_v11  ;;  %v2543_v17 = vmax.f32 %v2495_v5, %v2519_v32  ;;  %v2615_v39 = vld [vmem:[#allocation3 + $0xfd] sm:$0x1]  ;;  %v2687_v53 = vld [vmem:[#allocation3 + $0xfe] sm:$0x1]  ;;  %v2711_v11 = vld [vmem:[#allocation3 + $0xff] sm:$0x1]  ;;  %v3495_v50 = vpack.c.bf16 %v3480_v34, %v3479_v10 }
 0x264   :  { %12923 = vmatprep.mubr.msk.bf16.mxu1 %vm1537_vm4, %v3179_v13  ;;  %2375 = vst.msk [vmem:[#allocation4 + $0xa3] sm:$0x1] %vm2076_vm5, %v2351_v57  ;;  %v3180_v13 = vpack.c.bf16 %v15647_v26, %v15503_v27  ;;  %2471 = vst.msk [vmem:[#allocation4 + $0xa4] sm:$0x1] %vm2076_vm5, %v2447_v23  ;;  %v2639_v49 = vmax.f32 %v2591_v7, %v2615_v39  ;;  %v2735_v63 = vmax.f32 %v2687_v53, %v2711_v11  ;;  %v2783_v58 = vld [vmem:[#allocation3 + $0x100] sm:$0x1] }
 0x265   :  { %2567 = vst.msk [vmem:[#allocation4 + $0xa5] sm:$0x1] %vm2076_vm5, %v2543_v17  ;;  %v2807_v48 = vld [vmem:[#allocation3 + $0x101] sm:$0x1]  ;;  %v15657_v57 = vld [vmem:[#allocation4 + $0x42] sm:$0xff]  ;;  %v15659_v5 = vld [vmem:[#allocation4 + $0x52] sm:$0xff] }
 0x266   :  { %v2831_v16 = vmax.f32 %v2783_v58, %v2807_v48  ;;  %2663 = vst.msk [vmem:[#allocation4 + $0xa6] sm:$0x1] %vm2076_vm5, %v2639_v49  ;;  %2759 = vst.msk [vmem:[#allocation4 + $0xa7] sm:$0x1] %vm2076_vm5, %v2735_v63  ;;  %v15663_v39 = vld [vmem:[#allocation4 + $0x62] sm:$0xff]  ;;  %v15665_v53 = vld [vmem:[#allocation4 + $0x72] sm:$0xff] }
 0x267   :  { %17667 = vst [vmem:[#allocation54_spill] sm:$0xff] %v15657_v57  ;;  %17668 = vst [vmem:[#allocation55_spill] sm:$0xff] %v15659_v5  ;;  %v2879_v48 = vld [vmem:[#allocation3 + $0x102] sm:$0x1]  ;;  %v2903_v10 = vld [vmem:[#allocation3 + $0x103] sm:$0x1] }
 0x268   :  { %2855 = vst.msk [vmem:[#allocation4 + $0xa8] sm:$0x1] %vm2076_vm5, %v2831_v16  ;;  %17669 = vst [vmem:[#allocation56_spill] sm:$0xff] %v15663_v39  ;;  %v3482_v23 = vld [vmem:[#allocation4 + $0x32] sm:$0xff]  ;;  %v2927_v34 = vmax.f32 %v2879_v48, %v2903_v10  ;;  %v2975_v11 = vld [vmem:[#allocation3 + $0x104] sm:$0x1] }
 0x269   :  { %17670 = vst [vmem:[#allocation57_spill] sm:$0xff] %v15665_v53  ;;  %v13885_v32 = vld [vmem:[%s17545_s3 + $0x2c] ss:$0 sps:$4 sm:$0x33]   ;;  %v3484_v7 = vld [vmem:[#allocation4 + $0x52] sm:$0xff]  ;;  %v3481_v49 = vld [vmem:[#allocation4 + $0x22] sm:$0xff] }
 0x26a   :  { %2951 = vst.msk [vmem:[#allocation4 + $0xa9] sm:$0x1] %vm2076_vm5, %v2927_v34  ;;  %v3095_v16 = vld [vmem:[#allocation3 + $0x107] sm:$0x1]  ;;  %v3496_v58 = vpack.c.bf16 %v3482_v23, %v3481_v49  ;;  %v3718_v17 = vsel %vm3245_vm3, %v13885_v32, 0  ;;  %v3486_v34 = vld [vmem:[#allocation4 + $0x72] sm:$0xff] }
 0x26b   :  { %12924 = vmatmul.mubr.msk.bf16.gmra.mrb[16].mxu1 %vm1537_vm4, %v3180_v13  ;;  %v2999_v13 = vld [vmem:[#allocation3 + $0x105] sm:$0x1]  ;;  %v2015_v48 = vld [vmem:[#allocation3 + $0x108] sm:$0x1]  ;;  %v2039_v10 = vld [vmem:[#allocation3 + $0x109] sm:$0x1] }
 0x26c   :  { %12931 = vmatprep.mubr.msk.bf16.mxu1 %vm1537_vm4, %v3495_v50  ;;  %v3023_v63 = vmax.f32 %v2975_v11, %v2999_v13  ;;  %v3071_v50 = vld [vmem:[#allocation3 + $0x106] sm:$0x1]  ;;  %v15684_v23 = vld [vmem:[%s17545_s3 + $0x30] sm:$0xff]   ;;  %v2112_v11 = vld [vmem:[#allocation3 + $0x10a] sm:$0x1] }
 0x26d   :  { %v3483_v57 = vld [vmem:[#allocation4 + $0x42] sm:$0xff]  ;;  %v3119_v5 = vmax.f32 %v3071_v50, %v3095_v16  ;;  %v3488_v13 = vld [vmem:[#allocation4 + $0xd2] sm:$0xff]  ;;  %v2304_v50 = vld [vmem:[#allocation3 + $0x10e] sm:$0x1] }
 0x26e   :  { %v3497_v24 = vpack.c.bf16 %v3484_v7, %v3483_v57  ;;  %3047 = vst.msk [vmem:[#allocation4 + $0xaa] sm:$0x1] %vm2076_vm5, %v3023_v63  ;;  %v12885_v57 = vpop.f32.mrb[0].mxu1  ;;  %v2063_v7 = vmax.f32 %v2015_v48, %v2039_v10  ;;  %v2208_v63 = vld [vmem:[#allocation3 + $0x10c] sm:$0x1]  ;;  %v15689_v10 = vld [vmem:[#allocation4 + $0x103] sm:$0xff] }
 0x26f   :  { %3143 = vst.msk [vmem:[#allocation4 + $0xab] sm:$0x1] %vm2076_vm5, %v3119_v5  ;;  %v1387_v5 = vadd.f32 %v15428_v33, %v12885_v57  ;;  %v2328_v39 = vld [vmem:[#allocation3 + $0x10f] sm:$0x1]  ;;  %v2400_v53 = vld [vmem:[#allocation3 + $0x110] sm:$0x1] }
 0x270   :  { %2088 = vst.msk [vmem:[#allocation4 + $0xb0] sm:$0x1] %vm2076_vm5, %v2063_v7  ;;  %17671 = vst [vmem:[#allocation58_spill] sm:$0xff] %v15689_v10  ;;  %v2448_v61 = vmax.f32 %v2400_v53, %v2424_v35  ;;  %v2496_v33 = vld [vmem:[#allocation3 + $0x112] sm:$0x1]  ;;  %v3489_v10 = vld [vmem:[#allocation4 + $0xe2] sm:$0xff] }
 0x271   :  { %v1535_v48 = vmax.f32 %v1387_v5, 0.0  ;;  %v2520_v57 = vld [vmem:[#allocation3 + $0x113] sm:$0x1]  ;;  %v2616_v7 = vld [vmem:[#allocation3 + $0x115] sm:$0x1]  ;;  %v15695_v5 = vld [vmem:[#allocation4 + $0x104] sm:$0xff] }
 0x272   :  { %17672 = vst [vmem:[#allocation59_spill] sm:$0xff] %v15695_v5  ;;  %2472 = vst.msk [vmem:[#allocation4 + $0xb4] sm:$0x1] %vm2076_vm5, %v2448_v61  ;;  %v2784_v53 = vld [vmem:[#allocation3 + $0x118] sm:$0x1] }
 0x273   :  { %12932 = vmatmul.mubr.msk.bf16.vlgmr.msra.gmra.mrb[4].mxu1 %vm1537_vm4, %v3496_v58  ;;  %v2136_v58 = vld [vmem:[#allocation3 + $0x10b] sm:$0x1]  ;;  %1680 = vst.msk [vmem:[#allocation2 + $0x470] sm:$0xff] %vm1537_vm4, %v1535_v48  ;;  %v2904_v61 = vld [vmem:[#allocation3 + $0x11b] sm:$0x1] }
 0x274   :  { %12948 = vmatpush3.bf16.msra.mxu1 %v15579_v28  ;;  %12935 = vmatprep.mubr.msk.bf16.mxu1 %vm1537_vm4, %v3497_v24  ;;  %v2160_v49 = vmax.f32 %v2112_v11, %v2136_v58  ;;  %v2232_v28 = vld [vmem:[#allocation3 + $0x10d] sm:$0x1]  ;;  %v3485_v24 = vld [vmem:[#allocation4 + $0x62] sm:$0xff]  ;;  %v2544_v11 = vmax.f32 %v2496_v33, %v2520_v57  ;;  %v2592_v58 = vld [vmem:[#allocation3 + $0x114] sm:$0x1] }
 0x275   :  { %13778 = vmatprep.subr.msk.bf16.mxu1 %vm3245_vm3, %v13885_v32  ;;  %v2256_v16 = vmax.f32 %v2208_v63, %v2232_v28  ;;  %v2352_v32 = vmax.f32 %v2304_v50, %v2328_v39  ;;  %v2688_v63 = vld [vmem:[#allocation3 + $0x116] sm:$0x1]  ;;  %v3498_v28 = vpack.c.bf16 %v3486_v34, %v3485_v24  ;;  %v2640_v35 = vmax.f32 %v2592_v58, %v2616_v7  ;;  %v2712_v39 = vld [vmem:[#allocation3 + $0x117] sm:$0x1]  ;;  %v2808_v34 = vld [vmem:[#allocation3 + $0x119] sm:$0x1] }
 0x276   :  { %2184 = vst.msk [vmem:[#allocation4 + $0xb1] sm:$0x1] %vm2076_vm5, %v2160_v49  ;;  %v15699_v49 = vld [vmem:[#allocation4 + $0xf3] sm:$0xff]  ;;  %2568 = vst.msk [vmem:[#allocation4 + $0xb5] sm:$0x1] %vm2076_vm5, %v2544_v11  ;;  %v2736_v50 = vmax.f32 %v2688_v63, %v2712_v39  ;;  %v1378_v24 = vpop.f32.mrb[1].mxu1  ;;  %v2832_v48 = vmax.f32 %v2784_v53, %v2808_v34 }
 0x277   :  { %2280 = vst.msk [vmem:[#allocation4 + $0xb2] sm:$0x1] %vm2076_vm5, %v2256_v16  ;;  %2376 = vst.msk [vmem:[#allocation4 + $0xb3] sm:$0x1] %vm2076_vm5, %v2352_v32  ;;  %v15703_v16 = vld [vmem:[#allocation4 + $0xf4] sm:$0xff]  ;;  %v12886_v33 = vpop.f32.mrb[2].mxu1 }
 0x278   :  { %12950 = vmatpush3.bf16.msra.mxu1 %v3718_v17  ;;  %v3499_v17 = vpack.c.bf16 %v3488_v13, %v3487_v19  ;;  %17673 = vst [vmem:[#allocation60_spill] sm:$0xff] %v15699_v49  ;;  %17674 = vst [vmem:[#allocation61_spill] sm:$0xff] %v15703_v16  ;;  %v2880_v32 = vld [vmem:[#allocation3 + $0x11a] sm:$0x1]  ;;  %v14328_v19 = vld [vmem:[%s17544_s2] ss:$0 sm:$0xff] }
 0x279   :  { %12967 = vmatprep.subr.bf16.mxu1 %v15684_v23  ;;  %2664 = vst.msk [vmem:[#allocation4 + $0xb6] sm:$0x1] %vm2076_vm5, %v2640_v35  ;;  %v1379_v13 = vadd.f32 %v14328_v19, %v1378_v24  ;;  %2760 = vst.msk [vmem:[#allocation4 + $0xb7] sm:$0x1] %vm2076_vm5, %v2736_v50  ;;  %v3490_v58 = vld [vmem:[#allocation4 + $0xf2] sm:$0xff]  ;;  %v1390_v7 = vadd.f32 %v14328_v19, %v12886_v33  ;;  %v1381_v63 = vpop.f32.mrb[3].mxu1 }
 0x27a   :  { %2856 = vst.msk [vmem:[#allocation4 + $0xb8] sm:$0x1] %vm2076_vm5, %v2832_v48  ;;  %v1982_v35 = vld [vmem:[#allocation2 + $0x458] sm:$0xff]  ;;  %v1382_v53 = vadd.f32 %v14328_v19, %v1381_v63  ;;  %v1989_v11 = vld [vmem:[#allocation2 + $0x470] sm:$0xff]  ;;  %v3500_v5 = vpack.c.bf16 %v3490_v58, %v3489_v10  ;;  %v3491_v16 = vld [vmem:[#allocation4 + $0x102] sm:$0xff] }
 0x27b   :  { %12936 = vmatmul.mubr.msk.bf16.gmra.mrb[8].mxu1 %vm1537_vm4, %v3498_v28  ;;  %v2928_v28 = vmax.f32 %v2880_v32, %v2904_v61  ;;  %v1533_v39 = vmax.f32 %v1379_v13, 0.0  ;;  %v3000_v34 = vld [vmem:[#allocation3 + $0x11d] sm:$0x1]  ;;  %v3492_v24 = vld [vmem:[#allocation4 + $0x112] sm:$0xff]  ;;  %v1536_v9 = vmax.f32 %v1390_v7, 0.0  ;;  %v1995_v48 = vmax.f32 %v1982_v35, %v1989_v11  ;;  %v15725_v58 = vld [vmem:[#allocation4 + $0x122] sm:$0xff] }
 0x27c   :  { %12939 = vmatprep.mubr.msk.bf16.mxu1 %vm1537_vm4, %v3499_v17  ;;  %v2976_v17 = vld [vmem:[#allocation3 + $0x11c] sm:$0x1]  ;;  %v1534_v50 = vmax.f32 %v1382_v53, 0.0  ;;  %v3072_v33 = vld [vmem:[#allocation3 + $0x11e] sm:$0x1]  ;;  %v3501_v61 = vpack.c.bf16 %v3492_v24, %v3491_v16  ;;  %v3494_v10 = vld [vmem:[#allocation4 + $0x132] sm:$0xff] }
 0x27d   :  { %2952 = vst.msk [vmem:[#allocation4 + $0xb9] sm:$0x1] %vm2076_vm5, %v2928_v28  ;;  %v3024_v57 = vmax.f32 %v2976_v17, %v3000_v34  ;;  %v3096_v32 = vld [vmem:[#allocation3 + $0x11f] sm:$0x1]  ;;  %v1981_v13 = vld [vmem:[#allocation2 + $0x450] sm:$0xff]  ;;  %v3502_v16 = vpack.c.bf16 %v3494_v10, %v15725_v58  ;;  %v15734_v17 = vld [vmem:[#allocation4 + $0x101] sm:$0xff] }
 0x27e   :  { %1678 = vst.msk [vmem:[#allocation2 + $0x460] sm:$0xff] %vm1537_vm4, %v1533_v39  ;;  %1681 = vst.msk [vmem:[#allocation2 + $0x478] sm:$0xff] %vm1537_vm4, %v1536_v9  ;;  %v3120_v19 = vmax.f32 %v3072_v33, %v3096_v32  ;;  %v3656_v9 = vld [vmem:[#allocation4 + $0x3] sm:$0xff]  ;;  %v15728_v28 = vld [vmem:[#allocation4 + $0x111] sm:$0xff] }
 0x27f   :  { %3048 = vst.msk [vmem:[#allocation4 + $0xba] sm:$0x1] %vm2076_vm5, %v3024_v57  ;;  %17675 = vst [vmem:[#allocation62_spill] sm:$0xff] %v15728_v28  ;;  %v14329_v35 = vld [vmem:[#allocation4 + $0x13] sm:$0xff]  ;;  %v15736_v34 = vld [vmem:[#allocation4 + $0x102] sm:$0xff] }
 0x280   :  { %1679 = vst.msk [vmem:[#allocation2 + $0x468] sm:$0xff] %vm1537_vm4, %v1534_v50  ;;  %2002 = vst.msk [vmem:[#allocation3 + $0x230] sm:$0xff] %vm1537_vm4, %v1995_v48  ;;  %v3672_v39 = vpack.c.bf16 %v14329_v35, %v3656_v9  ;;  %v14330_v33 = vld [vmem:[#allocation4 + $0x23] sm:$0xff]  ;;  %v14331_v48 = vld [vmem:[#allocation4 + $0x33] sm:$0xff] }
 0x281   :  { %3144 = vst.msk [vmem:[#allocation4 + $0xbb] sm:$0x1] %vm2076_vm5, %v3120_v19  ;;  %17677 = vst [vmem:[#allocation64_spill] sm:$0xff] %v15734_v17  ;;  %v3673_v32 = vpack.c.bf16 %v14331_v48, %v14330_v33  ;;  %v15747_v19 = vld [vmem:[#allocation4 + $0x123] sm:$0xff]  ;;  %v2049_v24 = vld [vmem:[#allocation3 + $0x1f9] sm:$0x1] }
 0x282   :  { %17678 = vst [vmem:[#allocation65_spill] sm:$0xff] %v15736_v34  ;;  %17679 = vst [vmem:[#allocation66_spill] sm:$0xff] %v15747_v19  ;;  %v15749_v10 = vld [vmem:[#allocation4 + $0x124] sm:$0xff]  ;;  %v2218_v34 = vld [vmem:[#allocation3 + $0x1fc] sm:$0x1] }
 0x283   :  { %12940 = vmatmul.mubr.msk.bf16.gmra.mrb[12].mxu1 %vm1537_vm4, %v3500_v5  ;;  %v15730_v5 = vld [vmem:[#allocation4 + $0x112] sm:$0xff]  ;;  %17680 = vst [vmem:[#allocation67_spill] sm:$0xff] %v15749_v10  ;;  %v3664_v48 = vld [vmem:[#allocation4 + $0xc3] sm:$0xff]  ;;  %v2506_v17 = vld [vmem:[#allocation3 + $0x202] sm:$0x1] }
 0x284   :  { %12943 = vmatprep.mubr.msk.bf16.mxu1 %vm1537_vm4, %v3501_v61  ;;  %17676 = vst [vmem:[#allocation63_spill] sm:$0xff] %v15730_v5  ;;  %v13887_v61 = vld [vmem:[%s17545_s3 + $0x38] ss:$0 sps:$4 sm:$0x33]   ;;  %v2602_v10 = vld [vmem:[#allocation3 + $0x204] sm:$0x1] }
 0x285   :  { %v1983_v11 = vld [vmem:[#allocation2 + $0x460] sm:$0xff]  ;;  %v1990_v57 = vld [vmem:[#allocation2 + $0x478] sm:$0xff]  ;;  %v3895_v35 = vsel %vm3245_vm3, %v13887_v61, 0  ;;  %v2914_v3 = vld [vmem:[#allocation3 + $0x20b] sm:$0x1] }
 0x286   :  { %v1996_v7 = vmax.f32 %v1983_v11, %v1990_v57  ;;  %v14333_v11 = vld [vmem:[#allocation4 + $0x53] sm:$0xff]  ;;  %v13889_v28 = vld [vmem:[%s17545_s3 + $0x44] ss:$0 sps:$4 sm:$0x33]  }
 0x287   :  { %v1988_v63 = vld [vmem:[#allocation2 + $0x468] sm:$0xff]  ;;  %v15752_v57 = vld [vmem:[#allocation4 + $0x113] sm:$0xff] }
 0x288   :  { %v1994_v53 = vmax.f32 %v1981_v13, %v1988_v63  ;;  %2003 = vst.msk [vmem:[#allocation3 + $0x238] sm:$0xff] %vm1537_vm4, %v1996_v7  ;;  %v14332_v13 = vld [vmem:[#allocation4 + $0x43] sm:$0xff]  ;;  %17681 = vst [vmem:[#allocation68_spill] sm:$0xff] %v15752_v57  ;;  %v2122_v7 = vld [vmem:[#allocation3 + $0x1fa] sm:$0x1] }
 0x289   :  { %v3674_v9 = vpack.c.bf16 %v14333_v11, %v14332_v13  ;;  %v14341_v49 = vld [vmem:[#allocation4 + $0x54] sm:$0xff] }
 0x28a   :  { %2001 = vst.msk [vmem:[#allocation3 + $0x228] sm:$0xff] %vm1537_vm4, %v1994_v53  ;;  %v15769_v53 = vld [vmem:[#allocation4 + $0x73] sm:$0xff] }
 0x28b   :  { %12944 = vmatmul.mubr.msk.bf16.gmra.mrb[16].mxu1 %vm1537_vm4, %v3502_v16  ;;  %v15754_v16 = vld [vmem:[#allocation4 + $0x114] sm:$0xff] }
 0x28c   :  { %12951 = vmatprep.mubr.msk.bf16.mxu1 %vm1537_vm4, %v3672_v39  ;;  %17682 = vst [vmem:[#allocation69_spill] sm:$0xff] %v15754_v16  ;;  %v15767_v39 = vld [vmem:[%s17545_s3 + $0x3c] sm:$0xff]   ;;  %v14339_v16 = vld [vmem:[#allocation4 + $0x34] sm:$0xff] }
 0x293   :  { %12952 = vmatmul.mubr.msk.bf16.vlgmr.msra.gmra.mrb[4].mxu1 %vm1537_vm4, %v3673_v32  ;;  %v14335_v32 = vld [vmem:[#allocation4 + $0xd3] sm:$0xff] }
 0x294   :  { %12968 = vmatpush3.bf16.msra.mxu1 %v15684_v23  ;;  %12955 = vmatprep.mubr.msk.bf16.mxu1 %vm1537_vm4, %v3674_v9  ;;  %v14334_v23 = vld [vmem:[#allocation4 + $0x63] sm:$0xff]  ;;  %v3676_v13 = vpack.c.bf16 %v14335_v32, %v3664_v48  ;;  %v15776_v9 = vld [vmem:[#allocation4 + $0x131] sm:$0xff]  ;;  %v2242_v48 = vld [vmem:[#allocation3 + $0x1fd] sm:$0x1] }
 0x295   :  { %13779 = vmatprep.subr.msk.bf16.mxu1 %vm3245_vm3, %v13887_v61  ;;  %v3675_v33 = vpack.c.bf16 %v15769_v53, %v14334_v23  ;;  %v14336_v61 = vld [vmem:[#allocation4 + $0xe3] sm:$0xff]  ;;  %17683 = vst [vmem:[#allocation70_spill] sm:$0xff] %v15776_v9  ;;  %v2314_v9 = vld [vmem:[#allocation3 + $0x1fe] sm:$0x1] }
 0x296   :  { %v3677_v11 = vpack.c.bf16 %v15514_v31, %v14336_v61  ;;  %v15781_v23 = vld [vmem:[#allocation4 + $0x121] sm:$0xff]  ;;  %v14337_v61 = vld [vmem:[#allocation4 + $0x14] sm:$0xff] }
 0x297   :  { %17684 = vst [vmem:[#allocation71_spill] sm:$0xff] %v15781_v23  ;;  %v2338_v23 = vld [vmem:[#allocation3 + $0x1ff] sm:$0x1] }
 0x298   :  { %12970 = vmatpush3.bf16.msra.mxu1 %v3895_v35  ;;  %v3678_v35 = vpack.c.bf16 %v15547_v25, %v15516_v47 }
 0x299   :  { %12987 = vmatprep.subr.bf16.mxu1 %v15767_v39 }
 0x29b   :  { %12956 = vmatmul.mubr.msk.bf16.gmra.mrb[8].mxu1 %vm1537_vm4, %v3675_v33  ;;  %v15786_v33 = vld [vmem:[#allocation4 + $0x133] sm:$0xff] }
 0x29c   :  { %12959 = vmatprep.mubr.msk.bf16.mxu1 %vm1537_vm4, %v3676_v13  ;;  %v3679_v32 = vpack.c.bf16 %v15786_v33, %v15549_v54  ;;  %v3833_v13 = vld [vmem:[#allocation4 + $0x4] sm:$0xff] }
 0x29d   :  { %v3849_v50 = vpack.c.bf16 %v14337_v61, %v3833_v13  ;;  %v2266_v13 = vmax.f32 %v2218_v34, %v2242_v48  ;;  %v2410_v61 = vld [vmem:[#allocation3 + $0x200] sm:$0x1]  ;;  %v2698_v34 = vld [vmem:[#allocation3 + $0x206] sm:$0x1] }
 0x29e   :  { %v14340_v48 = vld [vmem:[#allocation4 + $0x44] sm:$0xff] }
 0x29f   :  { %2290 = vst.msk [vmem:[#allocation4 + $0x152] sm:$0x1] %vm2076_vm5, %v2266_v13  ;;  %v3851_v20 = vpack.c.bf16 %v14341_v49, %v14340_v48  ;;  %v3010_v13 = vld [vmem:[#allocation3 + $0x20d] sm:$0x1] }
 0x2a0   :  { %v13891_v48 = vld [vmem:[%s17545_s3 + $0x50] ss:$0 sps:$4 sm:$0x33]  }
 0x2a3   :  { %12960 = vmatmul.mubr.msk.bf16.gmra.mrb[12].mxu1 %vm1537_vm4, %v3677_v11  ;;  %v2025_v11 = vld [vmem:[#allocation3 + $0x1f8] sm:$0x1] }
 0x2a4   :  { %12963 = vmatprep.mubr.msk.bf16.mxu1 %vm1537_vm4, %v3678_v35  ;;  %v2073_v63 = vmax.f32 %v2025_v11, %v2049_v24  ;;  %v2146_v35 = vld [vmem:[#allocation3 + $0x1fb] sm:$0x1]  ;;  %v2530_v11 = vld [vmem:[#allocation3 + $0x203] sm:$0x1] }
 0x2a5   :  { %v2170_v5 = vmax.f32 %v2122_v7, %v2146_v35  ;;  %v2626_v7 = vld [vmem:[#allocation3 + $0x205] sm:$0x1]  ;;  %v2554_v57 = vmax.f32 %v2506_v17, %v2530_v11 }
 0x2a6   :  { %2098 = vst.msk [vmem:[#allocation4 + $0x150] sm:$0x1] %vm2076_vm5, %v2073_v63  ;;  %v14338_v35 = vld [vmem:[#allocation4 + $0x24] sm:$0xff]  ;;  %v2650_v63 = vmax.f32 %v2602_v10, %v2626_v7 }
 0x2a7   :  { %2194 = vst.msk [vmem:[#allocation4 + $0x151] sm:$0x1] %vm2076_vm5, %v2170_v5  ;;  %v3850_v19 = vpack.c.bf16 %v14339_v16, %v14338_v35  ;;  %2578 = vst.msk [vmem:[#allocation4 + $0x155] sm:$0x1] %vm2076_vm5, %v2554_v57  ;;  %v2986_v16 = vld [vmem:[#allocation3 + $0x20c] sm:$0x1]  ;;  %v3854_v35 = vpack.c.bf16 %v15593_v62, %v15570_v56 }
 0x2a8   :  { %2674 = vst.msk [vmem:[#allocation4 + $0x156] sm:$0x1] %vm2076_vm5, %v2650_v63  ;;  %v3034_v49 = vmax.f32 %v2986_v16, %v3010_v13  ;;  %v13890_v57 = vld [vmem:[%s17545_s3 + $0x48] sm:$0xff]   ;;  %v3855_v63 = vpack.c.bf16 %v15603_v18, %v15595_v6 }
 0x2a9   :  { %v14343_v16 = vld [vmem:[#allocation4 + $0x21] sm:$0xff] }
 0x2aa   :  { %3058 = vst.msk [vmem:[#allocation4 + $0x15a] sm:$0x1] %vm2076_vm5, %v3034_v49  ;;  %v14347_v13 = vld [vmem:[#allocation4 + $0x61] sm:$0xff] }
 0x2ab   :  { %12964 = vmatmul.mubr.msk.bf16.gmra.mrb[16].mxu1 %vm1537_vm4, %v3679_v32  ;;  %v2362_v32 = vmax.f32 %v2314_v9, %v2338_v23  ;;  %v2722_v9 = vld [vmem:[#allocation3 + $0x207] sm:$0x1]  ;;  %v2794_v23 = vld [vmem:[#allocation3 + $0x208] sm:$0x1] }
 0x2ac   :  { %12971 = vmatprep.mubr.msk.bf16.mxu1 %vm1537_vm4, %v3849_v50  ;;  %v2434_v50 = vld [vmem:[#allocation3 + $0x201] sm:$0x1]  ;;  %v2746_v5 = vmax.f32 %v2698_v34, %v2722_v9  ;;  %v15827_v34 = vld [vmem:[#allocation4 + $0x134] sm:$0xff] }
 0x2ad   :  { %v2458_v24 = vmax.f32 %v2410_v61, %v2434_v50  ;;  %2386 = vst.msk [vmem:[#allocation4 + $0x153] sm:$0x1] %vm2076_vm5, %v2362_v32  ;;  %v2818_v61 = vld [vmem:[#allocation3 + $0x209] sm:$0x1]  ;;  %v2890_v50 = vld [vmem:[#allocation3 + $0x20a] sm:$0x1]  ;;  %v3856_v9 = vpack.c.bf16 %v15827_v34, %v15605_v29 }
 0x2ae   :  { %v2842_v17 = vmax.f32 %v2794_v23, %v2818_v61  ;;  %v2938_v10 = vmax.f32 %v2890_v50, %v2914_v3  ;;  %v3082_v32 = vld [vmem:[#allocation3 + $0x20e] sm:$0x1]  ;;  %2770 = vst.msk [vmem:[#allocation4 + $0x157] sm:$0x1] %vm2076_vm5, %v2746_v5  ;;  %v17685_v23 = vpack.c.bf16 %v14898_v44, %v14894_v40  ;;  %v17686_v5 = vpack.c.bf16 %v14974_v59, %v14970_v55  ;;  %v13892_v44 = vld [vmem:[%s17545_s3 + $0x54] sm:$0xff]   ;;  %v15852_v50 = vld [vmem:[#allocation4 + $0x80] sm:$0xff] }
 0x2af   :  { %2482 = vst.msk [vmem:[#allocation4 + $0x154] sm:$0x1] %vm2076_vm5, %v2458_v24  ;;  %v3106_v24 = vld [vmem:[#allocation3 + $0x20f] sm:$0x1]  ;;  %v17687_v61 = vpack.c.bf16 %v15052_v52, %v15046_v38  ;;  %v4250_v40 = vsel %vm3245_vm3, %v13891_v48, 0  ;;  %v4030_v55 = vpack.c.bf16 %v15852_v50, %v15590_v1  ;;  %v17688_v59 = vpack.c.bf16 %v15360_v42, %v15356_v15 }
 0x2b0   :  { %2866 = vst.msk [vmem:[#allocation4 + $0x158] sm:$0x1] %vm2076_vm5, %v2842_v17  ;;  %2962 = vst.msk [vmem:[#allocation4 + $0x159] sm:$0x1] %vm2076_vm5, %v2938_v10  ;;  %v3130_v3 = vmax.f32 %v3082_v32, %v3106_v24  ;;  %v17689_v38 = vpack.c.bf16 %v15440_v0, %v15436_v43  ;;  %v17690_v52 = vpack.c.bf16 %v15503_v27, %v15499_v51  ;;  %v15869_v17 = vld [vmem:[#allocation4 + $0x140] sm:$0xff]  ;;  %v4188_v10 = vld [vmem:[#allocation4 + $0x11] sm:$0xff] }
 0x2b1   :  { %v4034_v1 = vpack.c.bf16 %v15869_v17, %v15647_v26  ;;  %v4204_v15 = vpack.c.bf16 %v14343_v16, %v4188_v10  ;;  %v13893_v42 = vld [vmem:[%s17545_s3 + $0x5c] ss:$0 sps:$4 sm:$0x33]   ;;  %v14344_v43 = vld [vmem:[#allocation4 + $0x31] sm:$0xff]  ;;  %v14345_v0 = vld [vmem:[#allocation4 + $0x41] sm:$0xff] }
 0x2b2   :  { %3154 = vst.msk [vmem:[#allocation4 + $0x15b] sm:$0x1] %vm2076_vm5, %v3130_v3  ;;  %v4205_v51 = vpack.c.bf16 %v14345_v0, %v14344_v43  ;;  %v14346_v27 = vld [vmem:[#allocation4 + $0x51] sm:$0xff]  ;;  %v15880_v26 = vld [vmem:[#allocation4 + $0x81] sm:$0xff]  ;;  %v4427_v49 = vsel %vm3245_vm3, %v13893_v42, 0 }
 0x2b3   :  { %12972 = vmatmul.mubr.msk.bf16.vlgmr.msra.gmra.mrb[4].mxu1 %vm1537_vm4, %v3850_v19  ;;  %v4073_v19 = vsel %vm3245_vm3, %v13889_v28, 0  ;;  %v4206_v32 = vpack.c.bf16 %v14347_v13, %v14346_v27  ;;  %v15886_v24 = vld [vmem:[%s17545_s3 + $0x60] sm:$0xff]   ;;  %v2123_v3 = vld [vmem:[#allocation3 + $0x212] sm:$0x1]  ;;  %v2603_v10 = vld [vmem:[#allocation3 + $0x21c] sm:$0x1] }
 0x2b4   :  { %12988 = vmatpush3.bf16.msra.mxu1 %v15767_v39  ;;  %12975 = vmatprep.mubr.msk.bf16.mxu1 %vm1537_vm4, %v3851_v20  ;;  %v15813_v39 = vld [vmem:[#allocation4 + $0x74] sm:$0xff]  ;;  %v14342_v20 = vld [vmem:[#allocation4 + $0x64] sm:$0xff]  ;;  %v2627_v16 = vld [vmem:[#allocation3 + $0x21d] sm:$0x1] }
 0x2b5   :  { %13780 = vmatprep.subr.msk.bf16.mxu1 %vm3245_vm3, %v13889_v28  ;;  %v3852_v11 = vpack.c.bf16 %v15813_v39, %v14342_v20  ;;  %v3841_v28 = vld [vmem:[#allocation4 + $0xc4] sm:$0xff]  ;;  %v2651_v0 = vmax.f32 %v2603_v10, %v2627_v16  ;;  %v2795_v27 = vld [vmem:[#allocation3 + $0x220] sm:$0x1]  ;;  %v2819_v13 = vld [vmem:[#allocation3 + $0x221] sm:$0x1] }
 0x2b6   :  { %v3853_v7 = vpack.c.bf16 %v15561_v8, %v3841_v28  ;;  %v2219_v28 = vld [vmem:[#allocation3 + $0x214] sm:$0x1] }
 0x2b7   :  { %2675 = vst.msk [vmem:[#allocation4 + $0x166] sm:$0x1] %vm2076_vm5, %v2651_v0  ;;  %v4373_v16 = vld [vmem:[#allocation4 + $0xd2] sm:$0xff]  ;;  %v4387_v0 = vpack.c.bf16 %v15725_v58, %v15619_v46 }
 0x2b8   :  { %12990 = vmatpush3.bf16.msra.mxu1 %v4073_v19  ;;  %v2026_v19 = vld [vmem:[#allocation3 + $0x210] sm:$0x1]  ;;  %v13897_v58 = vld [vmem:[%s17545_s3 + $0x74] ss:$0 sps:$4 sm:$0x33]  }
 0x2b9   :  { %13007 = vmatprep.subr.bf16.mxu1 %v13890_v57 }
 0x2bb   :  { %12976 = vmatmul.mubr.msk.bf16.gmra.mrb[8].mxu1 %vm1537_vm4, %v3852_v11  ;;  %v2147_v11 = vld [vmem:[#allocation3 + $0x213] sm:$0x1] }
 0x2bc   :  { %12979 = vmatprep.mubr.msk.bf16.mxu1 %vm1537_vm4, %v3853_v7  ;;  %v2243_v7 = vld [vmem:[#allocation3 + $0x215] sm:$0x1] }
 0x2c3   :  { %12980 = vmatmul.mubr.msk.bf16.gmra.mrb[12].mxu1 %vm1537_vm4, %v3854_v35  ;;  %v4196_v35 = vld [vmem:[#allocation4 + $0xd1] sm:$0xff] }
 0x2c4   :  { %12983 = vmatprep.mubr.msk.bf16.mxu1 %vm1537_vm4, %v3855_v63  ;;  %v2171_v63 = vmax.f32 %v2123_v3, %v2147_v11 }
 0x2c6   :  { %2195 = vst.msk [vmem:[#allocation4 + $0x161] sm:$0x1] %vm2076_vm5, %v2171_v63  ;;  %v14353_v63 = vld [vmem:[#allocation4 + $0x22] sm:$0xff] }
 0x2cb   :  { %12984 = vmatmul.mubr.msk.bf16.gmra.mrb[16].mxu1 %vm1537_vm4, %v3856_v9  ;;  %v2267_v9 = vmax.f32 %v2219_v28, %v2243_v7  ;;  %v15905_v28 = vld [vmem:[#allocation4 + $0x141] sm:$0xff] }
 0x2cc   :  { %12991 = vmatprep.mubr.msk.bf16.mxu1 %vm1537_vm4, %v17685_v23  ;;  %v2315_v23 = vld [vmem:[#allocation3 + $0x216] sm:$0x1]  ;;  %v4211_v7 = vpack.c.bf16 %v15905_v28, %v15567_v37 }
 0x2cd   :  { %2291 = vst.msk [vmem:[#allocation4 + $0x162] sm:$0x1] %vm2076_vm5, %v2267_v9 }
 0x2d3   :  { %12992 = vmatmul.mubr.msk.bf16.vlgmr.msra.gmra.mrb[4].mxu1 %vm1537_vm4, %v17686_v5  ;;  %v2411_v5 = vld [vmem:[#allocation3 + $0x218] sm:$0x1] }
 0x2d4   :  { %13008 = vmatpush3.bf16.msra.mxu1 %v13890_v57  ;;  %12995 = vmatprep.mubr.msk.bf16.mxu1 %vm1537_vm4, %v17687_v61  ;;  %v2050_v57 = vld [vmem:[#allocation3 + $0x211] sm:$0x1] }
 0x2d5   :  { %13781 = vmatprep.subr.msk.bf16.mxu1 %vm3245_vm3, %v13891_v48  ;;  %v2074_v20 = vmax.f32 %v2026_v19, %v2050_v57  ;;  %v2339_v48 = vld [vmem:[#allocation3 + $0x217] sm:$0x1]  ;;  %v14351_v57 = vld [vmem:[#allocation4 + $0x101] sm:$0xff] }
 0x2d6   :  { %v2363_v61 = vmax.f32 %v2315_v23, %v2339_v48  ;;  %v14350_v19 = vld [vmem:[#allocation4 + $0xf1] sm:$0xff]  ;;  %v14355_v48 = vld [vmem:[#allocation4 + $0x42] sm:$0xff] }
 0x2d7   :  { %2099 = vst.msk [vmem:[#allocation4 + $0x160] sm:$0x1] %vm2076_vm5, %v2074_v20  ;;  %v4209_v3 = vpack.c.bf16 %v14351_v57, %v14350_v19  ;;  %v14352_v20 = vld [vmem:[#allocation4 + $0x111] sm:$0xff]  ;;  %v2915_v19 = vld [vmem:[#allocation3 + $0x223] sm:$0x1] }
 0x2d8   :  { %13010 = vmatpush3.bf16.msra.mxu1 %v4250_v40  ;;  %v2435_v40 = vld [vmem:[#allocation3 + $0x219] sm:$0x1]  ;;  %2387 = vst.msk [vmem:[#allocation4 + $0x163] sm:$0x1] %vm2076_vm5, %v2363_v61  ;;  %v4210_v11 = vpack.c.bf16 %v15557_v12, %v14352_v20  ;;  %v2987_v57 = vld [vmem:[#allocation3 + $0x224] sm:$0x1] }
 0x2d9   :  { %13027 = vmatprep.subr.bf16.mxu1 %v13892_v44  ;;  %v14354_v23 = vld [vmem:[#allocation4 + $0x32] sm:$0xff]  ;;  %v13895_v61 = vld [vmem:[%s17545_s3 + $0x68] ss:$0 sps:$4 sm:$0x33]   ;;  %v3011_v20 = vld [vmem:[#allocation3 + $0x225] sm:$0x1] }
 0x2db   :  { %12996 = vmatmul.mubr.msk.bf16.gmra.mrb[8].mxu1 %vm1537_vm4, %v4030_v55  ;;  %v2531_v55 = vld [vmem:[#allocation3 + $0x21b] sm:$0x1] }
 0x2dc   :  { %12999 = vmatprep.mubr.msk.bf16.mxu1 %vm1537_vm4, %v17688_v59  ;;  %v14348_v59 = vld [vmem:[#allocation4 + $0x71] sm:$0xff] }
 0x2e3   :  { %13000 = vmatmul.mubr.msk.bf16.gmra.mrb[12].mxu1 %vm1537_vm4, %v17689_v38  ;;  %v4207_v38 = vpack.c.bf16 %v15880_v26, %v14348_v59  ;;  %v4604_v59 = vsel %vm3245_vm3, %v13895_v61, 0 }
 0x2e4   :  { %13003 = vmatprep.mubr.msk.bf16.mxu1 %vm1537_vm4, %v17690_v52  ;;  %v2459_v52 = vmax.f32 %v2411_v5, %v2435_v40  ;;  %v4382_v5 = vpack.c.bf16 %v14355_v48, %v14354_v23  ;;  %v14356_v40 = vld [vmem:[#allocation4 + $0x52] sm:$0xff]  ;;  %v17695_v23 = vpack.c.bf16 %v15516_v47, %v15514_v31  ;;  %v17696_v48 = vpack.c.bf16 %v15549_v54, %v15547_v25  ;;  %v13899_v31 = vld [vmem:[%s17545_s3 + $0x80] ss:$0 sps:$4 sm:$0x33]   ;;  %v17699_v47 = vld [vmem:[#allocation23_spill] sm:$0xff] }
 0x2e5   :  { %v17700_v25 = vld [vmem:[#allocation22_spill] sm:$0xff] }
 0x2e6   :  { %2483 = vst.msk [vmem:[#allocation4 + $0x164] sm:$0x1] %vm2076_vm5, %v2459_v52  ;;  %v15922_v52 = vld [vmem:[#allocation4 + $0x82] sm:$0xff]  ;;  %v17701_v54 = vpack.c.bf16 %v17699_v47, %v17700_v25  ;;  %v13902_v47 = vld [vmem:[%s17545_s3 + $0x90] sm:$0xff]  }
 0x2eb   :  { %13004 = vmatmul.mubr.msk.bf16.gmra.mrb[16].mxu1 %vm1537_vm4, %v4034_v1 }
 0x2ec   :  { %13011 = vmatprep.mubr.msk.bf16.mxu1 %vm1537_vm4, %v4204_v15  ;;  %v2699_v15 = vld [vmem:[#allocation3 + $0x21e] sm:$0x1] }
 0x2f3   :  { %13012 = vmatmul.mubr.msk.bf16.vlgmr.msra.gmra.mrb[4].mxu1 %vm1537_vm4, %v4205_v51  ;;  %v2723_v51 = vld [vmem:[#allocation3 + $0x21f] sm:$0x1] }
 0x2f4   :  { %13028 = vmatpush3.bf16.msra.mxu1 %v13892_v44  ;;  %13015 = vmatprep.mubr.msk.bf16.mxu1 %vm1537_vm4, %v4206_v32  ;;  %v2507_v44 = vld [vmem:[#allocation3 + $0x21a] sm:$0x1]  ;;  %v2747_v32 = vmax.f32 %v2699_v15, %v2723_v51  ;;  %v14359_v15 = vld [vmem:[#allocation4 + $0xe2] sm:$0xff] }
 0x2f5   :  { %13782 = vmatprep.subr.msk.bf16.mxu1 %vm3245_vm3, %v13893_v42  ;;  %v2555_v1 = vmax.f32 %v2507_v44, %v2531_v55  ;;  %v14349_v42 = vld [vmem:[#allocation4 + $0xe1] sm:$0xff] }
 0x2f6   :  { %v4208_v43 = vpack.c.bf16 %v14349_v42, %v4196_v35  ;;  %2771 = vst.msk [vmem:[#allocation4 + $0x167] sm:$0x1] %vm2076_vm5, %v2747_v32  ;;  %v4365_v35 = vld [vmem:[#allocation4 + $0x12] sm:$0xff]  ;;  %v14357_v44 = vld [vmem:[#allocation4 + $0x62] sm:$0xff]  ;;  %v17691_v32 = vpack.c.bf16 %v14956_v21, %v14946_v14  ;;  %v17693_v14 = vpack.c.bf16 %v15097_v41, %v15093_v30  ;;  %v4781_v21 = vsel %vm3245_vm3, %v13897_v58, 0 }
 0x2f7   :  { %2579 = vst.msk [vmem:[#allocation4 + $0x165] sm:$0x1] %vm2076_vm5, %v2555_v1  ;;  %v4381_v9 = vpack.c.bf16 %v14353_v63, %v4365_v35  ;;  %v4383_v55 = vpack.c.bf16 %v14357_v44, %v14356_v40  ;;  %v14358_v1 = vld [vmem:[#allocation4 + $0x72] sm:$0xff]  ;;  %v15932_v51 = vld [vmem:[#allocation4 + $0x142] sm:$0xff]  ;;  %v3035_v35 = vmax.f32 %v2987_v57, %v3011_v20  ;;  %v17694_v41 = vpack.c.bf16 %v15417_v22, %v15412_v36  ;;  %v2316_v57 = vld [vmem:[#allocation3 + $0x22e] sm:$0x1] }
 0x2f8   :  { %13030 = vmatpush3.bf16.msra.mxu1 %v4427_v49  ;;  %v2843_v49 = vmax.f32 %v2795_v27, %v2819_v13  ;;  %v4384_v10 = vpack.c.bf16 %v15922_v52, %v14358_v1  ;;  %v14360_v42 = vld [vmem:[#allocation4 + $0xf2] sm:$0xff]  ;;  %v13900_v44 = vld [vmem:[%s17545_s3 + $0x84] sm:$0xff]   ;;  %v17706_v1 = vpack.c.bf16 %v15595_v6, %v15593_v62  ;;  %v13901_v62 = vld [vmem:[%s17545_s3 + $0x8c] ss:$0 sps:$4 sm:$0x33]  }
 0x2f9   :  { %13047 = vmatprep.subr.bf16.mxu1 %v15886_v24  ;;  %v15934_v27 = vld [vmem:[#allocation4 + $0x132] sm:$0xff]  ;;  %3059 = vst.msk [vmem:[#allocation4 + $0x16a] sm:$0x1] %vm2076_vm5, %v3035_v35  ;;  %v2027_v6 = vld [vmem:[#allocation3 + $0x228] sm:$0x1] }
 0x2fa   :  { %2867 = vst.msk [vmem:[#allocation4 + $0x168] sm:$0x1] %vm2076_vm5, %v2843_v49  ;;  %v4388_v13 = vpack.c.bf16 %v15932_v51, %v15934_v27  ;;  %v2891_v49 = vld [vmem:[#allocation3 + $0x222] sm:$0x1]  ;;  %v17697_v36 = vld [vmem:[#allocation21_spill] sm:$0xff] }
 0x2fb   :  { %13016 = vmatmul.mubr.msk.bf16.gmra.mrb[8].mxu1 %vm1537_vm4, %v4207_v38  ;;  %v13896_v38 = vld [vmem:[%s17545_s3 + $0x6c] sm:$0xff]   ;;  %v17698_v22 = vpack.c.bf16 %v15113_v2, %v17697_v36  ;;  %v4959_v2 = vsel %vm3245_vm3, %v13899_v31, 0  ;;  %v2796_v36 = vld [vmem:[#allocation3 + $0x238] sm:$0x1] }
 0x2fc   :  { %13019 = vmatprep.mubr.msk.bf16.mxu1 %vm1537_vm4, %v4208_v43  ;;  %v4386_v43 = vpack.c.bf16 %v15614_v45, %v14360_v42  ;;  %v17703_v40 = vld [vmem:[#allocation25_spill] sm:$0xff]  ;;  %v2412_v20 = vld [vmem:[#allocation3 + $0x230] sm:$0x1] }
 0x303   :  { %13020 = vmatmul.mubr.msk.bf16.gmra.mrb[12].mxu1 %vm1537_vm4, %v4209_v3  ;;  %v2939_v3 = vmax.f32 %v2891_v49, %v2915_v19 }
 0x304   :  { %13023 = vmatprep.mubr.msk.bf16.mxu1 %vm1537_vm4, %v4210_v11  ;;  %v3083_v11 = vld [vmem:[#allocation3 + $0x226] sm:$0x1] }
 0x305   :  { %2963 = vst.msk [vmem:[#allocation4 + $0x169] sm:$0x1] %vm2076_vm5, %v2939_v3  ;;  %v2340_v3 = vld [vmem:[#allocation3 + $0x22f] sm:$0x1] }
 0x306   :  { %v2364_v35 = vmax.f32 %v2316_v57, %v2340_v3  ;;  %v17712_v57 = vld [vmem:[#allocation15_spill] sm:$0xff] }
 0x308   :  { %2388 = vst.msk [vmem:[#allocation4 + $0x173] sm:$0x1] %vm2076_vm5, %v2364_v35  ;;  %v13904_v35 = vld [vmem:[%s17545_s3 + $0x9c] sm:$0xff]  }
 0x30b   :  { %13024 = vmatmul.mubr.msk.bf16.gmra.mrb[16].mxu1 %vm1537_vm4, %v4211_v7  ;;  %v3107_v7 = vld [vmem:[#allocation3 + $0x227] sm:$0x1] }
 0x30c   :  { %13031 = vmatprep.mubr.msk.bf16.mxu1 %vm1537_vm4, %v4381_v9  ;;  %v3131_v63 = vmax.f32 %v3083_v11, %v3107_v7  ;;  %v17692_v9 = vpack.c.bf16 %v15034_v4, %v15029_v60  ;;  %v13898_v60 = vld [vmem:[%s17545_s3 + $0x78] sm:$0xff]   ;;  %v15962_v4 = vld [vmem:[#allocation4 + $0x83] sm:$0xff] }
 0x30d   :  { %v4561_v30 = vpack.c.bf16 %v15962_v4, %v15769_v53  ;;  %v14364_v11 = vld [vmem:[#allocation4 + $0x60] sm:$0xff] }
 0x30e   :  { %3155 = vst.msk [vmem:[#allocation4 + $0x16b] sm:$0x1] %vm2076_vm5, %v3131_v63  ;;  %v2436_v63 = vld [vmem:[#allocation3 + $0x231] sm:$0x1] }
 0x313   :  { %13032 = vmatmul.mubr.msk.bf16.vlgmr.msra.gmra.mrb[4].mxu1 %vm1537_vm4, %v4382_v5  ;;  %v15979_v5 = vld [vmem:[#allocation4 + $0x143] sm:$0xff] }
 0x314   :  { %13048 = vmatpush3.bf16.msra.mxu1 %v15886_v24  ;;  %13035 = vmatprep.mubr.msk.bf16.mxu1 %vm1537_vm4, %v4383_v55  ;;  %v4385_v24 = vpack.c.bf16 %v14359_v15, %v4373_v16  ;;  %v4565_v53 = vpack.c.bf16 %v15979_v5, %v15786_v33  ;;  %v16004_v55 = vld [vmem:[#allocation4 + $0x84] sm:$0xff] }
 0x315   :  { %13783 = vmatprep.subr.msk.bf16.mxu1 %vm3245_vm3, %v13895_v61  ;;  %v17702_v61 = vld [vmem:[#allocation24_spill] sm:$0xff]  ;;  %v4897_v15 = vld [vmem:[#allocation4 + $0x20] sm:$0xff] }
 0x316   :  { %v17704_v33 = vpack.c.bf16 %v17702_v61, %v17703_v40  ;;  %v16021_v16 = vld [vmem:[#allocation4 + $0x144] sm:$0xff]  ;;  %v2892_v61 = vld [vmem:[#allocation3 + $0x23a] sm:$0x1]  ;;  %v2916_v40 = vld [vmem:[#allocation3 + $0x23b] sm:$0x1] }
 0x318   :  { %13050 = vmatpush3.bf16.msra.mxu1 %v4604_v59  ;;  %v4738_v59 = vpack.c.bf16 %v16004_v55, %v15813_v39  ;;  %v4742_v39 = vpack.c.bf16 %v16021_v16, %v15827_v34  ;;  %v2244_v34 = vld [vmem:[#allocation3 + $0x22d] sm:$0x1] }
 0x319   :  { %13067 = vmatprep.subr.bf16.mxu1 %v13896_v38 }
 0x31b   :  { %13036 = vmatmul.mubr.msk.bf16.gmra.mrb[8].mxu1 %vm1537_vm4, %v4384_v10  ;;  %v17707_v10 = vpack.c.bf16 %v15605_v29, %v15603_v18  ;;  %v2051_v18 = vld [vmem:[#allocation3 + $0x229] sm:$0x1]  ;;  %v2124_v29 = vld [vmem:[#allocation3 + $0x22a] sm:$0x1] }
 0x31c   :  { %13039 = vmatprep.mubr.msk.bf16.mxu1 %vm1537_vm4, %v4385_v24  ;;  %v14361_v24 = vld [vmem:[#allocation4 + $0x30] sm:$0xff]  ;;  %v2075_v42 = vmax.f32 %v2027_v6, %v2051_v18  ;;  %v14366_v18 = vld [vmem:[#allocation4 + $0x100] sm:$0xff] }
 0x31d   :  { %v16058_v6 = vld [vmem:[#allocation4 + $0x130] sm:$0xff] }
 0x31e   :  { %2100 = vst.msk [vmem:[#allocation4 + $0x170] sm:$0x1] %vm2076_vm5, %v2075_v42  ;;  %v14368_v42 = vld [vmem:[#allocation4 + $0x120] sm:$0xff] }
 0x323   :  { %13040 = vmatmul.mubr.msk.bf16.gmra.mrb[12].mxu1 %vm1537_vm4, %v4386_v43  ;;  %v2148_v43 = vld [vmem:[#allocation3 + $0x22b] sm:$0x1] }
 0x324   :  { %13043 = vmatprep.mubr.msk.bf16.mxu1 %vm1537_vm4, %v4387_v0  ;;  %v2220_v0 = vld [vmem:[#allocation3 + $0x22c] sm:$0x1]  ;;  %v2172_v49 = vmax.f32 %v2124_v29, %v2148_v43  ;;  %v4919_v43 = vpack.c.bf16 %v16058_v6, %v14368_v42  ;;  %v13907_v42 = vld [vmem:[%s17545_s3 + $0xb0] ss:$0 sps:$4 sm:$0x33]  }
 0x325   :  { %v2268_v19 = vmax.f32 %v2220_v0, %v2244_v34  ;;  %v16063_v0 = vld [vmem:[#allocation4 + $0x150] sm:$0xff] }
 0x326   :  { %2196 = vst.msk [vmem:[#allocation4 + $0x171] sm:$0x1] %vm2076_vm5, %v2172_v49  ;;  %v4920_v34 = vpack.c.bf16 %v16063_v0, %v15869_v17  ;;  %v13903_v49 = vld [vmem:[%s17545_s3 + $0x98] ss:$0 sps:$4 sm:$0x33]  }
 0x327   :  { %2292 = vst.msk [vmem:[#allocation4 + $0x172] sm:$0x1] %vm2076_vm5, %v2268_v19  ;;  %v17711_v19 = vld [vmem:[#allocation16_spill] sm:$0xff] }
 0x328   :  { %v17713_v3 = vpack.c.bf16 %v17711_v19, %v17712_v57  ;;  %v17737_v19 = vld [vmem:[#allocation60_spill] sm:$0xff] }
 0x32b   :  { %13044 = vmatmul.mubr.msk.bf16.gmra.mrb[16].mxu1 %vm1537_vm4, %v4388_v13  ;;  %v14362_v13 = vld [vmem:[#allocation4 + $0x40] sm:$0xff] }
 0x32c   :  { %13051 = vmatprep.mubr.msk.bf16.mxu1 %vm1537_vm4, %v17691_v32  ;;  %v14363_v32 = vld [vmem:[#allocation4 + $0x50] sm:$0xff] }
 0x333   :  { %13052 = vmatmul.mubr.msk.bf16.vlgmr.msra.gmra.mrb[4].mxu1 %vm1537_vm4, %v17692_v9  ;;  %v2508_v9 = vld [vmem:[#allocation3 + $0x232] sm:$0x1] }
 0x334   :  { %13068 = vmatpush3.bf16.msra.mxu1 %v13896_v38  ;;  %13055 = vmatprep.mubr.msk.bf16.mxu1 %vm1537_vm4, %v17693_v14  ;;  %v17705_v38 = vpack.c.bf16 %v15570_v56, %v15561_v8  ;;  %v4913_v8 = vpack.c.bf16 %v14361_v24, %v4897_v15  ;;  %v16027_v56 = vld [vmem:[#allocation4 + $0x70] sm:$0xff]  ;;  %v3084_v24 = vld [vmem:[#allocation3 + $0x23e] sm:$0x1] }
 0x335   :  { %13784 = vmatprep.subr.msk.bf16.mxu1 %vm3245_vm3, %v13897_v58  ;;  %v4914_v58 = vpack.c.bf16 %v14363_v32, %v14362_v13  ;;  %v4915_v7 = vpack.c.bf16 %v16027_v56, %v14364_v11  ;;  %v2532_v14 = vld [vmem:[#allocation3 + $0x233] sm:$0x1]  ;;  %v17708_v13 = vld [vmem:[#allocation12_spill] sm:$0xff]  ;;  %v17709_v32 = vld [vmem:[#allocation11_spill] sm:$0xff] }
 0x336   :  { %v17715_v11 = vld [vmem:[#allocation17_spill] sm:$0xff] }
 0x338   :  { %13070 = vmatpush3.bf16.msra.mxu1 %v4781_v21  ;;  %v2460_v21 = vmax.f32 %v2412_v20, %v2436_v63  ;;  %v17714_v20 = vld [vmem:[#allocation18_spill] sm:$0xff]  ;;  %v16088_v63 = vld [vmem:[#allocation4 + $0x91] sm:$0xff] }
 0x339   :  { %13087 = vmatprep.subr.bf16.mxu1 %v13898_v60  ;;  %v17716_v17 = vpack.c.bf16 %v17714_v20, %v17715_v11  ;;  %v17738_v20 = vld [vmem:[#allocation58_spill] sm:$0xff]  ;;  %v17739_v11 = vld [vmem:[#allocation68_spill] sm:$0xff] }
 0x33a   :  { %2484 = vst.msk [vmem:[#allocation4 + $0x174] sm:$0x1] %vm2076_vm5, %v2460_v21  ;;  %v17718_v21 = vld [vmem:[#allocation44_spill] sm:$0xff] }
 0x33b   :  { %13056 = vmatmul.mubr.msk.bf16.gmra.mrb[8].mxu1 %vm1537_vm4, %v4561_v30  ;;  %v2604_v30 = vld [vmem:[#allocation3 + $0x234] sm:$0x1] }
 0x33c   :  { %13059 = vmatprep.mubr.msk.bf16.mxu1 %vm1537_vm4, %v17694_v41  ;;  %v2628_v41 = vld [vmem:[#allocation3 + $0x235] sm:$0x1] }
 0x343   :  { %13060 = vmatmul.mubr.msk.bf16.gmra.mrb[12].mxu1 %vm1537_vm4, %v17695_v23  ;;  %v2700_v23 = vld [vmem:[#allocation3 + $0x236] sm:$0x1] }
 0x344   :  { %13063 = vmatprep.mubr.msk.bf16.mxu1 %vm1537_vm4, %v17696_v48  ;;  %v2652_v48 = vmax.f32 %v2604_v30, %v2628_v41  ;;  %v17720_v30 = vld [vmem:[#allocation49_spill] sm:$0xff]  ;;  %v17721_v41 = vld [vmem:[#allocation48_spill] sm:$0xff] }
 0x346   :  { %2676 = vst.msk [vmem:[#allocation4 + $0x176] sm:$0x1] %vm2076_vm5, %v2652_v48  ;;  %v17723_v48 = vpack.c.bf16 %v15567_v37, %v15557_v12  ;;  %v17728_v12 = vld [vmem:[#allocation19_spill] sm:$0xff] }
 0x34b   :  { %13064 = vmatmul.mubr.msk.bf16.gmra.mrb[16].mxu1 %vm1537_vm4, %v4565_v53  ;;  %v2724_v53 = vld [vmem:[#allocation3 + $0x237] sm:$0x1] }
 0x34c   :  { %13071 = vmatprep.mubr.msk.bf16.mxu1 %vm1537_vm4, %v17698_v22  ;;  %v2820_v22 = vld [vmem:[#allocation3 + $0x239] sm:$0x1]  ;;  %v2748_v25 = vmax.f32 %v2700_v23, %v2724_v53  ;;  %v17722_v23 = vpack.c.bf16 %v17720_v30, %v17721_v41  ;;  %v16105_v53 = vld [vmem:[#allocation4 + $0x151] sm:$0xff]  ;;  %v14374_v41 = vld [vmem:[#allocation4 + $0x44] sm:$0xff] }
 0x34d   :  { %v16188_v30 = vld [vmem:[#allocation4 + $0x74] sm:$0xff] }
 0x34e   :  { %2772 = vst.msk [vmem:[#allocation4 + $0x177] sm:$0x1] %vm2076_vm5, %v2748_v25  ;;  %v17727_v25 = vld [vmem:[#allocation20_spill] sm:$0xff] }
 0x34f   :  { %v17729_v37 = vpack.c.bf16 %v17727_v25, %v17728_v12  ;;  %v5613_v12 = vld [vmem:[#allocation4 + $0xe4] sm:$0xff] }
 0x353   :  { %13072 = vmatmul.mubr.msk.bf16.vlgmr.msra.gmra.mrb[4].mxu1 %vm1537_vm4, %v17701_v54  ;;  %v2844_v54 = vmax.f32 %v2796_v36, %v2820_v22  ;;  %v17724_v36 = vld [vmem:[#allocation14_spill] sm:$0xff]  ;;  %v17725_v22 = vld [vmem:[#allocation13_spill] sm:$0xff] }
 0x354   :  { %13088 = vmatpush3.bf16.msra.mxu1 %v13898_v60  ;;  %13075 = vmatprep.mubr.msk.bf16.mxu1 %vm1537_vm4, %v17704_v33  ;;  %v2556_v60 = vmax.f32 %v2508_v9, %v2532_v14  ;;  %v16046_v33 = vld [vmem:[#allocation4 + $0x90] sm:$0xff]  ;;  %v5093_v9 = vpack.c.bf16 %v16088_v63, %v15880_v26  ;;  %v5097_v26 = vpack.c.bf16 %v16105_v53, %v15905_v28 }
 0x355   :  { %13785 = vmatprep.subr.msk.bf16.mxu1 %vm3245_vm3, %v13899_v31  ;;  %v5136_v31 = vsel %vm3245_vm3, %v13901_v62, 0  ;;  %2868 = vst.msk [vmem:[#allocation4 + $0x178] sm:$0x1] %vm2076_vm5, %v2844_v54  ;;  %v17717_v14 = vld [vmem:[#allocation45_spill] sm:$0xff]  ;;  %v17730_v54 = vld [vmem:[#allocation27_spill] sm:$0xff] }
 0x356   :  { %2580 = vst.msk [vmem:[#allocation4 + $0x175] sm:$0x1] %vm2076_vm5, %v2556_v60  ;;  %v17719_v60 = vpack.c.bf16 %v17717_v14, %v17718_v21  ;;  %v5605_v14 = vld [vmem:[#allocation4 + $0x24] sm:$0xff]  ;;  %v14373_v21 = vld [vmem:[#allocation4 + $0x34] sm:$0xff] }
 0x358   :  { %13090 = vmatpush3.bf16.msra.mxu1 %v4959_v2  ;;  %v2940_v2 = vmax.f32 %v2892_v61, %v2916_v40  ;;  %v17731_v61 = vld [vmem:[#allocation26_spill] sm:$0xff] }
 0x359   :  { %13107 = vmatprep.subr.bf16.mxu1 %v13900_v44  ;;  %v17732_v28 = vpack.c.bf16 %v17730_v54, %v17731_v61  ;;  %v16208_v61 = vld [vmem:[#allocation4 + $0x134] sm:$0xff] }
 0x35a   :  { %2964 = vst.msk [vmem:[#allocation4 + $0x179] sm:$0x1] %vm2076_vm5, %v2940_v2  ;;  %v13906_v2 = vld [vmem:[%s17545_s3 + $0xa8] sm:$0xff]  }
 0x35b   :  { %13076 = vmatmul.mubr.msk.bf16.gmra.mrb[8].mxu1 %vm1537_vm4, %v4738_v59  ;;  %v3012_v59 = vld [vmem:[#allocation3 + $0x23d] sm:$0x1] }
 0x35c   :  { %13079 = vmatprep.mubr.msk.bf16.mxu1 %vm1537_vm4, %v17705_v38  ;;  %v4916_v38 = vpack.c.bf16 %v16046_v33, %v15852_v50  ;;  %v14367_v50 = vld [vmem:[#allocation4 + $0x110] sm:$0xff] }
 0x35d   :  { %v4918_v29 = vpack.c.bf16 %v14367_v50, %v14366_v18  ;;  %v14369_v18 = vld [vmem:[#allocation4 + $0x33] sm:$0xff] }
 0x363   :  { %13080 = vmatmul.mubr.msk.bf16.gmra.mrb[12].mxu1 %vm1537_vm4, %v17706_v1  ;;  %v4905_v1 = vld [vmem:[#allocation4 + $0xe0] sm:$0xff] }
 0x364   :  { %13083 = vmatprep.mubr.msk.bf16.mxu1 %vm1537_vm4, %v17707_v10 }
 0x36b   :  { %13084 = vmatmul.mubr.msk.bf16.gmra.mrb[16].mxu1 %vm1537_vm4, %v4742_v39  ;;  %v14365_v39 = vld [vmem:[#allocation4 + $0xf0] sm:$0xff] }
 0x36c   :  { %13091 = vmatprep.mubr.msk.bf16.mxu1 %vm1537_vm4, %v4913_v8  ;;  %v4917_v15 = vpack.c.bf16 %v14365_v39, %v4905_v1  ;;  %v3108_v8 = vld [vmem:[#allocation3 + $0x23f] sm:$0x1]  ;;  %v16139_v39 = vld [vmem:[#allocation4 + $0x122] sm:$0xff] }
 0x36d   :  { %v17734_v1 = vld [vmem:[#allocation46_spill] sm:$0xff] }
 0x373   :  { %13092 = vmatmul.mubr.msk.bf16.vlgmr.msra.gmra.mrb[4].mxu1 %vm1537_vm4, %v4914_v58  ;;  %v17710_v58 = vpack.c.bf16 %v17708_v13, %v17709_v32  ;;  %v13908_v13 = vld [vmem:[%s17545_s3 + $0xb4] sm:$0xff]  }
 0x374   :  { %13108 = vmatpush3.bf16.msra.mxu1 %v13900_v44  ;;  %13095 = vmatprep.mubr.msk.bf16.mxu1 %vm1537_vm4, %v4915_v7  ;;  %v2988_v44 = vld [vmem:[#allocation3 + $0x23c] sm:$0x1]  ;;  %v5313_v7 = vsel %vm3245_vm3, %v13903_v49, 0  ;;  %v16167_v32 = vld [vmem:[#allocation4 + $0x93] sm:$0xff] }
 0x375   :  { %13786 = vmatprep.subr.msk.bf16.mxu1 %vm3245_vm3, %v13901_v62  ;;  %v3036_v10 = vmax.f32 %v2988_v44, %v3012_v59  ;;  %v3132_v62 = vmax.f32 %v3084_v24, %v3108_v8  ;;  %v16130_v44 = vld [vmem:[#allocation4 + $0x92] sm:$0xff]  ;;  %v17736_v24 = vpack.c.bf16 %v15619_v46, %v15614_v45 }
 0x376   :  { %v5270_v59 = vpack.c.bf16 %v16130_v44, %v15922_v52  ;;  %v16148_v52 = vld [vmem:[#allocation4 + $0x152] sm:$0xff] }
 0x377   :  { %3060 = vst.msk [vmem:[#allocation4 + $0x17a] sm:$0x1] %vm2076_vm5, %v3036_v10  ;;  %3156 = vst.msk [vmem:[#allocation4 + $0x17b] sm:$0x1] %vm2076_vm5, %v3132_v62  ;;  %v5274_v8 = vpack.c.bf16 %v16148_v52, %v15932_v51  ;;  %v5428_v62 = vld [vmem:[#allocation4 + $0x23] sm:$0xff]  ;;  %v14371_v45 = vld [vmem:[#allocation4 + $0x53] sm:$0xff] }
 0x378   :  { %13110 = vmatpush3.bf16.msra.mxu1 %v5136_v31  ;;  %v17726_v31 = vpack.c.bf16 %v17724_v36, %v17725_v22  ;;  %v5444_v50 = vpack.c.bf16 %v14369_v18, %v5428_v62  ;;  %v5667_v51 = vsel %vm3245_vm3, %v13907_v42, 0  ;;  %v14376_v36 = vld [vmem:[#allocation4 + $0x64] sm:$0xff] }
 0x379   :  { %13127 = vmatprep.subr.bf16.mxu1 %v13902_v47  ;;  %v5623_v22 = vpack.c.bf16 %v16188_v30, %v14376_v36  ;;  %v13911_v62 = vld [vmem:[%s17545_s3 + $0xc8] ss:$0 sps:$4 sm:$0x33]  }
 0x37b   :  { %13096 = vmatmul.mubr.msk.bf16.gmra.mrb[8].mxu1 %vm1537_vm4, %v4916_v38  ;;  %v17733_v38 = vld [vmem:[#allocation47_spill] sm:$0xff] }
 0x37c   :  { %13099 = vmatprep.mubr.msk.bf16.mxu1 %vm1537_vm4, %v4917_v15  ;;  %v17735_v10 = vpack.c.bf16 %v17733_v38, %v17734_v1  ;;  %v5273_v15 = vpack.c.bf16 %v15934_v27, %v16139_v39  ;;  %v16154_v27 = vld [vmem:[#allocation4 + $0x73] sm:$0xff] }
 0x383   :  { %13100 = vmatmul.mubr.msk.bf16.gmra.mrb[12].mxu1 %vm1537_vm4, %v4918_v29  ;;  %v14370_v29 = vld [vmem:[#allocation4 + $0x43] sm:$0xff] }
 0x384   :  { %13103 = vmatprep.mubr.msk.bf16.mxu1 %vm1537_vm4, %v4919_v43  ;;  %v5445_v46 = vpack.c.bf16 %v14371_v45, %v14370_v29  ;;  %v14372_v43 = vld [vmem:[#allocation4 + $0x63] sm:$0xff]  ;;  %v17748_v29 = vld [vmem:[#allocation30_spill] sm:$0xff] }
 0x38b   :  { %13104 = vmatmul.mubr.msk.bf16.gmra.mrb[16].mxu1 %vm1537_vm4, %v4920_v34  ;;  %v5446_v34 = vpack.c.bf16 %v16154_v27, %v14372_v43  ;;  %v17750_v43 = vld [vmem:[#allocation51_spill] sm:$0xff] }
 0x38c   :  { %13111 = vmatprep.mubr.msk.bf16.mxu1 %vm1537_vm4, %v17710_v58  ;;  %v5447_v58 = vpack.c.bf16 %v16167_v32, %v15962_v4  ;;  %v16182_v4 = vld [vmem:[#allocation4 + $0x153] sm:$0xff] }
 0x393   :  { %13112 = vmatmul.mubr.msk.bf16.vlgmr.msra.gmra.mrb[4].mxu1 %vm1537_vm4, %v17713_v3  ;;  %v16174_v3 = vld [vmem:[#allocation4 + $0x133] sm:$0xff] }
 0x394   :  { %13128 = vmatpush3.bf16.msra.mxu1 %v13902_v47  ;;  %13115 = vmatprep.mubr.msk.bf16.mxu1 %vm1537_vm4, %v17716_v17  ;;  %v13905_v47 = vld [vmem:[%s17545_s3 + $0xa4] ss:$0 sps:$4 sm:$0x33]   ;;  %v5449_v17 = vpack.c.bf16 %v17739_v11, %v17738_v20 }
 0x395   :  { %13787 = vmatprep.subr.msk.bf16.mxu1 %vm3245_vm3, %v13903_v49  ;;  %v5490_v40 = vsel %vm3245_vm3, %v13905_v47, 0  ;;  %v5436_v49 = vld [vmem:[#allocation4 + $0xe3] sm:$0xff] }
 0x396   :  { %v5448_v57 = vpack.c.bf16 %v17737_v19, %v5436_v49  ;;  %v17753_v49 = vld [vmem:[#allocation53_spill] sm:$0xff] }
 0x398   :  { %13130 = vmatpush3.bf16.msra.mxu1 %v5313_v7  ;;  %v17740_v7 = vld [vmem:[#allocation66_spill] sm:$0xff] }
 0x399   :  { %13147 = vmatprep.subr.bf16.mxu1 %v13904_v35 }
 0x39b   :  { %13116 = vmatmul.mubr.msk.bf16.gmra.mrb[8].mxu1 %vm1537_vm4, %v5093_v9  ;;  %v5451_v9 = vpack.c.bf16 %v16182_v4, %v15979_v5 }
 0x39c   :  { %13119 = vmatprep.mubr.msk.bf16.mxu1 %vm1537_vm4, %v17719_v60  ;;  %v5621_v60 = vpack.c.bf16 %v14373_v21, %v5605_v14  ;;  %v14378_v14 = vld [vmem:[#allocation4 + $0x41] sm:$0xff] }
 0x3a3   :  { %13120 = vmatmul.mubr.msk.bf16.gmra.mrb[12].mxu1 %vm1537_vm4, %v17722_v23  ;;  %v14375_v23 = vld [vmem:[#allocation4 + $0x54] sm:$0xff] }
 0x3a4   :  { %13123 = vmatprep.mubr.msk.bf16.mxu1 %vm1537_vm4, %v17723_v48  ;;  %v5622_v48 = vpack.c.bf16 %v14375_v23, %v14374_v41  ;;  %v14380_v41 = vld [vmem:[#allocation4 + $0x61] sm:$0xff] }
 0x3ab   :  { %13124 = vmatmul.mubr.msk.bf16.gmra.mrb[16].mxu1 %vm1537_vm4, %v5097_v26  ;;  %v13909_v26 = vld [vmem:[%s17545_s3 + $0xbc] ss:$0 sps:$4 sm:$0x33]  }
 0x3ac   :  { %13131 = vmatprep.mubr.msk.bf16.mxu1 %vm1537_vm4, %v17726_v31  ;;  %v5845_v5 = vsel %vm3245_vm3, %v13909_v26, 0  ;;  %v13910_v31 = vld [vmem:[%s17545_s3 + $0xc0] sm:$0xff]  }
 0x3b3   :  { %13132 = vmatmul.mubr.msk.bf16.vlgmr.msra.gmra.mrb[4].mxu1 %vm1537_vm4, %v17729_v37  ;;  %v17741_v37 = vld [vmem:[#allocation61_spill] sm:$0xff] }
 0x3b4   :  { %13148 = vmatpush3.bf16.msra.mxu1 %v13904_v35  ;;  %13135 = vmatprep.mubr.msk.bf16.mxu1 %vm1537_vm4, %v17732_v28  ;;  %v5450_v35 = vpack.c.bf16 %v16174_v3, %v17740_v7  ;;  %v5625_v54 = vpack.c.bf16 %v17741_v37, %v5613_v12  ;;  %v14377_v28 = vld [vmem:[#allocation4 + $0x104] sm:$0xff] }
 0x3b5   :  { %13788 = vmatprep.subr.msk.bf16.mxu1 %vm3245_vm3, %v13905_v47  ;;  %v16201_v47 = vld [vmem:[#allocation4 + $0x94] sm:$0xff]  ;;  %v17756_v12 = vld [vmem:[#allocation64_spill] sm:$0xff] }
 0x3b6   :  { %v5624_v25 = vpack.c.bf16 %v16201_v47, %v16004_v55  ;;  %v16215_v55 = vld [vmem:[#allocation4 + $0x154] sm:$0xff] }
 0x3b7   :  { %v5628_v1 = vpack.c.bf16 %v16215_v55, %v16021_v16  ;;  %v6022_v16 = vsel %vm3245_vm3, %v13911_v62, 0 }
 0x3b8   :  { %13150 = vmatpush3.bf16.msra.mxu1 %v5490_v40  ;;  %v17742_v40 = vld [vmem:[#allocation69_spill] sm:$0xff] }
 0x3b9   :  { %13167 = vmatprep.subr.bf16.mxu1 %v13906_v2 }
 0x3bb   :  { %13136 = vmatmul.mubr.msk.bf16.gmra.mrb[8].mxu1 %vm1537_vm4, %v5270_v59  ;;  %v17743_v59 = vld [vmem:[#allocation67_spill] sm:$0xff] }
 0x3bc   :  { %13139 = vmatprep.mubr.msk.bf16.mxu1 %vm1537_vm4, %v17735_v10  ;;  %v5627_v38 = vpack.c.bf16 %v16208_v61, %v17743_v59  ;;  %v17744_v10 = vld [vmem:[#allocation29_spill] sm:$0xff] }
 0x3c3   :  { %13140 = vmatmul.mubr.msk.bf16.gmra.mrb[12].mxu1 %vm1537_vm4, %v17736_v24 }
 0x3c4   :  { %13143 = vmatprep.mubr.msk.bf16.mxu1 %vm1537_vm4, %v5273_v15  ;;  %v17745_v15 = vld [vmem:[#allocation28_spill] sm:$0xff] }
 0x3c5   :  { %v17746_v24 = vpack.c.bf16 %v17744_v10, %v17745_v15  ;;  %v17759_v10 = vld [vmem:[#allocation70_spill] sm:$0xff] }
 0x3cb   :  { %13144 = vmatmul.mubr.msk.bf16.gmra.mrb[16].mxu1 %vm1537_vm4, %v5274_v8  ;;  %v16224_v8 = vld [vmem:[#allocation4 + $0x80] sm:$0xff] }
 0x3cc   :  { %13151 = vmatprep.mubr.msk.bf16.mxu1 %vm1537_vm4, %v5444_v50  ;;  %v5801_v18 = vpack.c.bf16 %v16224_v8, %v16027_v56  ;;  %v17747_v50 = vld [vmem:[#allocation31_spill] sm:$0xff] }
 0x3cd   :  { %v17749_v45 = vpack.c.bf16 %v17747_v50, %v17748_v29  ;;  %v16299_v29 = vld [vmem:[#allocation4 + $0x82] sm:$0xff] }
 0x3d3   :  { %13152 = vmatmul.mubr.msk.bf16.vlgmr.msra.gmra.mrb[4].mxu1 %vm1537_vm4, %v5445_v46  ;;  %v13912_v46 = vld [vmem:[%s17545_s3 + $0xcc] sm:$0xff]  }
 0x3d4   :  { %13168 = vmatpush3.bf16.msra.mxu1 %v13906_v2  ;;  %13155 = vmatprep.mubr.msk.bf16.mxu1 %vm1537_vm4, %v5446_v34  ;;  %v5626_v2 = vpack.c.bf16 %v17742_v40, %v14377_v28  ;;  %v17751_v34 = vld [vmem:[#allocation50_spill] sm:$0xff] }
 0x3d5   :  { %13789 = vmatprep.subr.msk.bf16.mxu1 %vm3245_vm3, %v13907_v42  ;;  %v16241_v42 = vld [vmem:[#allocation4 + $0xa0] sm:$0xff] }
 0x3d6   :  { %v5802_v56 = vpack.c.bf16 %v16241_v42, %v16046_v33  ;;  %v16259_v33 = vld [vmem:[#allocation4 + $0x160] sm:$0xff] }
 0x3d7   :  { %v16285_v28 = vld [vmem:[#allocation4 + $0x141] sm:$0xff] }
 0x3d8   :  { %13170 = vmatpush3.bf16.msra.mxu1 %v5667_v51  ;;  %v17752_v51 = vpack.c.bf16 %v17750_v43, %v17751_v34  ;;  %v5982_v15 = vpack.c.bf16 %v16285_v28, %v17759_v10  ;;  %v14385_v43 = vld [vmem:[#allocation4 + $0x72] sm:$0xff] }
 0x3d9   :  { %13187 = vmatprep.subr.bf16.mxu1 %v13908_v13  ;;  %v6155_v34 = vpack.c.bf16 %v16299_v29, %v14385_v43 }
 0x3db   :  { %13156 = vmatmul.mubr.msk.bf16.gmra.mrb[8].mxu1 %vm1537_vm4, %v5447_v58 }
 0x3dc   :  { %13159 = vmatprep.mubr.msk.bf16.mxu1 %vm1537_vm4, %v5448_v57  ;;  %v17754_v57 = vld [vmem:[#allocation52_spill] sm:$0xff] }
 0x3e3   :  { %13160 = vmatmul.mubr.msk.bf16.gmra.mrb[12].mxu1 %vm1537_vm4, %v5449_v17  ;;  %v17755_v17 = vpack.c.bf16 %v17753_v49, %v17754_v57  ;;  %v6145_v57 = vld [vmem:[#allocation4 + $0xf2] sm:$0xff] }
 0x3e4   :  { %13163 = vmatprep.mubr.msk.bf16.mxu1 %vm1537_vm4, %v5450_v35  ;;  %v5806_v35 = vpack.c.bf16 %v16259_v33, %v16063_v0 }
 0x3eb   :  { %13164 = vmatmul.mubr.msk.bf16.gmra.mrb[16].mxu1 %vm1537_vm4, %v5451_v9  ;;  %v5960_v9 = vld [vmem:[#allocation4 + $0x31] sm:$0xff] }
 0x3ec   :  { %13171 = vmatprep.mubr.msk.bf16.mxu1 %vm1537_vm4, %v5621_v60  ;;  %v5976_v21 = vpack.c.bf16 %v14378_v14, %v5960_v9  ;;  %v14379_v60 = vld [vmem:[#allocation4 + $0x51] sm:$0xff]  ;;  %v16318_v9 = vld [vmem:[#allocation4 + $0x142] sm:$0xff] }
 0x3ed   :  { %v5977_v23 = vpack.c.bf16 %v14380_v41, %v14379_v60  ;;  %v14387_v14 = vld [vmem:[#allocation4 + $0x112] sm:$0xff] }
 0x3ee   :  { %v16321_v60 = vld [vmem:[#allocation4 + $0x132] sm:$0xff] }
 0x3ef   :  { %v6159_v41 = vpack.c.bf16 %v16318_v9, %v16321_v60 }
 0x3f3   :  { %13172 = vmatmul.mubr.msk.bf16.vlgmr.msra.gmra.mrb[4].mxu1 %vm1537_vm4, %v5622_v48  ;;  %v13913_v48 = vld [vmem:[%s17545_s3 + $0xd4] ss:$0 sps:$4 sm:$0x33]  }
 0x3f4   :  { %13188 = vmatpush3.bf16.msra.mxu1 %v13908_v13  ;;  %13175 = vmatprep.mubr.msk.bf16.mxu1 %vm1537_vm4, %v5623_v22  ;;  %v16250_v13 = vld [vmem:[#allocation4 + $0x140] sm:$0xff]  ;;  %v6199_v0 = vsel %vm3245_vm3, %v13913_v48, 0  ;;  %v13914_v22 = vld [vmem:[%s17545_s3 + $0xd8] sm:$0xff]  }
 0x3f5   :  { %13790 = vmatprep.subr.msk.bf16.mxu1 %vm3245_vm3, %v13909_v26  ;;  %v5805_v58 = vpack.c.bf16 %v16250_v13, %v16058_v6  ;;  %v16265_v6 = vld [vmem:[#allocation4 + $0x81] sm:$0xff]  ;;  %v14381_v26 = vld [vmem:[#allocation4 + $0x71] sm:$0xff] }
 0x3f6   :  { %v5978_v36 = vpack.c.bf16 %v16265_v6, %v14381_v26  ;;  %v17761_v26 = vld [vmem:[#allocation34_spill] sm:$0xff] }
 0x3f8   :  { %13190 = vmatpush3.bf16.msra.mxu1 %v5845_v5  ;;  %v16278_v5 = vld [vmem:[#allocation4 + $0xa1] sm:$0xff] }
 0x3f9   :  { %13207 = vmatprep.subr.bf16.mxu1 %v13910_v31 }
 0x3fb   :  { %13176 = vmatmul.mubr.msk.bf16.gmra.mrb[8].mxu1 %vm1537_vm4, %v5624_v25  ;;  %v5968_v25 = vld [vmem:[#allocation4 + $0xf1] sm:$0xff] }
 0x3fc   :  { %13179 = vmatprep.mubr.msk.bf16.mxu1 %vm1537_vm4, %v5625_v54  ;;  %v5980_v54 = vpack.c.bf16 %v17756_v12, %v5968_v25  ;;  %v17764_v25 = vld [vmem:[#allocation40_spill] sm:$0xff] }
 0x403   :  { %13180 = vmatmul.mubr.msk.bf16.gmra.mrb[12].mxu1 %vm1537_vm4, %v5626_v2  ;;  %v17757_v2 = vld [vmem:[#allocation62_spill] sm:$0xff] }
 0x404   :  { %13183 = vmatprep.mubr.msk.bf16.mxu1 %vm1537_vm4, %v5627_v38  ;;  %v17758_v38 = vld [vmem:[#allocation71_spill] sm:$0xff] }
 0x40b   :  { %13184 = vmatmul.mubr.msk.bf16.gmra.mrb[16].mxu1 %vm1537_vm4, %v5628_v1  ;;  %v5981_v1 = vpack.c.bf16 %v17758_v38, %v17757_v2 }
 0x40c   :  { %13191 = vmatprep.mubr.msk.bf16.mxu1 %vm1537_vm4, %v17746_v24 }
 0x413   :  { %13192 = vmatmul.mubr.msk.bf16.vlgmr.msra.gmra.mrb[4].mxu1 %vm1537_vm4, %v17749_v45  ;;  %v14383_v45 = vld [vmem:[#allocation4 + $0x52] sm:$0xff] }
 0x414   :  { %13208 = vmatpush3.bf16.msra.mxu1 %v13910_v31  ;;  %13195 = vmatprep.mubr.msk.bf16.mxu1 %vm1537_vm4, %v5801_v18  ;;  %v5979_v31 = vpack.c.bf16 %v16278_v5, %v16088_v63  ;;  %v16293_v63 = vld [vmem:[#allocation4 + $0x161] sm:$0xff] }
 0x415   :  { %13791 = vmatprep.subr.msk.bf16.mxu1 %vm3245_vm3, %v13911_v62  ;;  %v5983_v24 = vpack.c.bf16 %v16293_v63, %v16105_v53  ;;  %v6137_v62 = vld [vmem:[#allocation4 + $0x32] sm:$0xff]  ;;  %v14382_v18 = vld [vmem:[#allocation4 + $0x42] sm:$0xff] }
 0x416   :  { %v6153_v50 = vpack.c.bf16 %v14382_v18, %v6137_v62  ;;  %v16362_v62 = vld [vmem:[#allocation4 + $0x143] sm:$0xff] }
 0x417   :  { %v6336_v18 = vpack.c.bf16 %v16362_v62, %v16174_v3  ;;  %v16380_v3 = vld [vmem:[#allocation4 + $0x84] sm:$0xff] }
 0x418   :  { %13210 = vmatpush3.bf16.msra.mxu1 %v6022_v16  ;;  %v14384_v16 = vld [vmem:[#allocation4 + $0x62] sm:$0xff] }
 0x419   :  { %13227 = vmatprep.subr.bf16.mxu1 %v13912_v46 }
 0x41b   :  { %13196 = vmatmul.mubr.msk.bf16.gmra.mrb[8].mxu1 %vm1537_vm4, %v5802_v56  ;;  %v13915_v56 = vld [vmem:[%s17545_s3 + $0xe0] ss:$0 sps:$4 sm:$0x33]  }
 0x41c   :  { %13199 = vmatprep.mubr.msk.bf16.mxu1 %vm1537_vm4, %v17752_v51  ;;  %v6376_v53 = vsel %vm3245_vm3, %v13915_v56, 0  ;;  %v13916_v51 = vld [vmem:[%s17545_s3 + $0xe4] sm:$0xff]  }
 0x423   :  { %13200 = vmatmul.mubr.msk.bf16.gmra.mrb[12].mxu1 %vm1537_vm4, %v17755_v17  ;;  %v14386_v17 = vld [vmem:[#allocation4 + $0x102] sm:$0xff] }
 0x424   :  { %13203 = vmatprep.mubr.msk.bf16.mxu1 %vm1537_vm4, %v5805_v58  ;;  %v16312_v58 = vld [vmem:[#allocation4 + $0xa2] sm:$0xff] }
 0x425   :  { %v6156_v49 = vpack.c.bf16 %v16312_v58, %v16130_v44  ;;  %v16327_v44 = vld [vmem:[#allocation4 + $0x162] sm:$0xff] }
 0x42b   :  { %13204 = vmatmul.mubr.msk.bf16.gmra.mrb[16].mxu1 %vm1537_vm4, %v5806_v35  ;;  %v6157_v35 = vpack.c.bf16 %v14386_v17, %v6145_v57  ;;  %v16406_v57 = vld [vmem:[#allocation4 + $0x144] sm:$0xff] }
 0x42c   :  { %13211 = vmatprep.mubr.msk.bf16.mxu1 %vm1537_vm4, %v5976_v21  ;;  %v6158_v21 = vpack.c.bf16 %v16139_v39, %v14387_v14  ;;  %v16336_v39 = vld [vmem:[#allocation4 + $0x83] sm:$0xff]  ;;  %v6513_v17 = vpack.c.bf16 %v16406_v57, %v16208_v61 }
 0x42d   :  { %v16421_v14 = vld [vmem:[#allocation4 + $0x164] sm:$0xff] }
 0x42e   :  { %v6514_v61 = vpack.c.bf16 %v16421_v14, %v16215_v55 }
 0x433   :  { %13212 = vmatmul.mubr.msk.bf16.vlgmr.msra.gmra.mrb[4].mxu1 %vm1537_vm4, %v5977_v23  ;;  %v6160_v23 = vpack.c.bf16 %v16327_v44, %v16148_v52 }
 0x434   :  { %13228 = vmatpush3.bf16.msra.mxu1 %v13912_v46  ;;  %13215 = vmatprep.mubr.msk.bf16.mxu1 %vm1537_vm4, %v5978_v36  ;;  %v6154_v46 = vpack.c.bf16 %v14384_v16, %v14383_v45 }
 0x435   :  { %13792 = vmatprep.subr.msk.bf16.mxu1 %vm3245_vm3, %v13913_v48  ;;  %v17760_v48 = vld [vmem:[#allocation32_spill] sm:$0xff] }
 0x436   :  { %v17762_v36 = vpack.c.bf16 %v17760_v48, %v17761_v26  ;;  %v6671_v48 = vld [vmem:[#allocation4 + $0x60] sm:$0xff] }
 0x438   :  { %13230 = vmatpush3.bf16.msra.mxu1 %v6199_v0  ;;  %v13917_v0 = vld [vmem:[%s17545_s3 + $0xec] ss:$0 sps:$4 sm:$0x33]  }
 0x439   :  { %13247 = vmatprep.subr.bf16.mxu1 %v13914_v22  ;;  %v6553_v52 = vsel %vm3245_vm3, %v13917_v0, 0 }
 0x43b   :  { %13216 = vmatmul.mubr.msk.bf16.gmra.mrb[8].mxu1 %vm1537_vm4, %v5979_v31  ;;  %v17763_v31 = vld [vmem:[#allocation38_spill] sm:$0xff] }
 0x43c   :  { %13219 = vmatprep.mubr.msk.bf16.mxu1 %vm1537_vm4, %v5980_v54  ;;  %v17765_v54 = vpack.c.bf16 %v17763_v31, %v17764_v25  ;;  %v6676_v31 = vld [vmem:[#allocation4 + $0xb0] sm:$0xff] }
 0x43d   :  { %v6678_v25 = vld [vmem:[#allocation4 + $0x110] sm:$0xff] }
 0x443   :  { %13220 = vmatmul.mubr.msk.bf16.gmra.mrb[12].mxu1 %vm1537_vm4, %v5981_v1  ;;  %v13918_v1 = vld [vmem:[%s17545_s3 + $0xf0] sm:$0xff]  }
 0x444   :  { %13223 = vmatprep.mubr.msk.bf16.mxu1 %vm1537_vm4, %v5982_v15  ;;  %v16353_v15 = vld [vmem:[#allocation4 + $0xa3] sm:$0xff] }
 0x44b   :  { %13224 = vmatmul.mubr.msk.bf16.gmra.mrb[16].mxu1 %vm1537_vm4, %v5983_v24  ;;  %v17766_v24 = vpack.c.bf16 %v17738_v20, %v17737_v19  ;;  %v17768_v19 = vld [vmem:[#allocation33_spill] sm:$0xff]  ;;  %v17769_v20 = vld [vmem:[#allocation35_spill] sm:$0xff] }
 0x44c   :  { %13231 = vmatprep.mubr.msk.bf16.mxu1 %vm1537_vm4, %v6153_v50  ;;  %v17767_v50 = vpack.c.bf16 %v17740_v7, %v17739_v11  ;;  %v17770_v16 = vpack.c.bf16 %v17768_v19, %v17769_v20  ;;  %v13919_v11 = vld [vmem:[%s17545_s3 + $0xf8] ss:$0 sps:$4 sm:$0x33]   ;;  %v6509_v7 = vpack.c.bf16 %v16380_v3, %v16188_v30  ;;  %v13931_v19 = vld [vmem:[%s17547_s5 + $0x90] ss:$16 sps:$4 sm:$0xff]  }
 0x44d   :  { %v13933_v20 = vld [vmem:[%s17547_s5 + $0x94] ss:$16 sps:$4 sm:$0xff]  }
 0x453   :  { %13232 = vmatmul.mubr.msk.bf16.vlgmr.msra.gmra.mrb[4].mxu1 %vm1537_vm4, %v6154_v46  ;;  %v17771_v46 = vld [vmem:[#allocation39_spill] sm:$0xff] }
 0x454   :  { %13248 = vmatpush3.bf16.msra.mxu1 %v13914_v22  ;;  %13235 = vmatprep.mubr.msk.bf16.mxu1 %vm1537_vm4, %v6155_v34  ;;  %v6332_v22 = vpack.c.bf16 %v16336_v39, %v16154_v27  ;;  %v6333_v27 = vpack.c.bf16 %v16353_v15, %v16167_v32  ;;  %v16371_v32 = vld [vmem:[#allocation4 + $0x163] sm:$0xff] }
 0x455   :  { %13793 = vmatprep.subr.msk.bf16.mxu1 %vm3245_vm3, %v13915_v56  ;;  %v6337_v45 = vpack.c.bf16 %v16371_v32, %v16182_v4  ;;  %v17772_v56 = vld [vmem:[#allocation41_spill] sm:$0xff]  ;;  %v6731_v4 = vsel %vm3245_vm3, %v13919_v11, 0  ;;  %v13920_v34 = vld [vmem:[%s17545_s3 + $0xfc] sm:$0xff]  }
 0x456   :  { %v17773_v43 = vpack.c.bf16 %v17771_v46, %v17772_v56  ;;  %v13934_v46 = vld [vmem:[%s17547_s5 + $0xb0] ss:$16 sps:$4 sm:$0xff]  }
 0x457   :  { %v6851_v56 = vld [vmem:[#allocation4 + $0x91] sm:$0xff] }
 0x458   :  { %13250 = vmatpush3.bf16.msra.mxu1 %v6376_v53  ;;  %v16397_v53 = vld [vmem:[#allocation4 + $0xa4] sm:$0xff] }
 0x459   :  { %13267 = vmatprep.subr.bf16.mxu1 %v13916_v51  ;;  %v6510_v30 = vpack.c.bf16 %v16397_v53, %v16201_v47  ;;  %v13928_v47 = vld [vmem:[%s17547_s5 + $0x70] ss:$16 sps:$4 sm:$0xff]  }
 0x45b   :  { %13236 = vmatmul.mubr.msk.bf16.gmra.mrb[8].mxu1 %vm1537_vm4, %v6156_v49 }
 0x45c   :  { %13239 = vmatprep.mubr.msk.bf16.mxu1 %vm1537_vm4, %v6157_v35  ;;  %v17776_v35 = vpack.c.bf16 %v17743_v59, %v17742_v40  ;;  %v6669_v40 = vld [vmem:[#allocation4 + $0x40] sm:$0xff] }
 0x463   :  { %13240 = vmatmul.mubr.msk.bf16.gmra.mrb[12].mxu1 %vm1537_vm4, %v6158_v21  ;;  %v6670_v21 = vld [vmem:[#allocation4 + $0x50] sm:$0xff] }
 0x464   :  { %13243 = vmatprep.mubr.msk.bf16.mxu1 %vm1537_vm4, %v6159_v41  ;;  %v6685_v59 = vpack.c.bf16 %v6670_v21, %v6669_v40  ;;  %v6672_v41 = vld [vmem:[#allocation4 + $0x70] sm:$0xff] }
 0x465   :  { %v6686_v26 = vpack.c.bf16 %v6672_v41, %v6671_v48  ;;  %v6859_v40 = vld [vmem:[#allocation4 + $0x151] sm:$0xff]  ;;  %v17784_v41 = vpack.c.bf16 %v17759_v10, %v17758_v38  ;;  %v17785_v48 = vld [vmem:[#allocation55_spill] sm:$0xff] }
 0x466   :  { %v17788_v10 = vld [vmem:[#allocation57_spill] sm:$0xff] }
 0x46b   :  { %13244 = vmatmul.mubr.msk.bf16.gmra.mrb[16].mxu1 %vm1537_vm4, %v6160_v23  ;;  %v6674_v23 = vld [vmem:[#allocation4 + $0x90] sm:$0xff] }
 0x46c   :  { %13251 = vmatprep.mubr.msk.bf16.mxu1 %vm1537_vm4, %v17762_v36  ;;  %v13921_v36 = vld [vmem:[%s17545_s3 + $0x104] ss:$0 sps:$4 sm:$0x33]  }
 0x46d   :  { %v6908_v55 = vsel %vm3245_vm3, %v13921_v36, 0 }
 0x473   :  { %13252 = vmatmul.mubr.msk.bf16.vlgmr.msra.gmra.mrb[4].mxu1 %vm1537_vm4, %v17765_v54  ;;  %v6688_v54 = vpack.c.bf16 %v6676_v31, %v16241_v42  ;;  %v17791_v31 = vld [vmem:[#allocation63_spill] sm:$0xff] }
 0x474   :  { %13268 = vmatpush3.bf16.msra.mxu1 %v13916_v51  ;;  %13255 = vmatprep.mubr.msk.bf16.mxu1 %vm1537_vm4, %v6332_v22  ;;  %v17774_v51 = vld [vmem:[#allocation59_spill] sm:$0xff] }
 0x475   :  { %13794 = vmatprep.subr.msk.bf16.mxu1 %vm3245_vm3, %v13917_v0  ;;  %v17775_v49 = vpack.c.bf16 %v17774_v51, %v17741_v37  ;;  %v13930_v37 = vld [vmem:[%s17547_s5 + $0x74] ss:$16 sps:$4 sm:$0xff]   ;;  %v6687_v0 = vpack.c.bf16 %v6674_v23, %v16224_v8  ;;  %v13922_v22 = vld [vmem:[%s17545_s3 + $0x108] sm:$0xff]   ;;  %v17780_v51 = vld [vmem:[#allocation42_spill] sm:$0xff] }
 0x476   :  { %7912 = vmatprep.subr.bf16.mxu0 %v13930_v37  ;;  %v6853_v37 = vld [vmem:[#allocation4 + $0xb1] sm:$0xff] }
 0x477   :  { %7913 = vmatpush1.bf16.msra.mxu0 %v13928_v47  ;;  %v6865_v21 = vpack.c.bf16 %v6853_v37, %v16278_v5  ;;  %v6861_v23 = vld [vmem:[#allocation4 + $0x171] sm:$0xff] }
 0x478   :  { %13270 = vmatpush3.bf16.msra.mxu1 %v6553_v52  ;;  %v6677_v52 = vld [vmem:[#allocation4 + $0x100] sm:$0xff]  ;;  %7914 = vmatprep.subr.bf16.mxu0 %v13933_v20  ;;  %v6869_v5 = vpack.c.bf16 %v6861_v23, %v16293_v63  ;;  %v7390_v23 = vld [vmem:[#allocation4 + $0x154] sm:$0xff] }
 0x479   :  { %13287 = vmatprep.subr.bf16.mxu1 %v13918_v1  ;;  %v6689_v8 = vpack.c.bf16 %v6678_v25, %v6677_v52  ;;  %v17792_v25 = vld [vmem:[#allocation65_spill] sm:$0xff]  ;;  %v7202_v20 = vld [vmem:[#allocation4 + $0x63] sm:$0xff] }
 0x47a   :  { %v7036_v52 = vld [vmem:[#allocation4 + $0x152] sm:$0xff] }
 0x47b   :  { %13256 = vmatmul.mubr.msk.bf16.gmra.mrb[8].mxu1 %vm1537_vm4, %v6333_v27  ;;  %v6682_v27 = vld [vmem:[#allocation4 + $0x150] sm:$0xff]  ;;  %7915 = vmatpush1.bf16.msra.mxu0 %v13931_v19 }
 0x47c   :  { %13259 = vmatprep.mubr.msk.bf16.mxu1 %vm1537_vm4, %v17766_v24  ;;  %v6679_v24 = vld [vmem:[#allocation4 + $0x120] sm:$0xff]  ;;  %v7205_v19 = vld [vmem:[#allocation4 + $0x93] sm:$0xff] }
 0x483   :  { %13260 = vmatmul.mubr.msk.bf16.gmra.mrb[12].mxu1 %vm1537_vm4, %v17767_v50  ;;  %v6691_v50 = vpack.c.bf16 %v6682_v27, %v16250_v13  ;;  %v7045_v27 = vpack.c.bf16 %v7036_v52, %v16318_v9  ;;  %v13927_v9 = vld [vmem:[%s17545_s3 + $0x128] ss:$0 sps:$4 sm:$0x33]  }
 0x484   :  { %13263 = vmatprep.mubr.msk.bf16.mxu1 %vm1537_vm4, %v6336_v18 }
 0x48b   :  { %13264 = vmatmul.mubr.msk.bf16.gmra.mrb[16].mxu1 %vm1537_vm4, %v6337_v45  ;;  %v6684_v45 = vld [vmem:[#allocation4 + $0x170] sm:$0xff] }
 0x48c   :  { %13271 = vmatprep.mubr.msk.bf16.mxu1 %vm1537_vm4, %v17770_v16  ;;  %v6692_v42 = vpack.c.bf16 %v6684_v45, %v16259_v33  ;;  %v17777_v16 = vld [vmem:[#allocation36_spill] sm:$0xff] }
 0x48d   :  { %v11819_v33 = vld [vmem:[%s17547_s5 + $0xd0] sm:$0x11] }
 0x493   :  { %13272 = vmatmul.mubr.msk.bf16.vlgmr.msra.gmra.mrb[4].mxu1 %vm1537_vm4, %v17773_v43  ;;  %v11834_v43 = vcombine.high %v11819_v33, %v11819_v33 }
 0x494   :  { %13288 = vmatpush3.bf16.msra.mxu1 %v13918_v1  ;;  %13275 = vmatprep.mubr.msk.bf16.mxu1 %vm1537_vm4, %v6509_v7  ;;  %v6680_v1 = vld [vmem:[#allocation4 + $0x130] sm:$0xff] }
 0x495   :  { %13795 = vmatprep.subr.msk.bf16.mxu1 %vm3245_vm3, %v13919_v11  ;;  %v6690_v18 = vpack.c.bf16 %v6680_v1, %v6679_v24  ;;  %v17778_v11 = vld [vmem:[#allocation37_spill] sm:$0xff] }
 0x496   :  { %v17779_v13 = vpack.c.bf16 %v17777_v16, %v17778_v11  ;;  %v13936_v7 = vld [vmem:[%s17547_s5 + $0xb4] ss:$16 sps:$4 sm:$0xff]   ;;  %v7218_v16 = vpack.c.bf16 %v7205_v19, %v16336_v39 }
 0x497   :  { %7916 = vmatprep.subr.bf16.mxu0 %v13936_v7  ;;  %v7038_v24 = vld [vmem:[#allocation4 + $0x172] sm:$0xff] }
 0x498   :  { %13290 = vmatpush3.bf16.msra.mxu1 %v6731_v4  ;;  %v11833_v4 = vcombine.low %v11819_v33, %v11819_v33  ;;  %7917 = vmatpush1.bf16.msra.mxu0 %v13934_v46  ;;  %v7207_v11 = vld [vmem:[#allocation4 + $0xb3] sm:$0xff]  ;;  %v7208_v33 = vld [vmem:[#allocation4 + $0x103] sm:$0xff] }
 0x499   :  { %13307 = vmatprep.subr.bf16.mxu1 %v13920_v34  ;;  %11837 = vmatprep.subr.msk.bf16.mxu0 %vm7899_vm6, %v11834_v43  ;;  %v7219_v7 = vpack.c.bf16 %v7207_v11, %v16353_v15  ;;  %v7211_v39 = vld [vmem:[#allocation4 + $0x133] sm:$0xff]  ;;  %v7210_v43 = vld [vmem:[#allocation4 + $0x123] sm:$0xff] }
 0x49b   :  { %13276 = vmatmul.mubr.msk.bf16.gmra.mrb[8].mxu1 %vm1537_vm4, %v6510_v30  ;;  %v6864_v30 = vpack.c.bf16 %v6851_v56, %v16265_v6  ;;  %v13924_v6 = vld [vmem:[%s17545_s3 + $0x114] sm:$0xff]  }
 0x49c   :  { %13279 = vmatprep.mubr.msk.bf16.mxu1 %vm1537_vm4, %v17775_v49  ;;  %v17781_v49 = vld [vmem:[#allocation43_spill] sm:$0xff]  ;;  %v7213_v56 = vld [vmem:[#allocation4 + $0x153] sm:$0xff] }
 0x4a3   :  { %13280 = vmatmul.mubr.msk.bf16.gmra.mrb[12].mxu1 %vm1537_vm4, %v17776_v35  ;;  %v7901_v35 = vsel %vm7899_vm6, %v11833_v4, 0  ;;  %v7221_v4 = vpack.c.bf16 %v7211_v39, %v7210_v43 }
 0x4a4   :  { %13283 = vmatprep.mubr.msk.bf16.mxu1 %vm1537_vm4, %v6513_v17  ;;  %v17782_v17 = vpack.c.bf16 %v17780_v51, %v17781_v49  ;;  %7919 = vmatpush1.bf16.msra.mxu0 %v7901_v35  ;;  %v7378_v51 = vld [vmem:[#allocation4 + $0x54] sm:$0xff]  ;;  %v7377_v49 = vld [vmem:[#allocation4 + $0x44] sm:$0xff] }
 0x4a5   :  { %v7380_v35 = vld [vmem:[#allocation4 + $0x74] sm:$0xff] }
 0x4ab   :  { %13284 = vmatmul.mubr.msk.bf16.gmra.mrb[16].mxu1 %vm1537_vm4, %v6514_v61  ;;  %v17783_v61 = vpack.c.bf16 %v17757_v2, %v17756_v12  ;;  %v7028_v2 = vld [vmem:[#allocation4 + $0x92] sm:$0xff] }
 0x4ac   :  { %13291 = vmatprep.mubr.msk.bf16.mxu1 %vm1537_vm4, %v6685_v59  ;;  %v6868_v59 = vpack.c.bf16 %v6859_v40, %v16285_v28  ;;  %v13925_v28 = vld [vmem:[%s17545_s3 + $0x11c] ss:$0 sps:$4 sm:$0x33]   ;;  %v7041_v38 = vpack.c.bf16 %v7028_v2, %v16299_v29  ;;  %v7385_v40 = vld [vmem:[#allocation4 + $0x104] sm:$0xff]  ;;  %v14413_v2 = vmov 0  }
 0x4ad   :  { %v7262_v63 = vsel %vm3245_vm3, %v13925_v28, 0  ;;  %7944 = vmatprep.mubr.bf16.mxu0 %v14413_v2 }
 0x4b3   :  { %13292 = vmatmul.mubr.msk.bf16.vlgmr.msra.gmra.mrb[4].mxu1 %vm1537_vm4, %v6686_v26  ;;  %v17786_v26 = vld [vmem:[#allocation54_spill] sm:$0xff] }
 0x4b4   :  { %13308 = vmatpush3.bf16.msra.mxu1 %v13920_v34  ;;  %13295 = vmatprep.mubr.msk.bf16.mxu1 %vm1537_vm4, %v6687_v0  ;;  %v13923_v34 = vld [vmem:[%s17545_s3 + $0x110] ss:$0 sps:$4 sm:$0x33]   ;;  %v17787_v12 = vpack.c.bf16 %v17785_v48, %v17786_v26  ;;  %v7392_v26 = vld [vmem:[#allocation4 + $0x174] sm:$0xff] }
 0x4b5   :  { %13796 = vmatprep.subr.msk.bf16.mxu1 %vm3245_vm3, %v13921_v36  ;;  %v7085_v47 = vsel %vm3245_vm3, %v13923_v34, 0  ;;  %v17789_v36 = vld [vmem:[#allocation56_spill] sm:$0xff] }
 0x4b6   :  { %v17790_v0 = vpack.c.bf16 %v17788_v10, %v17789_v36 }
 0x4b8   :  { %13310 = vmatpush3.bf16.msra.mxu1 %v6908_v55  ;;  %v13926_v55 = vld [vmem:[%s17545_s3 + $0x120] sm:$0xff]  }
 0x4b9   :  { %13327 = vmatprep.subr.bf16.mxu1 %v13922_v22 }
 0x4bb   :  { %13296 = vmatmul.mubr.msk.bf16.gmra.mrb[8].mxu1 %vm1537_vm4, %v6688_v54  ;;  %v17793_v54 = vpack.c.bf16 %v17791_v31, %v17792_v25 }
 0x4bc   :  { %13299 = vmatprep.mubr.msk.bf16.mxu1 %vm1537_vm4, %v6689_v8  ;;  %v7033_v8 = vld [vmem:[#allocation4 + $0x122] sm:$0xff] }
 0x4bd   :  { %v7044_v1 = vpack.c.bf16 %v16321_v60, %v7033_v8 }
 0x4c3   :  { %13300 = vmatmul.mubr.msk.bf16.gmra.mrb[12].mxu1 %vm1537_vm4, %v6690_v18  ;;  %v7046_v18 = vpack.c.bf16 %v7038_v24, %v16327_v44  ;;  %v7439_v44 = vsel %vm3245_vm3, %v13927_v9, 0 }
 0x4c4   :  { %13303 = vmatprep.mubr.msk.bf16.mxu1 %vm1537_vm4, %v6691_v50  ;;  %v7200_v50 = vld [vmem:[#allocation4 + $0x43] sm:$0xff] }
 0x4cb   :  { %13304 = vmatmul.mubr.msk.bf16.gmra.mrb[16].mxu1 %vm1537_vm4, %v6692_v42  ;;  %v7203_v42 = vld [vmem:[#allocation4 + $0x73] sm:$0xff] }
 0x4cc   :  { %13311 = vmatprep.mubr.msk.bf16.mxu1 %vm1537_vm4, %v17779_v13  ;;  %v7217_v60 = vpack.c.bf16 %v7203_v42, %v7202_v20  ;;  %v7209_v13 = vld [vmem:[#allocation4 + $0x113] sm:$0xff] }
 0x4cd   :  { %v7220_v46 = vpack.c.bf16 %v7209_v13, %v7208_v33 }
 0x4d3   :  { %13312 = vmatmul.mubr.msk.bf16.vlgmr.msra.gmra.mrb[4].mxu1 %vm1537_vm4, %v17782_v17  ;;  %v7393_v17 = vpack.c.bf16 %v7378_v51, %v7377_v49 }
 0x4d4   :  { %13328 = vmatpush3.bf16.msra.mxu1 %v13922_v22  ;;  %13315 = vmatprep.mubr.msk.bf16.mxu1 %vm1537_vm4, %v6864_v30  ;;  %v7030_v22 = vld [vmem:[#allocation4 + $0xb2] sm:$0xff] }
 0x4d5   :  { %13797 = vmatprep.subr.msk.bf16.mxu1 %vm3245_vm3, %v13923_v34  ;;  %v7042_v29 = vpack.c.bf16 %v7030_v22, %v16312_v58  ;;  %v7201_v58 = vld [vmem:[#allocation4 + $0x53] sm:$0xff]  ;;  %v7222_v34 = vpack.c.bf16 %v7213_v56, %v16362_v62 }
 0x4d6   :  { %v7216_v45 = vpack.c.bf16 %v7201_v58, %v7200_v50  ;;  %v7215_v30 = vld [vmem:[#allocation4 + $0x173] sm:$0xff] }
 0x4d7   :  { %v7223_v15 = vpack.c.bf16 %v7215_v30, %v16371_v32 }
 0x4d8   :  { %13330 = vmatpush3.bf16.msra.mxu1 %v7085_v47  ;;  %v7382_v47 = vld [vmem:[#allocation4 + $0x94] sm:$0xff] }
 0x4d9   :  { %13347 = vmatprep.subr.bf16.mxu1 %v13924_v6  ;;  %v7395_v62 = vpack.c.bf16 %v7382_v47, %v16380_v3  ;;  %v7399_v3 = vpack.c.bf16 %v7390_v23, %v16406_v57  ;;  %v16561_v57 = vld [vmem:[%s17546_s4] ss:$0 sm:$0xff] }
 0x4db   :  { %13316 = vmatmul.mubr.msk.bf16.gmra.mrb[8].mxu1 %vm1537_vm4, %v6865_v21  ;;  %v7384_v21 = vld [vmem:[#allocation4 + $0xb4] sm:$0xff] }
 0x4dc   :  { %13319 = vmatprep.mubr.msk.bf16.mxu1 %vm1537_vm4, %v17783_v61  ;;  %v7386_v61 = vld [vmem:[#allocation4 + $0x114] sm:$0xff]  ;;  %v7396_v32 = vpack.c.bf16 %v7384_v21, %v16397_v53  ;;  %v13941_v53 = vld [vmem:[%s17547_s5 + $0x7c] ss:$16 sps:$4 sm:$0xff]  }
 0x4dd   :  { %7953 = vmatprep.subr.bf16.mxu0 %v13941_v53 }
 0x4e3   :  { %13320 = vmatmul.mubr.msk.bf16.gmra.mrb[12].mxu1 %vm1537_vm4, %v17784_v41  ;;  %v7388_v41 = vld [vmem:[#allocation4 + $0x134] sm:$0xff] }
 0x4e4   :  { %13323 = vmatprep.mubr.msk.bf16.mxu1 %vm1537_vm4, %v6868_v59  ;;  %v7397_v59 = vpack.c.bf16 %v7386_v61, %v7385_v40 }
 0x4eb   :  { %13324 = vmatmul.mubr.msk.bf16.gmra.mrb[16].mxu1 %vm1537_vm4, %v6869_v5  ;;  %v7387_v5 = vld [vmem:[#allocation4 + $0x124] sm:$0xff] }
 0x4ec   :  { %13331 = vmatprep.mubr.msk.bf16.mxu1 %vm1537_vm4, %v17787_v12  ;;  %v7398_v48 = vpack.c.bf16 %v7388_v41, %v7387_v5  ;;  %v7400_v12 = vpack.c.bf16 %v7392_v26, %v16421_v14 }
 0x4f3   :  { %13332 = vmatmul.mubr.msk.bf16.vlgmr.msra.gmra.mrb[4].mxu1 %vm1537_vm4, %v17790_v0 }
 0x4f4   :  { %13348 = vmatpush3.bf16.msra.mxu1 %v13924_v6  ;;  %13335 = vmatprep.mubr.msk.bf16.mxu1 %vm1537_vm4, %v7041_v38  ;;  %v7379_v6 = vld [vmem:[#allocation4 + $0x64] sm:$0xff] }
 0x4f5   :  { %13798 = vmatprep.subr.msk.bf16.mxu1 %vm3245_vm3, %v13925_v28  ;;  %v7394_v37 = vpack.c.bf16 %v7380_v35, %v7379_v6 }
 0x4f8   :  { %13350 = vmatpush3.bf16.msra.mxu1 %v7262_v63 }
 0x4f9   :  { %13367 = vmatprep.subr.bf16.mxu1 %v13926_v55 }
 0x4fb   :  { %13336 = vmatmul.mubr.msk.bf16.gmra.mrb[8].mxu1 %vm1537_vm4, %v7042_v29 }
 0x4fc   :  { %13339 = vmatprep.mubr.msk.bf16.mxu1 %vm1537_vm4, %v17793_v54 }
 0x503   :  { %13340 = vmatmul.mubr.msk.bf16.gmra.mrb[12].mxu1 %vm1537_vm4, %v7044_v1 }
 0x504   :  { %13343 = vmatprep.mubr.msk.bf16.mxu1 %vm1537_vm4, %v7045_v27 }
 0x50b   :  { %13344 = vmatmul.mubr.msk.bf16.gmra.mrb[16].mxu1 %vm1537_vm4, %v7046_v18 }
 0x50c   :  { %13351 = vmatprep.mubr.msk.bf16.mxu1 %vm1537_vm4, %v7216_v45 }
 0x513   :  { %13352 = vmatmul.mubr.msk.bf16.vlgmr.msra.gmra.mrb[4].mxu1 %vm1537_vm4, %v7217_v60 }
 0x514   :  { %13368 = vmatpush3.bf16.msra.mxu1 %v13926_v55  ;;  %13355 = vmatprep.mubr.msk.bf16.mxu1 %vm1537_vm4, %v7218_v16 }
 0x515   :  { %13799 = vmatprep.subr.msk.bf16.mxu1 %vm3245_vm3, %v13927_v9 }
 0x518   :  { %13370 = vmatpush3.bf16.msra.mxu1 %v7439_v44 }
 0x51b   :  { %13356 = vmatmul.mubr.msk.bf16.gmra.mrb[8].mxu1 %vm1537_vm4, %v7219_v7 }
 0x51c   :  { %13359 = vmatprep.mubr.msk.bf16.mxu1 %vm1537_vm4, %v7220_v46 }
 0x523   :  { %13360 = vmatmul.mubr.msk.bf16.gmra.mrb[12].mxu1 %vm1537_vm4, %v7221_v4 }
 0x524   :  { %13363 = vmatprep.mubr.msk.bf16.mxu1 %vm1537_vm4, %v7222_v34 }
 0x52b   :  { %13364 = vmatmul.mubr.msk.bf16.gmra.mrb[16].mxu1 %vm1537_vm4, %v7223_v15 }
 0x52c   :  { %13371 = vmatprep.mubr.msk.bf16.mxu1 %vm1537_vm4, %v7393_v17 }
 0x533   :  { %13372 = vmatmul.mubr.msk.bf16.vlgmr.msra.gmra.mrb[4].mxu1 %vm1537_vm4, %v7394_v37 }
 0x534   :  { %13375 = vmatprep.mubr.msk.bf16.mxu1 %vm1537_vm4, %v7395_v62 }
 0x53b   :  { %13376 = vmatmul.mubr.msk.bf16.gmra.mrb[8].mxu1 %vm1537_vm4, %v7396_v32 }
 0x53c   :  { %13379 = vmatprep.mubr.msk.bf16.mxu1 %vm1537_vm4, %v7397_v59 }
 0x543   :  { %13380 = vmatmul.mubr.msk.bf16.gmra.mrb[12].mxu1 %vm1537_vm4, %v7398_v48 }
 0x544   :  { %13383 = vmatprep.mubr.msk.bf16.mxu1 %vm1537_vm4, %v7399_v3 }
 0x54b   :  { %13384 = vmatmul.mubr.msk.bf16.gmra.mrb[16].mxu1 %vm1537_vm4, %v7400_v12 }
 0x606   :  { %v13373_v28 = vpop.f32.mrb[4].mxu1 }
 0x607   :  { %v7563_v38 = vadd.f32 %v13373_v28, %v16561_v57  ;;  %v7475_v10 = vpop.f32.mrb[5].mxu1 }
 0x608   :  { %v7561_v14 = vadd.f32 %v16561_v57, %v7475_v10  ;;  %v13374_v36 = vpop.f32.mrb[6].mxu1 }
 0x609   :  { %v7579_v0 = vmax.f32 %v7563_v38, 0.0  ;;  %v7564_v63 = vadd.f32 %v13374_v36, %v16561_v57  ;;  %v7478_v55 = vpop.f32.mrb[7].mxu1 }
 0x60a   :  { %v7577_v22 = vmax.f32 %v7561_v14, 0.0  ;;  %v7562_v29 = vadd.f32 %v16561_v57, %v7478_v55 }
 0x60b   :  { %7596 = vst.msk [vmem:[#allocation5 + $0x10] sm:$0xff] %vm7593_vm7, %v7579_v0  ;;  %v7580_v31 = vmax.f32 %v7564_v63, 0.0 }
 0x60c   :  { %7594 = vst.msk [vmem:[#allocation5] sm:$0xff] %vm7593_vm7, %v7577_v22  ;;  %v7578_v25 = vmax.f32 %v7562_v29, 0.0 }
 0x60d   :  { %7597 = vst.msk [vmem:[#allocation5 + $0x18] sm:$0xff] %vm7593_vm7, %v7580_v31 }
 0x60e   :  { %7595 = vst.msk [vmem:[#allocation5 + $0x8] sm:$0xff] %vm7593_vm7, %v7578_v25  ;;  %v13377_v54 = vpop.f32.mrb[8].mxu1 }
 0x60f   :  { %v7567_v52 = vadd.f32 %v13377_v54, %v16561_v57  ;;  %v7491_v8 = vpop.f32.mrb[9].mxu1 }
 0x610   :  { %v7565_v1 = vadd.f32 %v16561_v57, %v7491_v8  ;;  %v13378_v27 = vpop.f32.mrb[10].mxu1 }
 0x611   :  { %v7583_v24 = vmax.f32 %v7567_v52, 0.0  ;;  %v7568_v58 = vadd.f32 %v13378_v27, %v16561_v57  ;;  %v7494_v18 = vpop.f32.mrb[11].mxu1 }
 0x612   :  { %v7581_v50 = vmax.f32 %v7565_v1, 0.0  ;;  %v7566_v45 = vadd.f32 %v16561_v57, %v7494_v18  ;;  %v7620_v19 = vld [vmem:[#allocation5 + $0x10] sm:$0xff] }
 0x613   :  { %7600 = vst.msk [vmem:[#allocation5 + $0x30] sm:$0xff] %vm7593_vm7, %v7583_v24  ;;  %v7584_v42 = vmax.f32 %v7568_v58, 0.0  ;;  %v7610_v9 = vld [vmem:[#allocation5] sm:$0xff] }
 0x614   :  { %v7623_v20 = vld [vmem:[#allocation5 + $0x18] sm:$0xff]  ;;  %7598 = vst.msk [vmem:[#allocation5 + $0x20] sm:$0xff] %vm7593_vm7, %v7581_v50  ;;  %v7582_v60 = vmax.f32 %v7566_v45, 0.0 }
 0x615   :  { %v7625_v16 = vmax.f32 %v7620_v19, %v7623_v20  ;;  %v7613_v44 = vld [vmem:[#allocation5 + $0x8] sm:$0xff]  ;;  %7601 = vst.msk [vmem:[#allocation5 + $0x38] sm:$0xff] %vm7593_vm7, %v7584_v42 }
 0x616   :  { %v7615_v11 = vmax.f32 %v7610_v9, %v7613_v44  ;;  %7599 = vst.msk [vmem:[#allocation5 + $0x28] sm:$0xff] %vm7593_vm7, %v7582_v60  ;;  %v13381_v13 = vpop.f32.mrb[12].mxu1 }
 0x617   :  { %7628 = vst.msk [vmem:[#allocation6 + $0x8] sm:$0xff] %vm7593_vm7, %v7625_v16  ;;  %v7571_v7 = vadd.f32 %v13381_v13, %v16561_v57  ;;  %v7507_v33 = vpop.f32.mrb[13].mxu1 }
 0x618   :  { %7617 = vst.msk [vmem:[#allocation6] sm:$0xff] %vm7593_vm7, %v7615_v11  ;;  %v7569_v46 = vadd.f32 %v16561_v57, %v7507_v33  ;;  %v13382_v39 = vpop.f32.mrb[14].mxu1 }
 0x619   :  { %v7587_v56 = vmax.f32 %v7571_v7, 0.0  ;;  %v7572_v43 = vadd.f32 %v13382_v39, %v16561_v57  ;;  %v7510_v4 = vpop.f32.mrb[15].mxu1 }
 0x61a   :  { %v7585_v34 = vmax.f32 %v7569_v46, 0.0  ;;  %v7570_v30 = vadd.f32 %v16561_v57, %v7510_v4  ;;  %v7642_v15 = vld [vmem:[#allocation5 + $0x30] sm:$0xff] }
 0x61b   :  { %7604 = vst.msk [vmem:[#allocation5 + $0x50] sm:$0xff] %vm7593_vm7, %v7587_v56  ;;  %v7588_v51 = vmax.f32 %v7572_v43, 0.0  ;;  %v7631_v35 = vld [vmem:[#allocation5 + $0x20] sm:$0xff] }
 0x61c   :  { %v7645_v49 = vld [vmem:[#allocation5 + $0x38] sm:$0xff]  ;;  %7602 = vst.msk [vmem:[#allocation5 + $0x40] sm:$0xff] %vm7593_vm7, %v7585_v34  ;;  %v7586_v17 = vmax.f32 %v7570_v30, 0.0 }
 0x61d   :  { %v7647_v47 = vmax.f32 %v7642_v15, %v7645_v49  ;;  %v7634_v6 = vld [vmem:[#allocation5 + $0x28] sm:$0xff]  ;;  %7605 = vst.msk [vmem:[#allocation5 + $0x58] sm:$0xff] %vm7593_vm7, %v7588_v51 }
 0x61e   :  { %v7636_v37 = vmax.f32 %v7631_v35, %v7634_v6  ;;  %7603 = vst.msk [vmem:[#allocation5 + $0x48] sm:$0xff] %vm7593_vm7, %v7586_v17  ;;  %v13385_v62 = vpop.f32.mrb[16].mxu1  ;;  %v13939_v6 = vld [vmem:[%s17547_s5 + $0x78] ss:$16 sps:$4 sm:$0xff]  }
 0x61f   :  { %7650 = vst.msk [vmem:[#allocation6 + $0x18] sm:$0xff] %vm7593_vm7, %v7647_v47  ;;  %v7575_v21 = vadd.f32 %v13385_v62, %v16561_v57  ;;  %v7523_v61 = vpop.f32.mrb[17].mxu1  ;;  %v7685_v32 = vld [vmem:[#allocation6 + $0x2] sm:$0x1]  ;;  %v7693_v40 = vld [vmem:[#allocation6 + $0x3] sm:$0x1] }
 0x620   :  { %7639 = vst.msk [vmem:[#allocation6 + $0x10] sm:$0xff] %vm7593_vm7, %v7636_v37  ;;  %v7573_v59 = vadd.f32 %v16561_v57, %v7523_v61  ;;  %v13386_v41 = vpop.f32.mrb[18].mxu1  ;;  %v7701_v23 = vmax.f32 %v7685_v32, %v7693_v40  ;;  %v7652_v5 = vld [vmem:[#allocation6] sm:$0x1]  ;;  %v7660_v48 = vld [vmem:[#allocation6 + $0x1] sm:$0x1] }
 0x621   :  { %v7591_v3 = vmax.f32 %v7575_v21, 0.0  ;;  %v7576_v26 = vadd.f32 %v13386_v41, %v16561_v57  ;;  %v7526_v12 = vpop.f32.mrb[19].mxu1  ;;  %v7668_v53 = vmax.f32 %v7652_v5, %v7660_v48  ;;  %v7717_v28 = vld [vmem:[#allocation6 + $0x4] sm:$0x1]  ;;  %v7725_v38 = vld [vmem:[#allocation6 + $0x5] sm:$0x1] }
 0x622   :  { %v7589_v10 = vmax.f32 %v7573_v59, 0.0  ;;  %v7574_v14 = vadd.f32 %v16561_v57, %v7526_v12  ;;  %7709 = vst.msk [vmem:[#allocation7 + $0x1] sm:$0x1] %vm7676_vm8, %v7701_v23  ;;  %v7733_v36 = vmax.f32 %v7717_v28, %v7725_v38  ;;  %v7749_v0 = vld [vmem:[#allocation6 + $0x6] sm:$0x1]  ;;  %v7621_v29 = vld [vmem:[#allocation5 + $0x50] sm:$0xff] }
 0x623   :  { %v7757_v63 = vld [vmem:[#allocation6 + $0x7] sm:$0x1]  ;;  %7608 = vst.msk [vmem:[#allocation5 + $0x70] sm:$0xff] %vm7593_vm7, %v7591_v3  ;;  %v7592_v55 = vmax.f32 %v7576_v26, 0.0  ;;  %v7653_v62 = vld [vmem:[#allocation6 + $0x8] sm:$0x1] }
 0x624   :  { %7677 = vst.msk [vmem:[#allocation7] sm:$0x1] %vm7676_vm8, %v7668_v53  ;;  %v7765_v22 = vmax.f32 %v7749_v0, %v7757_v63  ;;  %v7624_v31 = vld [vmem:[#allocation5 + $0x58] sm:$0xff]  ;;  %v7590_v25 = vmax.f32 %v7574_v14, 0.0  ;;  %7741 = vst.msk [vmem:[#allocation7 + $0x2] sm:$0x1] %vm7676_vm8, %v7733_v36 }
 0x625   :  { %7606 = vst.msk [vmem:[#allocation5 + $0x60] sm:$0xff] %vm7593_vm7, %v7589_v10  ;;  %v7611_v54 = vld [vmem:[#allocation5 + $0x40] sm:$0xff]  ;;  %v7626_v57 = vmax.f32 %v7621_v29, %v7624_v31  ;;  %v7614_v52 = vld [vmem:[#allocation5 + $0x48] sm:$0xff]  ;;  %7609 = vst.msk [vmem:[#allocation5 + $0x78] sm:$0xff] %vm7593_vm7, %v7592_v55 }
 0x626   :  { %7773 = vst.msk [vmem:[#allocation7 + $0x3] sm:$0x1] %vm7676_vm8, %v7765_v22  ;;  %v7752_v8 = vld [vmem:[#allocation6 + $0x1e] sm:$0x1]  ;;  %v7760_v1 = vld [vmem:[#allocation6 + $0x1f] sm:$0x1]  ;;  %v7616_v27 = vmax.f32 %v7611_v54, %v7614_v52 }
 0x627   :  { %7607 = vst.msk [vmem:[#allocation5 + $0x68] sm:$0xff] %vm7593_vm7, %v7590_v25  ;;  %v7768_v24 = vmax.f32 %v7752_v8, %v7760_v1  ;;  %7629 = vst.msk [vmem:[#allocation6 + $0x28] sm:$0xff] %vm7593_vm7, %v7626_v57  ;;  %v13944_v32 = vld [vmem:[%s17547_s5 + $0x9c] ss:$16 sps:$4 sm:$0xff]   ;;  %v7661_v40 = vld [vmem:[#allocation6 + $0x9] sm:$0x1] }
 0x628   :  { %7618 = vst.msk [vmem:[#allocation6 + $0x20] sm:$0xff] %vm7593_vm7, %v7616_v27  ;;  %v7669_v41 = vmax.f32 %v7653_v62, %v7661_v40  ;;  %v13942_v5 = vld [vmem:[%s17547_s5 + $0x98] ss:$16 sps:$4 sm:$0xff]   ;;  %v13947_v48 = vld [vmem:[%s17547_s5 + $0xbc] ss:$16 sps:$4 sm:$0xff]  }
 0x629   :  { %7776 = vst.msk [vmem:[#allocation7 + $0xf] sm:$0x1] %vm7676_vm8, %v7768_v24  ;;  %v7799_v30 = vld [vmem:[#allocation7 + $0x1] sm:$0x1]  ;;  %v11820_v3 = vld [vmem:[%s17547_s5 + $0xd8] sm:$0x11] }
 0x62a   :  { %v7643_v58 = vld [vmem:[#allocation5 + $0x70] sm:$0xff]  ;;  %v7801_v15 = vpack.c.bf16 %v7799_v30, %v7799_v30  ;;  %7678 = vst.msk [vmem:[#allocation7 + $0x4] sm:$0x1] %vm7676_vm8, %v7669_v41  ;;  %v13945_v26 = vld [vmem:[%s17547_s5 + $0xb8] ss:$16 sps:$4 sm:$0xff]   ;;  %v11836_v12 = vcombine.high %v11820_v3, %v11820_v3  ;;  %v11835_v53 = vcombine.low %v11820_v3, %v11820_v3 }
 0x62b   :  { %v13952_v38 = vld [vmem:[%s17547_s5 + $0x4] ss:$16 sps:$4 sm:$0xff]   ;;  %v13950_v14 = vld [vmem:[%s17547_s5] ss:$16 sps:$4 sm:$0xff]   ;;  %v13963_v24 = vld [vmem:[%s17547_s5 + $0xc] ss:$16 sps:$4 sm:$0xff]  }
 0x62c   :  { %v7646_v18 = vld [vmem:[#allocation5 + $0x78] sm:$0xff]  ;;  %v7632_v50 = vld [vmem:[#allocation5 + $0x60] sm:$0xff]  ;;  %v7820_v35 = vunpack.c.l.b16 %v7801_v15  ;;  %v7907_v28 = vsel %vm7899_vm6, %v11835_v53, 0 }
 0x62d   :  { %v7648_v45 = vmax.f32 %v7643_v58, %v7646_v18  ;;  %v13955_v36 = vld [vmem:[%s17547_s5 + $0x24] ss:$16 sps:$4 sm:$0xff]   ;;  %v13953_v63 = vld [vmem:[%s17547_s5 + $0x20] ss:$16 sps:$4 sm:$0xff]   ;;  %v13961_v18 = vld [vmem:[%s17547_s5 + $0x8] ss:$16 sps:$4 sm:$0xff]  }
 0x62e   :  { %v7635_v42 = vld [vmem:[#allocation5 + $0x68] sm:$0xff]  ;;  %v13958_v55 = vld [vmem:[%s17547_s5 + $0x44] ss:$16 sps:$4 sm:$0xff]   ;;  %v7781_v22 = vld [vmem:[#allocation7] sm:$0x1] }
 0x62f   :  { %v7637_v19 = vmax.f32 %v7632_v50, %v7635_v42  ;;  %7651 = vst.msk [vmem:[#allocation6 + $0x38] sm:$0xff] %vm7593_vm7, %v7648_v45  ;;  %v7689_v20 = vld [vmem:[#allocation6 + $0x22] sm:$0x1]  ;;  %v7697_v60 = vld [vmem:[#allocation6 + $0x23] sm:$0x1]  ;;  %v7783_v54 = vpack.c.bf16 %v7781_v22, %v7781_v22 }
 0x630   :  { %v7656_v9 = vld [vmem:[#allocation6 + $0x20] sm:$0x1]  ;;  %v7705_v16 = vmax.f32 %v7689_v20, %v7697_v60  ;;  %v7664_v44 = vld [vmem:[#allocation6 + $0x21] sm:$0x1]  ;;  %v7721_v11 = vld [vmem:[#allocation6 + $0x24] sm:$0x1] }
 0x631   :  { %7640 = vst.msk [vmem:[#allocation6 + $0x30] sm:$0xff] %vm7593_vm7, %v7637_v19  ;;  %v7729_v13 = vld [vmem:[#allocation6 + $0x25] sm:$0x1]  ;;  %v7672_v7 = vmax.f32 %v7656_v9, %v7664_v44  ;;  %v7753_v46 = vld [vmem:[#allocation6 + $0x26] sm:$0x1]  ;;  %v7996_v1 = vunpack.c.l.b16 %v7783_v54 }
 0x632   :  { %v7737_v33 = vmax.f32 %v7721_v11, %v7729_v13  ;;  %v7761_v39 = vld [vmem:[#allocation6 + $0x27] sm:$0x1]  ;;  %7713 = vst.msk [vmem:[#allocation7 + $0x11] sm:$0x1] %vm7676_vm8, %v7705_v16  ;;  %v7657_v21 = vld [vmem:[#allocation6 + $0x28] sm:$0x1] }
 0x633   :  { %v7769_v56 = vmax.f32 %v7753_v46, %v7761_v39  ;;  %7681 = vst.msk [vmem:[#allocation7 + $0x10] sm:$0x1] %vm7676_vm8, %v7672_v7  ;;  %v7665_v59 = vld [vmem:[#allocation6 + $0x29] sm:$0x1]  ;;  %v7797_v29 = vld [vmem:[%s17547_s5 + $0x60] sm:$0x11] }
 0x634   :  { %7745 = vst.msk [vmem:[#allocation7 + $0x12] sm:$0x1] %vm7676_vm8, %v7737_v33  ;;  %v7673_v23 = vmax.f32 %v7657_v21, %v7665_v59  ;;  %v13956_v25 = vld [vmem:[%s17547_s5 + $0x40] ss:$16 sps:$4 sm:$0xff]   ;;  %v11854_v57 = vcombine.high %v7797_v29, %v7797_v29  ;;  %v11853_v52 = vcombine.low %v7797_v29, %v7797_v29  ;;  %v7686_v50 = vld [vmem:[#allocation6 + $0xa] sm:$0x1] }
 0x635   :  { %7777 = vst.msk [vmem:[#allocation7 + $0x13] sm:$0x1] %vm7676_vm8, %v7769_v56  ;;  %v7690_v45 = vld [vmem:[#allocation6 + $0x2a] sm:$0x1]  ;;  %v7694_v42 = vld [vmem:[#allocation6 + $0xb] sm:$0x1] }
 0x636   :  { %v7756_v43 = vld [vmem:[#allocation6 + $0x3e] sm:$0x1]  ;;  %v7764_v4 = vld [vmem:[#allocation6 + $0x3f] sm:$0x1]  ;;  %7682 = vst.msk [vmem:[#allocation7 + $0x14] sm:$0x1] %vm7676_vm8, %v7673_v23  ;;  %v7702_v9 = vmax.f32 %v7686_v50, %v7694_v42 }
 0x637   :  { %v7772_v34 = vmax.f32 %v7756_v43, %v7764_v4  ;;  %v8075_v27 = vsel %vm7899_vm6, %v11853_v52, 0  ;;  %v13966_v20 = vld [vmem:[%s17547_s5 + $0x2c] ss:$16 sps:$4 sm:$0xff]   ;;  %v7698_v60 = vld [vmem:[#allocation6 + $0x2b] sm:$0x1] }
 0x638   :  { %v7706_v16 = vmax.f32 %v7690_v45, %v7698_v60  ;;  %7710 = vst.msk [vmem:[#allocation7 + $0x5] sm:$0x1] %vm7676_vm8, %v7702_v9  ;;  %v13964_v44 = vld [vmem:[%s17547_s5 + $0x28] ss:$16 sps:$4 sm:$0xff]   ;;  %v13969_v11 = vld [vmem:[%s17547_s5 + $0x4c] ss:$16 sps:$4 sm:$0xff]  }
 0x639   :  { %7780 = vst.msk [vmem:[#allocation7 + $0x1f] sm:$0x1] %vm7676_vm8, %v7772_v34  ;;  %v7800_v51 = vld [vmem:[#allocation7 + $0x11] sm:$0x1]  ;;  %v7798_v13 = vld [vmem:[%s17547_s5 + $0x68] sm:$0x11] }
 0x63a   :  { %v7802_v49 = vpack.c.bf16 %v7800_v51, %v7800_v51  ;;  %v7782_v10 = vld [vmem:[#allocation7 + $0x10] sm:$0x1]  ;;  %7714 = vst.msk [vmem:[#allocation7 + $0x15] sm:$0x1] %vm7676_vm8, %v7706_v16  ;;  %v13967_v7 = vld [vmem:[%s17547_s5 + $0x48] ss:$16 sps:$4 sm:$0xff]   ;;  %v11856_v33 = vcombine.high %v7798_v13, %v7798_v13  ;;  %v11855_v46 = vcombine.low %v7798_v13, %v7798_v13 }
 0x63b   :  { %v7784_v0 = vpack.c.bf16 %v7782_v10, %v7782_v10  ;;  %v13974_v56 = vld [vmem:[%s17547_s5 + $0xe4] ss:$16 sps:$4 sm:$0xff]   ;;  %v8169_v43 = vld [vmem:[#allocation7 + $0x12] sm:$0x1]  ;;  %v13985_v40 = vld [vmem:[%s17547_s5 + $0xec] ss:$16 sps:$4 sm:$0xff]  }
 0x63c   :  { %v7821_v17 = vunpack.c.l.b16 %v7802_v49  ;;  %v8081_v39 = vsel %vm7899_vm6, %v11855_v46, 0  ;;  %v13972_v4 = vld [vmem:[%s17547_s5 + $0xe0] ss:$16 sps:$4 sm:$0xff]   ;;  %v13977_v34 = vld [vmem:[%s17547_s5 + $0x104] ss:$16 sps:$4 sm:$0xff]   ;;  %v8171_v30 = vpack.c.bf16 %v8169_v43, %v8169_v43 }
 0x63d   :  { %v7997_v31 = vunpack.c.l.b16 %v7784_v0  ;;  %v13975_v51 = vld [vmem:[%s17547_s5 + $0x100] ss:$16 sps:$4 sm:$0xff]   ;;  %v13980_v15 = vld [vmem:[%s17547_s5 + $0x124] ss:$16 sps:$4 sm:$0xff]   ;;  %v13983_v41 = vld [vmem:[%s17547_s5 + $0xe8] ss:$16 sps:$4 sm:$0xff]  }
 0x63e   :  { %v7822_v47 = vrot.slane %v7821_v17, 7  ;;  %v8168_v49 = vld [vmem:[#allocation7 + $0x2] sm:$0x1]  ;;  %v11873_v17 = vld [vmem:[%s17547_s5 + $0x140] sm:$0x11] }
 0x63f   :  { %v7998_v8 = vrot.slane %v7997_v31, 7  ;;  %v11887_v62 = vcombine.low %v11873_v17, %v11873_v17  ;;  %v7718_v23 = vld [vmem:[#allocation6 + $0xc] sm:$0x1]  ;;  %v7758_v0 = vld [vmem:[#allocation6 + $0xf] sm:$0x1] }
 0x640   :  { %v7824_v37 = vsel %vm7823_vm9, %v7822_v47, %v7820_v35  ;;  %v8190_v35 = vunpack.c.l.b16 %v8171_v30  ;;  %v13978_v47 = vld [vmem:[%s17547_s5 + $0x120] ss:$16 sps:$4 sm:$0xff]   ;;  %v11874_v10 = vld [vmem:[%s17547_s5 + $0x148] sm:$0x11]  ;;  %v7655_v54 = vld [vmem:[#allocation6 + $0x18] sm:$0x1] }
 0x641   :  { %v7825_v61 = vpack.c.b16 %v7824_v37, %v7824_v37  ;;  %v7999_v58 = vsel %vm7823_vm9, %v7998_v8, %v7996_v1  ;;  %v11888_v37 = vcombine.high %v11873_v17, %v11873_v17  ;;  %v13989_v22 = vld [vmem:[%s17547_s5 + $0x128] ss:$16 sps:$4 sm:$0xff]   ;;  %v11890_v29 = vcombine.high %v11874_v10, %v11874_v10  ;;  %v7654_v52 = vld [vmem:[#allocation6 + $0x10] sm:$0x1]  ;;  %v7662_v8 = vld [vmem:[#allocation6 + $0x11] sm:$0x1] }
 0x642   :  { %v8000_v19 = vpack.c.b16 %v7999_v58, %v7999_v58  ;;  %v8191_v21 = vrot.slane %v8190_v35, 7  ;;  %v7687_v1 = vld [vmem:[#allocation6 + $0x12] sm:$0x1]  ;;  %v7695_v58 = vld [vmem:[#allocation6 + $0x13] sm:$0x1] }
 0x643   :  { %11838 = vmatmul.mubr.msk.bf16.vlgmr.msra.gmra.mrb[140].mxu0 %vm7593_vm7, %v7825_v61  ;;  %v7727_v50 = vld [vmem:[#allocation6 + $0x15] sm:$0x1]  ;;  %v13994_v45 = vld [vmem:[%s17547_s5 + $0x150] ss:$16 sps:$4 sm:$0xff]   ;;  %v7751_v60 = vld [vmem:[#allocation6 + $0x16] sm:$0x1] }
 0x644   :  { %7954 = vmatpush1.bf16.msra.mxu0 %v13939_v6  ;;  %7985 = vmatprep.mubr.bf16.mxu0 %v14413_v2  ;;  %v8170_v6 = vpack.c.bf16 %v8168_v49, %v8168_v49  ;;  %v8366_v42 = vld [vmem:[#allocation7 + $0x13] sm:$0x1]  ;;  %v13999_v9 = vld [vmem:[%s17547_s5 + $0x174] ss:$16 sps:$4 sm:$0xff]   ;;  %v7696_v13 = vld [vmem:[#allocation6 + $0x1b] sm:$0x1] }
 0x645   :  { %7955 = vmatprep.subr.bf16.mxu0 %v13944_v32  ;;  %v8268_v32 = vsel %vm7899_vm6, %v11887_v62, 0  ;;  %v7759_v16 = vld [vmem:[#allocation6 + $0x17] sm:$0x1]  ;;  %v8368_v46 = vpack.c.bf16 %v8366_v42, %v8366_v42  ;;  %v13997_v43 = vld [vmem:[%s17547_s5 + $0x170] ss:$16 sps:$4 sm:$0xff]  }
 0x646   :  { %v7762_v30 = vld [vmem:[#allocation6 + $0x2f] sm:$0x1]  ;;  %v8564_v42 = vld [vmem:[#allocation7 + $0x14] sm:$0x1] }
 0x647   :  { %v8387_v17 = vunpack.c.l.b16 %v8368_v46 }
 0x648   :  { %7956 = vmatpush1.bf16.msra.mxu0 %v13942_v5  ;;  %v7722_v5 = vld [vmem:[#allocation6 + $0x2c] sm:$0x1] }
 0x649   :  { %7957 = vmatprep.subr.bf16.mxu0 %v13947_v48  ;;  %v7726_v48 = vld [vmem:[#allocation6 + $0xd] sm:$0x1]  ;;  %v8388_v62 = vrot.slane %v8387_v17, 7  ;;  %v14030_v17 = vld [vmem:[%s17547_s5 + $0x1e8] ss:$16 sps:$4 sm:$0xff]  }
 0x64a   :  { %v7734_v53 = vmax.f32 %v7718_v23, %v7726_v48  ;;  %v7666_v23 = vld [vmem:[#allocation6 + $0x31] sm:$0x1] }
 0x64c   :  { %7958 = vmatpush1.bf16.msra.mxu0 %v13945_v26  ;;  %v13988_v26 = vld [vmem:[%s17547_s5 + $0x10c] ss:$16 sps:$4 sm:$0xff]   ;;  %7742 = vst.msk [vmem:[#allocation7 + $0x6] sm:$0x1] %vm7676_vm8, %v7734_v53  ;;  %v7723_v53 = vld [vmem:[#allocation6 + $0x34] sm:$0x1] }
 0x64d   :  { %11839 = vmatprep.subr.msk.bf16.mxu0 %vm7899_vm6, %v11836_v12  ;;  %v7730_v12 = vld [vmem:[#allocation6 + $0x2d] sm:$0x1] }
 0x650   :  { %7960 = vmatpush1.bf16.msra.mxu0 %v7907_v28  ;;  %v7738_v28 = vmax.f32 %v7722_v5, %v7730_v12  ;;  %v7691_v5 = vld [vmem:[#allocation6 + $0x32] sm:$0x1]  ;;  %v7699_v12 = vld [vmem:[#allocation6 + $0x33] sm:$0x1] }
 0x651   :  { %8086 = vmatprep.subr.bf16.mxu0 %v13952_v38  ;;  %v13986_v38 = vld [vmem:[%s17547_s5 + $0x108] ss:$16 sps:$4 sm:$0xff]  }
 0x652   :  { %7746 = vst.msk [vmem:[#allocation7 + $0x16] sm:$0x1] %vm7676_vm8, %v7738_v28  ;;  %v14005_v28 = vld [vmem:[%s17547_s5 + $0x158] ss:$16 sps:$4 sm:$0xff]  }
 0x653   :  { %11840 = vmatmul.mubr.msk.bf16.vlgmr.msra.gmra.mrb[144].mxu0 %vm7593_vm7, %v7825_v61  ;;  %v8189_v61 = vunpack.c.l.b16 %v8170_v6 }
 0x654   :  { %8087 = vmatpush1.bf16.msra.mxu0 %v13950_v14  ;;  %8118 = vmatprep.mubr.bf16.mxu0 %v14413_v2  ;;  %v7750_v14 = vld [vmem:[#allocation6 + $0xe] sm:$0x1] }
 0x655   :  { %8088 = vmatprep.subr.bf16.mxu0 %v13955_v36  ;;  %v8192_v59 = vsel %vm7823_vm9, %v8191_v21, %v8189_v61  ;;  %v13991_v36 = vld [vmem:[%s17547_s5 + $0x12c] ss:$16 sps:$4 sm:$0xff]  }
 0x656   :  { %v8193_v3 = vpack.c.b16 %v8192_v59, %v8192_v59  ;;  %v7667_v59 = vld [vmem:[#allocation6 + $0x39] sm:$0x1] }
 0x658   :  { %8089 = vmatpush1.bf16.msra.mxu0 %v13953_v63  ;;  %v7766_v63 = vmax.f32 %v7750_v14, %v7758_v0  ;;  %v7755_v14 = vld [vmem:[#allocation6 + $0x36] sm:$0x1]  ;;  %v7763_v0 = vld [vmem:[#allocation6 + $0x37] sm:$0x1] }
 0x659   :  { %8090 = vmatprep.subr.bf16.mxu0 %v13958_v55  ;;  %v11889_v55 = vcombine.low %v11874_v10, %v11874_v10  ;;  %v7731_v10 = vld [vmem:[#allocation6 + $0x35] sm:$0x1] }
 0x65a   :  { %7774 = vst.msk [vmem:[#allocation7 + $0x7] sm:$0x1] %vm7676_vm8, %v7766_v63  ;;  %v7692_v63 = vld [vmem:[#allocation6 + $0x3a] sm:$0x1] }
 0x65b   :  { %v8274_v31 = vsel %vm7899_vm6, %v11889_v55, 0  ;;  %v7700_v55 = vld [vmem:[#allocation6 + $0x3b] sm:$0x1] }
 0x65c   :  { %8091 = vmatpush1.bf16.msra.mxu0 %v13956_v25  ;;  %v13996_v25 = vld [vmem:[%s17547_s5 + $0x154] ss:$16 sps:$4 sm:$0xff]  }
 0x65d   :  { %11857 = vmatprep.subr.msk.bf16.mxu0 %vm7899_vm6, %v11854_v57  ;;  %v7663_v57 = vld [vmem:[#allocation6 + $0x19] sm:$0x1] }
 0x660   :  { %8093 = vmatpush1.bf16.msra.mxu0 %v8075_v27  ;;  %v7671_v27 = vmax.f32 %v7655_v54, %v7663_v57  ;;  %v7724_v54 = vld [vmem:[#allocation6 + $0x3c] sm:$0x1]  ;;  %v7732_v57 = vld [vmem:[#allocation6 + $0x3d] sm:$0x1] }
 0x661   :  { %8127 = vmatprep.subr.bf16.mxu0 %v13963_v24  ;;  %v7670_v24 = vmax.f32 %v7654_v52, %v7662_v8  ;;  %v7740_v52 = vmax.f32 %v7724_v54, %v7732_v57  ;;  %v14008_v8 = vld [vmem:[%s17547_s5 + $0x178] ss:$16 sps:$4 sm:$0xff]  }
 0x662   :  { %7680 = vst.msk [vmem:[#allocation7 + $0xc] sm:$0x1] %vm7676_vm8, %v7671_v27  ;;  %v11908_v27 = vld [vmem:[%s17547_s5 + $0x1b8] sm:$0x11] }
 0x663   :  { %11858 = vmatmul.mubr.msk.bf16.vlgmr.msra.gmra.mrb[148].mxu0 %vm7593_vm7, %v8000_v19  ;;  %7679 = vst.msk [vmem:[#allocation7 + $0x8] sm:$0x1] %vm7676_vm8, %v7670_v24  ;;  %7748 = vst.msk [vmem:[#allocation7 + $0x1e] sm:$0x1] %vm7676_vm8, %v7740_v52  ;;  %v14011_v24 = vld [vmem:[%s17547_s5 + $0x198] ss:$16 sps:$4 sm:$0xff]  }
 0x664   :  { %8128 = vmatpush1.bf16.msra.mxu0 %v13961_v18  ;;  %8159 = vmatprep.mubr.bf16.mxu0 %v14413_v2  ;;  %v7719_v18 = vld [vmem:[#allocation6 + $0x14] sm:$0x1]  ;;  %v11976_v54 = vld [vmem:[%s17547_s5 + $0x298] sm:$0x11] }
 0x665   :  { %8129 = vmatprep.subr.bf16.mxu0 %v13966_v20  ;;  %v7735_v20 = vmax.f32 %v7719_v18, %v7727_v50  ;;  %v11923_v18 = vcombine.low %v11908_v27, %v11908_v27  ;;  %v14055_v57 = vld [vmem:[%s17547_s5 + $0x278] ss:$16 sps:$4 sm:$0xff]   ;;  %v11992_v52 = vcombine.high %v11976_v54, %v11976_v54 }
 0x667   :  { %7743 = vst.msk [vmem:[#allocation7 + $0xa] sm:$0x1] %vm7676_vm8, %v7735_v20  ;;  %v8471_v50 = vsel %vm7899_vm6, %v11923_v18, 0  ;;  %v14021_v20 = vld [vmem:[%s17547_s5 + $0x1e4] ss:$16 sps:$4 sm:$0xff]  }
 0x668   :  { %8130 = vmatpush1.bf16.msra.mxu0 %v13964_v44  ;;  %v7688_v44 = vld [vmem:[#allocation6 + $0x1a] sm:$0x1]  ;;  %v14065_v18 = vld [vmem:[%s17547_s5 + $0x2c4] ss:$16 sps:$4 sm:$0xff]  }
 0x669   :  { %8131 = vmatprep.subr.bf16.mxu0 %v13969_v11  ;;  %v7767_v11 = vmax.f32 %v7751_v60, %v7759_v16  ;;  %v8566_v60 = vpack.c.bf16 %v8564_v42, %v8564_v42  ;;  %v14024_v16 = vld [vmem:[%s17547_s5 + $0x204] ss:$16 sps:$4 sm:$0xff]  }
 0x66a   :  { %v14068_v42 = vld [vmem:[%s17547_s5 + $0x2e4] ss:$16 sps:$4 sm:$0xff]  }
 0x66b   :  { %7775 = vst.msk [vmem:[#allocation7 + $0xb] sm:$0x1] %vm7676_vm8, %v7767_v11  ;;  %v11941_v11 = vld [vmem:[%s17547_s5 + $0x220] sm:$0x11] }
 0x66c   :  { %8132 = vmatpush1.bf16.msra.mxu0 %v13967_v7  ;;  %v7720_v7 = vld [vmem:[#allocation6 + $0x1c] sm:$0x1]  ;;  %v11956_v46 = vcombine.high %v11941_v11, %v11941_v11 }
 0x66d   :  { %11859 = vmatprep.subr.msk.bf16.mxu0 %vm7899_vm6, %v11856_v33  ;;  %v7728_v33 = vld [vmem:[#allocation6 + $0x1d] sm:$0x1] }
 0x670   :  { %8134 = vmatpush1.bf16.msra.mxu0 %v8081_v39  ;;  %v7704_v39 = vmax.f32 %v7688_v44, %v7696_v13  ;;  %v8563_v44 = vld [vmem:[#allocation7 + $0x4] sm:$0x1]  ;;  %v8585_v13 = vunpack.c.l.b16 %v8566_v60 }
 0x671   :  { %8279 = vmatprep.subr.bf16.mxu0 %v13974_v56  ;;  %v7736_v56 = vmax.f32 %v7720_v7, %v7728_v33  ;;  %v14022_v7 = vld [vmem:[%s17547_s5 + $0x200] ss:$16 sps:$4 sm:$0xff]   ;;  %v8565_v33 = vpack.c.bf16 %v8563_v44, %v8563_v44 }
 0x672   :  { %7712 = vst.msk [vmem:[#allocation7 + $0xd] sm:$0x1] %vm7676_vm8, %v7704_v39  ;;  %v11955_v39 = vcombine.low %v11941_v11, %v11941_v11 }
 0x673   :  { %11860 = vmatmul.mubr.msk.bf16.vlgmr.msra.gmra.mrb[152].mxu0 %vm7593_vm7, %v8000_v19  ;;  %v7703_v19 = vmax.f32 %v7687_v1, %v7695_v58  ;;  %7744 = vst.msk [vmem:[#allocation7 + $0xe] sm:$0x1] %vm7676_vm8, %v7736_v56  ;;  %v14013_v1 = vld [vmem:[%s17547_s5 + $0x19c] ss:$16 sps:$4 sm:$0xff]   ;;  %v11924_v58 = vcombine.high %v11908_v27, %v11908_v27  ;;  %v8586_v56 = vrot.slane %v8585_v13, 7 }
 0x674   :  { %8280 = vmatpush1.bf16.msra.mxu0 %v13972_v4  ;;  %8311 = vmatprep.mubr.bf16.mxu0 %v14413_v2  ;;  %v11907_v4 = vld [vmem:[%s17547_s5 + $0x1b0] sm:$0x11] }
 0x675   :  { %8281 = vmatprep.subr.bf16.mxu0 %v13977_v34  ;;  %7711 = vst.msk [vmem:[#allocation7 + $0x9] sm:$0x1] %vm7676_vm8, %v7703_v19  ;;  %v7754_v34 = vld [vmem:[#allocation6 + $0x2e] sm:$0x1]  ;;  %v11921_v35 = vcombine.low %v11907_v4, %v11907_v4  ;;  %v14016_v19 = vld [vmem:[%s17547_s5 + $0x1c0] ss:$16 sps:$4 sm:$0xff]  }
 0x676   :  { %v7770_v49 = vmax.f32 %v7754_v34, %v7762_v30  ;;  %v14029_v34 = vld [vmem:[%s17547_s5 + $0x1cc] ss:$16 sps:$4 sm:$0xff]   ;;  %v14062_v27 = vld [vmem:[%s17547_s5 + $0x2a4] ss:$16 sps:$4 sm:$0xff]  }
 0x677   :  { %v8465_v21 = vsel %vm7899_vm6, %v11921_v35, 0  ;;  %v14035_v35 = vld [vmem:[%s17547_s5 + $0x20c] ss:$16 sps:$4 sm:$0xff]  }
 0x678   :  { %8282 = vmatpush1.bf16.msra.mxu0 %v13975_v51  ;;  %v14002_v51 = vld [vmem:[%s17547_s5 + $0x194] ss:$16 sps:$4 sm:$0xff]   ;;  %7778 = vst.msk [vmem:[#allocation7 + $0x17] sm:$0x1] %vm7676_vm8, %v7770_v49  ;;  %v14032_v49 = vld [vmem:[%s17547_s5 + $0x1ec] ss:$16 sps:$4 sm:$0xff]  }
 0x679   :  { %8283 = vmatprep.subr.bf16.mxu0 %v13980_v15  ;;  %v8365_v15 = vld [vmem:[#allocation7 + $0x3] sm:$0x1] }
 0x67a   :  { %v8367_v6 = vpack.c.bf16 %v8365_v15, %v8365_v15 }
 0x67c   :  { %8284 = vmatpush1.bf16.msra.mxu0 %v13978_v47  ;;  %v14000_v47 = vld [vmem:[%s17547_s5 + $0x190] ss:$16 sps:$4 sm:$0xff]   ;;  %v8386_v61 = vunpack.c.l.b16 %v8367_v6  ;;  %v14033_v6 = vld [vmem:[%s17547_s5 + $0x208] ss:$16 sps:$4 sm:$0xff]  }
 0x67d   :  { %11891 = vmatprep.subr.msk.bf16.mxu0 %vm7899_vm6, %v11888_v37  ;;  %v11922_v37 = vcombine.high %v11907_v4, %v11907_v4  ;;  %v8663_v4 = vsel %vm7899_vm6, %v11955_v39, 0 }
 0x680   :  { %8286 = vmatpush1.bf16.msra.mxu0 %v8268_v32  ;;  %v14007_v32 = vld [vmem:[%s17547_s5 + $0x15c] ss:$16 sps:$4 sm:$0xff]  }
 0x681   :  { %8320 = vmatprep.subr.bf16.mxu0 %v13985_v40  ;;  %v7659_v40 = vld [vmem:[#allocation6 + $0x38] sm:$0x1] }
 0x682   :  { %v7675_v48 = vmax.f32 %v7659_v40, %v7667_v59  ;;  %v14038_v40 = vld [vmem:[%s17547_s5 + $0x230] ss:$16 sps:$4 sm:$0xff]   ;;  %v14043_v59 = vld [vmem:[%s17547_s5 + $0x254] ss:$16 sps:$4 sm:$0xff]  }
 0x683   :  { %11892 = vmatmul.mubr.msk.bf16.vlgmr.msra.gmra.mrb[156].mxu0 %vm7593_vm7, %v8193_v3 }
 0x684   :  { %8321 = vmatpush1.bf16.msra.mxu0 %v13983_v41  ;;  %8352 = vmatprep.mubr.bf16.mxu0 %v14413_v2  ;;  %v7658_v41 = vld [vmem:[#allocation6 + $0x30] sm:$0x1]  ;;  %7684 = vst.msk [vmem:[#allocation7 + $0x1c] sm:$0x1] %vm7676_vm8, %v7675_v48  ;;  %v8760_v48 = vld [vmem:[#allocation7 + $0x5] sm:$0x1] }
 0x685   :  { %8322 = vmatprep.subr.bf16.mxu0 %v13988_v26  ;;  %v7674_v26 = vmax.f32 %v7658_v41, %v7666_v23  ;;  %v14041_v23 = vld [vmem:[%s17547_s5 + $0x250] ss:$16 sps:$4 sm:$0xff]  }
 0x687   :  { %7683 = vst.msk [vmem:[#allocation7 + $0x18] sm:$0x1] %vm7676_vm8, %v7674_v26 }
 0x688   :  { %8323 = vmatpush1.bf16.msra.mxu0 %v13986_v38  ;;  %v7707_v38 = vmax.f32 %v7691_v5, %v7699_v12  ;;  %v14046_v5 = vld [vmem:[%s17547_s5 + $0x274] ss:$16 sps:$4 sm:$0xff]   ;;  %v14044_v12 = vld [vmem:[%s17547_s5 + $0x270] ss:$16 sps:$4 sm:$0xff]  }
 0x689   :  { %8324 = vmatprep.subr.bf16.mxu0 %v13991_v36  ;;  %v7739_v36 = vmax.f32 %v7723_v53, %v7731_v10  ;;  %v8762_v53 = vpack.c.bf16 %v8760_v48, %v8760_v48 }
 0x68a   :  { %7715 = vst.msk [vmem:[#allocation7 + $0x19] sm:$0x1] %vm7676_vm8, %v7707_v38 }
 0x68b   :  { %7747 = vst.msk [vmem:[#allocation7 + $0x1a] sm:$0x1] %vm7676_vm8, %v7739_v36 }
 0x68c   :  { %8325 = vmatpush1.bf16.msra.mxu0 %v13989_v22 }
 0x68d   :  { %11893 = vmatprep.subr.msk.bf16.mxu0 %vm7899_vm6, %v11890_v29  ;;  %v14010_v29 = vld [vmem:[%s17547_s5 + $0x17c] ss:$16 sps:$4 sm:$0xff]  }
 0x690   :  { %8327 = vmatpush1.bf16.msra.mxu0 %v8274_v31  ;;  %v7771_v31 = vmax.f32 %v7755_v14, %v7763_v0  ;;  %v8781_v14 = vunpack.c.l.b16 %v8762_v53  ;;  %v14051_v0 = vld [vmem:[%s17547_s5 + $0x23c] ss:$16 sps:$4 sm:$0xff]  }
 0x691   :  { %8476 = vmatprep.subr.bf16.mxu0 %v13996_v25  ;;  %v7708_v25 = vmax.f32 %v7692_v63, %v7700_v55  ;;  %v14049_v55 = vld [vmem:[%s17547_s5 + $0x238] ss:$16 sps:$4 sm:$0xff]  }
 0x692   :  { %7779 = vst.msk [vmem:[#allocation7 + $0x1b] sm:$0x1] %vm7676_vm8, %v7771_v31  ;;  %v14052_v31 = vld [vmem:[%s17547_s5 + $0x258] ss:$16 sps:$4 sm:$0xff]  }
 0x693   :  { %11894 = vmatmul.mubr.msk.bf16.vlgmr.msra.gmra.mrb[160].mxu0 %vm7593_vm7, %v8193_v3  ;;  %v8389_v3 = vsel %vm7823_vm9, %v8388_v62, %v8386_v61  ;;  %7716 = vst.msk [vmem:[#allocation7 + $0x1d] sm:$0x1] %vm7676_vm8, %v7708_v25  ;;  %v14040_v61 = vld [vmem:[%s17547_s5 + $0x234] ss:$16 sps:$4 sm:$0xff]   ;;  %v14057_v25 = vld [vmem:[%s17547_s5 + $0x27c] ss:$16 sps:$4 sm:$0xff]  }
 0x694   :  { %8477 = vmatpush1.bf16.msra.mxu0 %v13994_v45  ;;  %8508 = vmatprep.mubr.bf16.mxu0 %v14413_v2  ;;  %v8390_v22 = vpack.c.b16 %v8389_v3, %v8389_v3  ;;  %v14018_v45 = vld [vmem:[%s17547_s5 + $0x1c4] ss:$16 sps:$4 sm:$0xff]  }
 0x695   :  { %8478 = vmatprep.subr.bf16.mxu0 %v13999_v9  ;;  %v14019_v9 = vld [vmem:[%s17547_s5 + $0x1e0] ss:$16 sps:$4 sm:$0xff]  }
 0x696   :  { %v11975_v3 = vld [vmem:[%s17547_s5 + $0x290] sm:$0x11] }
 0x697   :  { %v11989_v38 = vcombine.low %v11975_v3, %v11975_v3 }
 0x698   :  { %8479 = vmatpush1.bf16.msra.mxu0 %v13997_v43  ;;  %v8584_v43 = vunpack.c.l.b16 %v8565_v33 }
 0x699   :  { %8480 = vmatprep.subr.bf16.mxu0 %v14002_v51  ;;  %v14027_v51 = vld [vmem:[%s17547_s5 + $0x1c8] ss:$16 sps:$4 sm:$0xff]   ;;  %v8860_v36 = vsel %vm7899_vm6, %v11989_v38, 0 }
 0x69a   :  { %v8587_v30 = vsel %vm7823_vm9, %v8586_v56, %v8584_v43  ;;  %v14071_v56 = vld [vmem:[%s17547_s5 + $0x2a8] ss:$16 sps:$4 sm:$0xff]  }
 0x69b   :  { %v8588_v15 = vpack.c.b16 %v8587_v30, %v8587_v30  ;;  %v14079_v30 = vld [vmem:[%s17547_s5 + $0x2ec] ss:$16 sps:$4 sm:$0xff]  }
 0x69c   :  { %8481 = vmatpush1.bf16.msra.mxu0 %v14000_v47  ;;  %v11942_v47 = vld [vmem:[%s17547_s5 + $0x228] sm:$0x11] }
 0x69d   :  { %11925 = vmatprep.subr.msk.bf16.mxu0 %vm7899_vm6, %v11922_v37  ;;  %v11958_v37 = vcombine.high %v11942_v47, %v11942_v47  ;;  %v11957_v62 = vcombine.low %v11942_v47, %v11942_v47  ;;  %v14084_v47 = vld [vmem:[%s17547_s5 + $0x314] ss:$16 sps:$4 sm:$0xff]  }
 0x6a0   :  { %8483 = vmatpush1.bf16.msra.mxu0 %v8465_v21  ;;  %v8669_v21 = vsel %vm7899_vm6, %v11957_v62, 0  ;;  %v14087_v62 = vld [vmem:[%s17547_s5 + $0x334] ss:$16 sps:$4 sm:$0xff]  }
 0x6a1   :  { %8517 = vmatprep.subr.bf16.mxu0 %v14007_v32  ;;  %v8761_v32 = vld [vmem:[#allocation7 + $0x15] sm:$0x1] }
 0x6a2   :  { %v8763_v41 = vpack.c.bf16 %v8761_v32, %v8761_v32  ;;  %v14090_v32 = vld [vmem:[%s17547_s5 + $0x354] ss:$16 sps:$4 sm:$0xff]  }
 0x6a3   :  { %11926 = vmatmul.mubr.msk.bf16.vlgmr.msra.gmra.mrb[164].mxu0 %vm7593_vm7, %v8390_v22 }
 0x6a4   :  { %8518 = vmatpush1.bf16.msra.mxu0 %v14005_v28  ;;  %8549 = vmatprep.mubr.bf16.mxu0 %v14413_v2  ;;  %v8782_v26 = vunpack.c.l.b16 %v8763_v41  ;;  %v11990_v28 = vcombine.high %v11975_v3, %v11975_v3  ;;  %v12043_v41 = vld [vmem:[%s17547_s5 + $0x370] sm:$0x11] }
 0x6a5   :  { %8519 = vmatprep.subr.bf16.mxu0 %v14010_v29  ;;  %v14054_v29 = vld [vmem:[%s17547_s5 + $0x25c] ss:$16 sps:$4 sm:$0xff]   ;;  %v14088_v3 = vld [vmem:[%s17547_s5 + $0x350] ss:$16 sps:$4 sm:$0xff]   ;;  %v12058_v53 = vcombine.high %v12043_v41, %v12043_v41 }
 0x6a6   :  { %v8783_v10 = vrot.slane %v8782_v26, 7 }
 0x6a8   :  { %8520 = vmatpush1.bf16.msra.mxu0 %v14008_v8  ;;  %v8784_v63 = vsel %vm7823_vm9, %v8783_v10, %v8781_v14  ;;  %v11991_v8 = vcombine.low %v11976_v54, %v11976_v54  ;;  %v12044_v54 = vld [vmem:[%s17547_s5 + $0x378] sm:$0x11] }
 0x6a9   :  { %8521 = vmatprep.subr.bf16.mxu0 %v14013_v1 }
 0x6aa   :  { %v8866_v1 = vsel %vm7899_vm6, %v11991_v8, 0  ;;  %v14099_v8 = vld [vmem:[%s17547_s5 + $0x358] ss:$16 sps:$4 sm:$0xff]  }
 0x6ac   :  { %8522 = vmatpush1.bf16.msra.mxu0 %v14011_v24  ;;  %v8958_v24 = vld [vmem:[#allocation7 + $0x16] sm:$0x1] }
 0x6ad   :  { %11927 = vmatprep.subr.msk.bf16.mxu0 %vm7899_vm6, %v11924_v58  ;;  %v14060_v58 = vld [vmem:[%s17547_s5 + $0x2a0] ss:$16 sps:$4 sm:$0xff]  }
 0x6b0   :  { %8524 = vmatpush1.bf16.msra.mxu0 %v8471_v50  ;;  %v8960_v50 = vpack.c.bf16 %v8958_v24, %v8958_v24  ;;  %v12059_v24 = vcombine.low %v12044_v54, %v12044_v54 }
 0x6b1   :  { %8674 = vmatprep.subr.bf16.mxu0 %v14018_v45  ;;  %v14063_v45 = vld [vmem:[%s17547_s5 + $0x2c0] ss:$16 sps:$4 sm:$0xff]  }
 0x6b2   :  { %v8979_v60 = vunpack.c.l.b16 %v8960_v50  ;;  %v9353_v50 = vld [vmem:[#allocation7 + $0x18] sm:$0x1] }
 0x6b3   :  { %11928 = vmatmul.mubr.msk.bf16.vlgmr.msra.gmra.mrb[168].mxu0 %vm7593_vm7, %v8390_v22  ;;  %v8785_v22 = vpack.c.b16 %v8784_v63, %v8784_v63  ;;  %v14093_v63 = vld [vmem:[%s17547_s5 + $0x318] ss:$16 sps:$4 sm:$0xff]  }
 0x6b4   :  { %8675 = vmatpush1.bf16.msra.mxu0 %v14016_v19  ;;  %8706 = vmatprep.mubr.bf16.mxu0 %v14413_v2  ;;  %v8957_v19 = vld [vmem:[#allocation7 + $0x6] sm:$0x1]  ;;  %v8980_v13 = vrot.slane %v8979_v60, 7 }
 0x6b5   :  { %8676 = vmatprep.subr.bf16.mxu0 %v14021_v20  ;;  %v12009_v20 = vld [vmem:[%s17547_s5 + $0x300] sm:$0x11] }
 0x6b6   :  { %v12024_v44 = vcombine.high %v12009_v20, %v12009_v20  ;;  %v12023_v11 = vcombine.low %v12009_v20, %v12009_v20  ;;  %v14107_v20 = vld [vmem:[%s17547_s5 + $0x3a0] ss:$16 sps:$4 sm:$0xff]   ;;  %v14112_v60 = vld [vmem:[%s17547_s5 + $0x3c4] ss:$16 sps:$4 sm:$0xff]  }
 0x6b8   :  { %8677 = vmatpush1.bf16.msra.mxu0 %v14019_v9  ;;  %v14066_v9 = vld [vmem:[%s17547_s5 + $0x2e0] ss:$16 sps:$4 sm:$0xff]   ;;  %v9057_v33 = vsel %vm7899_vm6, %v12023_v11, 0 }
 0x6b9   :  { %8678 = vmatprep.subr.bf16.mxu0 %v14024_v16  ;;  %v8959_v16 = vpack.c.bf16 %v8957_v19, %v8957_v19  ;;  %v9355_v19 = vpack.c.bf16 %v9353_v50, %v9353_v50  ;;  %v14139_v50 = vld [vmem:[%s17547_s5 + $0x3fc] ss:$16 sps:$4 sm:$0xff]  }
 0x6bb   :  { %v9374_v11 = vunpack.c.l.b16 %v9355_v19 }
 0x6bc   :  { %8679 = vmatpush1.bf16.msra.mxu0 %v14022_v7  ;;  %v8978_v7 = vunpack.c.l.b16 %v8959_v16 }
 0x6bd   :  { %11959 = vmatprep.subr.msk.bf16.mxu0 %vm7899_vm6, %v11956_v46  ;;  %v14073_v46 = vld [vmem:[%s17547_s5 + $0x2ac] ss:$16 sps:$4 sm:$0xff]  }
 0x6be   :  { %v8981_v39 = vsel %vm7823_vm9, %v8980_v13, %v8978_v7 }
 0x6bf   :  { %v8982_v43 = vpack.c.b16 %v8981_v39, %v8981_v39  ;;  %v14110_v39 = vld [vmem:[%s17547_s5 + $0x3c0] ss:$16 sps:$4 sm:$0xff]  }
 0x6c0   :  { %8681 = vmatpush1.bf16.msra.mxu0 %v8663_v4  ;;  %v14076_v4 = vld [vmem:[%s17547_s5 + $0x2cc] ss:$16 sps:$4 sm:$0xff]  }
 0x6c1   :  { %8715 = vmatprep.subr.bf16.mxu0 %v14029_v34  ;;  %v14074_v34 = vld [vmem:[%s17547_s5 + $0x2c8] ss:$16 sps:$4 sm:$0xff]  }
 0x6c3   :  { %11960 = vmatmul.mubr.msk.bf16.vlgmr.msra.gmra.mrb[172].mxu0 %vm7593_vm7, %v8588_v15 }
 0x6c4   :  { %8716 = vmatpush1.bf16.msra.mxu0 %v14027_v51  ;;  %8747 = vmatprep.mubr.bf16.mxu0 %v14413_v2  ;;  %v12010_v51 = vld [vmem:[%s17547_s5 + $0x308] sm:$0x11] }
 0x6c5   :  { %8717 = vmatprep.subr.bf16.mxu0 %v14032_v49  ;;  %v12026_v49 = vcombine.high %v12010_v51, %v12010_v51 }
 0x6c8   :  { %8718 = vmatpush1.bf16.msra.mxu0 %v14030_v17  ;;  %v12025_v17 = vcombine.low %v12010_v51, %v12010_v51 }
 0x6c9   :  { %8719 = vmatprep.subr.bf16.mxu0 %v14035_v35 }
 0x6ca   :  { %v9063_v35 = vsel %vm7899_vm6, %v12025_v17, 0 }
 0x6cc   :  { %8720 = vmatpush1.bf16.msra.mxu0 %v14033_v6  ;;  %v9155_v6 = vld [vmem:[#allocation7 + $0x17] sm:$0x1] }
 0x6cd   :  { %11961 = vmatprep.subr.msk.bf16.mxu0 %vm7899_vm6, %v11958_v37  ;;  %v14082_v37 = vld [vmem:[%s17547_s5 + $0x310] ss:$16 sps:$4 sm:$0xff]  }
 0x6d0   :  { %8722 = vmatpush1.bf16.msra.mxu0 %v8669_v21  ;;  %v9157_v21 = vpack.c.bf16 %v9155_v6, %v9155_v6  ;;  %v14120_v6 = vld [vmem:[%s17547_s5 + $0x3ac] ss:$16 sps:$4 sm:$0xff]  }
 0x6d1   :  { %8871 = vmatprep.subr.bf16.mxu0 %v14040_v61  ;;  %v14085_v61 = vld [vmem:[%s17547_s5 + $0x330] ss:$16 sps:$4 sm:$0xff]  }
 0x6d3   :  { %11962 = vmatmul.mubr.msk.bf16.vlgmr.msra.gmra.mrb[176].mxu0 %vm7593_vm7, %v8588_v15  ;;  %v14077_v15 = vld [vmem:[%s17547_s5 + $0x2e8] ss:$16 sps:$4 sm:$0xff]  }
 0x6d4   :  { %8872 = vmatpush1.bf16.msra.mxu0 %v14038_v40  ;;  %8903 = vmatprep.mubr.bf16.mxu0 %v14413_v2  ;;  %v9154_v40 = vld [vmem:[#allocation7 + $0x7] sm:$0x1] }
 0x6d5   :  { %8873 = vmatprep.subr.bf16.mxu0 %v14043_v59  ;;  %v9156_v26 = vpack.c.bf16 %v9154_v40, %v9154_v40 }
 0x6d7   :  { %v9175_v10 = vunpack.c.l.b16 %v9156_v26 }
 0x6d8   :  { %8874 = vmatpush1.bf16.msra.mxu0 %v14041_v23  ;;  %v9176_v23 = vunpack.c.l.b16 %v9157_v21 }
 0x6d9   :  { %8875 = vmatprep.subr.bf16.mxu0 %v14046_v5 }
 0x6da   :  { %v9177_v38 = vrot.slane %v9176_v23, 7  ;;  %v14121_v23 = vld [vmem:[%s17547_s5 + $0x3c8] ss:$16 sps:$4 sm:$0xff]  }
 0x6dc   :  { %8876 = vmatpush1.bf16.msra.mxu0 %v14044_v12 }
 0x6dd   :  { %11993 = vmatprep.subr.msk.bf16.mxu0 %vm7899_vm6, %v11990_v28  ;;  %v12057_v28 = vcombine.low %v12043_v41, %v12043_v41 }
 0x6df   :  { %v9254_v14 = vsel %vm7899_vm6, %v12057_v28, 0  ;;  %v14126_v28 = vld [vmem:[%s17547_s5 + $0x3f0] ss:$16 sps:$4 sm:$0xff]  }
 0x6e0   :  { %8878 = vmatpush1.bf16.msra.mxu0 %v8860_v36  ;;  %v14095_v36 = vld [vmem:[%s17547_s5 + $0x31c] ss:$16 sps:$4 sm:$0xff]  }
 0x6e1   :  { %8912 = vmatprep.subr.bf16.mxu0 %v14051_v0  ;;  %v9178_v0 = vsel %vm7823_vm9, %v9177_v38, %v9175_v10  ;;  %v14131_v38 = vld [vmem:[%s17547_s5 + $0x414] ss:$16 sps:$4 sm:$0xff]  }
 0x6e3   :  { %11994 = vmatmul.mubr.msk.bf16.vlgmr.msra.gmra.mrb[180].mxu0 %vm7593_vm7, %v8785_v22 }
 0x6e4   :  { %8913 = vmatpush1.bf16.msra.mxu0 %v14049_v55  ;;  %8944 = vmatprep.mubr.bf16.mxu0 %v14413_v2  ;;  %v9179_v55 = vpack.c.b16 %v9178_v0, %v9178_v0  ;;  %v9549_v0 = vld [vmem:[#allocation7 + $0x9] sm:$0x1] }
 0x6e5   :  { %8914 = vmatprep.subr.bf16.mxu0 %v14054_v29  ;;  %v14096_v29 = vld [vmem:[%s17547_s5 + $0x338] ss:$16 sps:$4 sm:$0xff]  }
 0x6e8   :  { %8915 = vmatpush1.bf16.msra.mxu0 %v14052_v31  ;;  %v14101_v31 = vld [vmem:[%s17547_s5 + $0x35c] ss:$16 sps:$4 sm:$0xff]  }
 0x6e9   :  { %8916 = vmatprep.subr.bf16.mxu0 %v14057_v25 }
 0x6ec   :  { %8917 = vmatpush1.bf16.msra.mxu0 %v14055_v57 }
 0x6ed   :  { %11995 = vmatprep.subr.msk.bf16.mxu0 %vm7899_vm6, %v11992_v52 }
 0x6f0   :  { %8919 = vmatpush1.bf16.msra.mxu0 %v8866_v1 }
 0x6f1   :  { %9068 = vmatprep.subr.bf16.mxu0 %v14062_v27  ;;  %v12060_v27 = vcombine.high %v12044_v54, %v12044_v54 }
 0x6f3   :  { %11996 = vmatmul.mubr.msk.bf16.vlgmr.msra.gmra.mrb[184].mxu0 %vm7593_vm7, %v8785_v22  ;;  %v14098_v22 = vld [vmem:[%s17547_s5 + $0x33c] ss:$16 sps:$4 sm:$0xff]  }
 0x6f4   :  { %9069 = vmatpush1.bf16.msra.mxu0 %v14060_v58  ;;  %9100 = vmatprep.mubr.bf16.mxu0 %v14413_v2  ;;  %v9260_v58 = vsel %vm7899_vm6, %v12059_v24, 0 }
 0x6f5   :  { %9070 = vmatprep.subr.bf16.mxu0 %v14065_v18  ;;  %v14106_v18 = vld [vmem:[%s17547_s5 + $0x384] ss:$16 sps:$4 sm:$0xff]  }
 0x6f8   :  { %9071 = vmatpush1.bf16.msra.mxu0 %v14063_v45  ;;  %v14104_v45 = vld [vmem:[%s17547_s5 + $0x380] ss:$16 sps:$4 sm:$0xff]  }
 0x6f9   :  { %9072 = vmatprep.subr.bf16.mxu0 %v14068_v42  ;;  %v14109_v42 = vld [vmem:[%s17547_s5 + $0x3a4] ss:$16 sps:$4 sm:$0xff]  }
 0x6fc   :  { %9073 = vmatpush1.bf16.msra.mxu0 %v14066_v9  ;;  %v9352_v9 = vld [vmem:[#allocation7 + $0x8] sm:$0x1] }
 0x6fd   :  { %12027 = vmatprep.subr.msk.bf16.mxu0 %vm7899_vm6, %v12024_v44  ;;  %v12077_v44 = vld [vmem:[%s17547_s5 + $0x3e0] sm:$0x11] }
 0x700   :  { %9075 = vmatpush1.bf16.msra.mxu0 %v9057_v33 }
 0x701   :  { %9109 = vmatprep.subr.bf16.mxu0 %v14073_v46 }
 0x703   :  { %12028 = vmatmul.mubr.msk.bf16.vlgmr.msra.gmra.mrb[188].mxu0 %vm7593_vm7, %v8982_v43 }
 0x704   :  { %9110 = vmatpush1.bf16.msra.mxu0 %v14071_v56  ;;  %9141 = vmatprep.mubr.bf16.mxu0 %v14413_v2  ;;  %v9354_v56 = vpack.c.bf16 %v9352_v9, %v9352_v9  ;;  %v14145_v9 = vld [vmem:[%s17547_s5 + $0x43c] ss:$16 sps:$4 sm:$0xff]  }
 0x705   :  { %9111 = vmatprep.subr.bf16.mxu0 %v14076_v4  ;;  %v12092_v4 = vcombine.high %v12077_v44, %v12077_v44 }
 0x706   :  { %v9373_v51 = vunpack.c.l.b16 %v9354_v56 }
 0x708   :  { %9112 = vmatpush1.bf16.msra.mxu0 %v14074_v34  ;;  %v12091_v34 = vcombine.low %v12077_v44, %v12077_v44  ;;  %v12112_v44 = vld [vmem:[%s17547_s5 + $0x458] sm:$0x11] }
 0x709   :  { %9113 = vmatprep.subr.bf16.mxu0 %v14079_v30  ;;  %v9375_v30 = vrot.slane %v9374_v11, 7  ;;  %v12128_v56 = vcombine.high %v12112_v44, %v12112_v44 }
 0x70b   :  { %v9376_v17 = vsel %vm7823_vm9, %v9375_v30, %v9373_v51  ;;  %v9747_v30 = vld [vmem:[#allocation7 + $0x1a] sm:$0x1]  ;;  %v14148_v51 = vld [vmem:[%s17547_s5 + $0x460] ss:$16 sps:$4 sm:$0xff]  }
 0x70c   :  { %9114 = vmatpush1.bf16.msra.mxu0 %v14077_v15  ;;  %v9452_v15 = vsel %vm7899_vm6, %v12091_v34, 0  ;;  %v14150_v34 = vld [vmem:[%s17547_s5 + $0x464] ss:$16 sps:$4 sm:$0xff]  }
 0x70d   :  { %12029 = vmatprep.subr.msk.bf16.mxu0 %vm7899_vm6, %v12026_v49  ;;  %v14117_v49 = vld [vmem:[%s17547_s5 + $0x38c] ss:$16 sps:$4 sm:$0xff]  }
 0x710   :  { %9116 = vmatpush1.bf16.msra.mxu0 %v9063_v35  ;;  %v14115_v35 = vld [vmem:[%s17547_s5 + $0x388] ss:$16 sps:$4 sm:$0xff]  }
 0x711   :  { %9265 = vmatprep.subr.bf16.mxu0 %v14084_v47  ;;  %v9377_v47 = vpack.c.b16 %v9376_v17, %v9376_v17  ;;  %v14151_v17 = vld [vmem:[%s17547_s5 + $0x480] ss:$16 sps:$4 sm:$0xff]  }
 0x713   :  { %12030 = vmatmul.mubr.msk.bf16.vlgmr.msra.gmra.mrb[192].mxu0 %vm7593_vm7, %v8982_v43 }
 0x714   :  { %9266 = vmatpush1.bf16.msra.mxu0 %v14082_v37  ;;  %9297 = vmatprep.mubr.bf16.mxu0 %v14413_v2  ;;  %v14118_v37 = vld [vmem:[%s17547_s5 + $0x3a8] ss:$16 sps:$4 sm:$0xff]  }
 0x715   :  { %9267 = vmatprep.subr.bf16.mxu0 %v14087_v62  ;;  %v14123_v62 = vld [vmem:[%s17547_s5 + $0x3cc] ss:$16 sps:$4 sm:$0xff]  }
 0x716   :  { %v7946_v59 = vpop.f32.mrb[140].mxu0 }
 0x717   :  { %v7948_v5 = vpop.f32.mrb[141].mxu0 }
 0x718   :  { %9268 = vmatpush1.bf16.msra.mxu0 %v14085_v61  ;;  %v7950_v48 = vpop.f32.mrb[142].mxu0  ;;  %v12078_v61 = vld [vmem:[%s17547_s5 + $0x3e8] sm:$0x11] }
 0x719   :  { %v7951_v12 = vpop.f32.mrb[143].mxu0  ;;  %9269 = vmatprep.subr.bf16.mxu0 %v14090_v32  ;;  %v12094_v48 = vcombine.high %v12078_v61, %v12078_v61 }
 0x71a   :  { %v14128_v12 = vld [vmem:[%s17547_s5 + $0x3f4] ss:$16 sps:$4 sm:$0xff]  }
 0x71c   :  { %9270 = vmatpush1.bf16.msra.mxu0 %v14088_v3  ;;  %v12093_v3 = vcombine.low %v12078_v61, %v12078_v61 }
 0x71d   :  { %12061 = vmatprep.subr.msk.bf16.mxu0 %vm7899_vm6, %v12058_v53  ;;  %v9550_v53 = vld [vmem:[#allocation7 + $0x19] sm:$0x1] }
 0x71e   :  { %v9458_v26 = vsel %vm7899_vm6, %v12093_v3, 0  ;;  %v9552_v10 = vpack.c.bf16 %v9550_v53, %v9550_v53  ;;  %v14161_v53 = vld [vmem:[%s17547_s5 + $0x46c] ss:$16 sps:$4 sm:$0xff]  }
 0x720   :  { %9272 = vmatpush1.bf16.msra.mxu0 %v9254_v14  ;;  %v14129_v14 = vld [vmem:[%s17547_s5 + $0x410] ss:$16 sps:$4 sm:$0xff]  }
 0x721   :  { %9306 = vmatprep.subr.bf16.mxu0 %v14095_v36  ;;  %v14134_v36 = vld [vmem:[%s17547_s5 + $0x434] ss:$16 sps:$4 sm:$0xff]  }
 0x723   :  { %12062 = vmatmul.mubr.msk.bf16.vlgmr.msra.gmra.mrb[196].mxu0 %vm7593_vm7, %v9179_v55 }
 0x724   :  { %9307 = vmatpush1.bf16.msra.mxu0 %v14093_v63  ;;  %9338 = vmatprep.mubr.bf16.mxu0 %v14413_v2 }
 0x725   :  { %9308 = vmatprep.subr.bf16.mxu0 %v14098_v22  ;;  %v9571_v22 = vunpack.c.l.b16 %v9552_v10 }
 0x726   :  { %v7987_v25 = vpop.f32.mrb[144].mxu0 }
 0x727   :  { %v7989_v57 = vpop.f32.mrb[145].mxu0  ;;  %v9572_v24 = vrot.slane %v9571_v22, 7 }
 0x728   :  { %v7991_v52 = vpop.f32.mrb[146].mxu0  ;;  %9309 = vmatpush1.bf16.msra.mxu0 %v14096_v29 }
 0x729   :  { %v7992_v1 = vpop.f32.mrb[147].mxu0  ;;  %9310 = vmatprep.subr.bf16.mxu0 %v14101_v31  ;;  %v9551_v52 = vpack.c.bf16 %v9549_v0, %v9549_v0  ;;  %v14167_v0 = vld [vmem:[%s17547_s5 + $0x4ac] ss:$16 sps:$4 sm:$0xff]  }
 0x72c   :  { %9311 = vmatpush1.bf16.msra.mxu0 %v14099_v8 }
 0x72d   :  { %12063 = vmatprep.subr.msk.bf16.mxu0 %vm7899_vm6, %v12060_v27 }
 0x730   :  { %9313 = vmatpush1.bf16.msra.mxu0 %v9260_v58  ;;  %v9570_v58 = vunpack.c.l.b16 %v9551_v52 }
 0x731   :  { %9463 = vmatprep.subr.bf16.mxu0 %v14106_v18 }
 0x733   :  { %12064 = vmatmul.mubr.msk.bf16.vlgmr.msra.gmra.mrb[200].mxu0 %vm7593_vm7, %v9179_v55  ;;  %v12111_v55 = vld [vmem:[%s17547_s5 + $0x450] sm:$0x11] }
 0x734   :  { %9464 = vmatpush1.bf16.msra.mxu0 %v14104_v45  ;;  %9495 = vmatprep.mubr.bf16.mxu0 %v14413_v2  ;;  %v12126_v1 = vcombine.high %v12111_v55, %v12111_v55  ;;  %v12125_v27 = vcombine.low %v12111_v55, %v12111_v55  ;;  %v9573_v45 = vsel %vm7823_vm9, %v9572_v24, %v9570_v58  ;;  %v12146_v55 = vld [vmem:[%s17547_s5 + $0x4c8] sm:$0x11]  ;;  %v9944_v24 = vld [vmem:[#allocation7 + $0x1b] sm:$0x1]  ;;  %v14170_v58 = vld [vmem:[%s17547_s5 + $0x4d0] ss:$16 sps:$4 sm:$0xff]  }
 0x735   :  { %9465 = vmatprep.subr.bf16.mxu0 %v14109_v42  ;;  %v14137_v42 = vld [vmem:[%s17547_s5 + $0x3f8] ss:$16 sps:$4 sm:$0xff]   ;;  %v9574_v19 = vpack.c.b16 %v9573_v45, %v9573_v45  ;;  %v12162_v52 = vcombine.high %v12146_v55, %v12146_v55  ;;  %v14173_v45 = vld [vmem:[%s17547_s5 + $0x4f0] ss:$16 sps:$4 sm:$0xff]  }
 0x736   :  { %v8120_v16 = vpop.f32.mrb[148].mxu0  ;;  %v9649_v18 = vsel %vm7899_vm6, %v12125_v27, 0  ;;  %v14172_v27 = vld [vmem:[%s17547_s5 + $0x4d4] ss:$16 sps:$4 sm:$0xff]  }
 0x737   :  { %v8121_v13 = vadd.f32 %v8120_v16, %v7946_v59  ;;  %v8122_v7 = vpop.f32.mrb[149].mxu0 }
 0x738   :  { %v8123_v33 = vadd.f32 %v8122_v7, %v7948_v5  ;;  %v8124_v46 = vpop.f32.mrb[150].mxu0  ;;  %9466 = vmatpush1.bf16.msra.mxu0 %v14107_v20  ;;  %v14142_v20 = vld [vmem:[%s17547_s5 + $0x41c] ss:$16 sps:$4 sm:$0xff]  }
 0x739   :  { %v8125_v43 = vpop.f32.mrb[151].mxu0  ;;  %9467 = vmatprep.subr.bf16.mxu0 %v14112_v60  ;;  %v14140_v60 = vld [vmem:[%s17547_s5 + $0x418] ss:$16 sps:$4 sm:$0xff]  }
 0x73a   :  { %v14143_v46 = vld [vmem:[%s17547_s5 + $0x438] ss:$16 sps:$4 sm:$0xff]   ;;  %v12127_v43 = vcombine.low %v12112_v44, %v12112_v44 }
 0x73c   :  { %9468 = vmatpush1.bf16.msra.mxu0 %v14110_v39 }
 0x73d   :  { %12095 = vmatprep.subr.msk.bf16.mxu0 %vm7899_vm6, %v12092_v4  ;;  %v9655_v4 = vsel %vm7899_vm6, %v12127_v43, 0 }
 0x740   :  { %9470 = vmatpush1.bf16.msra.mxu0 %v9452_v15  ;;  %v14153_v15 = vld [vmem:[%s17547_s5 + $0x484] ss:$16 sps:$4 sm:$0xff]  }
 0x741   :  { %9504 = vmatprep.subr.bf16.mxu0 %v14117_v49  ;;  %v9749_v49 = vpack.c.bf16 %v9747_v30, %v9747_v30  ;;  %v14183_v30 = vld [vmem:[%s17547_s5 + $0x4dc] ss:$16 sps:$4 sm:$0xff]  }
 0x743   :  { %12096 = vmatmul.mubr.msk.bf16.vlgmr.msra.gmra.mrb[204].mxu0 %vm7593_vm7, %v9377_v47 }
 0x744   :  { %9505 = vmatpush1.bf16.msra.mxu0 %v14115_v35  ;;  %9536 = vmatprep.mubr.bf16.mxu0 %v14413_v2  ;;  %v14156_v35 = vld [vmem:[%s17547_s5 + $0x4a4] ss:$16 sps:$4 sm:$0xff]  }
 0x745   :  { %9506 = vmatprep.subr.bf16.mxu0 %v14120_v6 }
 0x746   :  { %v8161_v21 = vpop.f32.mrb[152].mxu0 }
 0x747   :  { %v8162_v32 = vadd.f32 %v8161_v21, %v7987_v25  ;;  %v8163_v40 = vpop.f32.mrb[153].mxu0 }
 0x748   :  { %v8164_v59 = vadd.f32 %v8163_v40, %v7989_v57  ;;  %v8165_v41 = vpop.f32.mrb[154].mxu0  ;;  %9507 = vmatpush1.bf16.msra.mxu0 %v14118_v37  ;;  %v14132_v57 = vld [vmem:[%s17547_s5 + $0x430] ss:$16 sps:$4 sm:$0xff]  }
 0x749   :  { %v8166_v5 = vpop.f32.mrb[155].mxu0  ;;  %9508 = vmatprep.subr.bf16.mxu0 %v14123_v62  ;;  %v12145_v37 = vld [vmem:[%s17547_s5 + $0x4c0] sm:$0x11]  ;;  %v9768_v62 = vunpack.c.l.b16 %v9749_v49 }
 0x74a   :  { %v12160_v5 = vcombine.high %v12145_v37, %v12145_v37 }
 0x74b   :  { %v9769_v3 = vrot.slane %v9768_v62, 7 }
 0x74c   :  { %9509 = vmatpush1.bf16.msra.mxu0 %v14121_v23 }
 0x74d   :  { %12097 = vmatprep.subr.msk.bf16.mxu0 %vm7899_vm6, %v12094_v48  ;;  %v12159_v48 = vcombine.low %v12145_v37, %v12145_v37  ;;  %v12180_v37 = vld [vmem:[%s17547_s5 + $0x538] sm:$0x11] }
 0x750   :  { %9511 = vmatpush1.bf16.msra.mxu0 %v9458_v26 }
 0x751   :  { %9660 = vmatprep.subr.bf16.mxu0 %v14128_v12  ;;  %v9846_v12 = vsel %vm7899_vm6, %v12159_v48, 0  ;;  %v14194_v48 = vld [vmem:[%s17547_s5 + $0x544] ss:$16 sps:$4 sm:$0xff]  }
 0x753   :  { %12098 = vmatmul.mubr.msk.bf16.vlgmr.msra.gmra.mrb[208].mxu0 %vm7593_vm7, %v9377_v47  ;;  %v9746_v47 = vld [vmem:[#allocation7 + $0xa] sm:$0x1] }
 0x754   :  { %9661 = vmatpush1.bf16.msra.mxu0 %v14126_v28  ;;  %9692 = vmatprep.mubr.bf16.mxu0 %v14413_v2  ;;  %v9748_v41 = vpack.c.bf16 %v9746_v47, %v9746_v47  ;;  %v14189_v47 = vld [vmem:[%s17547_s5 + $0x51c] ss:$16 sps:$4 sm:$0xff]  }
 0x755   :  { %9662 = vmatprep.subr.bf16.mxu0 %v14131_v38  ;;  %v14159_v38 = vld [vmem:[%s17547_s5 + $0x468] ss:$16 sps:$4 sm:$0xff]  }
 0x756   :  { %v8313_v63 = vpop.f32.mrb[156].mxu0  ;;  %v9767_v26 = vunpack.c.l.b16 %v9748_v41  ;;  %v12196_v41 = vcombine.high %v12180_v37, %v12180_v37 }
 0x757   :  { %v8361_v29 = vadd.f32 %v8313_v63, %v8121_v13  ;;  %v8315_v31 = vpop.f32.mrb[157].mxu0 }
 0x758   :  { %v8362_v25 = vadd.f32 %v8315_v31, %v8123_v33  ;;  %v8317_v54 = vpop.f32.mrb[158].mxu0  ;;  %9663 = vmatpush1.bf16.msra.mxu0 %v14129_v14  ;;  %v9770_v28 = vsel %vm7823_vm9, %v9769_v3, %v9767_v26  ;;  %v14164_v14 = vld [vmem:[%s17547_s5 + $0x48c] ss:$16 sps:$4 sm:$0xff]   ;;  %v14192_v26 = vld [vmem:[%s17547_s5 + $0x540] ss:$16 sps:$4 sm:$0xff]  }
 0x759   :  { %v8318_v8 = vpop.f32.mrb[159].mxu0  ;;  %9664 = vmatprep.subr.bf16.mxu0 %v14134_v36  ;;  %v9771_v10 = vpack.c.b16 %v9770_v28, %v9770_v28  ;;  %v14162_v36 = vld [vmem:[%s17547_s5 + $0x488] ss:$16 sps:$4 sm:$0xff]   ;;  %v10142_v3 = vld [vmem:[#allocation7 + $0x1c] sm:$0x1] }
 0x75a   :  { %v14165_v54 = vld [vmem:[%s17547_s5 + $0x4a8] ss:$16 sps:$4 sm:$0xff]   ;;  %v12161_v8 = vcombine.low %v12146_v55, %v12146_v55  ;;  %v14195_v28 = vld [vmem:[%s17547_s5 + $0x560] ss:$16 sps:$4 sm:$0xff]  }
 0x75c   :  { %9665 = vmatpush1.bf16.msra.mxu0 %v14132_v57 }
 0x75d   :  { %12129 = vmatprep.subr.msk.bf16.mxu0 %vm7899_vm6, %v12126_v1  ;;  %v9852_v1 = vsel %vm7899_vm6, %v12161_v8, 0 }
 0x760   :  { %9667 = vmatpush1.bf16.msra.mxu0 %v9649_v18  ;;  %v14175_v18 = vld [vmem:[%s17547_s5 + $0x4f4] ss:$16 sps:$4 sm:$0xff]  }
 0x761   :  { %9701 = vmatprep.subr.bf16.mxu0 %v14139_v50  ;;  %v9946_v50 = vpack.c.bf16 %v9944_v24, %v9944_v24  ;;  %v14205_v24 = vld [vmem:[%s17547_s5 + $0x54c] ss:$16 sps:$4 sm:$0xff]  }
 0x763   :  { %12130 = vmatmul.mubr.msk.bf16.vlgmr.msra.gmra.mrb[212].mxu0 %vm7593_vm7, %v9574_v19 }
 0x764   :  { %9702 = vmatpush1.bf16.msra.mxu0 %v14137_v42  ;;  %9733 = vmatprep.mubr.bf16.mxu0 %v14413_v2  ;;  %v14178_v42 = vld [vmem:[%s17547_s5 + $0x514] ss:$16 sps:$4 sm:$0xff]  }
 0x765   :  { %9703 = vmatprep.subr.bf16.mxu0 %v14142_v20 }
 0x766   :  { %v8354_v16 = vpop.f32.mrb[160].mxu0 }
 0x767   :  { %v8363_v11 = vadd.f32 %v8354_v16, %v8162_v32  ;;  %v8356_v13 = vpop.f32.mrb[161].mxu0 }
 0x768   :  { %v8364_v7 = vadd.f32 %v8356_v13, %v8164_v59  ;;  %v8358_v33 = vpop.f32.mrb[162].mxu0  ;;  %9704 = vmatpush1.bf16.msra.mxu0 %v14140_v60  ;;  %v14154_v59 = vld [vmem:[%s17547_s5 + $0x4a0] ss:$16 sps:$4 sm:$0xff]  }
 0x769   :  { %v8359_v39 = vpop.f32.mrb[163].mxu0  ;;  %9705 = vmatprep.subr.bf16.mxu0 %v14145_v9  ;;  %v12179_v60 = vld [vmem:[%s17547_s5 + $0x530] sm:$0x11]  ;;  %v9965_v9 = vunpack.c.l.b16 %v9946_v50 }
 0x76a   :  { %v12194_v39 = vcombine.high %v12179_v60, %v12179_v60 }
 0x76b   :  { %v9966_v43 = vrot.slane %v9965_v9, 7 }
 0x76c   :  { %9706 = vmatpush1.bf16.msra.mxu0 %v14143_v46 }
 0x76d   :  { %12131 = vmatprep.subr.msk.bf16.mxu0 %vm7899_vm6, %v12128_v56  ;;  %v12193_v56 = vcombine.low %v12179_v60, %v12179_v60  ;;  %v12214_v60 = vld [vmem:[%s17547_s5 + $0x5a8] sm:$0x11] }
 0x770   :  { %9708 = vmatpush1.bf16.msra.mxu0 %v9655_v4 }
 0x771   :  { %9857 = vmatprep.subr.bf16.mxu0 %v14150_v34  ;;  %v10043_v34 = vsel %vm7899_vm6, %v12193_v56, 0  ;;  %v14216_v56 = vld [vmem:[%s17547_s5 + $0x5b4] ss:$16 sps:$4 sm:$0xff]  }
 0x773   :  { %12132 = vmatmul.mubr.msk.bf16.vlgmr.msra.gmra.mrb[216].mxu0 %vm7593_vm7, %v9574_v19  ;;  %v9943_v19 = vld [vmem:[#allocation7 + $0xb] sm:$0x1] }
 0x774   :  { %9858 = vmatpush1.bf16.msra.mxu0 %v14148_v51  ;;  %9889 = vmatprep.mubr.bf16.mxu0 %v14413_v2  ;;  %v9945_v33 = vpack.c.bf16 %v9943_v19, %v9943_v19  ;;  %v14211_v19 = vld [vmem:[%s17547_s5 + $0x58c] ss:$16 sps:$4 sm:$0xff]  }
 0x775   :  { %9859 = vmatprep.subr.bf16.mxu0 %v14153_v15  ;;  %v14181_v15 = vld [vmem:[%s17547_s5 + $0x4d8] ss:$16 sps:$4 sm:$0xff]  }
 0x776   :  { %v8510_v6 = vpop.f32.mrb[164].mxu0  ;;  %v9964_v4 = vunpack.c.l.b16 %v9945_v33  ;;  %v12230_v33 = vcombine.high %v12214_v60, %v12214_v60 }
 0x777   :  { %v8558_v21 = vadd.f32 %v8510_v6, %v8361_v29  ;;  %v8512_v61 = vpop.f32.mrb[165].mxu0 }
 0x778   :  { %v8559_v32 = vadd.f32 %v8512_v61, %v8362_v25  ;;  %v8514_v40 = vpop.f32.mrb[166].mxu0  ;;  %9860 = vmatpush1.bf16.msra.mxu0 %v14151_v17  ;;  %v9967_v51 = vsel %vm7823_vm9, %v9966_v43, %v9964_v4  ;;  %v14186_v17 = vld [vmem:[%s17547_s5 + $0x4fc] ss:$16 sps:$4 sm:$0xff]   ;;  %v14214_v4 = vld [vmem:[%s17547_s5 + $0x5b0] ss:$16 sps:$4 sm:$0xff]  }
 0x779   :  { %v8515_v23 = vpop.f32.mrb[167].mxu0  ;;  %9861 = vmatprep.subr.bf16.mxu0 %v14156_v35  ;;  %v9968_v49 = vpack.c.b16 %v9967_v51, %v9967_v51  ;;  %v14184_v35 = vld [vmem:[%s17547_s5 + $0x4f8] ss:$16 sps:$4 sm:$0xff]   ;;  %v10339_v43 = vld [vmem:[#allocation7 + $0x1d] sm:$0x1] }
 0x77a   :  { %v14187_v40 = vld [vmem:[%s17547_s5 + $0x518] ss:$16 sps:$4 sm:$0xff]   ;;  %v12195_v23 = vcombine.low %v12180_v37, %v12180_v37  ;;  %v14217_v51 = vld [vmem:[%s17547_s5 + $0x5d0] ss:$16 sps:$4 sm:$0xff]  }
 0x77c   :  { %9862 = vmatpush1.bf16.msra.mxu0 %v14154_v59 }
 0x77d   :  { %12163 = vmatprep.subr.msk.bf16.mxu0 %vm7899_vm6, %v12160_v5  ;;  %v10049_v5 = vsel %vm7899_vm6, %v12195_v23, 0 }
 0x780   :  { %9864 = vmatpush1.bf16.msra.mxu0 %v9846_v12  ;;  %v14197_v12 = vld [vmem:[%s17547_s5 + $0x564] ss:$16 sps:$4 sm:$0xff]  }
 0x781   :  { %9898 = vmatprep.subr.bf16.mxu0 %v14161_v53  ;;  %v10144_v53 = vpack.c.bf16 %v10142_v3, %v10142_v3  ;;  %v14227_v3 = vld [vmem:[%s17547_s5 + $0x5bc] ss:$16 sps:$4 sm:$0xff]  }
 0x783   :  { %12164 = vmatmul.mubr.msk.bf16.vlgmr.msra.gmra.mrb[220].mxu0 %vm7593_vm7, %v9771_v10 }
 0x784   :  { %9899 = vmatpush1.bf16.msra.mxu0 %v14159_v38  ;;  %9930 = vmatprep.mubr.bf16.mxu0 %v14413_v2  ;;  %v14200_v38 = vld [vmem:[%s17547_s5 + $0x584] ss:$16 sps:$4 sm:$0xff]  }
 0x785   :  { %9900 = vmatprep.subr.bf16.mxu0 %v14164_v14 }
 0x786   :  { %v8551_v63 = vpop.f32.mrb[168].mxu0 }
 0x787   :  { %v8560_v22 = vadd.f32 %v8551_v63, %v8363_v11  ;;  %v8553_v29 = vpop.f32.mrb[169].mxu0 }
 0x788   :  { %v8561_v31 = vadd.f32 %v8553_v29, %v8364_v7  ;;  %v8555_v25 = vpop.f32.mrb[170].mxu0  ;;  %9901 = vmatpush1.bf16.msra.mxu0 %v14162_v36  ;;  %v14176_v7 = vld [vmem:[%s17547_s5 + $0x510] ss:$16 sps:$4 sm:$0xff]  }
 0x789   :  { %v8556_v57 = vpop.f32.mrb[171].mxu0  ;;  %9902 = vmatprep.subr.bf16.mxu0 %v14167_v0  ;;  %v12213_v36 = vld [vmem:[%s17547_s5 + $0x5a0] sm:$0x11]  ;;  %v10163_v0 = vunpack.c.l.b16 %v10144_v53 }
 0x78a   :  { %v12228_v57 = vcombine.high %v12213_v36, %v12213_v36 }
 0x78b   :  { %v10164_v8 = vrot.slane %v10163_v0, 7 }
 0x78c   :  { %9903 = vmatpush1.bf16.msra.mxu0 %v14165_v54 }
 0x78d   :  { %12165 = vmatprep.subr.msk.bf16.mxu0 %vm7899_vm6, %v12162_v52  ;;  %v12227_v52 = vcombine.low %v12213_v36, %v12213_v36  ;;  %v12248_v36 = vld [vmem:[%s17547_s5 + $0x618] sm:$0x11] }
 0x790   :  { %9905 = vmatpush1.bf16.msra.mxu0 %v9852_v1 }
 0x791   :  { %10054 = vmatprep.subr.bf16.mxu0 %v14172_v27  ;;  %v10241_v27 = vsel %vm7899_vm6, %v12227_v52, 0  ;;  %v14238_v52 = vld [vmem:[%s17547_s5 + $0x624] ss:$16 sps:$4 sm:$0xff]  }
 0x793   :  { %12166 = vmatmul.mubr.msk.bf16.vlgmr.msra.gmra.mrb[224].mxu0 %vm7593_vm7, %v9771_v10  ;;  %v10141_v10 = vld [vmem:[#allocation7 + $0xc] sm:$0x1] }
 0x794   :  { %10055 = vmatpush1.bf16.msra.mxu0 %v14170_v58  ;;  %10086 = vmatprep.mubr.bf16.mxu0 %v14413_v2  ;;  %v10143_v25 = vpack.c.bf16 %v10141_v10, %v10141_v10  ;;  %v14233_v10 = vld [vmem:[%s17547_s5 + $0x5fc] ss:$16 sps:$4 sm:$0xff]  }
 0x795   :  { %10056 = vmatprep.subr.bf16.mxu0 %v14175_v18  ;;  %v14203_v18 = vld [vmem:[%s17547_s5 + $0x548] ss:$16 sps:$4 sm:$0xff]  }
 0x796   :  { %v8708_v20 = vpop.f32.mrb[172].mxu0  ;;  %v10162_v1 = vunpack.c.l.b16 %v10143_v25  ;;  %v12264_v25 = vcombine.high %v12248_v36, %v12248_v36 }
 0x797   :  { %v8756_v16 = vadd.f32 %v8708_v20, %v8558_v21  ;;  %v8710_v44 = vpop.f32.mrb[173].mxu0 }
 0x798   :  { %v8757_v11 = vadd.f32 %v8710_v44, %v8559_v32  ;;  %v8712_v13 = vpop.f32.mrb[174].mxu0  ;;  %10057 = vmatpush1.bf16.msra.mxu0 %v14173_v45  ;;  %v10165_v58 = vsel %vm7823_vm9, %v10164_v8, %v10162_v1  ;;  %v14208_v45 = vld [vmem:[%s17547_s5 + $0x56c] ss:$16 sps:$4 sm:$0xff]   ;;  %v14236_v1 = vld [vmem:[%s17547_s5 + $0x620] ss:$16 sps:$4 sm:$0xff]  }
 0x799   :  { %v8713_v46 = vpop.f32.mrb[175].mxu0  ;;  %10058 = vmatprep.subr.bf16.mxu0 %v14178_v42  ;;  %v10166_v50 = vpack.c.b16 %v10165_v58, %v10165_v58  ;;  %v14206_v42 = vld [vmem:[%s17547_s5 + $0x568] ss:$16 sps:$4 sm:$0xff]   ;;  %v10536_v8 = vld [vmem:[#allocation7 + $0x1e] sm:$0x1] }
 0x79a   :  { %v14209_v13 = vld [vmem:[%s17547_s5 + $0x588] ss:$16 sps:$4 sm:$0xff]   ;;  %v12229_v46 = vcombine.low %v12214_v60, %v12214_v60  ;;  %v14239_v58 = vld [vmem:[%s17547_s5 + $0x640] ss:$16 sps:$4 sm:$0xff]  }
 0x79c   :  { %10059 = vmatpush1.bf16.msra.mxu0 %v14176_v7 }
 0x79d   :  { %12197 = vmatprep.subr.msk.bf16.mxu0 %vm7899_vm6, %v12194_v39  ;;  %v10247_v39 = vsel %vm7899_vm6, %v12229_v46, 0 }
 0x7a0   :  { %10061 = vmatpush1.bf16.msra.mxu0 %v10043_v34  ;;  %v14219_v34 = vld [vmem:[%s17547_s5 + $0x5d4] ss:$16 sps:$4 sm:$0xff]  }
 0x7a1   :  { %10095 = vmatprep.subr.bf16.mxu0 %v14183_v30  ;;  %v10341_v30 = vpack.c.bf16 %v10339_v43, %v10339_v43  ;;  %v14249_v43 = vld [vmem:[%s17547_s5 + $0x62c] ss:$16 sps:$4 sm:$0xff]  }
 0x7a3   :  { %12198 = vmatmul.mubr.msk.bf16.vlgmr.msra.gmra.mrb[228].mxu0 %vm7593_vm7, %v9968_v49 }
 0x7a4   :  { %10096 = vmatpush1.bf16.msra.mxu0 %v14181_v15  ;;  %10127 = vmatprep.mubr.bf16.mxu0 %v14413_v2  ;;  %v14222_v15 = vld [vmem:[%s17547_s5 + $0x5f4] ss:$16 sps:$4 sm:$0xff]  }
 0x7a5   :  { %10097 = vmatprep.subr.bf16.mxu0 %v14186_v17 }
 0x7a6   :  { %v8749_v6 = vpop.f32.mrb[176].mxu0 }
 0x7a7   :  { %v8758_v62 = vadd.f32 %v8749_v6, %v8560_v22  ;;  %v8751_v21 = vpop.f32.mrb[177].mxu0 }
 0x7a8   :  { %v8759_v61 = vadd.f32 %v8751_v21, %v8561_v31  ;;  %v8753_v32 = vpop.f32.mrb[178].mxu0  ;;  %10098 = vmatpush1.bf16.msra.mxu0 %v14184_v35  ;;  %v14198_v31 = vld [vmem:[%s17547_s5 + $0x580] ss:$16 sps:$4 sm:$0xff]  }
 0x7a9   :  { %v8754_v59 = vpop.f32.mrb[179].mxu0  ;;  %10099 = vmatprep.subr.bf16.mxu0 %v14189_v47  ;;  %v12247_v35 = vld [vmem:[%s17547_s5 + $0x610] sm:$0x11]  ;;  %v10360_v47 = vunpack.c.l.b16 %v10341_v30 }
 0x7aa   :  { %v12262_v59 = vcombine.high %v12247_v35, %v12247_v35 }
 0x7ab   :  { %v10361_v23 = vrot.slane %v10360_v47, 7 }
 0x7ac   :  { %10100 = vmatpush1.bf16.msra.mxu0 %v14187_v40 }
 0x7ad   :  { %12199 = vmatprep.subr.msk.bf16.mxu0 %vm7899_vm6, %v12196_v41  ;;  %v12261_v41 = vcombine.low %v12247_v35, %v12247_v35  ;;  %v12282_v35 = vld [vmem:[%s17547_s5 + $0x688] sm:$0x11] }
 0x7b0   :  { %10102 = vmatpush1.bf16.msra.mxu0 %v10049_v5 }
 0x7b1   :  { %10252 = vmatprep.subr.bf16.mxu0 %v14194_v48  ;;  %v10438_v48 = vsel %vm7899_vm6, %v12261_v41, 0  ;;  %v14260_v41 = vld [vmem:[%s17547_s5 + $0x694] ss:$16 sps:$4 sm:$0xff]  }
 0x7b3   :  { %12200 = vmatmul.mubr.msk.bf16.vlgmr.msra.gmra.mrb[232].mxu0 %vm7593_vm7, %v9968_v49  ;;  %v10338_v49 = vld [vmem:[#allocation7 + $0xd] sm:$0x1] }
 0x7b4   :  { %10253 = vmatpush1.bf16.msra.mxu0 %v14192_v26  ;;  %10284 = vmatprep.mubr.bf16.mxu0 %v14413_v2  ;;  %v10340_v32 = vpack.c.bf16 %v10338_v49, %v10338_v49  ;;  %v14255_v49 = vld [vmem:[%s17547_s5 + $0x66c] ss:$16 sps:$4 sm:$0xff]  }
 0x7b5   :  { %10254 = vmatprep.subr.bf16.mxu0 %v14197_v12  ;;  %v14225_v12 = vld [vmem:[%s17547_s5 + $0x5b8] ss:$16 sps:$4 sm:$0xff]  }
 0x7b6   :  { %v8905_v14 = vpop.f32.mrb[180].mxu0  ;;  %v10359_v5 = vunpack.c.l.b16 %v10340_v32  ;;  %v12298_v32 = vcombine.high %v12282_v35, %v12282_v35 }
 0x7b7   :  { %v8953_v63 = vadd.f32 %v8905_v14, %v8756_v16  ;;  %v8907_v55 = vpop.f32.mrb[181].mxu0 }
 0x7b8   :  { %v8954_v22 = vadd.f32 %v8907_v55, %v8757_v11  ;;  %v8909_v29 = vpop.f32.mrb[182].mxu0  ;;  %10255 = vmatpush1.bf16.msra.mxu0 %v14195_v28  ;;  %v10362_v26 = vsel %vm7823_vm9, %v10361_v23, %v10359_v5  ;;  %v14230_v28 = vld [vmem:[%s17547_s5 + $0x5dc] ss:$16 sps:$4 sm:$0xff]   ;;  %v14258_v5 = vld [vmem:[%s17547_s5 + $0x690] ss:$16 sps:$4 sm:$0xff]  }
 0x7b9   :  { %v8910_v54 = vpop.f32.mrb[183].mxu0  ;;  %10256 = vmatprep.subr.bf16.mxu0 %v14200_v38  ;;  %v10363_v53 = vpack.c.b16 %v10362_v26, %v10362_v26  ;;  %v14228_v38 = vld [vmem:[%s17547_s5 + $0x5d8] ss:$16 sps:$4 sm:$0xff]   ;;  %v10733_v23 = vld [vmem:[#allocation7 + $0x1f] sm:$0x1] }
 0x7ba   :  { %v14231_v29 = vld [vmem:[%s17547_s5 + $0x5f8] ss:$16 sps:$4 sm:$0xff]   ;;  %v12263_v54 = vcombine.low %v12248_v36, %v12248_v36  ;;  %v14261_v26 = vld [vmem:[%s17547_s5 + $0x6b0] ss:$16 sps:$4 sm:$0xff]  }
 0x7bc   :  { %10257 = vmatpush1.bf16.msra.mxu0 %v14198_v31 }
 0x7bd   :  { %12231 = vmatprep.subr.msk.bf16.mxu0 %vm7899_vm6, %v12228_v57  ;;  %v10444_v57 = vsel %vm7899_vm6, %v12263_v54, 0 }
 0x7c0   :  { %10259 = vmatpush1.bf16.msra.mxu0 %v10241_v27  ;;  %v14241_v27 = vld [vmem:[%s17547_s5 + $0x644] ss:$16 sps:$4 sm:$0xff]  }
 0x7c1   :  { %10293 = vmatprep.subr.bf16.mxu0 %v14205_v24  ;;  %v10538_v24 = vpack.c.bf16 %v10536_v8, %v10536_v8  ;;  %v14271_v8 = vld [vmem:[%s17547_s5 + $0x69c] ss:$16 sps:$4 sm:$0xff]  }
 0x7c3   :  { %12232 = vmatmul.mubr.msk.bf16.vlgmr.msra.gmra.mrb[236].mxu0 %vm7593_vm7, %v10166_v50 }
 0x7c4   :  { %10294 = vmatpush1.bf16.msra.mxu0 %v14203_v18  ;;  %10325 = vmatprep.mubr.bf16.mxu0 %v14413_v2  ;;  %v14244_v18 = vld [vmem:[%s17547_s5 + $0x664] ss:$16 sps:$4 sm:$0xff]  }
 0x7c5   :  { %10295 = vmatprep.subr.bf16.mxu0 %v14208_v45 }
 0x7c6   :  { %v8946_v20 = vpop.f32.mrb[184].mxu0 }
 0x7c7   :  { %v8955_v9 = vadd.f32 %v8946_v20, %v8758_v62  ;;  %v8948_v16 = vpop.f32.mrb[185].mxu0 }
 0x7c8   :  { %v8956_v44 = vadd.f32 %v8948_v16, %v8759_v61  ;;  %v8950_v11 = vpop.f32.mrb[186].mxu0  ;;  %10296 = vmatpush1.bf16.msra.mxu0 %v14206_v42  ;;  %v14220_v61 = vld [vmem:[%s17547_s5 + $0x5f0] ss:$16 sps:$4 sm:$0xff]  }
 0x7c9   :  { %v8951_v7 = vpop.f32.mrb[187].mxu0  ;;  %10297 = vmatprep.subr.bf16.mxu0 %v14211_v19  ;;  %v12281_v42 = vld [vmem:[%s17547_s5 + $0x680] sm:$0x11]  ;;  %v10557_v19 = vunpack.c.l.b16 %v10538_v24 }
 0x7ca   :  { %v12296_v7 = vcombine.high %v12281_v42, %v12281_v42 }
 0x7cb   :  { %v10558_v46 = vrot.slane %v10557_v19, 7 }
 0x7cc   :  { %10298 = vmatpush1.bf16.msra.mxu0 %v14209_v13 }
 0x7cd   :  { %12233 = vmatprep.subr.msk.bf16.mxu0 %vm7899_vm6, %v12230_v33  ;;  %v12295_v33 = vcombine.low %v12281_v42, %v12281_v42  ;;  %v12316_v42 = vld [vmem:[%s17547_s5 + $0x6f8] sm:$0x11] }
 0x7d0   :  { %10300 = vmatpush1.bf16.msra.mxu0 %v10247_v39 }
 0x7d1   :  { %10449 = vmatprep.subr.bf16.mxu0 %v14216_v56  ;;  %v10635_v56 = vsel %vm7899_vm6, %v12295_v33, 0 }
 0x7d3   :  { %12234 = vmatmul.mubr.msk.bf16.vlgmr.msra.gmra.mrb[240].mxu0 %vm7593_vm7, %v10166_v50  ;;  %v10535_v50 = vld [vmem:[#allocation7 + $0xe] sm:$0x1] }
 0x7d4   :  { %10450 = vmatpush1.bf16.msra.mxu0 %v14214_v4  ;;  %10481 = vmatprep.mubr.bf16.mxu0 %v14413_v2  ;;  %v10537_v11 = vpack.c.bf16 %v10535_v50, %v10535_v50  ;;  %v14277_v50 = vld [vmem:[%s17547_s5 + $0x6dc] ss:$16 sps:$4 sm:$0xff]  }
 0x7d5   :  { %10451 = vmatprep.subr.bf16.mxu0 %v14219_v34  ;;  %v14247_v34 = vld [vmem:[%s17547_s5 + $0x628] ss:$16 sps:$4 sm:$0xff]  }
 0x7d6   :  { %v9102_v17 = vpop.f32.mrb[188].mxu0  ;;  %v10556_v39 = vunpack.c.l.b16 %v10537_v11  ;;  %v12331_v11 = vcombine.low %v12316_v42, %v12316_v42 }
 0x7d7   :  { %v9150_v6 = vadd.f32 %v9102_v17, %v8953_v63  ;;  %v9104_v37 = vpop.f32.mrb[189].mxu0 }
 0x7d8   :  { %v9151_v62 = vadd.f32 %v9104_v37, %v8954_v22  ;;  %v9106_v21 = vpop.f32.mrb[190].mxu0  ;;  %10452 = vmatpush1.bf16.msra.mxu0 %v14217_v51  ;;  %v10559_v4 = vsel %vm7823_vm9, %v10558_v46, %v10556_v39  ;;  %v14252_v51 = vld [vmem:[%s17547_s5 + $0x64c] ss:$16 sps:$4 sm:$0xff]  }
 0x7d9   :  { %v9107_v40 = vpop.f32.mrb[191].mxu0  ;;  %10453 = vmatprep.subr.bf16.mxu0 %v14222_v15  ;;  %v10560_v30 = vpack.c.b16 %v10559_v4, %v10559_v4  ;;  %v14250_v15 = vld [vmem:[%s17547_s5 + $0x648] ss:$16 sps:$4 sm:$0xff]  }
 0x7da   :  { %v14253_v21 = vld [vmem:[%s17547_s5 + $0x668] ss:$16 sps:$4 sm:$0xff]   ;;  %v12297_v40 = vcombine.low %v12282_v35, %v12282_v35 }
 0x7dc   :  { %10454 = vmatpush1.bf16.msra.mxu0 %v14220_v61 }
 0x7dd   :  { %12265 = vmatprep.subr.msk.bf16.mxu0 %vm7899_vm6, %v12262_v59  ;;  %v10641_v59 = vsel %vm7899_vm6, %v12297_v40, 0 }
 0x7e0   :  { %10456 = vmatpush1.bf16.msra.mxu0 %v10438_v48  ;;  %v14263_v48 = vld [vmem:[%s17547_s5 + $0x6b4] ss:$16 sps:$4 sm:$0xff]  }
 0x7e1   :  { %10490 = vmatprep.subr.bf16.mxu0 %v14227_v3  ;;  %v10735_v3 = vpack.c.bf16 %v10733_v23, %v10733_v23  ;;  %v14283_v23 = vld [vmem:[%s17549_s7 + $0x8] sm:$0xff]  }
 0x7e3   :  { %12266 = vmatmul.mubr.msk.bf16.vlgmr.msra.gmra.mrb[244].mxu0 %vm7593_vm7, %v10363_v53 }
 0x7e4   :  { %10491 = vmatpush1.bf16.msra.mxu0 %v14225_v12  ;;  %10522 = vmatprep.mubr.bf16.mxu0 %v14413_v2  ;;  %v14266_v12 = vld [vmem:[%s17547_s5 + $0x6d4] ss:$16 sps:$4 sm:$0xff]  }
 0x7e5   :  { %10492 = vmatprep.subr.bf16.mxu0 %v14230_v28 }
 0x7e6   :  { %v9143_v14 = vpop.f32.mrb[192].mxu0 }
 0x7e7   :  { %v9152_v0 = vadd.f32 %v9143_v14, %v8955_v9  ;;  %v9145_v63 = vpop.f32.mrb[193].mxu0 }
 0x7e8   :  { %v9153_v55 = vadd.f32 %v9145_v63, %v8956_v44  ;;  %v9147_v22 = vpop.f32.mrb[194].mxu0  ;;  %10493 = vmatpush1.bf16.msra.mxu0 %v14228_v38  ;;  %v14242_v44 = vld [vmem:[%s17547_s5 + $0x660] ss:$16 sps:$4 sm:$0xff]  }
 0x7e9   :  { %v9148_v31 = vpop.f32.mrb[195].mxu0  ;;  %10494 = vmatprep.subr.bf16.mxu0 %v14233_v10  ;;  %v12315_v38 = vld [vmem:[%s17547_s5 + $0x6f0] sm:$0x11]  ;;  %v10754_v10 = vunpack.c.l.b16 %v10735_v3 }
 0x7ea   :  { %v12330_v31 = vcombine.high %v12315_v38, %v12315_v38 }
 0x7eb   :  { %v10755_v54 = vrot.slane %v10754_v10, 7  ;;  %v14293_v10 = vld [vmem:[%s17549_s7 + $0xc8] sm:$0xff]  }
 0x7ec   :  { %10495 = vmatpush1.bf16.msra.mxu0 %v14231_v29 }
 0x7ed   :  { %12267 = vmatprep.subr.msk.bf16.mxu0 %vm7899_vm6, %v12264_v25  ;;  %v12329_v25 = vcombine.low %v12315_v38, %v12315_v38  ;;  %v14291_v38 = vld [vmem:[%s17549_s7 + $0x80] sm:$0xff]  }
 0x7f0   :  { %10497 = vmatpush1.bf16.msra.mxu0 %v10444_v57 }
 0x7f1   :  { %10646 = vmatprep.subr.bf16.mxu0 %v14238_v52  ;;  %v10832_v52 = vsel %vm7899_vm6, %v12329_v25, 0 }
 0x7f3   :  { %12268 = vmatmul.mubr.msk.bf16.vlgmr.msra.gmra.mrb[248].mxu0 %vm7593_vm7, %v10363_v53  ;;  %v10732_v53 = vld [vmem:[#allocation7 + $0xf] sm:$0x1] }
 0x7f4   :  { %10647 = vmatpush1.bf16.msra.mxu0 %v14236_v1  ;;  %10678 = vmatprep.mubr.bf16.mxu0 %v14413_v2  ;;  %v10734_v22 = vpack.c.bf16 %v10732_v53, %v10732_v53  ;;  %v14286_v53 = vld [vmem:[%s17549_s7 + $0x58] sm:$0xff]  }
 0x7f5   :  { %10648 = vmatprep.subr.bf16.mxu0 %v14241_v27  ;;  %v14269_v27 = vld [vmem:[%s17547_s5 + $0x698] ss:$16 sps:$4 sm:$0xff]  }
 0x7f6   :  { %v9299_v45 = vpop.f32.mrb[196].mxu0  ;;  %v10753_v57 = vunpack.c.l.b16 %v10734_v22 }
 0x7f7   :  { %v9347_v20 = vadd.f32 %v9299_v45, %v9150_v6  ;;  %v9301_v60 = vpop.f32.mrb[197].mxu0 }
 0x7f8   :  { %v9348_v9 = vadd.f32 %v9301_v60, %v9151_v62  ;;  %v9303_v16 = vpop.f32.mrb[198].mxu0  ;;  %10649 = vmatpush1.bf16.msra.mxu0 %v14239_v58  ;;  %v10756_v1 = vsel %vm7823_vm9, %v10755_v54, %v10753_v57  ;;  %v14274_v58 = vld [vmem:[%s17547_s5 + $0x6bc] ss:$16 sps:$4 sm:$0xff]  }
 0x7f9   :  { %v9304_v13 = vpop.f32.mrb[199].mxu0  ;;  %10650 = vmatprep.subr.bf16.mxu0 %v14244_v18  ;;  %v10757_v24 = vpack.c.b16 %v10756_v1, %v10756_v1  ;;  %v14272_v18 = vld [vmem:[%s17547_s5 + $0x6b8] ss:$16 sps:$4 sm:$0xff]   ;;  %v14297_v1 = vld [vmem:[%s17549_s7 + $0xd0] sm:$0xff]  }
 0x7fa   :  { %v14275_v16 = vld [vmem:[%s17547_s5 + $0x6d8] ss:$16 sps:$4 sm:$0xff]   ;;  %v10838_v13 = vsel %vm7899_vm6, %v12331_v11, 0 }
 0x7fb   :  { %v14294_v57 = vld [vmem:[%s17549_s7 + $0x28] sm:$0xff]  }
 0x7fc   :  { %10651 = vmatpush1.bf16.msra.mxu0 %v14242_v44  ;;  %v12332_v44 = vcombine.high %v12316_v42, %v12316_v42  ;;  %v14304_v42 = vld [vmem:[%s17549_s7 + $0xe0] sm:$0xff]  }
 0x7fd   :  { %12299 = vmatprep.subr.msk.bf16.mxu0 %vm7899_vm6, %v12296_v7 }
 0x800   :  { %10653 = vmatpush1.bf16.msra.mxu0 %v10635_v56 }
 0x801   :  { %10687 = vmatprep.subr.bf16.mxu0 %v14249_v43 }
 0x803   :  { %12300 = vmatmul.mubr.msk.bf16.vlgmr.msra.gmra.mrb[252].mxu0 %vm7593_vm7, %v10560_v30 }
 0x804   :  { %10688 = vmatpush1.bf16.msra.mxu0 %v14247_v34  ;;  %10719 = vmatprep.mubr.bf16.mxu0 %v14413_v2 }
 0x805   :  { %10689 = vmatprep.subr.bf16.mxu0 %v14252_v51 }
 0x806   :  { %v9340_v17 = vpop.f32.mrb[200].mxu0 }
 0x807   :  { %v9349_v47 = vadd.f32 %v9340_v17, %v9152_v0  ;;  %v9342_v6 = vpop.f32.mrb[201].mxu0 }
 0x808   :  { %v9350_v37 = vadd.f32 %v9342_v6, %v9153_v55  ;;  %v9344_v62 = vpop.f32.mrb[202].mxu0  ;;  %10690 = vmatpush1.bf16.msra.mxu0 %v14250_v15  ;;  %v14264_v55 = vld [vmem:[%s17547_s5 + $0x6d0] ss:$16 sps:$4 sm:$0xff]  }
 0x809   :  { %v9345_v61 = vpop.f32.mrb[203].mxu0  ;;  %10691 = vmatprep.subr.bf16.mxu0 %v14255_v49 }
 0x80a   :  { %v14281_v61 = vld [vmem:[%s17549_s7] sm:$0xff]  }
 0x80c   :  { %10692 = vmatpush1.bf16.msra.mxu0 %v14253_v21  ;;  %v14280_v21 = vld [vmem:[%s17549_s7 + $0x40] sm:$0xff]  }
 0x80d   :  { %12301 = vmatprep.subr.msk.bf16.mxu0 %vm7899_vm6, %v12298_v32  ;;  %v14282_v32 = vld [vmem:[%s17549_s7 + $0x48] sm:$0xff]   ;;  %12695 = vmatprep.subr.bf16.mxu1 %v14280_v21 }
 0x80e   :  { %12696 = vmatpush3.bf16.msra.mxu1 %v14281_v61 }
 0x80f   :  { %12697 = vmatprep.subr.bf16.mxu1 %v14282_v32 }
 0x810   :  { %10694 = vmatpush1.bf16.msra.mxu0 %v10641_v59 }
 0x811   :  { %10843 = vmatprep.subr.bf16.mxu0 %v14260_v41 }
 0x812   :  { %12698 = vmatpush3.bf16.msra.mxu1 %v14283_v23 }
 0x813   :  { %12302 = vmatmul.mubr.msk.bf16.vlgmr.msra.gmra.mrb[0].mxu0 %vm7593_vm7, %v10560_v30 }
 0x814   :  { %10844 = vmatpush1.bf16.msra.mxu0 %v14258_v5  ;;  %10875 = vmatprep.mubr.bf16.mxu0 %v14413_v2 }
 0x815   :  { %10845 = vmatprep.subr.bf16.mxu0 %v14263_v48 }
 0x816   :  { %v9497_v28 = vpop.f32.mrb[204].mxu0 }
 0x817   :  { %v9545_v14 = vadd.f32 %v9497_v28, %v9347_v20  ;;  %v9499_v36 = vpop.f32.mrb[205].mxu0  ;;  %v14289_v28 = vld [vmem:[%s17549_s7 + $0xc0] sm:$0xff]  }
 0x818   :  { %v9546_v0 = vadd.f32 %v9499_v36, %v9348_v9  ;;  %v9501_v63 = vpop.f32.mrb[206].mxu0  ;;  %10846 = vmatpush1.bf16.msra.mxu0 %v14261_v26  ;;  %v14284_v26 = vld [vmem:[%s17549_s7 + $0x50] sm:$0xff]   ;;  %v14288_v36 = vld [vmem:[%s17549_s7 + $0x60] sm:$0xff]  }
 0x819   :  { %v9502_v29 = vpop.f32.mrb[207].mxu0  ;;  %10847 = vmatprep.subr.bf16.mxu0 %v14266_v12  ;;  %v14285_v12 = vld [vmem:[%s17549_s7 + $0x10] sm:$0xff]   ;;  %12699 = vmatprep.subr.bf16.mxu1 %v14284_v26  ;;  %v14292_v63 = vld [vmem:[%s17549_s7 + $0x68] sm:$0xff]  }
 0x81a   :  { %12700 = vmatpush3.bf16.msra.mxu1 %v14285_v12 }
 0x81b   :  { %12701 = vmatprep.subr.bf16.mxu1 %v14286_v53 }
 0x81c   :  { %10848 = vmatpush1.bf16.msra.mxu0 %v14264_v55 }
 0x81d   :  { %12333 = vmatprep.subr.msk.bf16.mxu0 %vm7899_vm6, %v12330_v31 }
 0x820   :  { %10850 = vmatpush1.bf16.msra.mxu0 %v10832_v52  ;;  %v14295_v52 = vld [vmem:[%s17549_s7 + $0x88] sm:$0xff]  }
 0x821   :  { %10884 = vmatprep.subr.bf16.mxu0 %v14271_v8  ;;  %v14296_v8 = vld [vmem:[%s17549_s7 + $0x70] sm:$0xff]  }
 0x823   :  { %12334 = vmatmul.mubr.msk.bf16.vlgmr.msra.gmra.mrb[4].mxu0 %vm7593_vm7, %v10757_v24 }
 0x824   :  { %10885 = vmatpush1.bf16.msra.mxu0 %v14269_v27  ;;  %10916 = vmatprep.mubr.bf16.mxu0 %v14413_v2  ;;  %v14298_v27 = vld [vmem:[%s17549_s7 + $0x30] sm:$0xff]  }
 0x825   :  { %10886 = vmatprep.subr.bf16.mxu0 %v14274_v58  ;;  %v14300_v58 = vld [vmem:[%s17549_s7 + $0x78] sm:$0xff]  }
 0x826   :  { %v9538_v45 = vpop.f32.mrb[208].mxu0 }
 0x827   :  { %v9547_v19 = vadd.f32 %v9538_v45, %v9349_v47  ;;  %v9540_v20 = vpop.f32.mrb[209].mxu0  ;;  %v14303_v45 = vld [vmem:[%s17549_s7 + $0x98] sm:$0xff]  }
 0x828   :  { %v9548_v60 = vadd.f32 %v9540_v20, %v9350_v37  ;;  %v9542_v9 = vpop.f32.mrb[210].mxu0  ;;  %10887 = vmatpush1.bf16.msra.mxu0 %v14272_v18  ;;  %v14301_v18 = vld [vmem:[%s17549_s7 + $0xd8] sm:$0xff]  }
 0x829   :  { %v9543_v2 = vpop.f32.mrb[211].mxu0  ;;  %10888 = vmatprep.subr.bf16.mxu0 %v14277_v50  ;;  %v14302_v50 = vld [vmem:[%s17549_s7 + $0x38] sm:$0xff]   ;;  %v14305_v9 = vld [vmem:[%s17549_s7 + $0xa0] sm:$0xff]  }
 0x82c   :  { %10889 = vmatpush1.bf16.msra.mxu0 %v14275_v16 }
 0x82d   :  { %12335 = vmatprep.subr.msk.bf16.mxu0 %vm7899_vm6, %v12332_v44  ;;  %v14306_v44 = vld [vmem:[%s17549_s7 + $0xe8] sm:$0xff]  }
 0x830   :  { %10891 = vmatpush1.bf16.msra.mxu0 %v10838_v13  ;;  %v14307_v13 = vld [vmem:[%s17549_s7 + $0xa8] sm:$0xff]  }
 0x831   :  { %12717 = vmatprep.subr.bf16.mxu0 %v14289_v28 }
 0x833   :  { %12336 = vmatmul.mubr.msk.bf16.vlgmr.msra.gmra.mrb[8].mxu0 %vm7593_vm7, %v10757_v24  ;;  %v14299_v24 = vld [vmem:[%s17549_s7 + $0x90] sm:$0xff]  }
 0x834   :  { %12718 = vmatpush3.bf16.msra.mxu0 %v14291_v38 }
 0x835   :  { %12719 = vmatprep.subr.bf16.mxu0 %v14293_v10 }
 0x836   :  { %v9694_v7 = vpop.f32.mrb[212].mxu0 }
 0x837   :  { %v9742_v33 = vadd.f32 %v9694_v7, %v9545_v14  ;;  %v9696_v46 = vpop.f32.mrb[213].mxu0  ;;  %v14287_v14 = vld [vmem:[%s17549_s7 + $0x18] sm:$0xff]   ;;  %v14308_v7 = vld [vmem:[%s17549_s7 + $0xf0] sm:$0xff]  }
 0x838   :  { %v9743_v39 = vadd.f32 %v9696_v46, %v9546_v0  ;;  %v9698_v56 = vpop.f32.mrb[214].mxu0  ;;  %12702 = vmatpush3.bf16.msra.mxu1 %v14287_v14  ;;  %v14290_v0 = vld [vmem:[%s17549_s7 + $0x20] sm:$0xff]   ;;  %12720 = vmatpush3.bf16.msra.mxu0 %v14295_v52  ;;  %v14310_v46 = vld [vmem:[%s17549_s7 + $0xf8] ss:$0 sps:$4 sm:$0x33]  }
 0x839   :  { %v9699_v43 = vpop.f32.mrb[215].mxu0  ;;  %12703 = vmatprep.subr.bf16.mxu1 %v14288_v36  ;;  %12721 = vmatprep.subr.bf16.mxu0 %v14297_v1 }
 0x83c   :  { %12704 = vmatpush3.bf16.msra.mxu1 %v14290_v0  ;;  %12722 = vmatpush3.bf16.msra.mxu0 %v14299_v24 }
 0x83d   :  { %12705 = vmatprep.subr.bf16.mxu1 %v14292_v63  ;;  %12723 = vmatprep.subr.bf16.mxu0 %v14301_v18 }
 0x840   :  { %12706 = vmatpush3.bf16.msra.mxu1 %v14294_v57  ;;  %12724 = vmatpush3.bf16.msra.mxu0 %v14303_v45 }
 0x841   :  { %12707 = vmatprep.subr.bf16.mxu1 %v14296_v8  ;;  %12725 = vmatprep.subr.bf16.mxu0 %v14304_v42 }
 0x844   :  { %12708 = vmatpush3.bf16.msra.mxu1 %v14298_v27  ;;  %12726 = vmatpush3.bf16.msra.mxu0 %v14305_v9 }
 0x845   :  { %12709 = vmatprep.subr.bf16.mxu1 %v14300_v58  ;;  %12727 = vmatprep.subr.bf16.mxu0 %v14306_v44 }
 0x846   :  { %v9735_v4 = vpop.f32.mrb[216].mxu0 }
 0x847   :  { %v9744_v34 = vadd.f32 %v9735_v4, %v9547_v19  ;;  %v9737_v30 = vpop.f32.mrb[217].mxu0 }
 0x848   :  { %v9745_v51 = vadd.f32 %v9737_v30, %v9548_v60  ;;  %v9739_v15 = vpop.f32.mrb[218].mxu0  ;;  %12710 = vmatpush3.bf16.msra.mxu1 %v14302_v50  ;;  %12728 = vmatpush3.bf16.msra.mxu0 %v14307_v13 }
 0x849   :  { %v9740_v49 = vpop.f32.mrb[219].mxu0  ;;  %12729 = vmatprep.subr.bf16.mxu0 %v14308_v7 }
 0x856   :  { %v9891_v17 = vpop.f32.mrb[220].mxu0 }
 0x857   :  { %v9939_v35 = vadd.f32 %v9891_v17, %v9742_v33  ;;  %v9893_v47 = vpop.f32.mrb[221].mxu0  ;;  %v14309_v33 = vld [vmem:[%s17549_s7 + $0xb0] sm:$0xff]  }
 0x858   :  { %v9940_v6 = vadd.f32 %v9893_v47, %v9743_v39  ;;  %v9895_v37 = vpop.f32.mrb[222].mxu0  ;;  %12730 = vmatpush3.bf16.msra.mxu0 %v14309_v33  ;;  %v14311_v39 = vld [vmem:[%s17549_s7 + $0xb8] sm:$0xff]  }
 0x859   :  { %v9896_v62 = vpop.f32.mrb[223].mxu0  ;;  %13800 = vmatprep.subr.msk.bf16.mxu0 %vm3245_vm3, %v14310_v46 }
 0x85c   :  { %12732 = vmatpush3.bf16.msra.mxu0 %v14311_v39 }
 0x866   :  { %v9932_v40 = vpop.f32.mrb[224].mxu0 }
 0x867   :  { %v9941_v59 = vadd.f32 %v9932_v40, %v9744_v34  ;;  %v9934_v41 = vpop.f32.mrb[225].mxu0 }
 0x868   :  { %v9942_v5 = vadd.f32 %v9934_v41, %v9745_v51  ;;  %v9936_v48 = vpop.f32.mrb[226].mxu0 }
 0x869   :  { %v9937_v3 = vpop.f32.mrb[227].mxu0 }
 0x876   :  { %v10088_v55 = vpop.f32.mrb[228].mxu0 }
 0x877   :  { %v10136_v22 = vadd.f32 %v10088_v55, %v9939_v35  ;;  %v10090_v29 = vpop.f32.mrb[229].mxu0 }
 0x878   :  { %v10137_v31 = vadd.f32 %v10090_v29, %v9940_v6  ;;  %v10092_v25 = vpop.f32.mrb[230].mxu0  ;;  %v10931_v29 = vlaneseq }
 0x879   :  { %v10093_v54 = vpop.f32.mrb[231].mxu0 }
 0x87a   :  { %v10929_v54 = vld [vmem:[%s17548_s6] sm:$0xf] }
 0x886   :  { %v10129_v19 = vpop.f32.mrb[232].mxu0 }
 0x887   :  { %v10138_v20 = vadd.f32 %v10129_v19, %v9941_v59  ;;  %v10131_v60 = vpop.f32.mrb[233].mxu0 }
 0x888   :  { %v10139_v16 = vadd.f32 %v10131_v60, %v9942_v5  ;;  %v10133_v2 = vpop.f32.mrb[234].mxu0 }
 0x889   :  { %v10134_v11 = vpop.f32.mrb[235].mxu0 }
 0x896   :  { %v10286_v56 = vpop.f32.mrb[236].mxu0 }
 0x897   :  { %v10334_v43 = vadd.f32 %v10286_v56, %v10136_v22  ;;  %v10288_v4 = vpop.f32.mrb[237].mxu0 }
 0x898   :  { %v10335_v34 = vadd.f32 %v10288_v4, %v10137_v31  ;;  %v10290_v30 = vpop.f32.mrb[238].mxu0  ;;  %v10932_v31 = vshrl.u32 %v10931_v29, 7 }
 0x899   :  { %v10291_v51 = vpop.f32.mrb[239].mxu0 }
 0x89a   :  { %v10933_v25 = vsub.s32 0, %v10932_v31  ;;  %v10937_v57 = vsub.s32 1, %v10932_v31  ;;  %v10945_v2 = vsub.s32 3, %v10932_v31 }
 0x89c   :  { %v10934_v52 = vrot.slane %v10929_v54, %v10933_v25  ;;  %v10938_v1 = vrot.slane %v10929_v54, %v10937_v57  ;;  %v10946_v13 = vrot.slane %v10929_v54, %v10945_v2 }
 0x8a6   :  { %v10327_v15 = vpop.f32.mrb[240].mxu0 }
 0x8a7   :  { %v10336_v49 = vadd.f32 %v10327_v15, %v10138_v20  ;;  %v10329_v17 = vpop.f32.mrb[241].mxu0 }
 0x8a8   :  { %v10337_v35 = vadd.f32 %v10329_v17, %v10139_v16  ;;  %v10331_v47 = vpop.f32.mrb[242].mxu0  ;;  %v10941_v16 = vsub.s32 2, %v10932_v31 }
 0x8a9   :  { %v10332_v6 = vpop.f32.mrb[243].mxu0 }
 0x8aa   :  { %v10942_v44 = vrot.slane %v10929_v54, %v10941_v16 }
 0x8b6   :  { %v10483_v37 = vpop.f32.mrb[244].mxu0 }
 0x8b7   :  { %v10531_v62 = vadd.f32 %v10483_v37, %v10334_v43  ;;  %v10485_v21 = vpop.f32.mrb[245].mxu0  ;;  %v12337_v37 = vld [vmem:[%s17550_s8] ss:$0 sm:$0xff]  ;;  %s14414_s8 = smov [#allocation8]  }
 0x8b8   :  { %v10532_v61 = vadd.f32 %v10485_v21, %v10335_v34  ;;  %v10487_v32 = vpop.f32.mrb[246].mxu0  ;;  %s11329_s11 = sshll.u32 %s14414_s8, 4  ;;  %s11330_s11 = int_to_ptr.vmem [resolvable:$true] %s11329_s11 }
 0x8b9   :  { %v10488_v40 = vpop.f32.mrb[247].mxu0  ;;  %s14388_s12 = scalar_lea.vmem %s11330_s11, 32  ;;  %p14393_p1 = scmp.lt.s32.totalorder %s11330_s11, %s11330_s11 }
 0x8ba   :  { %p14389_p0 = scmp.ne.s32.totalorder %s11330_s11, %s14388_s12  ;;  %p14394_p2 = scmp.lt.s32.totalorder %s14388_s12, %s14388_s12 }
 0x8bc   :  { %p14395_p3 = por %p14394_p2, %p14393_p1 }
 0x8be   :  { %p14396_p4 = pnand %p14395_p3, %p14389_p0 }
 0x8c6   :  { %v10524_v59 = vpop.f32.mrb[248].mxu0 }
 0x8c7   :  { %v10533_v41 = vadd.f32 %v10524_v59, %v10336_v49  ;;  %v10526_v23 = vpop.f32.mrb[249].mxu0 }
 0x8c8   :  { %v10534_v5 = vadd.f32 %v10526_v23, %v10337_v35  ;;  %v10528_v48 = vpop.f32.mrb[250].mxu0 }
 0x8c9   :  { %v10529_v3 = vpop.f32.mrb[251].mxu0 }
 0x8d6   :  { %v10680_v26 = vpop.f32.mrb[252].mxu0 }
 0x8d7   :  { %v10728_v12 = vadd.f32 %v10680_v26, %v10531_v62  ;;  %v10682_v53 = vpop.f32.mrb[253].mxu0 }
 0x8d8   :  { %v10729_v28 = vadd.f32 %v10682_v53, %v10532_v61  ;;  %v10684_v38 = vpop.f32.mrb[254].mxu0 }
 0x8d9   :  { %v10685_v10 = vpop.f32.mrb[255].mxu0 }
 0x8e6   :  { %v10721_v14 = vpop.f32.mrb[0].mxu0 }
 0x8e7   :  { %v10730_v36 = vadd.f32 %v10721_v14, %v10533_v41  ;;  %v10723_v0 = vpop.f32.mrb[1].mxu0 }
 0x8e8   :  { %v10731_v63 = vadd.f32 %v10723_v0, %v10534_v5  ;;  %v10725_v55 = vpop.f32.mrb[2].mxu0 }
 0x8e9   :  { %v10726_v22 = vpop.f32.mrb[3].mxu0 }
 0x8f6   :  { %v10877_v8 = vpop.f32.mrb[4].mxu0 }
 0x8f7   :  { %v10925_v27 = vadd.f32 %v10877_v8, %v10728_v12  ;;  %v10879_v24 = vpop.f32.mrb[5].mxu0 }
 0x8f8   :  { %v10926_v58 = vadd.f32 %v10879_v24, %v10729_v28  ;;  %v10881_v18 = vpop.f32.mrb[6].mxu0 }
 0x8f9   :  { %v10951_v50 = vadd.f32 %v10934_v52, %v10925_v27  ;;  %v10882_v45 = vpop.f32.mrb[7].mxu0 }
 0x8fa   :  { %v10952_v42 = vadd.f32 %v10938_v1, %v10926_v58 }
 0x8fb   :  { %v10955_v19 = vmax.f32 %v10951_v50, 0.0 }
 0x8fc   :  { %v10956_v20 = vmax.f32 %v10952_v42, 0.0 }
 0x8fd   :  { %v10959_v9 = vpack.c.bf16 %v10955_v19, %v10955_v19 }
 0x8fe   :  { %v10960_v60 = vpack.c.bf16 %v10956_v20, %v10956_v20 }
 0x900   :  { %11261 = vmatprep.mubr.bf16.mxu1 %v10960_v60 }
 0x901   :  { %11262 = vmatmul.mubr.bf16.vlgmr.msra.gmra.mrb[20].mxu1 %v10959_v9 }
 0x906   :  { %v10918_v11 = vpop.f32.mrb[8].mxu0 }
 0x907   :  { %v10927_v7 = vadd.f32 %v10918_v11, %v10730_v36  ;;  %v10920_v33 = vpop.f32.mrb[9].mxu0 }
 0x908   :  { %v10928_v46 = vadd.f32 %v10920_v33, %v10731_v63  ;;  %v10922_v39 = vpop.f32.mrb[10].mxu0 }
 0x909   :  { %v10953_v56 = vadd.f32 %v10942_v44, %v10927_v7  ;;  %v10923_v43 = vpop.f32.mrb[11].mxu0 }
 0x90a   :  { %v10954_v4 = vadd.f32 %v10946_v13, %v10928_v46 }
 0x90b   :  { %v10957_v34 = vmax.f32 %v10953_v56, 0.0 }
 0x90c   :  { %v10958_v30 = vmax.f32 %v10954_v4, 0.0 }
 0x90d   :  { %v10961_v15 = vpack.c.bf16 %v10957_v34, %v10957_v34 }
 0x90e   :  { %v10962_v51 = vpack.c.bf16 %v10958_v30, %v10958_v30 }
 0x910   :  { %12370 = vmatprep.mubr.msk.bf16.mxu0 %vm11222_vm10, %v10962_v51 }
 0x911   :  { %11302 = vmatmul.mubr.bf16.vlgmr.msra.gmra.mrb[12].mxu0 %v10961_v15 }
 0x9d4   :  { %v12711_v49 = vpop.f32.mrb[20].mxu1 }
 0x9d5   :  { %v12712_v17 = vpop.f32.mrb[21].mxu1 }
 0x9d6   :  { %v12713_v35 = vadd.f32 %v12712_v17, %v12711_v49  ;;  %v12714_v47 = vpop.f32.mrb[22].mxu1 }
 0x9d7   :  { %v12715_v6 = vpop.f32.mrb[23].mxu1 }
 0x9d8   :  { %v11264_v61 = vadd.f32 %v12713_v35, %v12337_v37 }
 0x9e4   :  { %v12733_v62 = vpop.f32.mrb[12].mxu0 }
 0x9e5   :  { %v12734_v21 = vpop.f32.mrb[13].mxu0 }
 0x9e6   :  { %v12735_v32 = vadd.f32 %v12734_v21, %v12733_v62  ;;  %v12736_v40 = vpop.f32.mrb[14].mxu0 }
 0x9e7   :  { %v12737_v59 = vpop.f32.mrb[15].mxu0 }
 0x9e8   :  { %v11304_v41 = vadd.f32 %v12735_v32, %v11264_v61 }
 0x9ea   :  { %v11310_v23 = vsel %vm11309_vm11, %v11304_v41, -inf }
 0x9eb   :  { %11311 = vmax.xlane.f32.xlu0 %v11310_v23 }
 0xa78   :  { %v11312_v5 = vpop.xlane.xlu0 %11311 }
 0xa79   :  { %v11313_v48 = vsub.f32 %v11304_v41, %v11312_v5 }
 0xa7b   :  { %v11314_v3 = vmul.f32 1.442695, %v11313_v48 }
 0xa7d   :  { %14312 = vpow2.f32 %v11314_v3 }
 0xa87   :  { %v14313_v26 = vpop.eup %14312 }
 0xa88   :  { %v11316_v12 = vsel %vm11309_vm11, %v14313_v26, 0.0 }
 0xa89   :  { %11317 = vadd.xlane.f32.xlu0 %v11316_v12 }
 0xb16   :  { %v11318_v53 = vpop.xlane.xlu0 %11317 }
 0xb17   :  { %14314 = vlog2.f32 %v11318_v53 }
 0xb21   :  { %v14315_v28 = vpop.eup %14314 }
 0xb22   :  { %v11320_v38 = vmul.f32 0.6931472, %v14315_v28 }
 0xb24   :  { %v11321_v10 = vsub.f32 %v11313_v48, %v11320_v38 }
 0xb26   :  { %11322 = vst.msk [vmem:[#allocation8] sm:$0x3] %vm11309_vm11, %v11321_v10 }
 0xb27   :  { %14399 = shalt.err (!%p14396_p4)
}
 0xb28   :  { %s14400_s15 = scalar_lea.hbm %s17551_s9, 32 }
 0xb29   :  { %p14401_p5 = scmp.ne.s32.totalorder %s17551_s9, %s14400_s15  ;;  %p14404_p6 = scmp.lt.u32.totalorder %s14400_s15, %s17551_s9 }
 0xb2b   :  { %p14406_p7 = pnand %p14404_p6, %p14401_p5 }
 0xb2d   :  { %14409 = shalt.err (!%p14406_p7)
}
 0xb2e   :  { %11332 = dma.vmem_to_hbm [thread:$0]  %s11330_s11, 32, %s17551_s9, [#allocation9]  }
 0xb2f   :  { %14410 = dma.done.wait [#allocation9], 32  }
 0xb30   :  { %14411 = vsyncadd [#allocation9], 4294967264 }
 0xb31   :  { %11336 = vsyncpa [#allocation9], 1 }

</bundles_post_ra>
